<compile_context>
chip_gen: v7x
topology: tpu7x:2x2x1
jax: 0.10.0
libtpu: 0.0.40
codegen_flags: <defaults>
</compile_context>

<pallas_src>
import functools

import jax
import jax.numpy as jnp
from jax.experimental import pallas as pl
from jax.experimental.pallas import tpu as pltpu


# ----------------------------------------------------------------------------
# Fused Pallas kernel: whole forward pass, everything resident in VMEM.
#
# Big bf16 slab (width 80) row layout:
#   rows 0          : T*NF   -> 7 blocks of kron(adj^T, W_t)   (80 rows each)
#   rows T*NF       : +NS    -> kron(adj^T, W_sp)              (cols 0:64)
#   rows T*NF+NS    : +T*NF  -> fc_w (native torch row order)  (cols 0:35)
#
# Small f32 slab (width 80) row layout:
#   rows 0:8   w_ih [nst+nt, 4H]   rows 8:16  w_hh [H, 4H]
#   rows 16:23 b_st [T, N*nst]     row 23 b_sp   row 24 fc_b   row 25 b_lstm
#   row 26 w3_h (row)              row 27 w23_s = fc2_w @ fc3_w_spatial (row)
#   row 28 b3_total                rows 29:32 zero pad
# ----------------------------------------------------------------------------
def _fused_forward_kernel(acts_ref, wbig_ref, small_ref, o_ref,
                          *, B, N, T, nt, ns, nst, H):
  f32 = jnp.float32
  NF = N * nst          # 80 : per-timestep GCN width, columns ordered (n, c)
  NS = N * ns           # 64 : spatial GCN width
  FT = nst * T          # 35 : FC output width
  G4 = 4 * H            # 32 : LSTM gate width
  OFF_SP = T * NF       # 560
  OFF_FC = OFF_SP + NS  # 624
  dot = functools.partial(jnp.dot, preferred_element_type=f32)

  acts = acts_ref[...]                                           # [B, 645] f32

  # --- 7 spatio-temporal GraphConvs + FC, accumulated per timestep ----------
  # Per-t operator kron(adj^T, W_t) keeps columns in (n, c) order, matching
  # fc_w's native torch (t, n, c) row order, so FC is a running accumulation
  # (no concat, no reshape).
  st_fc = jnp.zeros((B, FT), f32) + small_ref[24:25, 0:FT]       # start at fc_b
  for t in range(T):
    xt = acts[:, t * NF:(t + 1) * NF]                            # [B, 80]
    m_t = wbig_ref[t * NF:(t + 1) * NF, 0:NF].astype(f32)        # [80, 80] (bf16 -> f32)
    g_t = jnp.maximum(dot(xt, m_t) + small_ref[16 + t:17 + t, 0:NF], 0.0)
    fcw_t = wbig_ref[OFF_FC + t * NF:OFF_FC + (t + 1) * NF, 0:FT].astype(f32)
    st_fc = st_fc + dot(g_t, fcw_t)                              # [B, 35]

  # --- spatial GraphConv (FC2 is folded into the FC3 head below) ------------
  x_sp = acts[:, OFF_SP:OFF_SP + NS]                             # [B, 64]
  m_sp = wbig_ref[OFF_SP:OFF_SP + NS, 0:NS].astype(f32)          # [64, 64]
  g_sp = jnp.maximum(dot(x_sp, m_sp) + small_ref[23:24, 0:NS], 0.0)

  # --- LSTM: input projections hoisted off the serial chain -----------------
  x_t = acts[:, OFF_FC:]                                         # [B, T*nt]
  w_ih_st = small_ref[0:nst, 0:G4]                               # [5, 32]
  w_ih_t = small_ref[nst:nst + nt, 0:G4]                         # [3, 32]
  b_l = small_ref[25:26, 0:G4]                                   # [1, 32]
  w_hh = small_ref[8:16, 0:G4]                                   # [8, 32]
  whh_g = [w_hh[:, g * H:(g + 1) * H] for g in range(4)]         # 4 x [8, 8]

  gx = []                                   # per-(t, gate) blocks, h-independent
  for t in range(T):
    gall = (dot(st_fc[:, t * nst:(t + 1) * nst], w_ih_st)
            + dot(x_t[:, t * nt:(t + 1) * nt], w_ih_t) + b_l)    # [B, 32]
    gx.append([gall[:, g * H:(g + 1) * H] for g in range(4)])

  h = jnp.zeros((B, H), f32)
  c = jnp.zeros((B, H), f32)
  for t in range(T):   # serial chain: only full-tile dots + sigmoid/tanh/mul
    i_g = jax.nn.sigmoid(gx[t][0] + dot(h, whh_g[0]))
    f_g = jax.nn.sigmoid(gx[t][1] + dot(h, whh_g[1]))
    g_g = jnp.tanh(gx[t][2] + dot(h, whh_g[2]))
    o_g = jax.nn.sigmoid(gx[t][3] + dot(h, whh_g[3]))
    c = f_g * c + i_g * g_g
    h = o_g * jnp.tanh(c)

  # --- head: FC3 with FC2 folded into its spatial half (weights as rows) ----
  w3_h = small_ref[26:27, 0:H]                                   # [1, 8]
  w23_s = small_ref[27:28, 0:NS]                                 # [1, 64]
  b3 = small_ref[28:29, 0:1]                                     # [1, 1]
  out = (jnp.sum(h * w3_h, axis=1, keepdims=True)
         + jnp.sum(g_sp * w23_s, axis=1, keepdims=True) + b3)
  o_ref[...] = jnp.maximum(out, 0.0)                             # [B, 1]


def _full_spec(shape):
  nd = len(shape)
  return pl.BlockSpec(shape, lambda i, _nd=nd: (0,) * _nd)


def fused_forward(x, w_big, w_small, *, nt, ns, nst, ms, T):
  """Full NeuralNet.forward as one pallas_call.  x: [B, T, ms, ms, nt+ns+nst]."""
  B = x.shape[0]
  N = ms * ms
  H = nt + nst

  # Layout glue only (slices + contiguous reshapes + one concat, no transpose);
  # all compute happens inside the single Pallas kernel below.
  x_st = x[:, :, :, :, nt + ns:nt + ns + nst].reshape(B, T * N * nst)  # (t,n,c)
  x_sp = x[:, 0, :, :, nt:nt + ns].reshape(B, N * ns)                  # (n,c)
  x_t = x[:, :, 0, 0, :nt].reshape(B, T * nt)                          # (t,c)
  acts = jnp.concatenate([x_st, x_sp, x_t], axis=1).astype(jnp.float32)

  kernel = functools.partial(_fused_forward_kernel,
                             B=B, N=N, T=T, nt=nt, ns=ns, nst=nst, H=H)
  return pl.pallas_call(
      kernel,
      out_shape=jax.ShapeDtypeStruct((B, 1), jnp.float32),
      grid=(1,),
      in_specs=[_full_spec(acts.shape), _full_spec(w_big.shape),
                _full_spec(w_small.shape)],
      out_specs=pl.BlockSpec((B, 1), lambda i: (0, 0)),
      compiler_params=pltpu.CompilerParams(dimension_semantics=("arbitrary",)),
  )(acts, w_big, w_small)


# ----------------------------------------------------------------------------
# Canonical (PyTorch-convention) parameters + one-off host-side repacking.
# ----------------------------------------------------------------------------
def init_params(key, nt, ns, nst, ms, T):
  H = nt + nst
  ks = jax.random.split(key, 32)

  def n(k, shape, s=0.1):
    return (s * jax.random.normal(k, shape)).astype(jnp.float32)

  return {
      "cnn3d_w": jnp.stack([n(ks[i], (nst, nst)) for i in range(7)]),
      "cnn3d_b": jnp.stack([n(ks[7 + i], (nst,)) for i in range(7)]),
      "two_d_w": n(ks[14], (ns, ns)),
      "two_d_b": n(ks[15], (ns,)),
      "fc_w": n(ks[16], (ms * ms * nst * T, nst * T)),   # rows in torch (t, n, c) order
      "fc_b": n(ks[17], (nst * T,)),
      "fc2_w": n(ks[18], (ms * ms * ns, ns)),            # rows in torch (n, c) order
      "fc2_b": n(ks[19], (ns,)),
      "fc3_w": n(ks[20], (nt + ns + nst, 1)),
      "fc3_b": n(ks[21], (1,)),
      "lstm_w_ih": n(ks[22], (nst + nt, 4 * H)),         # [D, 4H], gate order i,f,g,o
      "lstm_w_hh": n(ks[23], (H, 4 * H)),
      "lstm_b": n(ks[24], (4 * H,)),                     # b_ih + b_hh combined
  }


def prepare_fused_params(params, adj, *, nt, ns, nst, ms, T):
  """One-off host-side repacking into the two fused-kernel weight slabs.
  Mathematically equivalent to the layer-by-layer forward."""
  N = ms * ms
  H = nt + nst
  NF = N * nst
  NS = N * ns
  f32 = jnp.float32
  adj_t = adj.T.astype(f32)
  WB = NF   # slab width = 80

  def pad_cols(a, width):
    a = jnp.asarray(a, f32)
    return jnp.pad(a, ((0, 0), (0, width - a.shape[1])))

  def row(vec):
    return pad_cols(jnp.asarray(vec, f32).reshape(1, -1), WB)

  # --- big bf16 slab: per-t kron(adj^T, W_t) blocks, m_sp, fc_w --------------
  blocks = [jnp.kron(adj_t, params["cnn3d_w"][t]) for t in range(T)]  # 7x[80,80]
  m_sp = jnp.kron(adj_t, params["two_d_w"])                           # [64, 64]
  w_big = jnp.concatenate(
      blocks + [pad_cols(m_sp, WB), pad_cols(params["fc_w"], WB)],
      axis=0).astype(jnp.bfloat16)                                    # [1184, 80]

  # --- small f32 slab: biases, LSTM, head (FC2 folded into FC3) --------------
  w3_sp = params["fc3_w"][H:, :]                                      # [ns, 1]
  w23_s = params["fc2_w"] @ w3_sp                                     # [N*ns, 1]
  b3_total = params["fc3_b"] + params["fc2_b"] @ w3_sp[:, 0]          # [1]
  b_st = jnp.stack([jnp.tile(params["cnn3d_b"][t], N) for t in range(T)])

  w_small = jnp.concatenate([
      pad_cols(params["lstm_w_ih"], WB),          # rows  0: 8
      pad_cols(params["lstm_w_hh"], WB),          # rows  8:16
      pad_cols(b_st, WB),                         # rows 16:23
      row(jnp.tile(params["two_d_b"], N)),        # row  23
      row(params["fc_b"]),                        # row  24
      row(params["lstm_b"]),                      # row  25
      row(params["fc3_w"][:H, 0]),                # row  26
      row(w23_s[:, 0]),                           # row  27
      row(b3_total),                              # row  28
      jnp.zeros((3, WB), f32),                    # rows 29:32 (pad to 8-multiple)
  ], axis=0)                                      # [32, 80] f32
  return w_big, w_small


# ----------------------------------------------------------------------------
# Plain-JAX reference (mirrors the PyTorch forward layer by layer) for checking.
# ----------------------------------------------------------------------------
def reference_forward(x, adj, params, *, nt, ns, nst, ms, T):
  B = x.shape[0]
  N = ms * ms
  H = nt + nst
  temporal = x[:, :, 0, 0, :nt]                                  # [B, T, nt]
  spatial = x[:, 0, :, :, nt:nt + ns].reshape(B, N, ns)          # [B, N, ns]
  st = x[:, :, :, :, nt + ns:nt + ns + nst]                      # [B, T, ms, ms, nst]

  st_out = []
  for t in range(T):
    xt = st[:, t].reshape(B, N, nst)
    yt = jnp.einsum("nm,bmf->bnf", adj,
                    jnp.einsum("bnf,fg->bng", xt, params["cnn3d_w"][t]))
    st_out.append(yt + params["cnn3d_b"][t])
  st_out = jax.nn.relu(jnp.stack(st_out, axis=1))                # [B, T, N, nst]

  sp_out = jax.nn.relu(
      jnp.einsum("nm,bmf->bnf", adj,
                 jnp.einsum("bnf,fg->bng", spatial, params["two_d_w"]))
      + params["two_d_b"])                                       # [B, N, ns]

  st_fc = st_out.reshape(B, -1) @ params["fc_w"] + params["fc_b"]
  st_fc = st_fc.reshape(B, T, nst)
  merged = jnp.concatenate([st_fc, temporal], axis=2)            # [B, T, nst+nt]

  h = jnp.zeros((B, H), jnp.float32)
  c = jnp.zeros((B, H), jnp.float32)
  for t in range(T):
    gates = (merged[:, t] @ params["lstm_w_ih"] + h @ params["lstm_w_hh"]
             + params["lstm_b"])
    i_g = jax.nn.sigmoid(gates[:, 0 * H:1 * H])
    f_g = jax.nn.sigmoid(gates[:, 1 * H:2 * H])
    g_g = jnp.tanh(gates[:, 2 * H:3 * H])
    o_g = jax.nn.sigmoid(gates[:, 3 * H:4 * H])
    c = f_g * c + i_g * g_g
    h = o_g * jnp.tanh(c)

  sv_fc = sp_out.reshape(B, -1) @ params["fc2_w"] + params["fc2_b"]
  final = jnp.concatenate([h, sv_fc], axis=1) @ params["fc3_w"] + params["fc3_b"]
  return jax.nn.relu(final)


# ----------------------------------------------------------------------------
if __name__ == "__main__":
  jax.config.update("jax_default_matmul_precision", "highest")

  nt, ns, nst = 3, 4, 5        # num_temporal, num_spatial, num_spatial_tempoal
  ms, T, B = 4, 7, 2           # map_size, input_len (loop requires 7), batch
  C = nt + ns + nst
  N = ms * ms

  key = jax.random.PRNGKey(0)
  kx, kadj, kp = jax.random.split(key, 3)

  x = jax.random.normal(kx, (B, T, ms, ms, C), dtype=jnp.float32)
  adj = jax.random.uniform(kadj, (N, N), dtype=jnp.float32)
  adj = adj / jnp.sum(adj, axis=1, keepdims=True)   # row-normalized adjacency

  params = init_params(kp, nt, ns, nst, ms, T)
  w_big, w_small = prepare_fused_params(params, adj, nt=nt, ns=ns, nst=nst,
                                        ms=ms, T=T)

  fwd = jax.jit(functools.partial(fused_forward, nt=nt, ns=ns, nst=nst,
                                  ms=ms, T=T))
  out = fwd(x, w_big, w_small)
  jax.block_until_ready(out)

  ref = reference_forward(x, adj, params, nt=nt, ns=ns, nst=nst, ms=ms, T=T)

  assert out.shape == (B, 1), out.shape
  assert bool(jnp.all(out >= 0.0))                               # final ReLU
  # Tolerance accounts for bf16 storage of the big matmul weights (review item 3).
  assert bool(jnp.allclose(out, ref, rtol=5e-3, atol=2e-3)), (out, ref)
  print("KERNEL_OK")
</pallas_src>

<mosaic_0001>
module attributes {stable_mosaic.version = 11 : i64} {
  func.func @_fused_forward_kernel(%arg0: i32, %arg1: memref<2x645xf32, #tpu.memory_space<vmem>>, %arg2: memref<1184x80xbf16, #tpu.memory_space<vmem>>, %arg3: memref<32x80xf32, #tpu.memory_space<vmem>>, %arg4: memref<2x1xf32, #tpu.memory_space<vmem>>) attributes {dimension_semantics = [#tpu.dimension_semantics<arbitrary>], iteration_bounds = array<i64: 1>, scalar_prefetch = 0 : i64, scratch_operands = 0 : i64, tpu.core_type = #tpu.core_type<tc>, window_params = [{pipeline_mode = #tpu.pipeline_mode<synchronous>, transform_indices = @transform_0, window_bounds = array<i64: 2, 645>}, {pipeline_mode = #tpu.pipeline_mode<synchronous>, transform_indices = @transform_1, window_bounds = array<i64: 1184, 80>}, {pipeline_mode = #tpu.pipeline_mode<synchronous>, transform_indices = @transform_2, window_bounds = array<i64: 32, 80>}, {pipeline_mode = #tpu.pipeline_mode<synchronous>, transform_indices = @transform_3, window_bounds = array<i64: 2, 1>}]} {
    %c0 = arith.constant 0 : index
    %c0_0 = arith.constant 0 : index
    %0 = vector.load %arg1[%c0, %c0_0] : memref<2x645xf32, #tpu.memory_space<vmem>>, vector<2x645xf32>
    %cst = arith.constant 0.000000e+00 : f32
    %1 = vector.broadcast %cst : f32 to vector<2x35xf32>
    %c24 = arith.constant 24 : index
    %c0_1 = arith.constant 0 : index
    %2 = vector.load %arg3[%c24, %c0_1] : memref<32x80xf32, #tpu.memory_space<vmem>>, vector<1x35xf32>
    %3 = vector.broadcast %2 : vector<1x35xf32> to vector<2x35xf32>
    %4 = arith.addf %1, %3 : vector<2x35xf32>
    %5 = vector.extract_strided_slice %0 {offsets = [0, 0], sizes = [2, 80], strides = [1, 1]} : vector<2x645xf32> to vector<2x80xf32>
    %c0_2 = arith.constant 0 : index
    %c0_3 = arith.constant 0 : index
    %6 = vector.load %arg2[%c0_2, %c0_3] : memref<1184x80xbf16, #tpu.memory_space<vmem>>, vector<80x80xbf16>
    %7 = arith.extf %6 : vector<80x80xbf16> to vector<80x80xf32>
    %cst_4 = arith.constant dense<0.000000e+00> : vector<2x80xf32>
    %8 = tpu.matmul %5, %7, %cst_4 {dimension_numbers = #tpu.dot_dimension_numbers<[1], [0], [0], [1], [0, 0, 1, 1], [], []>, precision = #tpu.contract_precision<fp32>} : vector<2x80xf32>, vector<80x80xf32>, vector<2x80xf32> -> vector<2x80xf32>
    %c16 = arith.constant 16 : index
    %c0_5 = arith.constant 0 : index
    %9 = vector.load %arg3[%c16, %c0_5] : memref<32x80xf32, #tpu.memory_space<vmem>>, vector<1x80xf32>
    %10 = vector.broadcast %9 : vector<1x80xf32> to vector<2x80xf32>
    %11 = arith.addf %8, %10 : vector<2x80xf32>
    %cst_6 = arith.constant 0.000000e+00 : f32
    %12 = vector.broadcast %cst_6 : f32 to vector<2x80xf32>
    %13 = arith.maximumf %11, %12 : vector<2x80xf32>
    %c624 = arith.constant 624 : index
    %c0_7 = arith.constant 0 : index
    %14 = vector.load %arg2[%c624, %c0_7] : memref<1184x80xbf16, #tpu.memory_space<vmem>>, vector<80x35xbf16>
    %15 = arith.extf %14 : vector<80x35xbf16> to vector<80x35xf32>
    %cst_8 = arith.constant dense<0.000000e+00> : vector<2x35xf32>
    %16 = tpu.matmul %13, %15, %cst_8 {dimension_numbers = #tpu.dot_dimension_numbers<[1], [0], [0], [1], [0, 0, 1, 1], [], []>, precision = #tpu.contract_precision<fp32>} : vector<2x80xf32>, vector<80x35xf32>, vector<2x35xf32> -> vector<2x35xf32>
    %17 = arith.addf %4, %16 : vector<2x35xf32>
    %18 = vector.extract_strided_slice %0 {offsets = [0, 80], sizes = [2, 80], strides = [1, 1]} : vector<2x645xf32> to vector<2x80xf32>
    %c80 = arith.constant 80 : index
    %c0_9 = arith.constant 0 : index
    %19 = vector.load %arg2[%c80, %c0_9] : memref<1184x80xbf16, #tpu.memory_space<vmem>>, vector<80x80xbf16>
    %20 = arith.extf %19 : vector<80x80xbf16> to vector<80x80xf32>
    %cst_10 = arith.constant dense<0.000000e+00> : vector<2x80xf32>
    %21 = tpu.matmul %18, %20, %cst_10 {dimension_numbers = #tpu.dot_dimension_numbers<[1], [0], [0], [1], [0, 0, 1, 1], [], []>, precision = #tpu.contract_precision<fp32>} : vector<2x80xf32>, vector<80x80xf32>, vector<2x80xf32> -> vector<2x80xf32>
    %c17 = arith.constant 17 : index
    %c0_11 = arith.constant 0 : index
    %22 = vector.load %arg3[%c17, %c0_11] : memref<32x80xf32, #tpu.memory_space<vmem>>, vector<1x80xf32>
    %23 = vector.broadcast %22 : vector<1x80xf32> to vector<2x80xf32>
    %24 = arith.addf %21, %23 : vector<2x80xf32>
    %cst_12 = arith.constant 0.000000e+00 : f32
    %25 = vector.broadcast %cst_12 : f32 to vector<2x80xf32>
    %26 = arith.maximumf %24, %25 : vector<2x80xf32>
    %c704 = arith.constant 704 : index
    %c0_13 = arith.constant 0 : index
    %27 = vector.load %arg2[%c704, %c0_13] : memref<1184x80xbf16, #tpu.memory_space<vmem>>, vector<80x35xbf16>
    %28 = arith.extf %27 : vector<80x35xbf16> to vector<80x35xf32>
    %cst_14 = arith.constant dense<0.000000e+00> : vector<2x35xf32>
    %29 = tpu.matmul %26, %28, %cst_14 {dimension_numbers = #tpu.dot_dimension_numbers<[1], [0], [0], [1], [0, 0, 1, 1], [], []>, precision = #tpu.contract_precision<fp32>} : vector<2x80xf32>, vector<80x35xf32>, vector<2x35xf32> -> vector<2x35xf32>
    %30 = arith.addf %17, %29 : vector<2x35xf32>
    %31 = vector.extract_strided_slice %0 {offsets = [0, 160], sizes = [2, 80], strides = [1, 1]} : vector<2x645xf32> to vector<2x80xf32>
    %c160 = arith.constant 160 : index
    %c0_15 = arith.constant 0 : index
    %32 = vector.load %arg2[%c160, %c0_15] : memref<1184x80xbf16, #tpu.memory_space<vmem>>, vector<80x80xbf16>
    %33 = arith.extf %32 : vector<80x80xbf16> to vector<80x80xf32>
    %cst_16 = arith.constant dense<0.000000e+00> : vector<2x80xf32>
    %34 = tpu.matmul %31, %33, %cst_16 {dimension_numbers = #tpu.dot_dimension_numbers<[1], [0], [0], [1], [0, 0, 1, 1], [], []>, precision = #tpu.contract_precision<fp32>} : vector<2x80xf32>, vector<80x80xf32>, vector<2x80xf32> -> vector<2x80xf32>
    %c18 = arith.constant 18 : index
    %c0_17 = arith.constant 0 : index
    %35 = vector.load %arg3[%c18, %c0_17] : memref<32x80xf32, #tpu.memory_space<vmem>>, vector<1x80xf32>
    %36 = vector.broadcast %35 : vector<1x80xf32> to vector<2x80xf32>
    %37 = arith.addf %34, %36 : vector<2x80xf32>
    %cst_18 = arith.constant 0.000000e+00 : f32
    %38 = vector.broadcast %cst_18 : f32 to vector<2x80xf32>
    %39 = arith.maximumf %37, %38 : vector<2x80xf32>
    %c784 = arith.constant 784 : index
    %c0_19 = arith.constant 0 : index
    %40 = vector.load %arg2[%c784, %c0_19] : memref<1184x80xbf16, #tpu.memory_space<vmem>>, vector<80x35xbf16>
    %41 = arith.extf %40 : vector<80x35xbf16> to vector<80x35xf32>
    %cst_20 = arith.constant dense<0.000000e+00> : vector<2x35xf32>
    %42 = tpu.matmul %39, %41, %cst_20 {dimension_numbers = #tpu.dot_dimension_numbers<[1], [0], [0], [1], [0, 0, 1, 1], [], []>, precision = #tpu.contract_precision<fp32>} : vector<2x80xf32>, vector<80x35xf32>, vector<2x35xf32> -> vector<2x35xf32>
    %43 = arith.addf %30, %42 : vector<2x35xf32>
    %44 = vector.extract_strided_slice %0 {offsets = [0, 240], sizes = [2, 80], strides = [1, 1]} : vector<2x645xf32> to vector<2x80xf32>
    %c240 = arith.constant 240 : index
    %c0_21 = arith.constant 0 : index
    %45 = vector.load %arg2[%c240, %c0_21] : memref<1184x80xbf16, #tpu.memory_space<vmem>>, vector<80x80xbf16>
    %46 = arith.extf %45 : vector<80x80xbf16> to vector<80x80xf32>
    %cst_22 = arith.constant dense<0.000000e+00> : vector<2x80xf32>
    %47 = tpu.matmul %44, %46, %cst_22 {dimension_numbers = #tpu.dot_dimension_numbers<[1], [0], [0], [1], [0, 0, 1, 1], [], []>, precision = #tpu.contract_precision<fp32>} : vector<2x80xf32>, vector<80x80xf32>, vector<2x80xf32> -> vector<2x80xf32>
    %c19 = arith.constant 19 : index
    %c0_23 = arith.constant 0 : index
    %48 = vector.load %arg3[%c19, %c0_23] : memref<32x80xf32, #tpu.memory_space<vmem>>, vector<1x80xf32>
    %49 = vector.broadcast %48 : vector<1x80xf32> to vector<2x80xf32>
    %50 = arith.addf %47, %49 : vector<2x80xf32>
    %cst_24 = arith.constant 0.000000e+00 : f32
    %51 = vector.broadcast %cst_24 : f32 to vector<2x80xf32>
    %52 = arith.maximumf %50, %51 : vector<2x80xf32>
    %c864 = arith.constant 864 : index
    %c0_25 = arith.constant 0 : index
    %53 = vector.load %arg2[%c864, %c0_25] : memref<1184x80xbf16, #tpu.memory_space<vmem>>, vector<80x35xbf16>
    %54 = arith.extf %53 : vector<80x35xbf16> to vector<80x35xf32>
    %cst_26 = arith.constant dense<0.000000e+00> : vector<2x35xf32>
    %55 = tpu.matmul %52, %54, %cst_26 {dimension_numbers = #tpu.dot_dimension_numbers<[1], [0], [0], [1], [0, 0, 1, 1], [], []>, precision = #tpu.contract_precision<fp32>} : vector<2x80xf32>, vector<80x35xf32>, vector<2x35xf32> -> vector<2x35xf32>
    %56 = arith.addf %43, %55 : vector<2x35xf32>
    %57 = vector.extract_strided_slice %0 {offsets = [0, 320], sizes = [2, 80], strides = [1, 1]} : vector<2x645xf32> to vector<2x80xf32>
    %c320 = arith.constant 320 : index
    %c0_27 = arith.constant 0 : index
    %58 = vector.load %arg2[%c320, %c0_27] : memref<1184x80xbf16, #tpu.memory_space<vmem>>, vector<80x80xbf16>
    %59 = arith.extf %58 : vector<80x80xbf16> to vector<80x80xf32>
    %cst_28 = arith.constant dense<0.000000e+00> : vector<2x80xf32>
    %60 = tpu.matmul %57, %59, %cst_28 {dimension_numbers = #tpu.dot_dimension_numbers<[1], [0], [0], [1], [0, 0, 1, 1], [], []>, precision = #tpu.contract_precision<fp32>} : vector<2x80xf32>, vector<80x80xf32>, vector<2x80xf32> -> vector<2x80xf32>
    %c20 = arith.constant 20 : index
    %c0_29 = arith.constant 0 : index
    %61 = vector.load %arg3[%c20, %c0_29] : memref<32x80xf32, #tpu.memory_space<vmem>>, vector<1x80xf32>
    %62 = vector.broadcast %61 : vector<1x80xf32> to vector<2x80xf32>
    %63 = arith.addf %60, %62 : vector<2x80xf32>
    %cst_30 = arith.constant 0.000000e+00 : f32
    %64 = vector.broadcast %cst_30 : f32 to vector<2x80xf32>
    %65 = arith.maximumf %63, %64 : vector<2x80xf32>
    %c944 = arith.constant 944 : index
    %c0_31 = arith.constant 0 : index
    %66 = vector.load %arg2[%c944, %c0_31] : memref<1184x80xbf16, #tpu.memory_space<vmem>>, vector<80x35xbf16>
    %67 = arith.extf %66 : vector<80x35xbf16> to vector<80x35xf32>
    %cst_32 = arith.constant dense<0.000000e+00> : vector<2x35xf32>
    %68 = tpu.matmul %65, %67, %cst_32 {dimension_numbers = #tpu.dot_dimension_numbers<[1], [0], [0], [1], [0, 0, 1, 1], [], []>, precision = #tpu.contract_precision<fp32>} : vector<2x80xf32>, vector<80x35xf32>, vector<2x35xf32> -> vector<2x35xf32>
    %69 = arith.addf %56, %68 : vector<2x35xf32>
    %70 = vector.extract_strided_slice %0 {offsets = [0, 400], sizes = [2, 80], strides = [1, 1]} : vector<2x645xf32> to vector<2x80xf32>
    %c400 = arith.constant 400 : index
    %c0_33 = arith.constant 0 : index
    %71 = vector.load %arg2[%c400, %c0_33] : memref<1184x80xbf16, #tpu.memory_space<vmem>>, vector<80x80xbf16>
    %72 = arith.extf %71 : vector<80x80xbf16> to vector<80x80xf32>
    %cst_34 = arith.constant dense<0.000000e+00> : vector<2x80xf32>
    %73 = tpu.matmul %70, %72, %cst_34 {dimension_numbers = #tpu.dot_dimension_numbers<[1], [0], [0], [1], [0, 0, 1, 1], [], []>, precision = #tpu.contract_precision<fp32>} : vector<2x80xf32>, vector<80x80xf32>, vector<2x80xf32> -> vector<2x80xf32>
    %c21 = arith.constant 21 : index
    %c0_35 = arith.constant 0 : index
    %74 = vector.load %arg3[%c21, %c0_35] : memref<32x80xf32, #tpu.memory_space<vmem>>, vector<1x80xf32>
    %75 = vector.broadcast %74 : vector<1x80xf32> to vector<2x80xf32>
    %76 = arith.addf %73, %75 : vector<2x80xf32>
    %cst_36 = arith.constant 0.000000e+00 : f32
    %77 = vector.broadcast %cst_36 : f32 to vector<2x80xf32>
    %78 = arith.maximumf %76, %77 : vector<2x80xf32>
    %c1024 = arith.constant 1024 : index
    %c0_37 = arith.constant 0 : index
    %79 = vector.load %arg2[%c1024, %c0_37] : memref<1184x80xbf16, #tpu.memory_space<vmem>>, vector<80x35xbf16>
    %80 = arith.extf %79 : vector<80x35xbf16> to vector<80x35xf32>
    %cst_38 = arith.constant dense<0.000000e+00> : vector<2x35xf32>
    %81 = tpu.matmul %78, %80, %cst_38 {dimension_numbers = #tpu.dot_dimension_numbers<[1], [0], [0], [1], [0, 0, 1, 1], [], []>, precision = #tpu.contract_precision<fp32>} : vector<2x80xf32>, vector<80x35xf32>, vector<2x35xf32> -> vector<2x35xf32>
    %82 = arith.addf %69, %81 : vector<2x35xf32>
    %83 = vector.extract_strided_slice %0 {offsets = [0, 480], sizes = [2, 80], strides = [1, 1]} : vector<2x645xf32> to vector<2x80xf32>
    %c480 = arith.constant 480 : index
    %c0_39 = arith.constant 0 : index
    %84 = vector.load %arg2[%c480, %c0_39] : memref<1184x80xbf16, #tpu.memory_space<vmem>>, vector<80x80xbf16>
    %85 = arith.extf %84 : vector<80x80xbf16> to vector<80x80xf32>
    %cst_40 = arith.constant dense<0.000000e+00> : vector<2x80xf32>
    %86 = tpu.matmul %83, %85, %cst_40 {dimension_numbers = #tpu.dot_dimension_numbers<[1], [0], [0], [1], [0, 0, 1, 1], [], []>, precision = #tpu.contract_precision<fp32>} : vector<2x80xf32>, vector<80x80xf32>, vector<2x80xf32> -> vector<2x80xf32>
    %c22 = arith.constant 22 : index
    %c0_41 = arith.constant 0 : index
    %87 = vector.load %arg3[%c22, %c0_41] : memref<32x80xf32, #tpu.memory_space<vmem>>, vector<1x80xf32>
    %88 = vector.broadcast %87 : vector<1x80xf32> to vector<2x80xf32>
    %89 = arith.addf %86, %88 : vector<2x80xf32>
    %cst_42 = arith.constant 0.000000e+00 : f32
    %90 = vector.broadcast %cst_42 : f32 to vector<2x80xf32>
    %91 = arith.maximumf %89, %90 : vector<2x80xf32>
    %c1104 = arith.constant 1104 : index
    %c0_43 = arith.constant 0 : index
    %92 = vector.load %arg2[%c1104, %c0_43] : memref<1184x80xbf16, #tpu.memory_space<vmem>>, vector<80x35xbf16>
    %93 = arith.extf %92 : vector<80x35xbf16> to vector<80x35xf32>
    %cst_44 = arith.constant dense<0.000000e+00> : vector<2x35xf32>
    %94 = tpu.matmul %91, %93, %cst_44 {dimension_numbers = #tpu.dot_dimension_numbers<[1], [0], [0], [1], [0, 0, 1, 1], [], []>, precision = #tpu.contract_precision<fp32>} : vector<2x80xf32>, vector<80x35xf32>, vector<2x35xf32> -> vector<2x35xf32>
    %95 = arith.addf %82, %94 : vector<2x35xf32>
    %96 = vector.extract_strided_slice %0 {offsets = [0, 560], sizes = [2, 64], strides = [1, 1]} : vector<2x645xf32> to vector<2x64xf32>
    %c560 = arith.constant 560 : index
    %c0_45 = arith.constant 0 : index
    %97 = vector.load %arg2[%c560, %c0_45] : memref<1184x80xbf16, #tpu.memory_space<vmem>>, vector<64x64xbf16>
    %98 = arith.extf %97 : vector<64x64xbf16> to vector<64x64xf32>
    %cst_46 = arith.constant dense<0.000000e+00> : vector<2x64xf32>
    %99 = tpu.matmul %96, %98, %cst_46 {dimension_numbers = #tpu.dot_dimension_numbers<[1], [0], [0], [1], [0, 0, 1, 1], [], []>, precision = #tpu.contract_precision<fp32>} : vector<2x64xf32>, vector<64x64xf32>, vector<2x64xf32> -> vector<2x64xf32>
    %c23 = arith.constant 23 : index
    %c0_47 = arith.constant 0 : index
    %100 = vector.load %arg3[%c23, %c0_47] : memref<32x80xf32, #tpu.memory_space<vmem>>, vector<1x64xf32>
    %101 = vector.broadcast %100 : vector<1x64xf32> to vector<2x64xf32>
    %102 = arith.addf %99, %101 : vector<2x64xf32>
    %cst_48 = arith.constant 0.000000e+00 : f32
    %103 = vector.broadcast %cst_48 : f32 to vector<2x64xf32>
    %104 = arith.maximumf %102, %103 : vector<2x64xf32>
    %105 = vector.extract_strided_slice %0 {offsets = [0, 624], sizes = [2, 21], strides = [1, 1]} : vector<2x645xf32> to vector<2x21xf32>
    %c0_49 = arith.constant 0 : index
    %c0_50 = arith.constant 0 : index
    %106 = vector.load %arg3[%c0_49, %c0_50] : memref<32x80xf32, #tpu.memory_space<vmem>>, vector<5x32xf32>
    %c5 = arith.constant 5 : index
    %c0_51 = arith.constant 0 : index
    %107 = vector.load %arg3[%c5, %c0_51] : memref<32x80xf32, #tpu.memory_space<vmem>>, vector<3x32xf32>
    %c25 = arith.constant 25 : index
    %c0_52 = arith.constant 0 : index
    %108 = vector.load %arg3[%c25, %c0_52] : memref<32x80xf32, #tpu.memory_space<vmem>>, vector<1x32xf32>
    %c8 = arith.constant 8 : index
    %c0_53 = arith.constant 0 : index
    %109 = vector.load %arg3[%c8, %c0_53] : memref<32x80xf32, #tpu.memory_space<vmem>>, vector<8x32xf32>
    %110 = vector.extract_strided_slice %109 {offsets = [0, 0], sizes = [8, 8], strides = [1, 1]} : vector<8x32xf32> to vector<8x8xf32>
    %111 = vector.extract_strided_slice %109 {offsets = [0, 8], sizes = [8, 8], strides = [1, 1]} : vector<8x32xf32> to vector<8x8xf32>
    %112 = vector.extract_strided_slice %109 {offsets = [0, 16], sizes = [8, 8], strides = [1, 1]} : vector<8x32xf32> to vector<8x8xf32>
    %113 = vector.extract_strided_slice %109 {offsets = [0, 24], sizes = [8, 8], strides = [1, 1]} : vector<8x32xf32> to vector<8x8xf32>
    %114 = vector.extract_strided_slice %95 {offsets = [0, 0], sizes = [2, 5], strides = [1, 1]} : vector<2x35xf32> to vector<2x5xf32>
    %cst_54 = arith.constant dense<0.000000e+00> : vector<2x32xf32>
    %115 = tpu.matmul %114, %106, %cst_54 {dimension_numbers = #tpu.dot_dimension_numbers<[1], [0], [0], [1], [0, 0, 1, 1], [], []>, precision = #tpu.contract_precision<fp32>} : vector<2x5xf32>, vector<5x32xf32>, vector<2x32xf32> -> vector<2x32xf32>
    %116 = vector.extract_strided_slice %105 {offsets = [0, 0], sizes = [2, 3], strides = [1, 1]} : vector<2x21xf32> to vector<2x3xf32>
    %cst_55 = arith.constant dense<0.000000e+00> : vector<2x32xf32>
    %117 = tpu.matmul %116, %107, %cst_55 {dimension_numbers = #tpu.dot_dimension_numbers<[1], [0], [0], [1], [0, 0, 1, 1], [], []>, precision = #tpu.contract_precision<fp32>} : vector<2x3xf32>, vector<3x32xf32>, vector<2x32xf32> -> vector<2x32xf32>
    %118 = arith.addf %115, %117 : vector<2x32xf32>
    %119 = vector.broadcast %108 : vector<1x32xf32> to vector<2x32xf32>
    %120 = arith.addf %118, %119 : vector<2x32xf32>
    %121 = vector.extract_strided_slice %120 {offsets = [0, 0], sizes = [2, 8], strides = [1, 1]} : vector<2x32xf32> to vector<2x8xf32>
    %122 = vector.extract_strided_slice %120 {offsets = [0, 8], sizes = [2, 8], strides = [1, 1]} : vector<2x32xf32> to vector<2x8xf32>
    %123 = vector.extract_strided_slice %120 {offsets = [0, 16], sizes = [2, 8], strides = [1, 1]} : vector<2x32xf32> to vector<2x8xf32>
    %124 = vector.extract_strided_slice %120 {offsets = [0, 24], sizes = [2, 8], strides = [1, 1]} : vector<2x32xf32> to vector<2x8xf32>
    %125 = vector.extract_strided_slice %95 {offsets = [0, 5], sizes = [2, 5], strides = [1, 1]} : vector<2x35xf32> to vector<2x5xf32>
    %cst_56 = arith.constant dense<0.000000e+00> : vector<2x32xf32>
    %126 = tpu.matmul %125, %106, %cst_56 {dimension_numbers = #tpu.dot_dimension_numbers<[1], [0], [0], [1], [0, 0, 1, 1], [], []>, precision = #tpu.contract_precision<fp32>} : vector<2x5xf32>, vector<5x32xf32>, vector<2x32xf32> -> vector<2x32xf32>
    %127 = vector.extract_strided_slice %105 {offsets = [0, 3], sizes = [2, 3], strides = [1, 1]} : vector<2x21xf32> to vector<2x3xf32>
    %cst_57 = arith.constant dense<0.000000e+00> : vector<2x32xf32>
    %128 = tpu.matmul %127, %107, %cst_57 {dimension_numbers = #tpu.dot_dimension_numbers<[1], [0], [0], [1], [0, 0, 1, 1], [], []>, precision = #tpu.contract_precision<fp32>} : vector<2x3xf32>, vector<3x32xf32>, vector<2x32xf32> -> vector<2x32xf32>
    %129 = arith.addf %126, %128 : vector<2x32xf32>
    %130 = vector.broadcast %108 : vector<1x32xf32> to vector<2x32xf32>
    %131 = arith.addf %129, %130 : vector<2x32xf32>
    %132 = vector.extract_strided_slice %131 {offsets = [0, 0], sizes = [2, 8], strides = [1, 1]} : vector<2x32xf32> to vector<2x8xf32>
    %133 = vector.extract_strided_slice %131 {offsets = [0, 8], sizes = [2, 8], strides = [1, 1]} : vector<2x32xf32> to vector<2x8xf32>
    %134 = vector.extract_strided_slice %131 {offsets = [0, 16], sizes = [2, 8], strides = [1, 1]} : vector<2x32xf32> to vector<2x8xf32>
    %135 = vector.extract_strided_slice %131 {offsets = [0, 24], sizes = [2, 8], strides = [1, 1]} : vector<2x32xf32> to vector<2x8xf32>
    %136 = vector.extract_strided_slice %95 {offsets = [0, 10], sizes = [2, 5], strides = [1, 1]} : vector<2x35xf32> to vector<2x5xf32>
    %cst_58 = arith.constant dense<0.000000e+00> : vector<2x32xf32>
    %137 = tpu.matmul %136, %106, %cst_58 {dimension_numbers = #tpu.dot_dimension_numbers<[1], [0], [0], [1], [0, 0, 1, 1], [], []>, precision = #tpu.contract_precision<fp32>} : vector<2x5xf32>, vector<5x32xf32>, vector<2x32xf32> -> vector<2x32xf32>
    %138 = vector.extract_strided_slice %105 {offsets = [0, 6], sizes = [2, 3], strides = [1, 1]} : vector<2x21xf32> to vector<2x3xf32>
    %cst_59 = arith.constant dense<0.000000e+00> : vector<2x32xf32>
    %139 = tpu.matmul %138, %107, %cst_59 {dimension_numbers = #tpu.dot_dimension_numbers<[1], [0], [0], [1], [0, 0, 1, 1], [], []>, precision = #tpu.contract_precision<fp32>} : vector<2x3xf32>, vector<3x32xf32>, vector<2x32xf32> -> vector<2x32xf32>
    %140 = arith.addf %137, %139 : vector<2x32xf32>
    %141 = vector.broadcast %108 : vector<1x32xf32> to vector<2x32xf32>
    %142 = arith.addf %140, %141 : vector<2x32xf32>
    %143 = vector.extract_strided_slice %142 {offsets = [0, 0], sizes = [2, 8], strides = [1, 1]} : vector<2x32xf32> to vector<2x8xf32>
    %144 = vector.extract_strided_slice %142 {offsets = [0, 8], sizes = [2, 8], strides = [1, 1]} : vector<2x32xf32> to vector<2x8xf32>
    %145 = vector.extract_strided_slice %142 {offsets = [0, 16], sizes = [2, 8], strides = [1, 1]} : vector<2x32xf32> to vector<2x8xf32>
    %146 = vector.extract_strided_slice %142 {offsets = [0, 24], sizes = [2, 8], strides = [1, 1]} : vector<2x32xf32> to vector<2x8xf32>
    %147 = vector.extract_strided_slice %95 {offsets = [0, 15], sizes = [2, 5], strides = [1, 1]} : vector<2x35xf32> to vector<2x5xf32>
    %cst_60 = arith.constant dense<0.000000e+00> : vector<2x32xf32>
    %148 = tpu.matmul %147, %106, %cst_60 {dimension_numbers = #tpu.dot_dimension_numbers<[1], [0], [0], [1], [0, 0, 1, 1], [], []>, precision = #tpu.contract_precision<fp32>} : vector<2x5xf32>, vector<5x32xf32>, vector<2x32xf32> -> vector<2x32xf32>
    %149 = vector.extract_strided_slice %105 {offsets = [0, 9], sizes = [2, 3], strides = [1, 1]} : vector<2x21xf32> to vector<2x3xf32>
    %cst_61 = arith.constant dense<0.000000e+00> : vector<2x32xf32>
    %150 = tpu.matmul %149, %107, %cst_61 {dimension_numbers = #tpu.dot_dimension_numbers<[1], [0], [0], [1], [0, 0, 1, 1], [], []>, precision = #tpu.contract_precision<fp32>} : vector<2x3xf32>, vector<3x32xf32>, vector<2x32xf32> -> vector<2x32xf32>
    %151 = arith.addf %148, %150 : vector<2x32xf32>
    %152 = vector.broadcast %108 : vector<1x32xf32> to vector<2x32xf32>
    %153 = arith.addf %151, %152 : vector<2x32xf32>
    %154 = vector.extract_strided_slice %153 {offsets = [0, 0], sizes = [2, 8], strides = [1, 1]} : vector<2x32xf32> to vector<2x8xf32>
    %155 = vector.extract_strided_slice %153 {offsets = [0, 8], sizes = [2, 8], strides = [1, 1]} : vector<2x32xf32> to vector<2x8xf32>
    %156 = vector.extract_strided_slice %153 {offsets = [0, 16], sizes = [2, 8], strides = [1, 1]} : vector<2x32xf32> to vector<2x8xf32>
    %157 = vector.extract_strided_slice %153 {offsets = [0, 24], sizes = [2, 8], strides = [1, 1]} : vector<2x32xf32> to vector<2x8xf32>
    %158 = vector.extract_strided_slice %95 {offsets = [0, 20], sizes = [2, 5], strides = [1, 1]} : vector<2x35xf32> to vector<2x5xf32>
    %cst_62 = arith.constant dense<0.000000e+00> : vector<2x32xf32>
    %159 = tpu.matmul %158, %106, %cst_62 {dimension_numbers = #tpu.dot_dimension_numbers<[1], [0], [0], [1], [0, 0, 1, 1], [], []>, precision = #tpu.contract_precision<fp32>} : vector<2x5xf32>, vector<5x32xf32>, vector<2x32xf32> -> vector<2x32xf32>
    %160 = vector.extract_strided_slice %105 {offsets = [0, 12], sizes = [2, 3], strides = [1, 1]} : vector<2x21xf32> to vector<2x3xf32>
    %cst_63 = arith.constant dense<0.000000e+00> : vector<2x32xf32>
    %161 = tpu.matmul %160, %107, %cst_63 {dimension_numbers = #tpu.dot_dimension_numbers<[1], [0], [0], [1], [0, 0, 1, 1], [], []>, precision = #tpu.contract_precision<fp32>} : vector<2x3xf32>, vector<3x32xf32>, vector<2x32xf32> -> vector<2x32xf32>
    %162 = arith.addf %159, %161 : vector<2x32xf32>
    %163 = vector.broadcast %108 : vector<1x32xf32> to vector<2x32xf32>
    %164 = arith.addf %162, %163 : vector<2x32xf32>
    %165 = vector.extract_strided_slice %164 {offsets = [0, 0], sizes = [2, 8], strides = [1, 1]} : vector<2x32xf32> to vector<2x8xf32>
    %166 = vector.extract_strided_slice %164 {offsets = [0, 8], sizes = [2, 8], strides = [1, 1]} : vector<2x32xf32> to vector<2x8xf32>
    %167 = vector.extract_strided_slice %164 {offsets = [0, 16], sizes = [2, 8], strides = [1, 1]} : vector<2x32xf32> to vector<2x8xf32>
    %168 = vector.extract_strided_slice %164 {offsets = [0, 24], sizes = [2, 8], strides = [1, 1]} : vector<2x32xf32> to vector<2x8xf32>
    %169 = vector.extract_strided_slice %95 {offsets = [0, 25], sizes = [2, 5], strides = [1, 1]} : vector<2x35xf32> to vector<2x5xf32>
    %cst_64 = arith.constant dense<0.000000e+00> : vector<2x32xf32>
    %170 = tpu.matmul %169, %106, %cst_64 {dimension_numbers = #tpu.dot_dimension_numbers<[1], [0], [0], [1], [0, 0, 1, 1], [], []>, precision = #tpu.contract_precision<fp32>} : vector<2x5xf32>, vector<5x32xf32>, vector<2x32xf32> -> vector<2x32xf32>
    %171 = vector.extract_strided_slice %105 {offsets = [0, 15], sizes = [2, 3], strides = [1, 1]} : vector<2x21xf32> to vector<2x3xf32>
    %cst_65 = arith.constant dense<0.000000e+00> : vector<2x32xf32>
    %172 = tpu.matmul %171, %107, %cst_65 {dimension_numbers = #tpu.dot_dimension_numbers<[1], [0], [0], [1], [0, 0, 1, 1], [], []>, precision = #tpu.contract_precision<fp32>} : vector<2x3xf32>, vector<3x32xf32>, vector<2x32xf32> -> vector<2x32xf32>
    %173 = arith.addf %170, %172 : vector<2x32xf32>
    %174 = vector.broadcast %108 : vector<1x32xf32> to vector<2x32xf32>
    %175 = arith.addf %173, %174 : vector<2x32xf32>
    %176 = vector.extract_strided_slice %175 {offsets = [0, 0], sizes = [2, 8], strides = [1, 1]} : vector<2x32xf32> to vector<2x8xf32>
    %177 = vector.extract_strided_slice %175 {offsets = [0, 8], sizes = [2, 8], strides = [1, 1]} : vector<2x32xf32> to vector<2x8xf32>
    %178 = vector.extract_strided_slice %175 {offsets = [0, 16], sizes = [2, 8], strides = [1, 1]} : vector<2x32xf32> to vector<2x8xf32>
    %179 = vector.extract_strided_slice %175 {offsets = [0, 24], sizes = [2, 8], strides = [1, 1]} : vector<2x32xf32> to vector<2x8xf32>
    %180 = vector.extract_strided_slice %95 {offsets = [0, 30], sizes = [2, 5], strides = [1, 1]} : vector<2x35xf32> to vector<2x5xf32>
    %cst_66 = arith.constant dense<0.000000e+00> : vector<2x32xf32>
    %181 = tpu.matmul %180, %106, %cst_66 {dimension_numbers = #tpu.dot_dimension_numbers<[1], [0], [0], [1], [0, 0, 1, 1], [], []>, precision = #tpu.contract_precision<fp32>} : vector<2x5xf32>, vector<5x32xf32>, vector<2x32xf32> -> vector<2x32xf32>
    %182 = vector.extract_strided_slice %105 {offsets = [0, 18], sizes = [2, 3], strides = [1, 1]} : vector<2x21xf32> to vector<2x3xf32>
    %cst_67 = arith.constant dense<0.000000e+00> : vector<2x32xf32>
    %183 = tpu.matmul %182, %107, %cst_67 {dimension_numbers = #tpu.dot_dimension_numbers<[1], [0], [0], [1], [0, 0, 1, 1], [], []>, precision = #tpu.contract_precision<fp32>} : vector<2x3xf32>, vector<3x32xf32>, vector<2x32xf32> -> vector<2x32xf32>
    %184 = arith.addf %181, %183 : vector<2x32xf32>
    %185 = vector.broadcast %108 : vector<1x32xf32> to vector<2x32xf32>
    %186 = arith.addf %184, %185 : vector<2x32xf32>
    %187 = vector.extract_strided_slice %186 {offsets = [0, 0], sizes = [2, 8], strides = [1, 1]} : vector<2x32xf32> to vector<2x8xf32>
    %188 = vector.extract_strided_slice %186 {offsets = [0, 8], sizes = [2, 8], strides = [1, 1]} : vector<2x32xf32> to vector<2x8xf32>
    %189 = vector.extract_strided_slice %186 {offsets = [0, 16], sizes = [2, 8], strides = [1, 1]} : vector<2x32xf32> to vector<2x8xf32>
    %190 = vector.extract_strided_slice %186 {offsets = [0, 24], sizes = [2, 8], strides = [1, 1]} : vector<2x32xf32> to vector<2x8xf32>
    %cst_68 = arith.constant 0.000000e+00 : f32
    %191 = vector.broadcast %cst_68 : f32 to vector<2x8xf32>
    %cst_69 = arith.constant 0.000000e+00 : f32
    %192 = vector.broadcast %cst_69 : f32 to vector<2x8xf32>
    %cst_70 = arith.constant dense<0.000000e+00> : vector<2x8xf32>
    %193 = tpu.matmul %191, %110, %cst_70 {dimension_numbers = #tpu.dot_dimension_numbers<[1], [0], [0], [1], [0, 0, 1, 1], [], []>, precision = #tpu.contract_precision<fp32>} : vector<2x8xf32>, vector<8x8xf32>, vector<2x8xf32> -> vector<2x8xf32>
    %194 = arith.addf %121, %193 : vector<2x8xf32>
    %195 = arith.negf %194 : vector<2x8xf32>
    %196 = math.exp %195 : vector<2x8xf32>
    %cst_71 = arith.constant 1.000000e+00 : f32
    %197 = vector.broadcast %cst_71 : f32 to vector<2x8xf32>
    %198 = arith.addf %197, %196 : vector<2x8xf32>
    %199 = arith.divf %197, %198 : vector<2x8xf32>
    %cst_72 = arith.constant dense<0.000000e+00> : vector<2x8xf32>
    %200 = tpu.matmul %191, %111, %cst_72 {dimension_numbers = #tpu.dot_dimension_numbers<[1], [0], [0], [1], [0, 0, 1, 1], [], []>, precision = #tpu.contract_precision<fp32>} : vector<2x8xf32>, vector<8x8xf32>, vector<2x8xf32> -> vector<2x8xf32>
    %201 = arith.addf %122, %200 : vector<2x8xf32>
    %202 = arith.negf %201 : vector<2x8xf32>
    %203 = math.exp %202 : vector<2x8xf32>
    %cst_73 = arith.constant 1.000000e+00 : f32
    %204 = vector.broadcast %cst_73 : f32 to vector<2x8xf32>
    %205 = arith.addf %204, %203 : vector<2x8xf32>
    %206 = arith.divf %204, %205 : vector<2x8xf32>
    %cst_74 = arith.constant dense<0.000000e+00> : vector<2x8xf32>
    %207 = tpu.matmul %191, %112, %cst_74 {dimension_numbers = #tpu.dot_dimension_numbers<[1], [0], [0], [1], [0, 0, 1, 1], [], []>, precision = #tpu.contract_precision<fp32>} : vector<2x8xf32>, vector<8x8xf32>, vector<2x8xf32> -> vector<2x8xf32>
    %208 = arith.addf %123, %207 : vector<2x8xf32>
    %209 = math.tanh %208 : vector<2x8xf32>
    %cst_75 = arith.constant dense<0.000000e+00> : vector<2x8xf32>
    %210 = tpu.matmul %191, %113, %cst_75 {dimension_numbers = #tpu.dot_dimension_numbers<[1], [0], [0], [1], [0, 0, 1, 1], [], []>, precision = #tpu.contract_precision<fp32>} : vector<2x8xf32>, vector<8x8xf32>, vector<2x8xf32> -> vector<2x8xf32>
    %211 = arith.addf %124, %210 : vector<2x8xf32>
    %212 = arith.negf %211 : vector<2x8xf32>
    %213 = math.exp %212 : vector<2x8xf32>
    %cst_76 = arith.constant 1.000000e+00 : f32
    %214 = vector.broadcast %cst_76 : f32 to vector<2x8xf32>
    %215 = arith.addf %214, %213 : vector<2x8xf32>
    %216 = arith.divf %214, %215 : vector<2x8xf32>
    %217 = arith.mulf %206, %192 : vector<2x8xf32>
    %218 = arith.mulf %199, %209 : vector<2x8xf32>
    %219 = arith.addf %217, %218 : vector<2x8xf32>
    %220 = math.tanh %219 : vector<2x8xf32>
    %221 = arith.mulf %216, %220 : vector<2x8xf32>
    %cst_77 = arith.constant dense<0.000000e+00> : vector<2x8xf32>
    %222 = tpu.matmul %221, %110, %cst_77 {dimension_numbers = #tpu.dot_dimension_numbers<[1], [0], [0], [1], [0, 0, 1, 1], [], []>, precision = #tpu.contract_precision<fp32>} : vector<2x8xf32>, vector<8x8xf32>, vector<2x8xf32> -> vector<2x8xf32>
    %223 = arith.addf %132, %222 : vector<2x8xf32>
    %224 = arith.negf %223 : vector<2x8xf32>
    %225 = math.exp %224 : vector<2x8xf32>
    %cst_78 = arith.constant 1.000000e+00 : f32
    %226 = vector.broadcast %cst_78 : f32 to vector<2x8xf32>
    %227 = arith.addf %226, %225 : vector<2x8xf32>
    %228 = arith.divf %226, %227 : vector<2x8xf32>
    %cst_79 = arith.constant dense<0.000000e+00> : vector<2x8xf32>
    %229 = tpu.matmul %221, %111, %cst_79 {dimension_numbers = #tpu.dot_dimension_numbers<[1], [0], [0], [1], [0, 0, 1, 1], [], []>, precision = #tpu.contract_precision<fp32>} : vector<2x8xf32>, vector<8x8xf32>, vector<2x8xf32> -> vector<2x8xf32>
    %230 = arith.addf %133, %229 : vector<2x8xf32>
    %231 = arith.negf %230 : vector<2x8xf32>
    %232 = math.exp %231 : vector<2x8xf32>
    %cst_80 = arith.constant 1.000000e+00 : f32
    %233 = vector.broadcast %cst_80 : f32 to vector<2x8xf32>
    %234 = arith.addf %233, %232 : vector<2x8xf32>
    %235 = arith.divf %233, %234 : vector<2x8xf32>
    %cst_81 = arith.constant dense<0.000000e+00> : vector<2x8xf32>
    %236 = tpu.matmul %221, %112, %cst_81 {dimension_numbers = #tpu.dot_dimension_numbers<[1], [0], [0], [1], [0, 0, 1, 1], [], []>, precision = #tpu.contract_precision<fp32>} : vector<2x8xf32>, vector<8x8xf32>, vector<2x8xf32> -> vector<2x8xf32>
    %237 = arith.addf %134, %236 : vector<2x8xf32>
    %238 = math.tanh %237 : vector<2x8xf32>
    %cst_82 = arith.constant dense<0.000000e+00> : vector<2x8xf32>
    %239 = tpu.matmul %221, %113, %cst_82 {dimension_numbers = #tpu.dot_dimension_numbers<[1], [0], [0], [1], [0, 0, 1, 1], [], []>, precision = #tpu.contract_precision<fp32>} : vector<2x8xf32>, vector<8x8xf32>, vector<2x8xf32> -> vector<2x8xf32>
    %240 = arith.addf %135, %239 : vector<2x8xf32>
    %241 = arith.negf %240 : vector<2x8xf32>
    %242 = math.exp %241 : vector<2x8xf32>
    %cst_83 = arith.constant 1.000000e+00 : f32
    %243 = vector.broadcast %cst_83 : f32 to vector<2x8xf32>
    %244 = arith.addf %243, %242 : vector<2x8xf32>
    %245 = arith.divf %243, %244 : vector<2x8xf32>
    %246 = arith.mulf %235, %219 : vector<2x8xf32>
    %247 = arith.mulf %228, %238 : vector<2x8xf32>
    %248 = arith.addf %246, %247 : vector<2x8xf32>
    %249 = math.tanh %248 : vector<2x8xf32>
    %250 = arith.mulf %245, %249 : vector<2x8xf32>
    %cst_84 = arith.constant dense<0.000000e+00> : vector<2x8xf32>
    %251 = tpu.matmul %250, %110, %cst_84 {dimension_numbers = #tpu.dot_dimension_numbers<[1], [0], [0], [1], [0, 0, 1, 1], [], []>, precision = #tpu.contract_precision<fp32>} : vector<2x8xf32>, vector<8x8xf32>, vector<2x8xf32> -> vector<2x8xf32>
    %252 = arith.addf %143, %251 : vector<2x8xf32>
    %253 = arith.negf %252 : vector<2x8xf32>
    %254 = math.exp %253 : vector<2x8xf32>
    %cst_85 = arith.constant 1.000000e+00 : f32
    %255 = vector.broadcast %cst_85 : f32 to vector<2x8xf32>
    %256 = arith.addf %255, %254 : vector<2x8xf32>
    %257 = arith.divf %255, %256 : vector<2x8xf32>
    %cst_86 = arith.constant dense<0.000000e+00> : vector<2x8xf32>
    %258 = tpu.matmul %250, %111, %cst_86 {dimension_numbers = #tpu.dot_dimension_numbers<[1], [0], [0], [1], [0, 0, 1, 1], [], []>, precision = #tpu.contract_precision<fp32>} : vector<2x8xf32>, vector<8x8xf32>, vector<2x8xf32> -> vector<2x8xf32>
    %259 = arith.addf %144, %258 : vector<2x8xf32>
    %260 = arith.negf %259 : vector<2x8xf32>
    %261 = math.exp %260 : vector<2x8xf32>
    %cst_87 = arith.constant 1.000000e+00 : f32
    %262 = vector.broadcast %cst_87 : f32 to vector<2x8xf32>
    %263 = arith.addf %262, %261 : vector<2x8xf32>
    %264 = arith.divf %262, %263 : vector<2x8xf32>
    %cst_88 = arith.constant dense<0.000000e+00> : vector<2x8xf32>
    %265 = tpu.matmul %250, %112, %cst_88 {dimension_numbers = #tpu.dot_dimension_numbers<[1], [0], [0], [1], [0, 0, 1, 1], [], []>, precision = #tpu.contract_precision<fp32>} : vector<2x8xf32>, vector<8x8xf32>, vector<2x8xf32> -> vector<2x8xf32>
    %266 = arith.addf %145, %265 : vector<2x8xf32>
    %267 = math.tanh %266 : vector<2x8xf32>
    %cst_89 = arith.constant dense<0.000000e+00> : vector<2x8xf32>
    %268 = tpu.matmul %250, %113, %cst_89 {dimension_numbers = #tpu.dot_dimension_numbers<[1], [0], [0], [1], [0, 0, 1, 1], [], []>, precision = #tpu.contract_precision<fp32>} : vector<2x8xf32>, vector<8x8xf32>, vector<2x8xf32> -> vector<2x8xf32>
    %269 = arith.addf %146, %268 : vector<2x8xf32>
    %270 = arith.negf %269 : vector<2x8xf32>
    %271 = math.exp %270 : vector<2x8xf32>
    %cst_90 = arith.constant 1.000000e+00 : f32
    %272 = vector.broadcast %cst_90 : f32 to vector<2x8xf32>
    %273 = arith.addf %272, %271 : vector<2x8xf32>
    %274 = arith.divf %272, %273 : vector<2x8xf32>
    %275 = arith.mulf %264, %248 : vector<2x8xf32>
    %276 = arith.mulf %257, %267 : vector<2x8xf32>
    %277 = arith.addf %275, %276 : vector<2x8xf32>
    %278 = math.tanh %277 : vector<2x8xf32>
    %279 = arith.mulf %274, %278 : vector<2x8xf32>
    %cst_91 = arith.constant dense<0.000000e+00> : vector<2x8xf32>
    %280 = tpu.matmul %279, %110, %cst_91 {dimension_numbers = #tpu.dot_dimension_numbers<[1], [0], [0], [1], [0, 0, 1, 1], [], []>, precision = #tpu.contract_precision<fp32>} : vector<2x8xf32>, vector<8x8xf32>, vector<2x8xf32> -> vector<2x8xf32>
    %281 = arith.addf %154, %280 : vector<2x8xf32>
    %282 = arith.negf %281 : vector<2x8xf32>
    %283 = math.exp %282 : vector<2x8xf32>
    %cst_92 = arith.constant 1.000000e+00 : f32
    %284 = vector.broadcast %cst_92 : f32 to vector<2x8xf32>
    %285 = arith.addf %284, %283 : vector<2x8xf32>
    %286 = arith.divf %284, %285 : vector<2x8xf32>
    %cst_93 = arith.constant dense<0.000000e+00> : vector<2x8xf32>
    %287 = tpu.matmul %279, %111, %cst_93 {dimension_numbers = #tpu.dot_dimension_numbers<[1], [0], [0], [1], [0, 0, 1, 1], [], []>, precision = #tpu.contract_precision<fp32>} : vector<2x8xf32>, vector<8x8xf32>, vector<2x8xf32> -> vector<2x8xf32>
    %288 = arith.addf %155, %287 : vector<2x8xf32>
    %289 = arith.negf %288 : vector<2x8xf32>
    %290 = math.exp %289 : vector<2x8xf32>
    %cst_94 = arith.constant 1.000000e+00 : f32
    %291 = vector.broadcast %cst_94 : f32 to vector<2x8xf32>
    %292 = arith.addf %291, %290 : vector<2x8xf32>
    %293 = arith.divf %291, %292 : vector<2x8xf32>
    %cst_95 = arith.constant dense<0.000000e+00> : vector<2x8xf32>
    %294 = tpu.matmul %279, %112, %cst_95 {dimension_numbers = #tpu.dot_dimension_numbers<[1], [0], [0], [1], [0, 0, 1, 1], [], []>, precision = #tpu.contract_precision<fp32>} : vector<2x8xf32>, vector<8x8xf32>, vector<2x8xf32> -> vector<2x8xf32>
    %295 = arith.addf %156, %294 : vector<2x8xf32>
    %296 = math.tanh %295 : vector<2x8xf32>
    %cst_96 = arith.constant dense<0.000000e+00> : vector<2x8xf32>
    %297 = tpu.matmul %279, %113, %cst_96 {dimension_numbers = #tpu.dot_dimension_numbers<[1], [0], [0], [1], [0, 0, 1, 1], [], []>, precision = #tpu.contract_precision<fp32>} : vector<2x8xf32>, vector<8x8xf32>, vector<2x8xf32> -> vector<2x8xf32>
    %298 = arith.addf %157, %297 : vector<2x8xf32>
    %299 = arith.negf %298 : vector<2x8xf32>
    %300 = math.exp %299 : vector<2x8xf32>
    %cst_97 = arith.constant 1.000000e+00 : f32
    %301 = vector.broadcast %cst_97 : f32 to vector<2x8xf32>
    %302 = arith.addf %301, %300 : vector<2x8xf32>
    %303 = arith.divf %301, %302 : vector<2x8xf32>
    %304 = arith.mulf %293, %277 : vector<2x8xf32>
    %305 = arith.mulf %286, %296 : vector<2x8xf32>
    %306 = arith.addf %304, %305 : vector<2x8xf32>
    %307 = math.tanh %306 : vector<2x8xf32>
    %308 = arith.mulf %303, %307 : vector<2x8xf32>
    %cst_98 = arith.constant dense<0.000000e+00> : vector<2x8xf32>
    %309 = tpu.matmul %308, %110, %cst_98 {dimension_numbers = #tpu.dot_dimension_numbers<[1], [0], [0], [1], [0, 0, 1, 1], [], []>, precision = #tpu.contract_precision<fp32>} : vector<2x8xf32>, vector<8x8xf32>, vector<2x8xf32> -> vector<2x8xf32>
    %310 = arith.addf %165, %309 : vector<2x8xf32>
    %311 = arith.negf %310 : vector<2x8xf32>
    %312 = math.exp %311 : vector<2x8xf32>
    %cst_99 = arith.constant 1.000000e+00 : f32
    %313 = vector.broadcast %cst_99 : f32 to vector<2x8xf32>
    %314 = arith.addf %313, %312 : vector<2x8xf32>
    %315 = arith.divf %313, %314 : vector<2x8xf32>
    %cst_100 = arith.constant dense<0.000000e+00> : vector<2x8xf32>
    %316 = tpu.matmul %308, %111, %cst_100 {dimension_numbers = #tpu.dot_dimension_numbers<[1], [0], [0], [1], [0, 0, 1, 1], [], []>, precision = #tpu.contract_precision<fp32>} : vector<2x8xf32>, vector<8x8xf32>, vector<2x8xf32> -> vector<2x8xf32>
    %317 = arith.addf %166, %316 : vector<2x8xf32>
    %318 = arith.negf %317 : vector<2x8xf32>
    %319 = math.exp %318 : vector<2x8xf32>
    %cst_101 = arith.constant 1.000000e+00 : f32
    %320 = vector.broadcast %cst_101 : f32 to vector<2x8xf32>
    %321 = arith.addf %320, %319 : vector<2x8xf32>
    %322 = arith.divf %320, %321 : vector<2x8xf32>
    %cst_102 = arith.constant dense<0.000000e+00> : vector<2x8xf32>
    %323 = tpu.matmul %308, %112, %cst_102 {dimension_numbers = #tpu.dot_dimension_numbers<[1], [0], [0], [1], [0, 0, 1, 1], [], []>, precision = #tpu.contract_precision<fp32>} : vector<2x8xf32>, vector<8x8xf32>, vector<2x8xf32> -> vector<2x8xf32>
    %324 = arith.addf %167, %323 : vector<2x8xf32>
    %325 = math.tanh %324 : vector<2x8xf32>
    %cst_103 = arith.constant dense<0.000000e+00> : vector<2x8xf32>
    %326 = tpu.matmul %308, %113, %cst_103 {dimension_numbers = #tpu.dot_dimension_numbers<[1], [0], [0], [1], [0, 0, 1, 1], [], []>, precision = #tpu.contract_precision<fp32>} : vector<2x8xf32>, vector<8x8xf32>, vector<2x8xf32> -> vector<2x8xf32>
    %327 = arith.addf %168, %326 : vector<2x8xf32>
    %328 = arith.negf %327 : vector<2x8xf32>
    %329 = math.exp %328 : vector<2x8xf32>
    %cst_104 = arith.constant 1.000000e+00 : f32
    %330 = vector.broadcast %cst_104 : f32 to vector<2x8xf32>
    %331 = arith.addf %330, %329 : vector<2x8xf32>
    %332 = arith.divf %330, %331 : vector<2x8xf32>
    %333 = arith.mulf %322, %306 : vector<2x8xf32>
    %334 = arith.mulf %315, %325 : vector<2x8xf32>
    %335 = arith.addf %333, %334 : vector<2x8xf32>
    %336 = math.tanh %335 : vector<2x8xf32>
    %337 = arith.mulf %332, %336 : vector<2x8xf32>
    %cst_105 = arith.constant dense<0.000000e+00> : vector<2x8xf32>
    %338 = tpu.matmul %337, %110, %cst_105 {dimension_numbers = #tpu.dot_dimension_numbers<[1], [0], [0], [1], [0, 0, 1, 1], [], []>, precision = #tpu.contract_precision<fp32>} : vector<2x8xf32>, vector<8x8xf32>, vector<2x8xf32> -> vector<2x8xf32>
    %339 = arith.addf %176, %338 : vector<2x8xf32>
    %340 = arith.negf %339 : vector<2x8xf32>
    %341 = math.exp %340 : vector<2x8xf32>
    %cst_106 = arith.constant 1.000000e+00 : f32
    %342 = vector.broadcast %cst_106 : f32 to vector<2x8xf32>
    %343 = arith.addf %342, %341 : vector<2x8xf32>
    %344 = arith.divf %342, %343 : vector<2x8xf32>
    %cst_107 = arith.constant dense<0.000000e+00> : vector<2x8xf32>
    %345 = tpu.matmul %337, %111, %cst_107 {dimension_numbers = #tpu.dot_dimension_numbers<[1], [0], [0], [1], [0, 0, 1, 1], [], []>, precision = #tpu.contract_precision<fp32>} : vector<2x8xf32>, vector<8x8xf32>, vector<2x8xf32> -> vector<2x8xf32>
    %346 = arith.addf %177, %345 : vector<2x8xf32>
    %347 = arith.negf %346 : vector<2x8xf32>
    %348 = math.exp %347 : vector<2x8xf32>
    %cst_108 = arith.constant 1.000000e+00 : f32
    %349 = vector.broadcast %cst_108 : f32 to vector<2x8xf32>
    %350 = arith.addf %349, %348 : vector<2x8xf32>
    %351 = arith.divf %349, %350 : vector<2x8xf32>
    %cst_109 = arith.constant dense<0.000000e+00> : vector<2x8xf32>
    %352 = tpu.matmul %337, %112, %cst_109 {dimension_numbers = #tpu.dot_dimension_numbers<[1], [0], [0], [1], [0, 0, 1, 1], [], []>, precision = #tpu.contract_precision<fp32>} : vector<2x8xf32>, vector<8x8xf32>, vector<2x8xf32> -> vector<2x8xf32>
    %353 = arith.addf %178, %352 : vector<2x8xf32>
    %354 = math.tanh %353 : vector<2x8xf32>
    %cst_110 = arith.constant dense<0.000000e+00> : vector<2x8xf32>
    %355 = tpu.matmul %337, %113, %cst_110 {dimension_numbers = #tpu.dot_dimension_numbers<[1], [0], [0], [1], [0, 0, 1, 1], [], []>, precision = #tpu.contract_precision<fp32>} : vector<2x8xf32>, vector<8x8xf32>, vector<2x8xf32> -> vector<2x8xf32>
    %356 = arith.addf %179, %355 : vector<2x8xf32>
    %357 = arith.negf %356 : vector<2x8xf32>
    %358 = math.exp %357 : vector<2x8xf32>
    %cst_111 = arith.constant 1.000000e+00 : f32
    %359 = vector.broadcast %cst_111 : f32 to vector<2x8xf32>
    %360 = arith.addf %359, %358 : vector<2x8xf32>
    %361 = arith.divf %359, %360 : vector<2x8xf32>
    %362 = arith.mulf %351, %335 : vector<2x8xf32>
    %363 = arith.mulf %344, %354 : vector<2x8xf32>
    %364 = arith.addf %362, %363 : vector<2x8xf32>
    %365 = math.tanh %364 : vector<2x8xf32>
    %366 = arith.mulf %361, %365 : vector<2x8xf32>
    %cst_112 = arith.constant dense<0.000000e+00> : vector<2x8xf32>
    %367 = tpu.matmul %366, %110, %cst_112 {dimension_numbers = #tpu.dot_dimension_numbers<[1], [0], [0], [1], [0, 0, 1, 1], [], []>, precision = #tpu.contract_precision<fp32>} : vector<2x8xf32>, vector<8x8xf32>, vector<2x8xf32> -> vector<2x8xf32>
    %368 = arith.addf %187, %367 : vector<2x8xf32>
    %369 = arith.negf %368 : vector<2x8xf32>
    %370 = math.exp %369 : vector<2x8xf32>
    %cst_113 = arith.constant 1.000000e+00 : f32
    %371 = vector.broadcast %cst_113 : f32 to vector<2x8xf32>
    %372 = arith.addf %371, %370 : vector<2x8xf32>
    %373 = arith.divf %371, %372 : vector<2x8xf32>
    %cst_114 = arith.constant dense<0.000000e+00> : vector<2x8xf32>
    %374 = tpu.matmul %366, %111, %cst_114 {dimension_numbers = #tpu.dot_dimension_numbers<[1], [0], [0], [1], [0, 0, 1, 1], [], []>, precision = #tpu.contract_precision<fp32>} : vector<2x8xf32>, vector<8x8xf32>, vector<2x8xf32> -> vector<2x8xf32>
    %375 = arith.addf %188, %374 : vector<2x8xf32>
    %376 = arith.negf %375 : vector<2x8xf32>
    %377 = math.exp %376 : vector<2x8xf32>
    %cst_115 = arith.constant 1.000000e+00 : f32
    %378 = vector.broadcast %cst_115 : f32 to vector<2x8xf32>
    %379 = arith.addf %378, %377 : vector<2x8xf32>
    %380 = arith.divf %378, %379 : vector<2x8xf32>
    %cst_116 = arith.constant dense<0.000000e+00> : vector<2x8xf32>
    %381 = tpu.matmul %366, %112, %cst_116 {dimension_numbers = #tpu.dot_dimension_numbers<[1], [0], [0], [1], [0, 0, 1, 1], [], []>, precision = #tpu.contract_precision<fp32>} : vector<2x8xf32>, vector<8x8xf32>, vector<2x8xf32> -> vector<2x8xf32>
    %382 = arith.addf %189, %381 : vector<2x8xf32>
    %383 = math.tanh %382 : vector<2x8xf32>
    %cst_117 = arith.constant dense<0.000000e+00> : vector<2x8xf32>
    %384 = tpu.matmul %366, %113, %cst_117 {dimension_numbers = #tpu.dot_dimension_numbers<[1], [0], [0], [1], [0, 0, 1, 1], [], []>, precision = #tpu.contract_precision<fp32>} : vector<2x8xf32>, vector<8x8xf32>, vector<2x8xf32> -> vector<2x8xf32>
    %385 = arith.addf %190, %384 : vector<2x8xf32>
    %386 = arith.negf %385 : vector<2x8xf32>
    %387 = math.exp %386 : vector<2x8xf32>
    %cst_118 = arith.constant 1.000000e+00 : f32
    %388 = vector.broadcast %cst_118 : f32 to vector<2x8xf32>
    %389 = arith.addf %388, %387 : vector<2x8xf32>
    %390 = arith.divf %388, %389 : vector<2x8xf32>
    %391 = arith.mulf %380, %364 : vector<2x8xf32>
    %392 = arith.mulf %373, %383 : vector<2x8xf32>
    %393 = arith.addf %391, %392 : vector<2x8xf32>
    %394 = math.tanh %393 : vector<2x8xf32>
    %395 = arith.mulf %390, %394 : vector<2x8xf32>
    %c26 = arith.constant 26 : index
    %c0_119 = arith.constant 0 : index
    %396 = vector.load %arg3[%c26, %c0_119] : memref<32x80xf32, #tpu.memory_space<vmem>>, vector<1x8xf32>
    %c27 = arith.constant 27 : index
    %c0_120 = arith.constant 0 : index
    %397 = vector.load %arg3[%c27, %c0_120] : memref<32x80xf32, #tpu.memory_space<vmem>>, vector<1x64xf32>
    %c28 = arith.constant 28 : index
    %c0_121 = arith.constant 0 : index
    %398 = vector.load %arg3[%c28, %c0_121] : memref<32x80xf32, #tpu.memory_space<vmem>>, vector<1x1xf32>
    %399 = vector.broadcast %396 : vector<1x8xf32> to vector<2x8xf32>
    %400 = arith.mulf %395, %399 : vector<2x8xf32>
    %cst_122 = arith.constant dense<0.000000e+00> : vector<2xf32>
    %401 = vector.multi_reduction <add>, %400, %cst_122 [1] : vector<2x8xf32> to vector<2xf32>
    %402 = vector.shape_cast %401 : vector<2xf32> to vector<2x1xf32>
    %403 = vector.broadcast %397 : vector<1x64xf32> to vector<2x64xf32>
    %404 = arith.mulf %104, %403 : vector<2x64xf32>
    %cst_123 = arith.constant dense<0.000000e+00> : vector<2xf32>
    %405 = vector.multi_reduction <add>, %404, %cst_123 [1] : vector<2x64xf32> to vector<2xf32>
    %406 = vector.shape_cast %405 : vector<2xf32> to vector<2x1xf32>
    %407 = arith.addf %402, %406 : vector<2x1xf32>
    %408 = vector.broadcast %398 : vector<1x1xf32> to vector<2x1xf32>
    %409 = arith.addf %407, %408 : vector<2x1xf32>
    %cst_124 = arith.constant 0.000000e+00 : f32
    %410 = vector.broadcast %cst_124 : f32 to vector<2x1xf32>
    %411 = arith.maximumf %409, %410 : vector<2x1xf32>
    %c0_125 = arith.constant 0 : index
    %c0_126 = arith.constant 0 : index
    %412 = vector.load %arg4[%c0_125, %c0_126] : memref<2x1xf32, #tpu.memory_space<vmem>>, vector<2x1xf32>
    tpu.vector_store %arg4[%c0_125, %c0_126], %411 {strides = array<i32>} : memref<2x1xf32, #tpu.memory_space<vmem>>, vector<2x1xf32>,
    return
  }
  func.func @transform_0(%arg0: i32) -> (i32, i32) {
    %c0_i32 = arith.constant 0 : i32
    %c0_i32_0 = arith.constant 0 : i32
    %c0_i32_1 = arith.constant 0 : i32
    return %c0_i32, %c0_i32_0 : i32, i32
  }
  func.func @transform_1(%arg0: i32) -> (i32, i32) {
    %c0_i32 = arith.constant 0 : i32
    %c0_i32_0 = arith.constant 0 : i32
    %c0_i32_1 = arith.constant 0 : i32
    return %c0_i32, %c0_i32_0 : i32, i32
  }
  func.func @transform_2(%arg0: i32) -> (i32, i32) {
    %c0_i32 = arith.constant 0 : i32
    %c0_i32_0 = arith.constant 0 : i32
    %c0_i32_1 = arith.constant 0 : i32
    return %c0_i32, %c0_i32_0 : i32, i32
  }
  func.func @transform_3(%arg0: i32) -> (i32, i32) {
    %c0_i32 = arith.constant 0 : i32
    %c0_i32_0 = arith.constant 0 : i32
    %c0_i32_1 = arith.constant 0 : i32
    return %c0_i32, %c0_i32_0 : i32, i32
  }
}

</mosaic_0001>

<bundles_post_ra>
// kernel: squeeze.3
= control target key start
LH: loop header
LB: loop body
LE: loop exit
PB: predicated region body
PF: predicated region fallthrough
CT: control target
= control target key end

     0   :  { %s7_s6 = smov 3  ;;  %s21_s9 = smov 3  ;;  %vm4_vm0 = vcmask 23552   ;;  %vm11_vm1 = vcmask 171152   ;;  %vm18_vm2 = vcmask 146552   ;;  %vm25_vm3 = vcmask 121952   ;;  %s106_s0 = inlined_call_operand.vmem [shape: f32[2,7,3], index: 0, kind: input, shape index: {}]   ;;  %s107_s1 = inlined_call_operand.vmem [shape: f32[2,21], index: 1, kind: output, shape index: {}]  }
   0x1   :  { %v54_v0 = vld [vmem:[%s106_s0 + $0x6] ss:$8 sm:%s7_s6]   ;;  %s66_s10 = smov 18   ;;  %v56_v1 = vld [vmem:[%s106_s0 + $0x4] ss:$8 sm:%s21_s9]   ;;  %s14_s13 = smov 3 }
   0x2   :  { %9 = vrot.lane.b32.xlu0 %v54_v0, %s66_s10  ;;  %s67_s14 = smov 12   ;;  %v55_v2 = vld [vmem:[%s106_s0 + $0x5] ss:$8 sm:%s14_s13]   ;;  %s28_s17 = smov 3  ;;  %vm32_vm4 = vcmask 97352   ;;  %vm39_vm5 = vcmask 72752  }
   0x3   :  { %23 = vrot.lane.b32.xlu1 %v56_v1, %s67_s14  ;;  %v57_v3 = vld [vmem:[%s106_s0 + $0x3] ss:$8 sm:%s28_s17]   ;;  %s35_s20 = smov 3  ;;  %s42_s21 = smov 3  ;;  %vm46_vm6 = vcmask 48152  }
   0x4   :  { %s68_s22 = smov 15   ;;  %v58_v4 = vld [vmem:[%s106_s0 + $0x2] ss:$8 sm:%s35_s20]   ;;  %s2_s25 = smov 3  ;;  %v59_v6 = vld [vmem:[%s106_s0 + $0x1] ss:$8 sm:%s42_s21]  }
   0x5   :  { %s69_s26 = smov 9   ;;  %v3_v5 = vld [vmem:[%s106_s0] ss:$8 sm:%s2_s25]   ;;  %s70_s0 = smov 6  }
   0x6   :  { %16 = vrot.lane.b32.xlu0 %v55_v2, %s68_s22  ;;  %5 = vst.msk [vmem:[#allocation0] sm:$0x3] %vm4_vm0, %v3_v5   ;;  %s71_s2 = smov 3  }
   0x7   :  { %30 = vrot.lane.b32.xlu1 %v57_v3, %s69_s26 }
   0xa   :  { %37 = vrot.lane.b32.xlu0 %v58_v4, %s70_s0 }
   0xb   :  { %44 = vrot.lane.b32.xlu1 %v59_v6, %s71_s2 }
  0x74   :  { %v10_v7 = vpop.permute.xlu0 %9  }
  0x75   :  { %12 = vst.msk [vmem:[#allocation0] sm:$0x3] %vm11_vm1, %v10_v7   ;;  %v24_v8 = vpop.permute.xlu1 %23  }
  0x78   :  { %v17_v9 = vpop.permute.xlu0 %16  }
  0x79   :  { %19 = vst.msk [vmem:[#allocation0] sm:$0x3] %vm18_vm2, %v17_v9   ;;  %v31_v10 = vpop.permute.xlu1 %30  }
  0x7a   :  { %26 = vst.msk [vmem:[#allocation0] sm:$0x3] %vm25_vm3, %v24_v8  }
  0x7b   :  { %33 = vst.msk [vmem:[#allocation0] sm:$0x3] %vm32_vm4, %v31_v10  }
  0x7c   :  { %v38_v11 = vpop.permute.xlu0 %37  }
  0x7d   :  { %40 = vst.msk [vmem:[#allocation0] sm:$0x3] %vm39_vm5, %v38_v11   ;;  %v45_v12 = vpop.permute.xlu1 %44  }
  0x7e   :  { %47 = vst.msk [vmem:[#allocation0] sm:$0x3] %vm46_vm6, %v45_v12  }
  0x85   :  { %v51_v13 = vld [vmem:[#allocation0] sm:$0x3] }
  0x86   :  { %53 = vst [vmem:[%s107_s1] sm:$0x3] %v51_v13 }

// kernel: squeeze.2
= control target key start
LH: loop header
LB: loop body
LE: loop exit
PB: predicated region body
PF: predicated region fallthrough
CT: control target
= control target key end

     0   :  { %vm43_vm0 = vcmask 1041409   ;;  %s232_s22 = smov 52   ;;  %s233_s23 = smov 56   ;;  %vm45_vm1 = vcmask 31744   ;;  %vm55_vm2 = vcmask 523744   ;;  %vm65_vm3 = vcmask 490944   ;;  %s299_s0 = inlined_call_operand.vmem [shape: f32[2,1,4,4,4], index: 0, kind: input, shape index: {}]   ;;  %s300_s1 = inlined_call_operand.vmem [shape: f32[2,64], index: 1, kind: output, shape index: {}]  }
   0x1   :  { %v209_v0 = vld [vmem:[%s299_s0 + $0x1c] sm:$0xf]  ;;  %v213_v1 = vld [vmem:[%s299_s0 + $0xc] sm:$0xf]  ;;  %v210_v2 = vld [vmem:[%s299_s0 + $0x18] sm:$0xf] }
   0x2   :  { %8 = vst [vmem:[#allocation1 + $0x38] sm:$0xf] %v209_v0  ;;  %28 = vst [vmem:[#allocation1 + $0x18] sm:$0xf] %v213_v1  ;;  %v214_v3 = vld [vmem:[%s299_s0 + $0x8] sm:$0xf] }
   0x3   :  { %13 = vst [vmem:[#allocation1 + $0x30] sm:$0xf] %v210_v2  ;;  %33 = vst [vmem:[#allocation1 + $0x10] sm:$0xf] %v214_v3  ;;  %v211_v4 = vld [vmem:[%s299_s0 + $0x14] sm:$0xf] }
   0x4   :  { %v215_v5 = vld [vmem:[%s299_s0 + $0x4] sm:$0xf]  ;;  %18 = vst [vmem:[#allocation1 + $0x28] sm:$0xf] %v211_v4  ;;  %v212_v6 = vld [vmem:[%s299_s0 + $0x10] sm:$0xf] }
   0x5   :  { %37 = vst [vmem:[#allocation1 + $0x8] sm:$0xf] %v215_v5  ;;  %v38_v7 = vld [vmem:[%s299_s0] sm:$0xf]  ;;  %23 = vst [vmem:[#allocation1 + $0x20] sm:$0xf] %v212_v6 }
   0x6   :  { %39 = vst [vmem:[#allocation1] sm:$0xf] %v38_v7  ;;  %s231_s0 = smov 60   ;;  %s234_s24 = smov 48   ;;  %vm75_vm4 = vcmask 458144   ;;  %vm85_vm5 = vcmask 425344  }
   0x7   :  { %s235_s25 = smov 44   ;;  %s236_s26 = smov 40   ;;  %vm95_vm6 = vcmask 392544   ;;  %vm105_vm7 = vcmask 359744   ;;  %vm115_vm8 = vcmask 326944   ;;  %vm125_vm9 = vcmask 294144  }
   0x8   :  { %s237_s27 = smov 36   ;;  %s238_s28 = smov 32   ;;  %vm135_vm10 = vcmask 261344   ;;  %vm145_vm11 = vcmask 228544   ;;  %vm155_vm12 = vcmask 195744   ;;  %vm165_vm13 = vcmask 162944  }
   0x9   :  { %v48_v8 = vld [vmem:[#allocation1 + $0x1b] sm:$0x1]   ;;  %v68_v10 = vld [vmem:[#allocation1 + $0x19] sm:$0x1]   ;;  %v58_v13 = vld [vmem:[#allocation1 + $0x1a] sm:$0x1]  }
   0xa   :  { %v50_v9 = vld [vmem:[#allocation1 + $0x3a] sm:$0x2]   ;;  %v70_v12 = vld [vmem:[#allocation1 + $0x38] sm:$0x2]   ;;  %v60_v14 = vld [vmem:[#allocation1 + $0x39] sm:$0x2]  }
   0xb   :  { %v52_v11 = vsel %vm43_vm0, %v50_v9, %v48_v8  ;;  %v72_v15 = vsel %vm43_vm0, %v70_v12, %v68_v10  ;;  %v78_v16 = vld [vmem:[#allocation1 + $0x18] sm:$0x1]   ;;  %v62_v18 = vsel %vm43_vm0, %v60_v14, %v58_v13  ;;  %v88_v20 = vld [vmem:[#allocation1 + $0x13] sm:$0x1]   ;;  %v98_v22 = vld [vmem:[#allocation1 + $0x12] sm:$0x1]  }
   0xc   :  { %53 = vrot.lane.b32.xlu0 %v52_v11, %s231_s0  ;;  %v80_v17 = vld [vmem:[#allocation1 + $0x37] sm:$0x2]   ;;  %73 = vrot.lane.b32.xlu1 %v72_v15, %s232_s22  ;;  %v90_v21 = vld [vmem:[#allocation1 + $0x32] sm:$0x2]   ;;  %v100_v23 = vld [vmem:[#allocation1 + $0x31] sm:$0x2]  }
   0xd   :  { %v82_v19 = vsel %vm43_vm0, %v80_v17, %v78_v16  ;;  %v92_v24 = vsel %vm43_vm0, %v90_v21, %v88_v20  ;;  %v102_v25 = vsel %vm43_vm0, %v100_v23, %v98_v22  ;;  %v108_v26 = vld [vmem:[#allocation1 + $0x11] sm:$0x1]   ;;  %v118_v28 = vld [vmem:[#allocation1 + $0x10] sm:$0x1]   ;;  %v40_v30 = vld [vmem:[#allocation1] sm:$0x1]  }
   0xe   :  { %v110_v27 = vld [vmem:[#allocation1 + $0x30] sm:$0x2]   ;;  %v120_v29 = vld [vmem:[#allocation1 + $0x2f] sm:$0x2]   ;;  %v42_v31 = vld [vmem:[#allocation1 + $0x1f] sm:$0x2]  }
   0xf   :  { %v112_v32 = vsel %vm43_vm0, %v110_v27, %v108_v26  ;;  %v44_v33 = vsel %vm43_vm0, %v42_v31, %v40_v30  ;;  %v122_v34 = vsel %vm43_vm0, %v120_v29, %v118_v28  ;;  %v128_v35 = vld [vmem:[#allocation1 + $0xb] sm:$0x1]   ;;  %v138_v37 = vld [vmem:[#allocation1 + $0xa] sm:$0x1]   ;;  %v148_v41 = vld [vmem:[#allocation1 + $0x9] sm:$0x1]  }
  0x10   :  { %63 = vrot.lane.b32.xlu0 %v62_v18, %s233_s23  ;;  %83 = vrot.lane.b32.xlu1 %v82_v19, %s234_s24  ;;  %v130_v36 = vld [vmem:[#allocation1 + $0x2a] sm:$0x2]   ;;  %46 = vst.msk [vmem:[#allocation0] sm:$0x3] %vm45_vm1, %v44_v33   ;;  %v140_v38 = vld [vmem:[#allocation1 + $0x29] sm:$0x2]  }
  0x11   :  { %v132_v39 = vsel %vm43_vm0, %v130_v36, %v128_v35  ;;  %v142_v40 = vsel %vm43_vm0, %v140_v38, %v138_v37  ;;  %v150_v42 = vld [vmem:[#allocation1 + $0x28] sm:$0x2]   ;;  %v158_v43 = vld [vmem:[#allocation1 + $0x8] sm:$0x1]   ;;  %s239_s29 = smov 28   ;;  %s240_s30 = smov 24  }
  0x12   :  { %v160_v44 = vld [vmem:[#allocation1 + $0x27] sm:$0x2]   ;;  %v152_v45 = vsel %vm43_vm0, %v150_v42, %v148_v41  ;;  %v168_v47 = vld [vmem:[#allocation1 + $0x3] sm:$0x1]   ;;  %v178_v49 = vld [vmem:[#allocation1 + $0x2] sm:$0x1]  }
  0x13   :  { %v162_v46 = vsel %vm43_vm0, %v160_v44, %v158_v43  ;;  %v170_v48 = vld [vmem:[#allocation1 + $0x22] sm:$0x2]   ;;  %v180_v50 = vld [vmem:[#allocation1 + $0x21] sm:$0x2]   ;;  %s241_s2 = smov 20   ;;  %s242_s3 = smov 16  }
  0x14   :  { %93 = vrot.lane.b32.xlu0 %v92_v24, %s235_s25  ;;  %103 = vrot.lane.b32.xlu1 %v102_v25, %s236_s26  ;;  %v172_v51 = vsel %vm43_vm0, %v170_v48, %v168_v47  ;;  %v182_v52 = vsel %vm43_vm0, %v180_v50, %v178_v49  ;;  %v188_v53 = vld [vmem:[#allocation1 + $0x1] sm:$0x1]   ;;  %s243_s4 = smov 12   ;;  %s244_s5 = smov 8   ;;  %vm175_vm14 = vcmask 130144   ;;  %vm185_vm15 = vcmask 97344  }
  0x15   :  { %v190_v54 = vld [vmem:[#allocation1 + $0x20] sm:$0x2]   ;;  %s245_s6 = smov 4  }
  0x16   :  { %v192_v55 = vsel %vm43_vm0, %v190_v54, %v188_v53  ;;  %vm195_vm0 = vcmask 64544  }
  0x18   :  { %113 = vrot.lane.b32.xlu0 %v112_v32, %s237_s27  ;;  %123 = vrot.lane.b32.xlu1 %v122_v34, %s238_s28 }
  0x1c   :  { %133 = vrot.lane.b32.xlu0 %v132_v39, %s239_s29  ;;  %143 = vrot.lane.b32.xlu1 %v142_v40, %s240_s30 }
  0x20   :  { %153 = vrot.lane.b32.xlu0 %v152_v45, %s241_s2  ;;  %163 = vrot.lane.b32.xlu1 %v162_v46, %s242_s3 }
  0x24   :  { %173 = vrot.lane.b32.xlu0 %v172_v51, %s243_s4  ;;  %183 = vrot.lane.b32.xlu1 %v182_v52, %s244_s5 }
  0x28   :  { %193 = vrot.lane.b32.xlu0 %v192_v55, %s245_s6 }
  0x7e   :  { %v54_v56 = vpop.permute.xlu0 %53   ;;  %v74_v57 = vpop.permute.xlu1 %73  }
  0x7f   :  { %56 = vst.msk [vmem:[#allocation0] sm:$0x3] %vm55_vm2, %v54_v56  }
  0x82   :  { %v64_v58 = vpop.permute.xlu0 %63   ;;  %v84_v59 = vpop.permute.xlu1 %83  }
  0x83   :  { %66 = vst.msk [vmem:[#allocation0] sm:$0x3] %vm65_vm3, %v64_v58  }
  0x84   :  { %76 = vst.msk [vmem:[#allocation0] sm:$0x3] %vm75_vm4, %v74_v57  }
  0x85   :  { %86 = vst.msk [vmem:[#allocation0] sm:$0x3] %vm85_vm5, %v84_v59  }
  0x86   :  { %v94_v60 = vpop.permute.xlu0 %93   ;;  %v104_v61 = vpop.permute.xlu1 %103  }
  0x87   :  { %96 = vst.msk [vmem:[#allocation0] sm:$0x3] %vm95_vm6, %v94_v60  }
  0x88   :  { %106 = vst.msk [vmem:[#allocation0] sm:$0x3] %vm105_vm7, %v104_v61  }
  0x8a   :  { %v114_v62 = vpop.permute.xlu0 %113   ;;  %v124_v63 = vpop.permute.xlu1 %123  }
  0x8b   :  { %116 = vst.msk [vmem:[#allocation0] sm:$0x3] %vm115_vm8, %v114_v62  }
  0x8c   :  { %126 = vst.msk [vmem:[#allocation0] sm:$0x3] %vm125_vm9, %v124_v63  }
  0x8e   :  { %v134_v0 = vpop.permute.xlu0 %133   ;;  %v144_v1 = vpop.permute.xlu1 %143  }
  0x8f   :  { %136 = vst.msk [vmem:[#allocation0] sm:$0x3] %vm135_vm10, %v134_v0  }
  0x90   :  { %146 = vst.msk [vmem:[#allocation0] sm:$0x3] %vm145_vm11, %v144_v1  }
  0x92   :  { %v154_v2 = vpop.permute.xlu0 %153   ;;  %v164_v3 = vpop.permute.xlu1 %163  }
  0x93   :  { %156 = vst.msk [vmem:[#allocation0] sm:$0x3] %vm155_vm12, %v154_v2  }
  0x94   :  { %166 = vst.msk [vmem:[#allocation0] sm:$0x3] %vm165_vm13, %v164_v3  }
  0x96   :  { %v174_v4 = vpop.permute.xlu0 %173   ;;  %v184_v5 = vpop.permute.xlu1 %183  }
  0x97   :  { %176 = vst.msk [vmem:[#allocation0] sm:$0x3] %vm175_vm14, %v174_v4  }
  0x98   :  { %186 = vst.msk [vmem:[#allocation0] sm:$0x3] %vm185_vm15, %v184_v5  }
  0x9a   :  { %v194_v6 = vpop.permute.xlu0 %193  }
  0x9b   :  { %196 = vst.msk [vmem:[#allocation0] sm:$0x3] %vm195_vm0, %v194_v6  }
  0xa2   :  { %v200_v7 = vld [vmem:[#allocation0] sm:$0x3] }
  0xa3   :  { %202 = vst [vmem:[%s300_s1] sm:$0x3] %v200_v7 }

// kernel: fused_forward.1
= control target key start
LH: loop header
LB: loop body
LE: loop exit
PB: predicated region body
PF: predicated region fallthrough
CT: control target
= control target key end

     0   :  { %vm47_vm0 = vcmask 654336   ;;  %v1110_v0 = vlaneseq  ;;  %v34311_v1 = vmov 0.0|0.0   ;;  %v34312_v4 = vmov 1983009808   ;;  %s34315_s24 = smov 48   ;;  %s34316_s25 = smov 96   ;;  %s39167_s1 = inlined_call_operand.vmem [shape: bf16[1184,80], index: 1, kind: input, shape index: {}]   ;;  %s39168_s0 = inlined_call_operand.vmem [shape: f32[2,645], index: 0, kind: input, shape index: {}]   ;;  %s39169_s2 = inlined_call_operand.vmem [shape: f32[32,80], index: 2, kind: input, shape index: {}]   ;;  %s39170_s3 = inlined_call_operand.vmem [shape: f32[2,1], index: 3, kind: output, shape index: {}]  }
   0x1   :  { %32457 = vmatprep.subr.bf16.mxu0 %v34311_v1  ;;  %v34362_v2 = vld [vmem:[%s39167_s1] sm:$0xff]   ;;  %v34367_v3 = vld [vmem:[%s39167_s1 + $0x8] sm:$0xff]   ;;  %v1108_v5 = vunpack.c.l.s4 %v34312_v4  ;;  %32547 = vmatprep.subr.bf16.mxu1 %v34311_v1  ;;  %vm34313_vm1 = vmmov 0   ;;  %v39187_v11 = vmov 0.0   ;;  %v34388_v15 = vld [vmem:[%s39167_s1 + $0x10] sm:$0xff]   ;;  %s34317_s9 = smov 16  }
   0x2   :  { %v27302_v6 = vunpack.c.l.bf16 %v34362_v2  ;;  %v27303_v7 = vunpack.c.h.bf16 %v34362_v2  ;;  %32459 = vmatpush3.bf16.msra.mxu0 %v34362_v2  ;;  %v27306_v8 = vunpack.c.l.bf16 %v34367_v3  ;;  %v27307_v9 = vunpack.c.h.bf16 %v34367_v3  ;;  %v34378_v10 = vld [vmem:[%s39168_s0] sm:$0xff]  ;;  %29171 = vmatprep.mubr.msk.f32.mxu0 %vm34313_vm1, %v39187_v11  ;;  %v34416_v26 = vld [vmem:[%s39167_s1 + $0x18] sm:$0xff]   ;;  %s34318_s30 = smov 64   ;;  %s34319_s17 = smov 112  }
   0x3   :  { %32460 = vmatprep.subr.bf16.mxu0 %v34311_v1  ;;  %v1109_v12 = vunpack.c.0.s8 %v1108_v5  ;;  %v1111_v13 = vshrl.u32 %v1110_v0, 7  ;;  %v49_v14 = vsel %vm47_vm0, %v34378_v10, 0  ;;  %29309 = vmatprep.mubr.msk.f32.mxu1 %vm34313_vm1, %v39187_v11  ;;  %v27310_v17 = vunpack.c.l.bf16 %v34388_v15  ;;  %v34428_v32 = vld [vmem:[%s39167_s1 + $0x20] sm:$0xff]   ;;  %s34320_s16 = smov 32   ;;  %s34321_s29 = smov 80  }
   0x4   :  { %v34392_v16 = vsub.f32 %v27302_v6, %v27302_v6  ;;  %v34395_v18 = vsub.f32 %v27303_v7, %v27303_v7  ;;  %v34399_v20 = vand.u32 4294901760, %v49_v14  ;;  %v27311_v21 = vunpack.c.h.bf16 %v34388_v15  ;;  %s34323_s6 = smov 10   ;;  %s34324_s7 = smov 7  }
   0x5   :  { %v34397_v19 = vsub.s32 %v1109_v12, %v1111_v13  ;;  %v34403_v22 = vsub.f32 %v27306_v8, %v27306_v8  ;;  %v34405_v23 = vsub.f32 %v27307_v9, %v27307_v9  ;;  %v34419_v28 = vsub.f32 %v27310_v17, %v27310_v17  ;;  %s34325_s8 = smov 4   ;;  %s34326_s10 = smov 1  }
   0x6   :  { %32462 = vmatpush3.bf16.msra.mxu0 %v34367_v3  ;;  %v34411_v25 = vsub.f32 %v49_v14, %v34399_v20  ;;  %v128_v27 = vand.u32 4294901760, %v34392_v16  ;;  %v34421_v29 = vsub.f32 %v27311_v21, %v27311_v21  ;;  %v27314_v30 = vunpack.c.l.bf16 %v34416_v26  ;;  %s34327_s18 = smov 103   ;;  %s34328_s19 = smov 123  }
   0x7   :  { %32463 = vmatprep.subr.bf16.mxu0 %v34311_v1  ;;  %v1113_v24 = vrot.slane %v34378_v10, %v34397_v19  ;;  %v27315_v31 = vunpack.c.h.bf16 %v34416_v26  ;;  %v27318_v34 = vunpack.c.l.bf16 %v34428_v32  ;;  %v134_v36 = vand.u32 4294901760, %v34395_v18  ;;  %s34329_s20 = smov 98   ;;  %s34330_s21 = smov 118  }
   0x8   :  { %v118_v35 = vand.u32 4294901760, %v34411_v25  ;;  %v27319_v37 = vunpack.c.h.bf16 %v34428_v32  ;;  %v129_v38 = vsub.f32 %v34392_v16, %v128_v27  ;;  %v140_v39 = vand.u32 4294901760, %v34403_v22  ;;  %s34333_s26 = smov 108   ;;  %s34334_s27 = smov 126  }
   0x9   :  { %1115 = vrot.lane.b32.xlu0 %v1113_v24, %s34315_s24  ;;  %v34430_v33 = vcombine.high %v1113_v24, %v1113_v24  ;;  %v146_v40 = vand.u32 4294901760, %v34405_v23  ;;  %v135_v41 = vsub.f32 %v34395_v18, %v134_v36  ;;  %v34443_v42 = vsub.f32 %v27314_v30, %v27314_v30  ;;  %s34335_s28 = smov 104   ;;  %s34336_s4 = smov 8  }
   0xa   :  { %32465 = vmatpush3.bf16.msra.mxu0 %v34388_v15  ;;  %v152_v43 = vand.u32 4294901760, %v34419_v28  ;;  %v158_v44 = vand.u32 4294901760, %v34421_v29  ;;  %v34448_v45 = vsub.f32 %v27315_v31, %v27315_v31  ;;  %v119_v46 = vsub.f32 %v34411_v25, %v118_v35 }
   0xb   :  { %32466 = vmatprep.subr.bf16.mxu0 %v34311_v1  ;;  %2179 = vrot.lane.b32.xlu1 %v34430_v33, %s34316_s25  ;;  %v141_v47 = vsub.f32 %v34403_v22, %v140_v39  ;;  %v147_v48 = vsub.f32 %v34405_v23, %v146_v40  ;;  %v34456_v49 = vsub.f32 %v27318_v34, %v27318_v34  ;;  %v130_v51 = vand.u32 4294901760, %v129_v38  ;;  %s34332_s25 = smov 120  }
   0xc   :  { %v181_v50 = vsub.f32 %v27319_v37, %v27319_v37  ;;  %v136_v52 = vand.u32 4294901760, %v135_v41  ;;  %v153_v53 = vsub.f32 %v34419_v28, %v152_v43  ;;  %v159_v54 = vsub.f32 %v34421_v29, %v158_v44 }
   0xd   :  { %1117 = vrot.lane.b32.xlu0 %v34430_v33, %s34315_s24  ;;  %v164_v55 = vand.u32 4294901760, %v34443_v42  ;;  %v120_v56 = vand.u32 4294901760, %v119_v46  ;;  %v142_v57 = vand.u32 4294901760, %v141_v47  ;;  %v148_v58 = vand.u32 4294901760, %v147_v48  ;;  %s34331_s24 = smov 113  }
   0xe   :  { %32468 = vmatpush3.bf16.msra.mxu0 %v34416_v26  ;;  %v170_v59 = vand.u32 4294901760, %v34448_v45  ;;  %v32473_v60 = vpack.c.bf16 %v136_v52, %v130_v51  ;;  %v176_v61 = vand.u32 4294901760, %v34456_v49  ;;  %v182_v62 = vand.u32 4294901760, %v181_v50  ;;  %v34546_v51 = vld [vmem:[%s39167_s1 + $0x40] sm:$0xff]  }
   0xf   :  { %32469 = vmatprep.subr.bf16.mxu0 %v34311_v1  ;;  %v34465_v63 = vpack.c.bf16 %v134_v36, %v128_v27  ;;  %v34468_v0 = vpack.c.bf16 %v146_v40, %v140_v39  ;;  %v34470_v4 = vpack.c.bf16 %v158_v44, %v152_v43  ;;  %v165_v7 = vsub.f32 %v34443_v42, %v164_v55  ;;  %v34531_v44 = vld [vmem:[%s39167_s1 + $0x38] sm:$0xff]  }
  0x10   :  { %v34472_v5 = vpack.c.bf16 %v170_v59, %v164_v55  ;;  %v34474_v6 = vpack.c.bf16 %v182_v62, %v176_v61  ;;  %v32476_v8 = vpack.c.bf16 %v148_v58, %v142_v57  ;;  %v154_v9 = vand.u32 4294901760, %v153_v53  ;;  %3247 = vrot.lane.b32.xlu1 %v34430_v33, %s34317_s9 }
  0x11   :  { %v160_v12 = vand.u32 4294901760, %v159_v54  ;;  %v171_v13 = vsub.f32 %v34448_v45, %v170_v59  ;;  %v166_v14 = vand.u32 4294901760, %v165_v7  ;;  %v177_v24 = vsub.f32 %v34456_v49, %v176_v61  ;;  %v34567_v59 = vld [vmem:[%s39167_s1 + $0x48] sm:$0xff]  }
  0x12   :  { %32471 = vmatpush3.bf16.msra.mxu0 %v34428_v32  ;;  %v183_v27 = vsub.f32 %v181_v50, %v182_v62  ;;  %v32488_v37 = vpack.c.bf16 %v34395_v18, %v34392_v16  ;;  %v32491_v38 = vpack.c.bf16 %v34405_v23, %v34403_v22  ;;  %v32494_v39 = vpack.c.bf16 %v34421_v29, %v34419_v28  ;;  %v34507_v22 = vld [vmem:[%s39167_s1 + $0x28] sm:$0xff]   ;;  %v34518_v29 = vld [vmem:[%s39167_s1 + $0x30] sm:$0xff]  }
  0x13   :  { %32472 = vmatprep.subr.bf16.mxu0 %v34311_v1  ;;  %v32479_v17 = vpack.c.bf16 %v160_v12, %v154_v9  ;;  %v172_v21 = vand.u32 4294901760, %v171_v13  ;;  %v178_v31 = vand.u32 4294901760, %v177_v24  ;;  %v32497_v16 = vpack.c.bf16 %v34448_v45, %v34443_v42 }
  0x14   :  { %v184_v34 = vand.u32 4294901760, %v183_v27  ;;  %v32500_v18 = vpack.c.bf16 %v181_v50, %v34456_v49  ;;  %v27342_v23 = vunpack.c.l.bf16 %v34507_v22  ;;  %v27343_v28 = vunpack.c.h.bf16 %v34507_v22 }
  0x15   :  { %29172 = vmatmul.mubr.f32.vlgmr.msra.gmra.mrb[0].mxu0 %v120_v56  ;;  %v32482_v30 = vpack.c.bf16 %v172_v21, %v166_v14  ;;  %v27346_v40 = vunpack.c.l.bf16 %v34518_v29  ;;  %v27347_v41 = vunpack.c.h.bf16 %v34518_v29  ;;  %v27350_v45 = vunpack.c.l.bf16 %v34531_v44 }
  0x16   :  { %32474 = vmatpush3.bf16.msra.mxu0 %v32473_v60  ;;  %29194 = vmatprep.mubr.msk.f32.mxu0 %vm34313_vm1, %v39187_v11  ;;  %v32485_v36 = vpack.c.bf16 %v184_v34, %v178_v31  ;;  %v34523_v42 = vsub.f32 %v27342_v23, %v27342_v23  ;;  %v34525_v43 = vsub.f32 %v27343_v28, %v27343_v28  ;;  %v27351_v48 = vunpack.c.h.bf16 %v34531_v44 }
  0x17   :  { %32475 = vmatprep.subr.bf16.mxu0 %v34311_v1  ;;  %v34534_v46 = vsub.f32 %v27346_v40, %v27346_v40  ;;  %v34536_v47 = vsub.f32 %v27347_v41, %v27347_v41  ;;  %v34548_v52 = vsub.f32 %v27350_v45, %v27350_v45  ;;  %v27354_v53 = vunpack.c.l.bf16 %v34546_v51 }
  0x18   :  { %v1200_v49 = vand.u32 4294901760, %v34523_v42  ;;  %v1206_v50 = vand.u32 4294901760, %v34525_v43  ;;  %v34557_v55 = vsub.f32 %v27351_v48, %v27351_v48  ;;  %v27355_v56 = vunpack.c.h.bf16 %v34546_v51 }
  0x19   :  { %v1212_v57 = vand.u32 4294901760, %v34534_v46  ;;  %v1218_v58 = vand.u32 4294901760, %v34536_v47  ;;  %v34575_v61 = vsub.f32 %v27354_v53, %v27354_v53  ;;  %v27358_v62 = vunpack.c.l.bf16 %v34567_v59 }
  0x1a   :  { %32477 = vmatpush3.bf16.msra.mxu0 %v32476_v8  ;;  %v34555_v54 = vpack.c.bf16 %v1206_v50, %v1200_v49  ;;  %v34578_v7 = vsub.f32 %v27355_v56, %v27355_v56  ;;  %v27359_v8 = vunpack.c.h.bf16 %v34567_v59  ;;  %v1224_v9 = vand.u32 4294901760, %v34548_v52 }
  0x1b   :  { %32478 = vmatprep.subr.bf16.mxu0 %v34311_v1  ;;  %v34573_v60 = vpack.c.bf16 %v1218_v58, %v1212_v57  ;;  %v1230_v12 = vand.u32 4294901760, %v34557_v55  ;;  %v34593_v14 = vsub.f32 %v27358_v62, %v27358_v62  ;;  %v1236_v21 = vand.u32 4294901760, %v34575_v61 }
  0x1c   :  { %v1242_v24 = vand.u32 4294901760, %v34578_v7  ;;  %vm1119_vm2 = vcmask 392192   ;;  %v1207_v33 = vsub.f32 %v34525_v43, %v1206_v50  ;;  %v1219_v31 = vsub.f32 %v34536_v47, %v1218_v58 }
  0x1d   :  { %v34589_v13 = vpack.c.bf16 %v1230_v12, %v1224_v9  ;;  %v1237_v23 = vsub.f32 %v34575_v61, %v1236_v21  ;;  %vm3251_vm3 = vcmask 130048   ;;  %vm4316_vm4 = vcmask 523264  }
  0x1e   :  { %32480 = vmatpush3.bf16.msra.mxu0 %v32479_v17  ;;  %v34595_v17 = vsub.f32 %v27359_v8, %v27359_v8  ;;  %v1243_v45 = vsub.f32 %v34578_v7, %v1242_v24  ;;  %vm6448_vm5 = vcmask 261120   ;;  %vm8007_vm6 = vcmask 1042432  }
  0x1f   :  { %32481 = vmatprep.subr.bf16.mxu0 %v34311_v1  ;;  %v1238_v48 = vand.u32 4294901760, %v1237_v23  ;;  %vm8004_vm7 = vcmask 23552   ;;  %vm8461_vm8 = vcmask 1044480   ;;  %vm8457_vm9 = vcmask 39936  }
  0x20   :  { %v1254_v27 = vand.u32 4294901760, %v34595_v17  ;;  %v1244_v50 = vand.u32 4294901760, %v1243_v45  ;;  %vm12525_vm10 = vcmask 7168   ;;  %vm14327_vm11 = vcmask 64512  }
  0x21   :  { %vm27248_vm12 = vcmask 517120   ;;  %vm27239_vm13 = vcmask 58368   ;;  %vm27259_vm14 = vcmask 1024  }
  0x22   :  { %32483 = vmatpush3.bf16.msra.mxu0 %v32482_v30  ;;  %v1208_v30 = vand.u32 4294901760, %v1207_v33  ;;  %v1255_v56 = vsub.f32 %v34595_v17, %v1254_v27 }
  0x23   :  { %32484 = vmatprep.subr.bf16.mxu0 %v34311_v1 }
  0x24   :  { %v1256_v62 = vand.u32 4294901760, %v1255_v56  ;;  %v34852_v56 = vld [vmem:[%s39167_s1 + $0x148] sm:$0xff]  }
  0x26   :  { %32486 = vmatpush3.bf16.msra.mxu0 %v32485_v36 }
  0x27   :  { %32487 = vmatprep.subr.bf16.mxu0 %v34311_v1 }
  0x29   :  { %29195 = vmatmul.mubr.f32.vlgmr.msra.gmra.mrb[0].mxu0 %v34399_v20 }
  0x2a   :  { %32489 = vmatpush3.bf16.msra.mxu0 %v32488_v37  ;;  %29217 = vmatprep.mubr.msk.f32.mxu0 %vm34313_vm1, %v39187_v11  ;;  %v1225_v37 = vsub.f32 %v34548_v52, %v1224_v9  ;;  %v32668_v9 = vpack.c.bf16 %v34525_v43, %v34523_v42  ;;  %v32680_v43 = vpack.c.bf16 %v34595_v17, %v34593_v14 }
  0x2b   :  { %32490 = vmatprep.subr.bf16.mxu0 %v34311_v1 }
  0x2c   :  { %v1226_v40 = vand.u32 4294901760, %v1225_v37  ;;  %v34795_v37 = vld [vmem:[%s39167_s1 + $0x70] sm:$0xff]  }
  0x2d   :  { %v27398_v23 = vunpack.c.l.bf16 %v34795_v37 }
  0x2e   :  { %32492 = vmatpush3.bf16.msra.mxu0 %v32491_v38 }
  0x2f   :  { %32493 = vmatprep.subr.bf16.mxu0 %v34311_v1  ;;  %v34825_v45 = vsub.f32 %v27398_v23, %v27398_v23 }
  0x32   :  { %32495 = vmatpush3.bf16.msra.mxu0 %v32494_v39 }
  0x33   :  { %32496 = vmatprep.subr.bf16.mxu0 %v34311_v1 }
  0x36   :  { %32498 = vmatpush3.bf16.msra.mxu0 %v32497_v16  ;;  %v1220_v16 = vand.u32 4294901760, %v1219_v31 }
  0x37   :  { %32499 = vmatprep.subr.bf16.mxu0 %v34311_v1 }
  0x3a   :  { %32501 = vmatpush3.bf16.msra.mxu0 %v32500_v18  ;;  %v1231_v18 = vsub.f32 %v34557_v55, %v1230_v12  ;;  %v32671_v12 = vpack.c.bf16 %v34536_v47, %v34534_v46 }
  0x3b   :  { %32502 = vmatprep.subr.bf16.mxu0 %v34311_v1 }
  0x3c   :  { %v1232_v41 = vand.u32 4294901760, %v1231_v18 }
  0x3d   :  { %29218 = vmatmul.mubr.f32.vlgmr.msra.gmra.mrb[0].mxu0 %v34411_v25  ;;  %v34607_v25 = vpack.c.bf16 %v1242_v24, %v1236_v21  ;;  %v32674_v21 = vpack.c.bf16 %v34557_v55, %v34548_v52  ;;  %v34740_v55 = vld [vmem:[%s39167_s1 + $0x58] sm:$0xff]   ;;  %v34753_v24 = vld [vmem:[%s39167_s1 + $0x60] sm:$0xff]  }
  0x3e   :  { %32504 = vmatpush3.bf16.msra.mxu0 %v34362_v2  ;;  %29240 = vmatprep.mubr.msk.f32.mxu0 %vm34313_vm1, %v39187_v11 }
  0x3f   :  { %32505 = vmatprep.subr.bf16.mxu0 %v34311_v1 }
  0x42   :  { %32507 = vmatpush3.bf16.msra.mxu0 %v34367_v3 }
  0x43   :  { %32508 = vmatprep.subr.bf16.mxu0 %v34311_v1 }
  0x46   :  { %32510 = vmatpush3.bf16.msra.mxu0 %v34388_v15 }
  0x47   :  { %32511 = vmatprep.subr.bf16.mxu0 %v34311_v1 }
  0x4a   :  { %32513 = vmatpush3.bf16.msra.mxu0 %v34416_v26 }
  0x4b   :  { %32514 = vmatprep.subr.bf16.mxu0 %v34311_v1 }
  0x4e   :  { %32516 = vmatpush3.bf16.msra.mxu0 %v34428_v32 }
  0x4f   :  { %32517 = vmatprep.subr.bf16.mxu0 %v34311_v1 }
  0x51   :  { %29241 = vmatmul.mubr.f32.vlgmr.msra.gmra.mrb[0].mxu0 %v118_v35  ;;  %v1248_v35 = vand.u32 4294901760, %v34593_v14 }
  0x52   :  { %32519 = vmatpush3.bf16.msra.mxu0 %v34465_v63  ;;  %29263 = vmatprep.mubr.msk.f32.mxu0 %vm34313_vm1, %v39187_v11 }
  0x53   :  { %32520 = vmatprep.subr.bf16.mxu0 %v34311_v1  ;;  %v34617_v63 = vpack.c.bf16 %v1254_v27, %v1248_v35  ;;  %v1249_v53 = vsub.f32 %v34593_v14, %v1248_v35 }
  0x55   :  { %v1250_v58 = vand.u32 4294901760, %v1249_v53 }
  0x56   :  { %32522 = vmatpush3.bf16.msra.mxu0 %v34468_v0 }
  0x57   :  { %32523 = vmatprep.subr.bf16.mxu0 %v34311_v1  ;;  %v32665_v8 = vpack.c.bf16 %v1256_v62, %v1250_v58  ;;  %v34875_v58 = vld [vmem:[%s39167_s1 + $0x158] sm:$0xff]  }
  0x5a   :  { %32525 = vmatpush3.bf16.msra.mxu0 %v34470_v4  ;;  %v1213_v4 = vsub.f32 %v34534_v46, %v1212_v57  ;;  %v32662_v57 = vpack.c.bf16 %v1244_v50, %v1238_v48  ;;  %v34729_v46 = vld [vmem:[%s39167_s1 + $0x50] sm:$0xff]  }
  0x5b   :  { %32526 = vmatprep.subr.bf16.mxu0 %v34311_v1  ;;  %v27382_v47 = vunpack.c.l.bf16 %v34729_v46  ;;  %v27383_v52 = vunpack.c.h.bf16 %v34729_v46 }
  0x5c   :  { %v1214_v36 = vand.u32 4294901760, %v1213_v4  ;;  %v34778_v4 = vld [vmem:[%s39167_s1 + $0x68] sm:$0xff]  }
  0x5d   :  { %v34745_v14 = vsub.f32 %v27382_v47, %v27382_v47  ;;  %v34747_v17 = vsub.f32 %v27383_v52, %v27383_v52  ;;  %v27394_v31 = vunpack.c.l.bf16 %v34778_v4 }
  0x5e   :  { %32528 = vmatpush3.bf16.msra.mxu0 %v34472_v5  ;;  %v32656_v28 = vpack.c.bf16 %v1220_v16, %v1214_v36 }
  0x5f   :  { %32529 = vmatprep.subr.bf16.mxu0 %v34311_v1  ;;  %v34800_v16 = vsub.f32 %v27394_v31, %v27394_v31 }
  0x62   :  { %32531 = vmatpush3.bf16.msra.mxu0 %v34474_v6 }
  0x63   :  { %32532 = vmatprep.subr.bf16.mxu0 %v34311_v1 }
  0x65   :  { %29264 = vmatmul.mubr.f32.vlgmr.msra.gmra.mrb[0].mxu0 %v34399_v20 }
  0x66   :  { %32534 = vmatpush3.bf16.msra.mxu0 %v34362_v2  ;;  %29286 = vmatprep.mubr.msk.f32.mxu0 %vm34313_vm1, %v39187_v11  ;;  %v3239_v2 = vcombine.high %v34378_v10, %v34378_v10 }
  0x67   :  { %32535 = vmatprep.subr.bf16.mxu0 %v34311_v1 }
  0x6a   :  { %32537 = vmatpush3.bf16.msra.mxu0 %v34367_v3  ;;  %v34642_v3 = vrot.slane %v3239_v2, %v34397_v19  ;;  %v27390_v2 = vunpack.c.l.bf16 %v34753_v24 }
  0x6b   :  { %32538 = vmatprep.subr.bf16.mxu0 %v34311_v1 }
  0x6c   :  { %3249 = vrot.lane.b32.xlu0 %v34642_v3, %s34317_s9  ;;  %4312 = vrot.lane.b32.xlu1 %v34642_v3, %s34318_s30 }
  0x6e   :  { %32540 = vmatpush3.bf16.msra.mxu0 %v34388_v15 }
  0x6f   :  { %32541 = vmatprep.subr.bf16.mxu0 %v34311_v1 }
  0x72   :  { %32543 = vmatpush3.bf16.msra.mxu0 %v34416_v26 }
  0x73   :  { %32544 = vmatprep.subr.bf16.mxu0 %v34311_v1 }
  0x76   :  { %32546 = vmatpush3.bf16.msra.mxu0 %v34428_v32  ;;  %v1201_v32 = vsub.f32 %v34523_v42, %v1200_v49  ;;  %v32659_v49 = vpack.c.bf16 %v1232_v41, %v1226_v40  ;;  %v32677_v42 = vpack.c.bf16 %v34578_v7, %v34575_v61  ;;  %v27386_v61 = vunpack.c.l.bf16 %v34740_v55  ;;  %v34809_v40 = vld [vmem:[%s39167_s1 + $0x138] sm:$0xff]  }
  0x77   :  { %32637 = vmatprep.subr.bf16.mxu0 %v34311_v1  ;;  %v27387_v7 = vunpack.c.h.bf16 %v34740_v55  ;;  %32549 = vmatpush3.bf16.msra.mxu1 %v34809_v40 }
  0x78   :  { %v1202_v6 = vand.u32 4294901760, %v1201_v32  ;;  %v34755_v35 = vsub.f32 %v27386_v61, %v27386_v61  ;;  %v34771_v32 = vsub.f32 %v27390_v2, %v27390_v2  ;;  %32550 = vmatprep.subr.bf16.mxu1 %v34311_v1 }
  0x79   :  { %29287 = vmatmul.mubr.f32.vlgmr.msra.gmra.mrb[0].mxu0 %v34399_v20  ;;  %v34757_v27 = vsub.f32 %v27387_v7, %v27387_v7 }
  0x7a   :  { %32639 = vmatpush3.bf16.msra.mxu0 %v34507_v22  ;;  %29447 = vmatprep.mubr.msk.f32.mxu0 %vm34313_vm1, %v39187_v11  ;;  %v32653_v39 = vpack.c.bf16 %v1208_v30, %v1202_v6  ;;  %v2272_v6 = vand.u32 4294901760, %v34755_v35 }
  0x7b   :  { %v1116_v15 = vpop.permute.xlu0 %1115  ;;  %32640 = vmatprep.subr.bf16.mxu0 %v34311_v1  ;;  %v2278_v30 = vand.u32 4294901760, %v34757_v27 }
  0x7c   :  { %v2273_v62 = vsub.f32 %v34755_v35, %v2272_v6 }
  0x7d   :  { %v34790_v36 = vpack.c.bf16 %v2278_v30, %v2272_v6 }
  0x7e   :  { %32642 = vmatpush3.bf16.msra.mxu0 %v34518_v29 }
  0x7f   :  { %v1118_v10 = vpop.permute.xlu0 %1117  ;;  %32643 = vmatprep.subr.bf16.mxu0 %v34311_v1 }
  0x80   :  { %v1120_v19 = vsel %vm1119_vm2, %v1116_v15, %v1118_v10  ;;  %v27391_v15 = vunpack.c.h.bf16 %v34753_v24  ;;  %v2260_v10 = vand.u32 4294901760, %v34745_v14 }
  0x81   :  { %v1121_v20 = vsel %vm47_vm0, %v1120_v19, 0  ;;  %v2266_v19 = vand.u32 4294901760, %v34747_v17 }
  0x82   :  { %v34655_v26 = vand.u32 4294901760, %v1121_v20  ;;  %32645 = vmatpush3.bf16.msra.mxu0 %v34531_v44  ;;  %v34773_v33 = vsub.f32 %v27391_v15, %v27391_v15 }
  0x83   :  { %32646 = vmatprep.subr.bf16.mxu0 %v34311_v1 }
  0x84   :  { %v34666_v0 = vsub.f32 %v1121_v20, %v34655_v26  ;;  %v34769_v20 = vpack.c.bf16 %v2266_v19, %v2260_v10 }
  0x86   :  { %v1190_v5 = vand.u32 4294901760, %v34666_v0  ;;  %32648 = vmatpush3.bf16.msra.mxu0 %v34546_v51 }
  0x87   :  { %32649 = vmatprep.subr.bf16.mxu0 %v34311_v1 }
  0x88   :  { %v1191_v34 = vsub.f32 %v34666_v0, %v1190_v5 }
  0x8a   :  { %32651 = vmatpush3.bf16.msra.mxu0 %v34567_v59  ;;  %v1192_v38 = vand.u32 4294901760, %v1191_v34  ;;  %v27395_v34 = vunpack.c.h.bf16 %v34778_v4 }
  0x8b   :  { %32652 = vmatprep.subr.bf16.mxu0 %v34311_v1 }
  0x8c   :  { %v34802_v18 = vsub.f32 %v27395_v34, %v27395_v34 }
  0x8d   :  { %29448 = vmatmul.mubr.f32.vlgmr.msra.gmra.mrb[2].mxu0 %v1192_v38  ;;  %v2284_v38 = vand.u32 4294901760, %v34771_v32 }
  0x8e   :  { %32654 = vmatpush3.bf16.msra.mxu0 %v32653_v39  ;;  %29470 = vmatprep.mubr.msk.f32.mxu0 %vm34313_vm1, %v39187_v11  ;;  %v2290_v39 = vand.u32 4294901760, %v34773_v33  ;;  %v2302_v50 = vand.u32 4294901760, %v34802_v18 }
  0x8f   :  { %32655 = vmatprep.subr.bf16.mxu0 %v34311_v1 }
  0x90   :  { %v34817_v41 = vpack.c.bf16 %v2290_v39, %v2284_v38 }
  0x92   :  { %32657 = vmatpush3.bf16.msra.mxu0 %v32656_v28  ;;  %v27399_v28 = vunpack.c.h.bf16 %v34795_v37 }
  0x93   :  { %32658 = vmatprep.subr.bf16.mxu0 %v34311_v1 }
  0x94   :  { %v34827_v48 = vsub.f32 %v27399_v28, %v27399_v28 }
  0x96   :  { %32660 = vmatpush3.bf16.msra.mxu0 %v32659_v49  ;;  %v2296_v49 = vand.u32 4294901760, %v34800_v16  ;;  %v2314_v53 = vand.u32 4294901760, %v34827_v48 }
  0x97   :  { %32661 = vmatprep.subr.bf16.mxu0 %v34311_v1 }
  0x98   :  { %v2297_v15 = vsub.f32 %v34800_v16, %v2296_v49  ;;  %v2315_v34 = vsub.f32 %v34827_v48, %v2314_v53 }
  0x9a   :  { %32663 = vmatpush3.bf16.msra.mxu0 %v32662_v57  ;;  %v2298_v6 = vand.u32 4294901760, %v2297_v15  ;;  %v27338_v15 = vunpack.c.l.bf16 %v34875_v58 }
  0x9b   :  { %32664 = vmatprep.subr.bf16.mxu0 %v34311_v1 }
  0x9e   :  { %32666 = vmatpush3.bf16.msra.mxu0 %v32665_v8  ;;  %v2279_v8 = vsub.f32 %v34757_v27, %v2278_v30 }
  0x9f   :  { %32667 = vmatprep.subr.bf16.mxu0 %v34311_v1 }
  0xa0   :  { %v2280_v47 = vand.u32 4294901760, %v2279_v8 }
  0xa1   :  { %29471 = vmatmul.mubr.f32.vlgmr.msra.gmra.mrb[2].mxu0 %v34655_v26 }
  0xa2   :  { %32669 = vmatpush3.bf16.msra.mxu0 %v32668_v9  ;;  %29493 = vmatprep.mubr.msk.f32.mxu0 %vm34313_vm1, %v39187_v11 }
  0xa3   :  { %32670 = vmatprep.subr.bf16.mxu0 %v34311_v1 }
  0xa6   :  { %32672 = vmatpush3.bf16.msra.mxu0 %v32671_v12  ;;  %v2285_v12 = vsub.f32 %v34771_v32, %v2284_v38  ;;  %v27322_v38 = vunpack.c.l.bf16 %v34809_v40 }
  0xa7   :  { %32673 = vmatprep.subr.bf16.mxu0 %v34311_v1 }
  0xa8   :  { %v2286_v61 = vand.u32 4294901760, %v2285_v12 }
  0xaa   :  { %32675 = vmatpush3.bf16.msra.mxu0 %v32674_v21  ;;  %v2291_v21 = vsub.f32 %v34773_v33, %v2290_v39  ;;  %v27323_v39 = vunpack.c.h.bf16 %v34809_v40 }
  0xab   :  { %32676 = vmatprep.subr.bf16.mxu0 %v34311_v1 }
  0xac   :  { %v2292_v7 = vand.u32 4294901760, %v2291_v21 }
  0xae   :  { %32678 = vmatpush3.bf16.msra.mxu0 %v32677_v42 }
  0xaf   :  { %32679 = vmatprep.subr.bf16.mxu0 %v34311_v1 }
  0xb2   :  { %32681 = vmatpush3.bf16.msra.mxu0 %v32680_v43  ;;  %v2274_v43 = vand.u32 4294901760, %v2273_v62 }
  0xb3   :  { %32682 = vmatprep.subr.bf16.mxu0 %v34311_v1 }
  0xb4   :  { %v32836_v2 = vpack.c.bf16 %v2280_v47, %v2274_v43 }
  0xb5   :  { %29494 = vmatmul.mubr.f32.vlgmr.msra.gmra.mrb[2].mxu0 %v34666_v0  ;;  %v34835_v0 = vld [vmem:[%s39167_s1 + $0x140] sm:$0xff]  }
  0xb6   :  { %32684 = vmatpush3.bf16.msra.mxu0 %v34507_v22  ;;  %29516 = vmatprep.mubr.msk.f32.mxu0 %vm34313_vm1, %v39187_v11 }
  0xb7   :  { %32685 = vmatprep.subr.bf16.mxu0 %v34311_v1  ;;  %32552 = vmatpush3.bf16.msra.mxu1 %v34835_v0 }
  0xb8   :  { %32553 = vmatprep.subr.bf16.mxu1 %v34311_v1 }
  0xba   :  { %32687 = vmatpush3.bf16.msra.mxu0 %v34518_v29 }
  0xbb   :  { %32688 = vmatprep.subr.bf16.mxu0 %v34311_v1  ;;  %32555 = vmatpush3.bf16.msra.mxu1 %v34852_v56 }
  0xbc   :  { %32556 = vmatprep.subr.bf16.mxu1 %v34311_v1 }
  0xbe   :  { %32690 = vmatpush3.bf16.msra.mxu0 %v34531_v44 }
  0xbf   :  { %32691 = vmatprep.subr.bf16.mxu0 %v34311_v1 }
  0xc2   :  { %32693 = vmatpush3.bf16.msra.mxu0 %v34546_v51 }
  0xc3   :  { %32694 = vmatprep.subr.bf16.mxu0 %v34311_v1 }
  0xc6   :  { %32696 = vmatpush3.bf16.msra.mxu0 %v34567_v59 }
  0xc7   :  { %32697 = vmatprep.subr.bf16.mxu0 %v34311_v1 }
  0xc9   :  { %29517 = vmatmul.mubr.f32.vlgmr.msra.gmra.mrb[2].mxu0 %v1190_v5  ;;  %v2308_v5 = vand.u32 4294901760, %v34825_v45 }
  0xca   :  { %32699 = vmatpush3.bf16.msra.mxu0 %v34555_v54  ;;  %29539 = vmatprep.mubr.msk.f32.mxu0 %vm34313_vm1, %v39187_v11  ;;  %v34842_v54 = vpack.c.bf16 %v2302_v50, %v2296_v49  ;;  %v2316_v49 = vand.u32 4294901760, %v2315_v34 }
  0xcb   :  { %32700 = vmatprep.subr.bf16.mxu0 %v34311_v1  ;;  %v34859_v57 = vpack.c.bf16 %v2314_v53, %v2308_v5  ;;  %v2309_v31 = vsub.f32 %v34825_v45, %v2308_v5  ;;  %v27327_v5 = vunpack.c.h.bf16 %v34835_v0 }
  0xcd   :  { %v2310_v28 = vand.u32 4294901760, %v2309_v31 }
  0xce   :  { %32702 = vmatpush3.bf16.msra.mxu0 %v34573_v60  ;;  %v34867_v60 = vld [vmem:[%s39167_s1 + $0x150] sm:$0xff]  }
  0xcf   :  { %32703 = vmatprep.subr.bf16.mxu0 %v34311_v1  ;;  %32558 = vmatpush3.bf16.msra.mxu1 %v34867_v60  ;;  %v32845_v53 = vpack.c.bf16 %v2316_v49, %v2310_v28  ;;  %v27334_v12 = vunpack.c.l.bf16 %v34867_v60  ;;  %v27335_v21 = vunpack.c.h.bf16 %v34867_v60  ;;  %v32860_v28 = vpack.c.bf16 %v34827_v48, %v34825_v45  ;;  %v35064_v49 = vld [vmem:[%s39167_s1 + $0x80] sm:$0xff]  }
  0xd0   :  { %32559 = vmatprep.subr.bf16.mxu1 %v34311_v1 }
  0xd2   :  { %32705 = vmatpush3.bf16.msra.mxu0 %v34589_v13  ;;  %v2180_v13 = vpop.permute.xlu1 %2179 }
  0xd3   :  { %32706 = vmatprep.subr.bf16.mxu0 %v34311_v1  ;;  %32561 = vmatpush3.bf16.msra.mxu1 %v34875_v58 }
  0xd4   :  { %32562 = vmatprep.subr.bf16.mxu1 %v34311_v1 }
  0xd6   :  { %32708 = vmatpush3.bf16.msra.mxu0 %v34607_v25  ;;  %v2267_v25 = vsub.f32 %v34747_v17, %v2266_v19  ;;  %v32839_v19 = vpack.c.bf16 %v2292_v7, %v2286_v61  ;;  %v35005_v7 = vsub.f32 %v27334_v12, %v27334_v12  ;;  %v35082_v12 = vld [vmem:[%s39167_s1 + $0x88] sm:$0xff]  }
  0xd7   :  { %32709 = vmatprep.subr.bf16.mxu0 %v34311_v1 }
  0xd8   :  { %v39178_v34 = vand.u32 4294901760, %v35005_v7 }
  0xda   :  { %32711 = vmatpush3.bf16.msra.mxu0 %v34617_v63 }
  0xdb   :  { %32712 = vmatprep.subr.bf16.mxu0 %v34311_v1 }
  0xdd   :  { %29540 = vmatmul.mubr.f32.vlgmr.msra.gmra.mrb[2].mxu0 %v34655_v26 }
  0xde   :  { %32714 = vmatpush3.bf16.msra.mxu0 %v34507_v22  ;;  %29562 = vmatprep.mubr.msk.f32.mxu0 %vm34313_vm1, %v39187_v11  ;;  %v2181_v22 = vsel %vm47_vm0, %v2180_v13, 0  ;;  %v34963_v13 = vsub.f32 %v27322_v38, %v27322_v38 }
  0xdf   :  { %32715 = vmatprep.subr.bf16.mxu0 %v34311_v1 }
  0xe0   :  { %v655_v62 = vand.u32 4294901760, %v34963_v13 }
  0xe2   :  { %32717 = vmatpush3.bf16.msra.mxu0 %v34518_v29  ;;  %v34902_v29 = vcombine.high %v34642_v3, %v34642_v3 }
  0xe3   :  { %32718 = vmatprep.subr.bf16.mxu0 %v34311_v1 }
  0xe4   :  { %4314 = vrot.lane.b32.xlu0 %v34902_v29, %s34318_s30  ;;  %5376 = vrot.lane.b32.xlu1 %v34902_v29, %s34319_s17 }
  0xe6   :  { %32720 = vmatpush3.bf16.msra.mxu0 %v34531_v44  ;;  %v34905_v44 = vand.u32 4294901760, %v2181_v22 }
  0xe7   :  { %32721 = vmatprep.subr.bf16.mxu0 %v34311_v1 }
  0xe8   :  { %6444 = vrot.lane.b32.xlu0 %v34902_v29, %s34320_s16 }
  0xea   :  { %32723 = vmatpush3.bf16.msra.mxu0 %v34546_v51  ;;  %v34911_v51 = vsub.f32 %v2181_v22, %v34905_v44  ;;  %v34965_v22 = vsub.f32 %v27323_v39, %v27323_v39 }
  0xeb   :  { %32724 = vmatprep.subr.bf16.mxu0 %v34311_v1 }
  0xec   :  { %v2250_v63 = vand.u32 4294901760, %v34911_v51  ;;  %v661_v8 = vand.u32 4294901760, %v34965_v22 }
  0xee   :  { %32726 = vmatpush3.bf16.msra.mxu0 %v34567_v59  ;;  %v2261_v59 = vsub.f32 %v34745_v14, %v2260_v10  ;;  %v2251_v9 = vsub.f32 %v34911_v51, %v2250_v63  ;;  %v2303_v10 = vsub.f32 %v34802_v18, %v2302_v50  ;;  %v27326_v50 = vunpack.c.l.bf16 %v34835_v0 }
  0xef   :  { %32817 = vmatprep.subr.bf16.mxu0 %v34311_v1 }
  0xf0   :  { %v2262_v3 = vand.u32 4294901760, %v2261_v59  ;;  %v2252_v52 = vand.u32 4294901760, %v2251_v9  ;;  %v2304_v30 = vand.u32 4294901760, %v2303_v10  ;;  %v34968_v59 = vsub.f32 %v27326_v50, %v27326_v50 }
  0xf1   :  { %29563 = vmatmul.mubr.f32.vlgmr.msra.gmra.mrb[2].mxu0 %v34655_v26  ;;  %v2268_v26 = vand.u32 4294901760, %v2267_v25  ;;  %v34970_v25 = vsub.f32 %v27327_v5, %v27327_v5  ;;  %v32848_v9 = vpack.c.bf16 %v34747_v17, %v34745_v14  ;;  %v32851_v17 = vpack.c.bf16 %v34757_v27, %v34755_v35 }
  0xf2   :  { %32819 = vmatpush3.bf16.msra.mxu0 %v34729_v46  ;;  %29723 = vmatprep.mubr.msk.f32.mxu0 %vm34313_vm1, %v39187_v11  ;;  %v32842_v23 = vpack.c.bf16 %v2304_v30, %v2298_v6  ;;  %v27339_v10 = vunpack.c.h.bf16 %v34875_v58  ;;  %v35022_v30 = vsub.f32 %v27338_v15, %v27338_v15  ;;  %v27426_v50 = vunpack.c.l.bf16 %v35064_v49 }
  0xf3   :  { %32820 = vmatprep.subr.bf16.mxu0 %v34311_v1  ;;  %v32833_v42 = vpack.c.bf16 %v2268_v26, %v2262_v3  ;;  %v27330_v3 = vunpack.c.l.bf16 %v34852_v56  ;;  %v27331_v26 = vunpack.c.h.bf16 %v34852_v56  ;;  %v673_v14 = vand.u32 4294901760, %v34970_v25 }
  0xf4   :  { %v35024_v31 = vsub.f32 %v27339_v10, %v27339_v10  ;;  %v39174_v39 = vand.u32 4294901760, %v35022_v30  ;;  %v27427_v5 = vunpack.c.h.bf16 %v35064_v49 }
  0xf5   :  { %v34987_v43 = vsub.f32 %v27330_v3, %v27330_v3  ;;  %v34989_v47 = vsub.f32 %v27331_v26, %v27331_v26  ;;  %v35075_v26 = vsub.f32 %v27426_v50, %v27426_v50 }
  0xf6   :  { %32822 = vmatpush3.bf16.msra.mxu0 %v34740_v55 }
  0xf7   :  { %32823 = vmatprep.subr.bf16.mxu0 %v34311_v1  ;;  %v39184_v35 = vand.u32 4294901760, %v34987_v43  ;;  %v39183_v27 = vand.u32 4294901760, %v34989_v47 }
  0xf9   :  { %v35019_v6 = vpack.c.bf16 %v39183_v27, %v39184_v35 }
  0xfa   :  { %32825 = vmatpush3.bf16.msra.mxu0 %v34753_v24 }
  0xfb   :  { %32826 = vmatprep.subr.bf16.mxu0 %v34311_v1 }
  0xfe   :  { %32828 = vmatpush3.bf16.msra.mxu0 %v34778_v4 }
  0xff   :  { %32829 = vmatprep.subr.bf16.mxu0 %v34311_v1 }
 0x102   :  { %32831 = vmatpush3.bf16.msra.mxu0 %v34795_v37 }
 0x103   :  { %32832 = vmatprep.subr.bf16.mxu0 %v34311_v1 }
 0x105   :  { %29724 = vmatmul.mubr.f32.vlgmr.msra.gmra.mrb[4].mxu0 %v2252_v52  ;;  %v667_v52 = vand.u32 4294901760, %v34968_v59 }
 0x106   :  { %32834 = vmatpush3.bf16.msra.mxu0 %v32833_v42  ;;  %29746 = vmatprep.mubr.msk.f32.mxu0 %vm34313_vm1, %v39187_v11  ;;  %v34985_v42 = vpack.c.bf16 %v661_v8, %v655_v62 }
 0x107   :  { %32835 = vmatprep.subr.bf16.mxu0 %v34311_v1  ;;  %v35002_v61 = vpack.c.bf16 %v673_v14, %v667_v52 }
 0x10a   :  { %32837 = vmatpush3.bf16.msra.mxu0 %v32836_v2  ;;  %v35007_v2 = vsub.f32 %v27335_v21, %v27335_v21  ;;  %v27430_v21 = vunpack.c.l.bf16 %v35082_v12 }
 0x10b   :  { %32838 = vmatprep.subr.bf16.mxu0 %v34311_v1 }
 0x10c   :  { %v39175_v38 = vand.u32 4294901760, %v35007_v2 }
 0x10e   :  { %32840 = vmatpush3.bf16.msra.mxu0 %v32839_v19  ;;  %v32854_v19 = vpack.c.bf16 %v34773_v33, %v34771_v32  ;;  %v32857_v32 = vpack.c.bf16 %v34802_v18, %v34800_v16  ;;  %v35034_v33 = vpack.c.bf16 %v39175_v38, %v39178_v34  ;;  %v35056_v18 = vld [vmem:[%s39167_s1 + $0x78] sm:$0xff]  }
 0x10f   :  { %32841 = vmatprep.subr.bf16.mxu0 %v34311_v1  ;;  %v27422_v45 = vunpack.c.l.bf16 %v35056_v18  ;;  %v27423_v48 = vunpack.c.h.bf16 %v35056_v18 }
 0x111   :  { %v35072_v3 = vsub.f32 %v27423_v48, %v27423_v48  ;;  %v35104_v48 = vsub.f32 %v27430_v21, %v27430_v21  ;;  %v35124_v21 = vld [vmem:[%s39167_s1 + $0x98] sm:$0xff]  }
 0x112   :  { %32843 = vmatpush3.bf16.msra.mxu0 %v32842_v23  ;;  %v39171_v23 = vand.u32 4294901760, %v35024_v31  ;;  %v27439_v38 = vunpack.c.h.bf16 %v35124_v21 }
 0x113   :  { %32844 = vmatprep.subr.bf16.mxu0 %v34311_v1  ;;  %v39172_v10 = vand.u32 4294901760, %v35072_v3 }
 0x114   :  { %v35045_v16 = vpack.c.bf16 %v39171_v23, %v39174_v39  ;;  %v35145_v34 = vsub.f32 %v27439_v38, %v27439_v38 }
 0x116   :  { %32846 = vmatpush3.bf16.msra.mxu0 %v32845_v53  ;;  %v35070_v53 = vsub.f32 %v27422_v45, %v27422_v45 }
 0x117   :  { %32847 = vmatprep.subr.bf16.mxu0 %v34311_v1 }
 0x118   :  { %v39173_v15 = vand.u32 4294901760, %v35070_v53 }
 0x119   :  { %29747 = vmatmul.mubr.f32.vlgmr.msra.gmra.mrb[4].mxu0 %v34905_v44 }
 0x11a   :  { %32849 = vmatpush3.bf16.msra.mxu0 %v32848_v9  ;;  %29769 = vmatprep.mubr.msk.f32.mxu0 %vm34313_vm1, %v39187_v11  ;;  %v35077_v9 = vsub.f32 %v27427_v5, %v27427_v5  ;;  %v39177_v5 = vand.u32 4294901760, %v35075_v26 }
 0x11b   :  { %32850 = vmatprep.subr.bf16.mxu0 %v34311_v1 }
 0x11c   :  { %v39176_v23 = vand.u32 4294901760, %v35077_v9 }
 0x11e   :  { %32852 = vmatpush3.bf16.msra.mxu0 %v32851_v17  ;;  %v27431_v17 = vunpack.c.h.bf16 %v35082_v12 }
 0x11f   :  { %32853 = vmatprep.subr.bf16.mxu0 %v34311_v1 }
 0x120   :  { %v35106_v50 = vsub.f32 %v27431_v17, %v27431_v17  ;;  %v27438_v17 = vunpack.c.l.bf16 %v35124_v21 }
 0x122   :  { %32855 = vmatpush3.bf16.msra.mxu0 %v32854_v19  ;;  %v35092_v19 = vld [vmem:[%s39167_s1 + $0x90] sm:$0xff]  }
 0x123   :  { %32856 = vmatprep.subr.bf16.mxu0 %v34311_v1  ;;  %v27435_v45 = vunpack.c.h.bf16 %v35092_v19 }
 0x125   :  { %v35119_v39 = vsub.f32 %v27435_v45, %v27435_v45  ;;  %v35143_v45 = vsub.f32 %v27438_v17, %v27438_v17  ;;  %v39185_v17 = vand.u32 4294901760, %v35145_v34 }
 0x126   :  { %32858 = vmatpush3.bf16.msra.mxu0 %v32857_v32  ;;  %v35098_v32 = vpack.c.bf16 %v39172_v10, %v39173_v15  ;;  %v35114_v10 = vpack.c.bf16 %v39176_v23, %v39177_v5  ;;  %v39182_v23 = vand.u32 4294901760, %v35104_v48  ;;  %v39179_v5 = vand.u32 4294901760, %v35106_v50 }
 0x127   :  { %32859 = vmatprep.subr.bf16.mxu0 %v34311_v1 }
 0x12a   :  { %32861 = vmatpush3.bf16.msra.mxu0 %v32860_v28  ;;  %v27434_v28 = vunpack.c.l.bf16 %v35092_v19 }
 0x12b   :  { %32862 = vmatprep.subr.bf16.mxu0 %v34311_v1 }
 0x12c   :  { %v35117_v15 = vsub.f32 %v27434_v28, %v27434_v28  ;;  %v35137_v28 = vpack.c.bf16 %v39179_v5, %v39182_v23 }
 0x12d   :  { %29770 = vmatmul.mubr.f32.vlgmr.msra.gmra.mrb[4].mxu0 %v34911_v51 }
 0x12e   :  { %32864 = vmatpush3.bf16.msra.mxu0 %v34729_v46  ;;  %29792 = vmatprep.mubr.msk.f32.mxu0 %vm34313_vm1, %v39187_v11  ;;  %39241 = vst [vmem:[#allocation2_spill] sm:$0xff] %v35137_v28  ;;  %v39181_v51 = vand.u32 4294901760, %v35117_v15  ;;  %v39247_v28 = vand.u32 4294901760, %v35007_v2 }
 0x12f   :  { %32865 = vmatprep.subr.bf16.mxu0 %v34311_v1 }
 0x132   :  { %32867 = vmatpush3.bf16.msra.mxu0 %v34740_v55 }
 0x133   :  { %32868 = vmatprep.subr.bf16.mxu0 %v34311_v1 }
 0x136   :  { %32870 = vmatpush3.bf16.msra.mxu0 %v34753_v24 }
 0x137   :  { %32871 = vmatprep.subr.bf16.mxu0 %v34311_v1 }
 0x13a   :  { %32873 = vmatpush3.bf16.msra.mxu0 %v34778_v4 }
 0x13b   :  { %32874 = vmatprep.subr.bf16.mxu0 %v34311_v1 }
 0x13e   :  { %32876 = vmatpush3.bf16.msra.mxu0 %v34795_v37 }
 0x13f   :  { %32877 = vmatprep.subr.bf16.mxu0 %v34311_v1 }
 0x141   :  { %29793 = vmatmul.mubr.f32.vlgmr.msra.gmra.mrb[4].mxu0 %v2250_v63  ;;  %v39180_v63 = vand.u32 4294901760, %v35119_v39 }
 0x142   :  { %32879 = vmatpush3.bf16.msra.mxu0 %v34769_v20  ;;  %29815 = vmatprep.mubr.msk.f32.mxu0 %vm34313_vm1, %v39187_v11  ;;  %v39186_v20 = vand.u32 4294901760, %v35143_v45 }
 0x143   :  { %32880 = vmatprep.subr.bf16.mxu0 %v34311_v1  ;;  %v35153_v5 = vpack.c.bf16 %v39180_v63, %v39181_v51  ;;  %v27266_v63 = vld [vmem:[%s39169_s2 + $0x10] ss:$0 sm:$0xff] }
 0x144   :  { %v35163_v38 = vpack.c.bf16 %v39185_v17, %v39186_v20  ;;  %v662_v17 = vsub.f32 %v34965_v22, %v661_v8  ;;  %v674_v8 = vsub.f32 %v34970_v25, %v673_v14 }
 0x145   :  { %39242 = vst [vmem:[#allocation3_spill] sm:$0xff] %v35153_v5  ;;  %v39246_v5 = vand.u32 4294901760, %v35005_v7 }
 0x146   :  { %32882 = vmatpush3.bf16.msra.mxu0 %v34790_v36  ;;  %39243 = vst [vmem:[#allocation4_spill] sm:$0xff] %v35163_v38 }
 0x147   :  { %32883 = vmatprep.subr.bf16.mxu0 %v34311_v1 }
 0x14a   :  { %32885 = vmatpush3.bf16.msra.mxu0 %v34817_v41  ;;  %v656_v41 = vsub.f32 %v34963_v13, %v655_v62  ;;  %v668_v62 = vsub.f32 %v34968_v59, %v667_v52 }
 0x14b   :  { %32886 = vmatprep.subr.bf16.mxu0 %v34311_v1 }
 0x14c   :  { %v550_v36 = vpop.f32.mrb[0].mxu0 }
 0x14d   :  { %v33789_v51 = vadd.f32 %v27266_v63, %v550_v36  ;;  %v29288_v23 = vpop.f32.mrb[1].mxu0  ;;  %v39245_v63 = vand.u32 4294901760, %v34989_v47  ;;  %v675_v36 = vand.u32 4294901760, %v674_v8 }
 0x14e   :  { %32888 = vmatpush3.bf16.msra.mxu0 %v34842_v54  ;;  %v663_v23 = vand.u32 4294901760, %v662_v17  ;;  %v669_v17 = vand.u32 4294901760, %v668_v62 }
 0x14f   :  { %v554_v27 = vmax.f32 %v33789_v51, 0.0  ;;  %32889 = vmatprep.subr.bf16.mxu0 %v34311_v1  ;;  %v39244_v51 = vand.u32 4294901760, %v34987_v43  ;;  %v686_v14 = vsub.f32 %v34989_v47, %v39245_v63  ;;  %v3250_v63 = vpop.permute.xlu0 %3249 }
 0x151   :  { %v576_v35 = vsel %vm47_vm0, %v554_v27, 0  ;;  %v657_v27 = vand.u32 4294901760, %v656_v41  ;;  %v680_v52 = vsub.f32 %v34987_v43, %v39244_v51  ;;  %v687_v38 = vand.u32 4294901760, %v686_v14 }
 0x152   :  { %v35179_v20 = vand.u32 4294901760, %v576_v35  ;;  %32891 = vmatpush3.bf16.msra.mxu0 %v34859_v57  ;;  %v692_v51 = vsub.f32 %v35005_v7, %v39246_v5 }
 0x153   :  { %32892 = vmatprep.subr.bf16.mxu0 %v34311_v1 }
 0x154   :  { %v35184_v54 = vsub.f32 %v576_v35, %v35179_v20  ;;  %v693_v62 = vand.u32 4294901760, %v692_v51 }
 0x155   :  { %29816 = vmatmul.mubr.f32.vlgmr.msra.gmra.mrb[4].mxu0 %v34905_v44 }
 0x156   :  { %32894 = vmatpush3.bf16.msra.mxu0 %v34729_v46  ;;  %v39189_v57 = vand.u32 4294901760, %v35184_v54  ;;  %29838 = vmatprep.mubr.msk.f32.mxu0 %vm34313_vm1, %v39187_v11  ;;  %v32563_v46 = vpack.c.bf16 %v663_v23, %v657_v27  ;;  %v681_v11 = vand.u32 4294901760, %v680_v52  ;;  %v698_v27 = vsub.f32 %v35007_v2, %v39247_v28 }
 0x157   :  { %32895 = vmatprep.subr.bf16.mxu0 %v34311_v1  ;;  %v39248_v23 = vmov 0.0   ;;  %v39250_v52 = vand.u32 4294901760, %v35024_v31 }
 0x158   :  { %v646_v35 = vsub.f32 %v35184_v54, %v39189_v57  ;;  %v32566_v57 = vpack.c.bf16 %v675_v36, %v669_v17  ;;  %v699_v8 = vand.u32 4294901760, %v698_v27  ;;  %v32581_v36 = vpack.c.bf16 %v34970_v25, %v34968_v59 }
 0x159   :  { %v710_v28 = vsub.f32 %v35024_v31, %v39250_v52  ;;  %v32584_v59 = vpack.c.bf16 %v34989_v47, %v34987_v43  ;;  %v32587_v47 = vpack.c.bf16 %v35007_v2, %v35005_v7  ;;  %v39255_v52 = vand.u32 4294901760, %v35104_v48 }
 0x15a   :  { %32897 = vmatpush3.bf16.msra.mxu0 %v34740_v55  ;;  %v647_v41 = vand.u32 4294901760, %v646_v35  ;;  %v32569_v55 = vpack.c.bf16 %v687_v38, %v681_v11  ;;  %v39249_v35 = vand.u32 4294901760, %v35022_v30  ;;  %v32572_v11 = vpack.c.bf16 %v699_v8, %v693_v62 }
 0x15b   :  { %32898 = vmatprep.subr.bf16.mxu0 %v34311_v1  ;;  %v39253_v62 = vand.u32 4294901760, %v35075_v26  ;;  %v32590_v7 = vpack.c.bf16 %v35024_v31, %v35022_v30 }
 0x15c   :  { %29310 = vmatmul.mubr.f32.vlgmr.msra.gmra.mrb[0].mxu1 %v647_v41  ;;  %v704_v5 = vsub.f32 %v35022_v30, %v39249_v35  ;;  %v39252_v41 = vand.u32 4294901760, %v35072_v3  ;;  %v39254_v35 = vand.u32 4294901760, %v35077_v9 }
 0x15d   :  { %32564 = vmatpush3.bf16.msra.mxu1 %v32563_v46  ;;  %29332 = vmatprep.mubr.msk.f32.mxu1 %vm34313_vm1, %v39248_v23  ;;  %v3345_v8 = vsub.f32 %v35075_v26, %v39253_v62  ;;  %v35315_v62 = vld [vmem:[%s39167_s1 + $0x160] sm:$0xff]  }
 0x15e   :  { %32900 = vmatpush3.bf16.msra.mxu0 %v34753_v24  ;;  %32565 = vmatprep.subr.bf16.mxu1 %v34311_v1  ;;  %v3248_v24 = vpop.permute.xlu1 %3247  ;;  %v705_v38 = vand.u32 4294901760, %v704_v5  ;;  %v3339_v51 = vsub.f32 %v35072_v3, %v39252_v41  ;;  %v3351_v5 = vsub.f32 %v35077_v9, %v39254_v35  ;;  %v27363_v35 = vunpack.c.h.bf16 %v35315_v62 }
 0x15f   :  { %32901 = vmatprep.subr.bf16.mxu0 %v34311_v1  ;;  %v3252_v14 = vsel %vm3251_vm3, %v3248_v24, %v3250_v63  ;;  %v39256_v24 = vand.u32 4294901760, %v35106_v50 }
 0x161   :  { %32567 = vmatpush3.bf16.msra.mxu1 %v32566_v57  ;;  %v711_v57 = vand.u32 4294901760, %v710_v28  ;;  %v3357_v28 = vsub.f32 %v35104_v48, %v39255_v52  ;;  %v3363_v63 = vsub.f32 %v35106_v50, %v39256_v24  ;;  %v35327_v52 = vld [vmem:[%s39167_s1 + $0x168] sm:$0xff]  }
 0x162   :  { %32903 = vmatpush3.bf16.msra.mxu0 %v34778_v4  ;;  %32568 = vmatprep.subr.bf16.mxu1 %v34311_v1  ;;  %v3253_v4 = vsel %vm47_vm0, %v3252_v14, 0  ;;  %v27367_v24 = vunpack.c.h.bf16 %v35327_v52 }
 0x163   :  { %32904 = vmatprep.subr.bf16.mxu0 %v34311_v1  ;;  %v32575_v46 = vpack.c.bf16 %v711_v57, %v705_v38  ;;  %v35236_v17 = vand.u32 4294901760, %v3253_v4  ;;  %v3346_v38 = vand.u32 4294901760, %v3345_v8  ;;  %v3352_v57 = vand.u32 4294901760, %v3351_v5 }
 0x164   :  { %v3358_v2 = vand.u32 4294901760, %v3357_v28  ;;  %v27362_v8 = vunpack.c.l.bf16 %v35315_v62  ;;  %v27366_v28 = vunpack.c.l.bf16 %v35327_v52 }
 0x165   :  { %32570 = vmatpush3.bf16.msra.mxu1 %v32569_v55  ;;  %v3340_v55 = vand.u32 4294901760, %v3339_v51  ;;  %v39259_v51 = vand.u32 4294901760, %v35143_v45 }
 0x166   :  { %32906 = vmatpush3.bf16.msra.mxu0 %v34795_v37  ;;  %32571 = vmatprep.subr.bf16.mxu1 %v34311_v1  ;;  %v32578_v37 = vpack.c.bf16 %v34965_v22, %v34963_v13  ;;  %v39251_v13 = vand.u32 4294901760, %v35070_v53 }
 0x167   :  { %32997 = vmatprep.subr.bf16.mxu0 %v34311_v1 }
 0x168   :  { %v3333_v22 = vsub.f32 %v35070_v53, %v39251_v13  ;;  %v39258_v13 = vand.u32 4294901760, %v35119_v39 }
 0x169   :  { %32573 = vmatpush3.bf16.msra.mxu1 %v32572_v11  ;;  %29839 = vmatmul.mubr.f32.vlgmr.msra.gmra.mrb[4].mxu0 %v34905_v44  ;;  %v35248_v44 = vsub.f32 %v3253_v4, %v35236_v17  ;;  %v3364_v4 = vand.u32 4294901760, %v3363_v63  ;;  %v35332_v63 = vsub.f32 %v27362_v8, %v27362_v8 }
 0x16a   :  { %32999 = vmatpush3.bf16.msra.mxu0 %v35056_v18  ;;  %32574 = vmatprep.subr.bf16.mxu1 %v34311_v1  ;;  %v3334_v25 = vand.u32 4294901760, %v3333_v22  ;;  %v3375_v22 = vsub.f32 %v35119_v39, %v39258_v13  ;;  %v35358_v13 = vld [vmem:[%s39167_s1 + $0x178] sm:$0xff]  }
 0x16b   :  { %33000 = vmatprep.subr.bf16.mxu0 %v34311_v1  ;;  %29999 = vmatprep.mubr.msk.f32.mxu0 %vm34313_vm1, %v39248_v23  ;;  %v3322_v27 = vand.u32 4294901760, %v35248_v44  ;;  %v33019_v30 = vpack.c.bf16 %v3364_v4, %v3358_v2 }
 0x16c   :  { %v33013_v11 = vpack.c.bf16 %v3340_v55, %v3334_v25  ;;  %v3376_v41 = vand.u32 4294901760, %v3375_v22  ;;  %v39260_v25 = vand.u32 4294901760, %v35145_v34  ;;  %v27374_v22 = vunpack.c.l.bf16 %v35358_v13 }
 0x16d   :  { %32576 = vmatpush3.bf16.msra.mxu1 %v32575_v46  ;;  %v3323_v43 = vsub.f32 %v35248_v44, %v3322_v27  ;;  %v33016_v46 = vpack.c.bf16 %v3352_v57, %v3346_v38  ;;  %v35341_v57 = vld [vmem:[%s39167_s1 + $0x170] sm:$0xff]  }
 0x16e   :  { %33002 = vmatpush3.bf16.msra.mxu0 %v35064_v49  ;;  %32577 = vmatprep.subr.bf16.mxu1 %v34311_v1  ;;  %v3387_v55 = vsub.f32 %v35145_v34, %v39260_v25  ;;  %v27370_v2 = vunpack.c.l.bf16 %v35341_v57  ;;  %v27371_v4 = vunpack.c.h.bf16 %v35341_v57  ;;  %v35383_v25 = vld [vmem:[%s39167_s1 + $0x180] sm:$0xff]   ;;  %v35394_v8 = vsub.f32 %v27374_v22, %v27374_v22 }
 0x16f   :  { %33003 = vmatprep.subr.bf16.mxu0 %v34311_v1  ;;  %v3324_v14 = vand.u32 4294901760, %v3323_v43 }
 0x170   :  { %29333 = vmatmul.mubr.f32.vlgmr.msra.gmra.mrb[0].mxu1 %v35179_v20 }
 0x171   :  { %32579 = vmatpush3.bf16.msra.mxu1 %v32578_v37  ;;  %29355 = vmatprep.mubr.msk.f32.mxu1 %vm34313_vm1, %v39248_v23  ;;  %v39257_v37 = vand.u32 4294901760, %v35117_v15 }
 0x172   :  { %33005 = vmatpush3.bf16.msra.mxu0 %v35082_v12  ;;  %32580 = vmatprep.subr.bf16.mxu1 %v34311_v1 }
 0x173   :  { %33006 = vmatprep.subr.bf16.mxu0 %v34311_v1 }
 0x175   :  { %32582 = vmatpush3.bf16.msra.mxu1 %v32581_v36  ;;  %v3369_v36 = vsub.f32 %v35117_v15, %v39257_v37 }
 0x176   :  { %33008 = vmatpush3.bf16.msra.mxu0 %v35092_v19  ;;  %32583 = vmatprep.subr.bf16.mxu1 %v34311_v1 }
 0x177   :  { %33009 = vmatprep.subr.bf16.mxu0 %v34311_v1  ;;  %v3370_v31 = vand.u32 4294901760, %v3369_v36  ;;  %v33028_v36 = vpack.c.bf16 %v35072_v3, %v35070_v53  ;;  %v35371_v53 = vsub.f32 %v27371_v4, %v27371_v4  ;;  %v39203_v4 = vand.u32 4294901760, %v35394_v8 }
 0x179   :  { %32585 = vmatpush3.bf16.msra.mxu1 %v32584_v59  ;;  %v3381_v59 = vsub.f32 %v35143_v45, %v39259_v51  ;;  %v33022_v5 = vpack.c.bf16 %v3376_v41, %v3370_v31  ;;  %v35369_v41 = vsub.f32 %v27370_v2, %v27370_v2 }
 0x17a   :  { %33011 = vmatpush3.bf16.msra.mxu0 %v35124_v21  ;;  %32586 = vmatprep.subr.bf16.mxu1 %v34311_v1 }
 0x17b   :  { %33012 = vmatprep.subr.bf16.mxu0 %v34311_v1  ;;  %v3382_v43 = vand.u32 4294901760, %v3381_v59  ;;  %v33031_v59 = vpack.c.bf16 %v35077_v9, %v35075_v26  ;;  %v27378_v26 = vunpack.c.l.bf16 %v35383_v25 }
 0x17d   :  { %32588 = vmatpush3.bf16.msra.mxu1 %v32587_v47  ;;  %30000 = vmatmul.mubr.f32.vlgmr.msra.gmra.mrb[6].mxu0 %v3324_v14  ;;  %v3388_v47 = vand.u32 4294901760, %v3387_v55  ;;  %v35343_v14 = vsub.f32 %v27366_v28, %v27366_v28 }
 0x17e   :  { %33014 = vmatpush3.bf16.msra.mxu0 %v33013_v11  ;;  %32589 = vmatprep.subr.bf16.mxu1 %v34311_v1  ;;  %v35334_v11 = vsub.f32 %v27363_v35, %v27363_v35  ;;  %v27379_v35 = vunpack.c.h.bf16 %v35383_v25 }
 0x17f   :  { %33015 = vmatprep.subr.bf16.mxu0 %v34311_v1  ;;  %30022 = vmatprep.mubr.msk.f32.mxu0 %vm34313_vm1, %v39248_v23  ;;  %v33025_v38 = vpack.c.bf16 %v3388_v47, %v3382_v43  ;;  %v1739_v3 = vand.u32 4294901760, %v35343_v14  ;;  %v1757_v43 = vand.u32 4294901760, %v35371_v53  ;;  %v33034_v47 = vpack.c.bf16 %v35106_v50, %v35104_v48 }
 0x180   :  { %v1733_v37 = vand.u32 4294901760, %v35334_v11  ;;  %v35417_v2 = vsub.f32 %v27379_v35, %v27379_v35  ;;  %v33037_v48 = vpack.c.bf16 %v35119_v39, %v35117_v15  ;;  %v33040_v39 = vpack.c.bf16 %v35145_v34, %v35143_v45  ;;  %v35492_v35 = vld [vmem:[%s39167_s1 + $0xb0] sm:$0xff]  }
 0x181   :  { %32591 = vmatpush3.bf16.msra.mxu1 %v32590_v7  ;;  %v35345_v7 = vsub.f32 %v27367_v24, %v27367_v24  ;;  %v39261_v24 = vand.u32 4294901760, %v35184_v54 }
 0x182   :  { %33017 = vmatpush3.bf16.msra.mxu0 %v33016_v46  ;;  %32592 = vmatprep.subr.bf16.mxu1 %v34311_v1  ;;  %v1727_v46 = vand.u32 4294901760, %v35332_v63 }
 0x183   :  { %33018 = vmatprep.subr.bf16.mxu0 %v34311_v1  ;;  %v1745_v51 = vand.u32 4294901760, %v35345_v7  ;;  %v32761_v29 = vpack.c.bf16 %v35345_v7, %v35343_v14 }
 0x184   :  { %29356 = vmatmul.mubr.f32.vlgmr.msra.gmra.mrb[0].mxu1 %v35184_v54  ;;  %v35367_v31 = vpack.c.bf16 %v1733_v37, %v1727_v46 }
 0x185   :  { %32594 = vmatpush3.bf16.msra.mxu1 %v34809_v40  ;;  %29378 = vmatprep.mubr.msk.f32.mxu1 %vm34313_vm1, %v39248_v23  ;;  %v35389_v55 = vpack.c.bf16 %v1745_v51, %v1739_v3 }
 0x186   :  { %33020 = vmatpush3.bf16.msra.mxu0 %v33019_v30  ;;  %32595 = vmatprep.subr.bf16.mxu1 %v34311_v1  ;;  %v27375_v30 = vunpack.c.h.bf16 %v35358_v13 }
 0x187   :  { %33021 = vmatprep.subr.bf16.mxu0 %v34311_v1 }
 0x188   :  { %v35397_v9 = vsub.f32 %v27375_v30, %v27375_v30 }
 0x189   :  { %32597 = vmatpush3.bf16.msra.mxu1 %v34835_v0 }
 0x18a   :  { %33023 = vmatpush3.bf16.msra.mxu0 %v33022_v5  ;;  %32598 = vmatprep.subr.bf16.mxu1 %v34311_v1  ;;  %v1751_v5 = vand.u32 4294901760, %v35369_v41 }
 0x18b   :  { %33024 = vmatprep.subr.bf16.mxu0 %v34311_v1 }
 0x18c   :  { %v35410_v28 = vpack.c.bf16 %v1757_v43, %v1751_v5 }
 0x18d   :  { %32600 = vmatpush3.bf16.msra.mxu1 %v34852_v56 }
 0x18e   :  { %33026 = vmatpush3.bf16.msra.mxu0 %v33025_v38  ;;  %32601 = vmatprep.subr.bf16.mxu1 %v34311_v1  ;;  %v35415_v38 = vsub.f32 %v27378_v26, %v27378_v26 }
 0x18f   :  { %33027 = vmatprep.subr.bf16.mxu0 %v34311_v1 }
 0x190   :  { %v39191_v54 = vand.u32 4294901760, %v35415_v38 }
 0x191   :  { %32603 = vmatpush3.bf16.msra.mxu1 %v34867_v60  ;;  %30023 = vmatmul.mubr.f32.vlgmr.msra.gmra.mrb[6].mxu0 %v35236_v17 }
 0x192   :  { %33029 = vmatpush3.bf16.msra.mxu0 %v33028_v36  ;;  %32604 = vmatprep.subr.bf16.mxu1 %v34311_v1  ;;  %v39196_v36 = vand.u32 4294901760, %v35397_v9 }
 0x193   :  { %33030 = vmatprep.subr.bf16.mxu0 %v34311_v1  ;;  %30045 = vmatprep.mubr.msk.f32.mxu0 %vm34313_vm1, %v39248_v23 }
 0x194   :  { %v35431_v50 = vpack.c.bf16 %v39196_v36, %v39203_v4 }
 0x195   :  { %32606 = vmatpush3.bf16.msra.mxu1 %v34875_v58 }
 0x196   :  { %33032 = vmatpush3.bf16.msra.mxu0 %v33031_v59  ;;  %32607 = vmatprep.subr.bf16.mxu1 %v34311_v1 }
 0x197   :  { %33033 = vmatprep.subr.bf16.mxu0 %v34311_v1 }
 0x198   :  { %29379 = vmatmul.mubr.f32.vlgmr.msra.gmra.mrb[0].mxu1 %v39261_v24 }
 0x199   :  { %32609 = vmatpush3.bf16.msra.mxu1 %v34985_v42  ;;  %29401 = vmatprep.mubr.msk.f32.mxu1 %vm34313_vm1, %v39248_v23  ;;  %v39190_v42 = vand.u32 4294901760, %v35417_v2 }
 0x19a   :  { %33035 = vmatpush3.bf16.msra.mxu0 %v33034_v47  ;;  %32610 = vmatprep.subr.bf16.mxu1 %v34311_v1  ;;  %v27471_v47 = vunpack.c.h.bf16 %v35492_v35 }
 0x19b   :  { %33036 = vmatprep.subr.bf16.mxu0 %v34311_v1  ;;  %v35444_v15 = vpack.c.bf16 %v39190_v42, %v39191_v54 }
 0x19d   :  { %32612 = vmatpush3.bf16.msra.mxu1 %v35002_v61  ;;  %v35457_v61 = vld [vmem:[%s39167_s1 + $0xa0] sm:$0xff]  }
 0x19e   :  { %33038 = vmatpush3.bf16.msra.mxu0 %v33037_v48  ;;  %32613 = vmatprep.subr.bf16.mxu1 %v34311_v1  ;;  %v27463_v34 = vunpack.c.h.bf16 %v35457_v61 }
 0x19f   :  { %33039 = vmatprep.subr.bf16.mxu0 %v34311_v1 }
 0x1a0   :  { %v35477_v59 = vsub.f32 %v27463_v34, %v27463_v34 }
 0x1a1   :  { %32615 = vmatpush3.bf16.msra.mxu1 %v35019_v6  ;;  %v27462_v6 = vunpack.c.l.bf16 %v35457_v61 }
 0x1a2   :  { %33041 = vmatpush3.bf16.msra.mxu0 %v33040_v39  ;;  %32616 = vmatprep.subr.bf16.mxu1 %v34311_v1  ;;  %v39192_v48 = vand.u32 4294901760, %v35477_v59  ;;  %v35503_v39 = vld [vmem:[%s39167_s1 + $0xb8] sm:$0xff]  }
 0x1a3   :  { %33042 = vmatprep.subr.bf16.mxu0 %v34311_v1  ;;  %v35475_v30 = vsub.f32 %v27462_v6, %v27462_v6  ;;  %v27474_v34 = vunpack.c.l.bf16 %v35503_v39 }
 0x1a5   :  { %32618 = vmatpush3.bf16.msra.mxu1 %v35034_v33  ;;  %30046 = vmatmul.mubr.f32.vlgmr.msra.gmra.mrb[6].mxu0 %v35248_v44  ;;  %v35468_v33 = vld [vmem:[%s39167_s1 + $0xa8] sm:$0xff]   ;;  %v39193_v24 = vand.u32 4294901760, %v35475_v30 }
 0x1a6   :  { %33044 = vmatpush3.bf16.msra.mxu0 %v35056_v18  ;;  %32619 = vmatprep.subr.bf16.mxu1 %v34311_v1  ;;  %v27466_v45 = vunpack.c.l.bf16 %v35468_v33  ;;  %v27467_v22 = vunpack.c.h.bf16 %v35468_v33 }
 0x1a7   :  { %33045 = vmatprep.subr.bf16.mxu0 %v34311_v1  ;;  %30068 = vmatprep.mubr.msk.f32.mxu0 %vm34313_vm1, %v39248_v23  ;;  %v35509_v6 = vpack.c.bf16 %v39192_v48, %v39193_v24  ;;  %v35538_v24 = vld [vmem:[%s39167_s1 + $0xc0] sm:$0xff]  }
 0x1a8   :  { %v35487_v26 = vsub.f32 %v27467_v22, %v27467_v22  ;;  %v35518_v22 = vsub.f32 %v27471_v47, %v27471_v47 }
 0x1a9   :  { %32621 = vmatpush3.bf16.msra.mxu1 %v35045_v16  ;;  %v35485_v16 = vsub.f32 %v27466_v45, %v27466_v45  ;;  %v27475_v45 = vunpack.c.h.bf16 %v35503_v39 }
 0x1aa   :  { %33047 = vmatpush3.bf16.msra.mxu0 %v35064_v49  ;;  %32622 = vmatprep.subr.bf16.mxu1 %v34311_v1  ;;  %v39194_v54 = vand.u32 4294901760, %v35487_v26  ;;  %v39199_v36 = vand.u32 4294901760, %v35518_v22 }
 0x1ab   :  { %33048 = vmatprep.subr.bf16.mxu0 %v34311_v1  ;;  %v39195_v42 = vand.u32 4294901760, %v35485_v16  ;;  %v35533_v47 = vsub.f32 %v27475_v45, %v27475_v45 }
 0x1ac   :  { %29402 = vmatmul.mubr.f32.vlgmr.msra.gmra.mrb[0].mxu1 %v35179_v20 }
 0x1ad   :  { %32624 = vmatpush3.bf16.msra.mxu1 %v34809_v40  ;;  %29424 = vmatprep.mubr.msk.f32.mxu1 %vm34313_vm1, %v39248_v23  ;;  %v27470_v40 = vunpack.c.l.bf16 %v35492_v35  ;;  %v35527_v48 = vpack.c.bf16 %v39194_v54, %v39195_v42  ;;  %v27479_v54 = vunpack.c.h.bf16 %v35538_v24 }
 0x1ae   :  { %33050 = vmatpush3.bf16.msra.mxu0 %v35082_v12  ;;  %32625 = vmatprep.subr.bf16.mxu1 %v34311_v1 }
 0x1af   :  { %33051 = vmatprep.subr.bf16.mxu0 %v34311_v1 }
 0x1b1   :  { %32627 = vmatpush3.bf16.msra.mxu1 %v34835_v0  ;;  %v35516_v0 = vsub.f32 %v27470_v40, %v27470_v40  ;;  %v35531_v40 = vsub.f32 %v27474_v34, %v27474_v34 }
 0x1b2   :  { %33053 = vmatpush3.bf16.msra.mxu0 %v35092_v19  ;;  %32628 = vmatprep.subr.bf16.mxu1 %v34311_v1 }
 0x1b3   :  { %33054 = vmatprep.subr.bf16.mxu0 %v34311_v1  ;;  %v39200_v42 = vand.u32 4294901760, %v35516_v0  ;;  %v39198_v44 = vand.u32 4294901760, %v35531_v40 }
 0x1b5   :  { %32630 = vmatpush3.bf16.msra.mxu1 %v34852_v56  ;;  %v27478_v56 = vunpack.c.l.bf16 %v35538_v24  ;;  %v35552_v34 = vpack.c.bf16 %v39199_v36, %v39200_v42  ;;  %v39265_v42 = vld [vmem:[#allocation3_spill] sm:$0xff] }
 0x1b6   :  { %33056 = vmatpush3.bf16.msra.mxu0 %v35124_v21  ;;  %32631 = vmatprep.subr.bf16.mxu1 %v34311_v1 }
 0x1b7   :  { %33057 = vmatprep.subr.bf16.mxu0 %v34311_v1  ;;  %v35559_v45 = vsub.f32 %v27478_v56, %v27478_v56 }
 0x1b9   :  { %32633 = vmatpush3.bf16.msra.mxu1 %v34867_v60  ;;  %30069 = vmatmul.mubr.f32.vlgmr.msra.gmra.mrb[6].mxu0 %v3322_v27  ;;  %v35561_v60 = vsub.f32 %v27479_v54, %v27479_v54  ;;  %v39197_v27 = vand.u32 4294901760, %v35533_v47  ;;  %v39202_v54 = vand.u32 4294901760, %v35559_v45 }
 0x1ba   :  { %33059 = vmatpush3.bf16.msra.mxu0 %v35098_v32  ;;  %32634 = vmatprep.subr.bf16.mxu1 %v34311_v1 }
 0x1bb   :  { %33060 = vmatprep.subr.bf16.mxu0 %v34311_v1  ;;  %30091 = vmatprep.mubr.msk.f32.mxu0 %vm34313_vm1, %v39248_v23  ;;  %v35570_v32 = vpack.c.bf16 %v39197_v27, %v39198_v44  ;;  %v39201_v56 = vand.u32 4294901760, %v35561_v60  ;;  %v27267_v27 = vld [vmem:[%s39169_s2 + $0x11] ss:$0 sm:$0xff] }
 0x1bd   :  { %32636 = vmatpush3.bf16.msra.mxu1 %v34875_v58  ;;  %39262 = vst [vmem:[#allocation5_spill] sm:$0xff] %v35570_v32  ;;  %v35585_v58 = vpack.c.bf16 %v39201_v56, %v39202_v54  ;;  %v1728_v54 = vsub.f32 %v35332_v63, %v1727_v46  ;;  %v39267_v32 = vand.u32 4294901760, %v35394_v8 }
 0x1be   :  { %33062 = vmatpush3.bf16.msra.mxu0 %v35114_v10  ;;  %32727 = vmatprep.subr.bf16.mxu1 %v34311_v1  ;;  %v39264_v10 = vld [vmem:[#allocation2_spill] sm:$0xff] }
 0x1bf   :  { %33063 = vmatprep.subr.bf16.mxu0 %v34311_v1  ;;  %39263 = vst [vmem:[#allocation6_spill] sm:$0xff] %v35585_v58  ;;  %v1729_v46 = vand.u32 4294901760, %v1728_v54 }
 0x1c0   :  { %29425 = vmatmul.mubr.f32.vlgmr.msra.gmra.mrb[0].mxu1 %v35179_v20 }
 0x1c1   :  { %32729 = vmatpush3.bf16.msra.mxu1 %v35315_v62  ;;  %29585 = vmatprep.mubr.msk.f32.mxu1 %vm34313_vm1, %v39248_v23 }
 0x1c2   :  { %33065 = vmatpush3.bf16.msra.mxu0 %v39264_v10  ;;  %32730 = vmatprep.subr.bf16.mxu1 %v34311_v1 }
 0x1c3   :  { %33066 = vmatprep.subr.bf16.mxu0 %v34311_v1 }
 0x1c4   :  { %v1622_v20 = vpop.f32.mrb[2].mxu0 }
 0x1c5   :  { %v33791_v44 = vadd.f32 %v27267_v27, %v1622_v20  ;;  %32732 = vmatpush3.bf16.msra.mxu1 %v35327_v52  ;;  %v29564_v36 = vpop.f32.mrb[3].mxu0  ;;  %v1734_v27 = vsub.f32 %v35334_v11, %v1733_v37  ;;  %v1740_v37 = vsub.f32 %v35343_v14, %v1739_v3  ;;  %v1746_v20 = vsub.f32 %v35345_v7, %v1745_v51 }
 0x1c6   :  { %33068 = vmatpush3.bf16.msra.mxu0 %v39265_v42  ;;  %32733 = vmatprep.subr.bf16.mxu1 %v34311_v1  ;;  %v39266_v42 = vld [vmem:[#allocation4_spill] sm:$0xff]  ;;  %v1752_v3 = vsub.f32 %v35369_v41, %v1751_v5  ;;  %v1758_v51 = vsub.f32 %v35371_v53, %v1757_v43  ;;  %v1764_v43 = vsub.f32 %v35394_v8, %v39267_v32 }
 0x1c7   :  { %v1626_v56 = vmax.f32 %v33791_v44, 0.0  ;;  %33069 = vmatprep.subr.bf16.mxu0 %v34311_v1  ;;  %v32764_v14 = vpack.c.bf16 %v35371_v53, %v35369_v41  ;;  %v32767_v53 = vpack.c.bf16 %v35397_v9, %v35394_v8  ;;  %v32770_v8 = vpack.c.bf16 %v35417_v2, %v35415_v38 }
 0x1c8   :  { %v1759_v58 = vand.u32 4294901760, %v1758_v51  ;;  %v4315_v51 = vpop.permute.xlu0 %4314 }
 0x1c9   :  { %v1648_v10 = vsel %vm47_vm0, %v1626_v56, 0  ;;  %32735 = vmatpush3.bf16.msra.mxu1 %v35341_v57  ;;  %v1735_v56 = vand.u32 4294901760, %v1734_v27  ;;  %v1747_v27 = vand.u32 4294901760, %v1746_v20  ;;  %v39269_v20 = vand.u32 4294901760, %v35415_v38 }
 0x1ca   :  { %v35605_v36 = vand.u32 4294901760, %v1648_v10  ;;  %33071 = vmatpush3.bf16.msra.mxu0 %v39266_v42  ;;  %32736 = vmatprep.subr.bf16.mxu1 %v34311_v1 }
 0x1cb   :  { %33072 = vmatprep.subr.bf16.mxu0 %v34311_v1  ;;  %v1776_v32 = vsub.f32 %v35415_v38, %v39269_v20 }
 0x1cc   :  { %v35611_v44 = vsub.f32 %v1648_v10, %v35605_v36  ;;  %v1741_v10 = vand.u32 4294901760, %v1740_v37 }
 0x1cd   :  { %32738 = vmatpush3.bf16.msra.mxu1 %v35358_v13  ;;  %30092 = vmatmul.mubr.f32.vlgmr.msra.gmra.mrb[6].mxu0 %v35236_v17 }
 0x1ce   :  { %v39204_v42 = vand.u32 4294901760, %v35611_v44  ;;  %33074 = vmatpush3.bf16.msra.mxu0 %v35056_v18  ;;  %32739 = vmatprep.subr.bf16.mxu1 %v34311_v1  ;;  %v32743_v18 = vpack.c.bf16 %v1735_v56, %v1729_v46  ;;  %v32746_v5 = vpack.c.bf16 %v1747_v27, %v1741_v10  ;;  %v39268_v46 = vand.u32 4294901760, %v35397_v9  ;;  %v27273_v27 = vld.sshfl [vmem:[%s39168_s0 + $0x8] sm:$0x33 pattern:$0x76325410] }
 0x1cf   :  { %33075 = vmatprep.subr.bf16.mxu0 %v34311_v1  ;;  %30114 = vmatprep.mubr.msk.f32.mxu0 %vm34313_vm1, %v39248_v23 }
 0x1d0   :  { %v1718_v54 = vsub.f32 %v35611_v44, %v39204_v42  ;;  %v1753_v42 = vand.u32 4294901760, %v1752_v3  ;;  %v1770_v56 = vsub.f32 %v35397_v9, %v39268_v46  ;;  %6446 = vrot.lane.b32.xlu1 %v27273_v27, %s34320_s16  ;;  %v39272_v46 = vand.u32 4294901760, %v35477_v59 }
 0x1d1   :  { %32741 = vmatpush3.bf16.msra.mxu1 %v35383_v25 }
 0x1d2   :  { %33077 = vmatpush3.bf16.msra.mxu0 %v35064_v49  ;;  %32742 = vmatprep.subr.bf16.mxu1 %v34311_v1  ;;  %v1719_v4 = vand.u32 4294901760, %v1718_v54  ;;  %v32749_v49 = vpack.c.bf16 %v1759_v58, %v1753_v42  ;;  %v1771_v37 = vand.u32 4294901760, %v1770_v56  ;;  %v39270_v54 = vand.u32 4294901760, %v35417_v2 }
 0x1d3   :  { %33078 = vmatprep.subr.bf16.mxu0 %v34311_v1  ;;  %v1777_v42 = vand.u32 4294901760, %v1776_v32  ;;  %v4404_v56 = vsub.f32 %v35477_v59, %v39272_v46  ;;  %v39274_v32 = vand.u32 4294901760, %v35487_v26 }
 0x1d4   :  { %29586 = vmatmul.mubr.f32.vlgmr.msra.gmra.mrb[0].mxu1 %v1719_v4  ;;  %v1765_v4 = vand.u32 4294901760, %v1764_v43  ;;  %v1782_v3 = vsub.f32 %v35417_v2, %v39270_v54  ;;  %8002 = vrot.lane.b32.xlu1 %v27273_v27, %s34317_s9 }
 0x1d5   :  { %32744 = vmatpush3.bf16.msra.mxu1 %v32743_v18  ;;  %29608 = vmatprep.mubr.msk.f32.mxu1 %vm34313_vm1, %v39248_v23  ;;  %v4416_v54 = vsub.f32 %v35487_v26, %v39274_v32 }
 0x1d6   :  { %33080 = vmatpush3.bf16.msra.mxu0 %v35082_v12  ;;  %32745 = vmatprep.subr.bf16.mxu1 %v34311_v1  ;;  %v4313_v12 = vpop.permute.xlu1 %4312  ;;  %v32752_v58 = vpack.c.bf16 %v1771_v37, %v1765_v4  ;;  %v1783_v18 = vand.u32 4294901760, %v1782_v3  ;;  %v4405_v4 = vand.u32 4294901760, %v4404_v56  ;;  %v39273_v37 = vand.u32 4294901760, %v35485_v16 }
 0x1d7   :  { %33081 = vmatprep.subr.bf16.mxu0 %v34311_v1  ;;  %v4317_v10 = vsel %vm4316_vm4, %v4313_v12, %v4315_v51  ;;  %v39275_v3 = vand.u32 4294901760, %v35516_v0  ;;  %v39276_v51 = vand.u32 4294901760, %v35518_v22  ;;  %v39279_v56 = vand.u32 4294901760, %v35559_v45 }
 0x1d8   :  { %v4410_v20 = vsub.f32 %v35485_v16, %v39273_v37  ;;  %v35750_v37 = vld [vmem:[%s39167_s1 + $0x188] sm:$0xff]  }
 0x1d9   :  { %32747 = vmatpush3.bf16.msra.mxu1 %v32746_v5  ;;  %v32755_v5 = vpack.c.bf16 %v1783_v18, %v1777_v42  ;;  %v4422_v12 = vsub.f32 %v35516_v0, %v39275_v3  ;;  %v27403_v32 = vunpack.c.h.bf16 %v35750_v37  ;;  %v35762_v3 = vld [vmem:[%s39167_s1 + $0x190] sm:$0xff]  }
 0x1da   :  { %33083 = vmatpush3.bf16.msra.mxu0 %v35092_v19  ;;  %32748 = vmatprep.subr.bf16.mxu1 %v34311_v1  ;;  %v4318_v19 = vsel %vm47_vm0, %v4317_v10, 0  ;;  %v4411_v18 = vand.u32 4294901760, %v4410_v20  ;;  %v4417_v10 = vand.u32 4294901760, %v4416_v54  ;;  %v27402_v20 = vunpack.c.l.bf16 %v35750_v37 }
 0x1db   :  { %33084 = vmatprep.subr.bf16.mxu0 %v34311_v1  ;;  %v35671_v43 = vand.u32 4294901760, %v4318_v19  ;;  %v4423_v9 = vand.u32 4294901760, %v4422_v12  ;;  %v27406_v12 = vunpack.c.l.bf16 %v35762_v3 }
 0x1dd   :  { %32750 = vmatpush3.bf16.msra.mxu1 %v32749_v49 }
 0x1de   :  { %33086 = vmatpush3.bf16.msra.mxu0 %v35124_v21  ;;  %32751 = vmatprep.subr.bf16.mxu1 %v34311_v1  ;;  %v32758_v21 = vpack.c.bf16 %v35334_v11, %v35332_v63  ;;  %v39271_v63 = vand.u32 4294901760, %v35475_v30 }
 0x1df   :  { %33177 = vmatprep.subr.bf16.mxu0 %v34311_v1 }
 0x1e0   :  { %v4398_v11 = vsub.f32 %v35475_v30, %v39271_v63  ;;  %v39278_v63 = vand.u32 4294901760, %v35533_v47 }
 0x1e1   :  { %32753 = vmatpush3.bf16.msra.mxu1 %v32752_v58  ;;  %30115 = vmatmul.mubr.f32.vlgmr.msra.gmra.mrb[6].mxu0 %v35236_v17  ;;  %v35682_v17 = vsub.f32 %v4318_v19, %v35671_v43  ;;  %v4428_v58 = vsub.f32 %v35518_v22, %v39276_v51  ;;  %v27407_v51 = vunpack.c.h.bf16 %v35762_v3 }
 0x1e2   :  { %33179 = vmatpush3.bf16.msra.mxu0 %v35457_v61  ;;  %32754 = vmatprep.subr.bf16.mxu1 %v34311_v1  ;;  %v4399_v7 = vand.u32 4294901760, %v4398_v11  ;;  %v4440_v11 = vsub.f32 %v35533_v47, %v39278_v63  ;;  %v35793_v63 = vld [vmem:[%s39167_s1 + $0x1a0] sm:$0xff]  }
 0x1e3   :  { %33180 = vmatprep.subr.bf16.mxu0 %v34311_v1  ;;  %30275 = vmatprep.mubr.msk.f32.mxu0 %vm34313_vm1, %v39248_v23  ;;  %v4387_v49 = vand.u32 4294901760, %v35682_v17  ;;  %v4429_v27 = vand.u32 4294901760, %v4428_v58  ;;  %v35767_v58 = vsub.f32 %v27402_v20, %v27402_v20 }
 0x1e4   :  { %v33193_v42 = vpack.c.bf16 %v4405_v4, %v4399_v7  ;;  %v4441_v46 = vand.u32 4294901760, %v4440_v11  ;;  %v39280_v7 = vand.u32 4294901760, %v35561_v60  ;;  %v27414_v11 = vunpack.c.l.bf16 %v35793_v63 }
 0x1e5   :  { %32756 = vmatpush3.bf16.msra.mxu1 %v32755_v5  ;;  %v4388_v41 = vsub.f32 %v35682_v17, %v4387_v49  ;;  %v33196_v5 = vpack.c.bf16 %v4417_v10, %v4411_v18  ;;  %v33199_v38 = vpack.c.bf16 %v4429_v27, %v4423_v9  ;;  %v35776_v10 = vld [vmem:[%s39167_s1 + $0x198] sm:$0xff]  }
 0x1e6   :  { %33182 = vmatpush3.bf16.msra.mxu0 %v35468_v33  ;;  %32757 = vmatprep.subr.bf16.mxu1 %v34311_v1  ;;  %v4452_v4 = vsub.f32 %v35561_v60, %v39280_v7  ;;  %v27410_v9 = vunpack.c.l.bf16 %v35776_v10  ;;  %v27411_v27 = vunpack.c.h.bf16 %v35776_v10  ;;  %v35818_v7 = vld [vmem:[%s39167_s1 + $0x1a8] sm:$0xff]   ;;  %v35829_v20 = vsub.f32 %v27414_v11, %v27414_v11 }
 0x1e7   :  { %33183 = vmatprep.subr.bf16.mxu0 %v34311_v1  ;;  %v4389_v19 = vand.u32 4294901760, %v4388_v41 }
 0x1e8   :  { %29609 = vmatmul.mubr.f32.vlgmr.msra.gmra.mrb[0].mxu1 %v35605_v36 }
 0x1e9   :  { %32759 = vmatpush3.bf16.msra.mxu1 %v32758_v21  ;;  %29631 = vmatprep.mubr.msk.f32.mxu1 %vm34313_vm1, %v39248_v23  ;;  %v39277_v21 = vand.u32 4294901760, %v35531_v40 }
 0x1ea   :  { %33185 = vmatpush3.bf16.msra.mxu0 %v35492_v35  ;;  %32760 = vmatprep.subr.bf16.mxu1 %v34311_v1 }
 0x1eb   :  { %33186 = vmatprep.subr.bf16.mxu0 %v34311_v1 }
 0x1ed   :  { %32762 = vmatpush3.bf16.msra.mxu1 %v32761_v29  ;;  %v4434_v29 = vsub.f32 %v35531_v40, %v39277_v21 }
 0x1ee   :  { %33188 = vmatpush3.bf16.msra.mxu0 %v35503_v39  ;;  %32763 = vmatprep.subr.bf16.mxu1 %v34311_v1 }
 0x1ef   :  { %33189 = vmatprep.subr.bf16.mxu0 %v34311_v1  ;;  %v4435_v2 = vand.u32 4294901760, %v4434_v29  ;;  %v33208_v29 = vpack.c.bf16 %v35477_v59, %v35475_v30  ;;  %v35806_v30 = vsub.f32 %v27411_v27, %v27411_v27  ;;  %v39219_v27 = vand.u32 4294901760, %v35829_v20 }
 0x1f1   :  { %32765 = vmatpush3.bf16.msra.mxu1 %v32764_v14  ;;  %v4446_v14 = vsub.f32 %v35559_v45, %v39279_v56  ;;  %v33202_v54 = vpack.c.bf16 %v4441_v46, %v4435_v2  ;;  %v35804_v46 = vsub.f32 %v27410_v9, %v27410_v9 }
 0x1f2   :  { %33191 = vmatpush3.bf16.msra.mxu0 %v35538_v24  ;;  %32766 = vmatprep.subr.bf16.mxu1 %v34311_v1 }
 0x1f3   :  { %33192 = vmatprep.subr.bf16.mxu0 %v34311_v1  ;;  %v4447_v41 = vand.u32 4294901760, %v4446_v14  ;;  %v33211_v14 = vpack.c.bf16 %v35487_v26, %v35485_v16  ;;  %v27418_v16 = vunpack.c.l.bf16 %v35818_v7 }
 0x1f5   :  { %32768 = vmatpush3.bf16.msra.mxu1 %v32767_v53  ;;  %30276 = vmatmul.mubr.f32.vlgmr.msra.gmra.mrb[8].mxu0 %v4389_v19  ;;  %v4453_v53 = vand.u32 4294901760, %v4452_v4  ;;  %v35778_v19 = vsub.f32 %v27406_v12, %v27406_v12 }
 0x1f6   :  { %33194 = vmatpush3.bf16.msra.mxu0 %v33193_v42  ;;  %32769 = vmatprep.subr.bf16.mxu1 %v34311_v1  ;;  %v35769_v42 = vsub.f32 %v27403_v32, %v27403_v32  ;;  %v27419_v32 = vunpack.c.h.bf16 %v35818_v7 }
 0x1f7   :  { %33195 = vmatprep.subr.bf16.mxu0 %v34311_v1  ;;  %30298 = vmatprep.mubr.msk.f32.mxu0 %vm34313_vm1, %v39248_v23  ;;  %v33205_v18 = vpack.c.bf16 %v4453_v53, %v4447_v41  ;;  %v2799_v59 = vand.u32 4294901760, %v35778_v19  ;;  %v2817_v41 = vand.u32 4294901760, %v35806_v30  ;;  %v33214_v53 = vpack.c.bf16 %v35518_v22, %v35516_v0 }
 0x1f8   :  { %v2793_v21 = vand.u32 4294901760, %v35769_v42  ;;  %v35852_v9 = vsub.f32 %v27419_v32, %v27419_v32  ;;  %v33217_v0 = vpack.c.bf16 %v35533_v47, %v35531_v40  ;;  %v33220_v40 = vpack.c.bf16 %v35561_v60, %v35559_v45  ;;  %v35903_v45 = vld [vmem:[%s39167_s1 + $0xd0] sm:$0xff]   ;;  %v35927_v32 = vld [vmem:[%s39167_s1 + $0xd8] sm:$0xff]  }
 0x1f9   :  { %32771 = vmatpush3.bf16.msra.mxu1 %v32770_v8  ;;  %v35780_v8 = vsub.f32 %v27407_v51, %v27407_v51  ;;  %v39281_v51 = vand.u32 4294901760, %v35611_v44  ;;  %v27506_v60 = vunpack.c.l.bf16 %v35903_v45  ;;  %v27507_v11 = vunpack.c.h.bf16 %v35903_v45 }
 0x1fa   :  { %33197 = vmatpush3.bf16.msra.mxu0 %v33196_v5  ;;  %32772 = vmatprep.subr.bf16.mxu1 %v34311_v1  ;;  %v2787_v5 = vand.u32 4294901760, %v35767_v58 }
 0x1fb   :  { %33198 = vmatprep.subr.bf16.mxu0 %v34311_v1  ;;  %v2805_v56 = vand.u32 4294901760, %v35780_v8 }
 0x1fc   :  { %29632 = vmatmul.mubr.f32.vlgmr.msra.gmra.mrb[0].mxu1 %v35611_v44  ;;  %v35802_v2 = vpack.c.bf16 %v2793_v21, %v2787_v5 }
 0x1fd   :  { %32774 = vmatpush3.bf16.msra.mxu1 %v35315_v62  ;;  %29654 = vmatprep.mubr.msk.f32.mxu1 %vm34313_vm1, %v39248_v23  ;;  %v35824_v4 = vpack.c.bf16 %v2805_v56, %v2799_v59 }
 0x1fe   :  { %33200 = vmatpush3.bf16.msra.mxu0 %v33199_v38  ;;  %32775 = vmatprep.subr.bf16.mxu1 %v34311_v1  ;;  %v27415_v38 = vunpack.c.h.bf16 %v35793_v63 }
 0x1ff   :  { %33201 = vmatprep.subr.bf16.mxu0 %v34311_v1 }
 0x200   :  { %v35832_v26 = vsub.f32 %v27415_v38, %v27415_v38 }
 0x201   :  { %32777 = vmatpush3.bf16.msra.mxu1 %v35327_v52 }
 0x202   :  { %33203 = vmatpush3.bf16.msra.mxu0 %v33202_v54  ;;  %32778 = vmatprep.subr.bf16.mxu1 %v34311_v1  ;;  %v2811_v54 = vand.u32 4294901760, %v35804_v46 }
 0x203   :  { %33204 = vmatprep.subr.bf16.mxu0 %v34311_v1 }
 0x204   :  { %v35845_v12 = vpack.c.bf16 %v2817_v41, %v2811_v54 }
 0x205   :  { %32780 = vmatpush3.bf16.msra.mxu1 %v35341_v57 }
 0x206   :  { %33206 = vmatpush3.bf16.msra.mxu0 %v33205_v18  ;;  %32781 = vmatprep.subr.bf16.mxu1 %v34311_v1  ;;  %v35850_v18 = vsub.f32 %v27418_v16, %v27418_v16  ;;  %v35922_v16 = vsub.f32 %v27507_v11, %v27507_v11 }
 0x207   :  { %33207 = vmatprep.subr.bf16.mxu0 %v34311_v1 }
 0x208   :  { %v39206_v44 = vand.u32 4294901760, %v35850_v18 }
 0x209   :  { %32783 = vmatpush3.bf16.msra.mxu1 %v35358_v13  ;;  %30299 = vmatmul.mubr.f32.vlgmr.msra.gmra.mrb[8].mxu0 %v35671_v43 }
 0x20a   :  { %33209 = vmatpush3.bf16.msra.mxu0 %v33208_v29  ;;  %32784 = vmatprep.subr.bf16.mxu1 %v34311_v1  ;;  %v39211_v29 = vand.u32 4294901760, %v35832_v26 }
 0x20b   :  { %33210 = vmatprep.subr.bf16.mxu0 %v34311_v1  ;;  %30321 = vmatprep.mubr.msk.f32.mxu0 %vm34313_vm1, %v39248_v23 }
 0x20c   :  { %v35866_v22 = vpack.c.bf16 %v39211_v29, %v39219_v27 }
 0x20d   :  { %32786 = vmatpush3.bf16.msra.mxu1 %v35383_v25 }
 0x20e   :  { %33212 = vmatpush3.bf16.msra.mxu0 %v33211_v14  ;;  %32787 = vmatprep.subr.bf16.mxu1 %v34311_v1 }
 0x20f   :  { %33213 = vmatprep.subr.bf16.mxu0 %v34311_v1 }
 0x210   :  { %29655 = vmatmul.mubr.f32.vlgmr.msra.gmra.mrb[0].mxu1 %v39281_v51 }
 0x211   :  { %32789 = vmatpush3.bf16.msra.mxu1 %v35367_v31  ;;  %29677 = vmatprep.mubr.msk.f32.mxu1 %vm34313_vm1, %v39248_v23  ;;  %v39205_v31 = vand.u32 4294901760, %v35852_v9 }
 0x212   :  { %33215 = vmatpush3.bf16.msra.mxu0 %v33214_v53  ;;  %32790 = vmatprep.subr.bf16.mxu1 %v34311_v1  ;;  %v27511_v53 = vunpack.c.h.bf16 %v35927_v32 }
 0x213   :  { %33216 = vmatprep.subr.bf16.mxu0 %v34311_v1  ;;  %v35879_v47 = vpack.c.bf16 %v39205_v31, %v39206_v44  ;;  %v39209_v44 = vand.u32 4294901760, %v35922_v16 }
 0x214   :  { %v35953_v11 = vsub.f32 %v27511_v53, %v27511_v53 }
 0x215   :  { %32792 = vmatpush3.bf16.msra.mxu1 %v35389_v55  ;;  %v35892_v55 = vld [vmem:[%s39167_s1 + $0xc8] sm:$0xff]  }
 0x216   :  { %33218 = vmatpush3.bf16.msra.mxu0 %v33217_v0  ;;  %32793 = vmatprep.subr.bf16.mxu1 %v34311_v1  ;;  %v39214_v29 = vand.u32 4294901760, %v35953_v11 }
 0x217   :  { %33219 = vmatprep.subr.bf16.mxu0 %v34311_v1 }
 0x219   :  { %32795 = vmatpush3.bf16.msra.mxu1 %v35410_v28  ;;  %v27502_v28 = vunpack.c.l.bf16 %v35892_v55 }
 0x21a   :  { %33221 = vmatpush3.bf16.msra.mxu0 %v33220_v40  ;;  %32796 = vmatprep.subr.bf16.mxu1 %v34311_v1  ;;  %v35938_v40 = vld [vmem:[%s39167_s1 + $0xe0] sm:$0xff]  }
 0x21b   :  { %33222 = vmatprep.subr.bf16.mxu0 %v34311_v1  ;;  %v35910_v38 = vsub.f32 %v27502_v28, %v27502_v28 }
 0x21d   :  { %32798 = vmatpush3.bf16.msra.mxu1 %v35431_v50  ;;  %30322 = vmatmul.mubr.f32.vlgmr.msra.gmra.mrb[8].mxu0 %v35682_v17  ;;  %v27503_v50 = vunpack.c.h.bf16 %v35892_v55  ;;  %v39208_v51 = vand.u32 4294901760, %v35910_v38 }
 0x21e   :  { %33224 = vmatpush3.bf16.msra.mxu0 %v35457_v61  ;;  %32799 = vmatprep.subr.bf16.mxu1 %v34311_v1 }
 0x21f   :  { %33225 = vmatprep.subr.bf16.mxu0 %v34311_v1  ;;  %30344 = vmatprep.mubr.msk.f32.mxu0 %vm34313_vm1, %v39248_v23  ;;  %v35912_v14 = vsub.f32 %v27503_v50, %v27503_v50  ;;  %v27514_v50 = vunpack.c.l.bf16 %v35938_v40 }
 0x221   :  { %32801 = vmatpush3.bf16.msra.mxu1 %v35444_v15  ;;  %v35920_v15 = vsub.f32 %v27506_v60, %v27506_v60  ;;  %v39207_v0 = vand.u32 4294901760, %v35912_v14  ;;  %v27515_v60 = vunpack.c.h.bf16 %v35938_v40 }
 0x222   :  { %33227 = vmatpush3.bf16.msra.mxu0 %v35468_v33  ;;  %32802 = vmatprep.subr.bf16.mxu1 %v34311_v1 }
 0x223   :  { %33228 = vmatprep.subr.bf16.mxu0 %v34311_v1  ;;  %v35944_v28 = vpack.c.bf16 %v39207_v0, %v39208_v51  ;;  %v39210_v31 = vand.u32 4294901760, %v35920_v15  ;;  %v35968_v53 = vsub.f32 %v27515_v60, %v27515_v60  ;;  %v35973_v51 = vld [vmem:[%s39167_s1 + $0xe8] sm:$0xff]  }
 0x224   :  { %29678 = vmatmul.mubr.f32.vlgmr.msra.gmra.mrb[0].mxu1 %v35605_v36 }
 0x225   :  { %32804 = vmatpush3.bf16.msra.mxu1 %v35315_v62  ;;  %29700 = vmatprep.mubr.msk.f32.mxu1 %vm34313_vm1, %v39248_v23  ;;  %v27510_v62 = vunpack.c.l.bf16 %v35927_v32  ;;  %v35962_v0 = vpack.c.bf16 %v39209_v44, %v39210_v31  ;;  %v27519_v44 = vunpack.c.h.bf16 %v35973_v51 }
 0x226   :  { %33230 = vmatpush3.bf16.msra.mxu0 %v35492_v35  ;;  %32805 = vmatprep.subr.bf16.mxu1 %v34311_v1 }
 0x227   :  { %33231 = vmatprep.subr.bf16.mxu0 %v34311_v1 }
 0x229   :  { %32807 = vmatpush3.bf16.msra.mxu1 %v35327_v52  ;;  %v35951_v52 = vsub.f32 %v27510_v62, %v27510_v62  ;;  %v35966_v62 = vsub.f32 %v27514_v50, %v27514_v50 }
 0x22a   :  { %33233 = vmatpush3.bf16.msra.mxu0 %v35503_v39  ;;  %32808 = vmatprep.subr.bf16.mxu1 %v34311_v1 }
 0x22b   :  { %33234 = vmatprep.subr.bf16.mxu0 %v34311_v1  ;;  %v39217_v31 = vand.u32 4294901760, %v35951_v52  ;;  %v39213_v17 = vand.u32 4294901760, %v35966_v62 }
 0x22d   :  { %32810 = vmatpush3.bf16.msra.mxu1 %v35341_v57  ;;  %v27518_v57 = vunpack.c.l.bf16 %v35973_v51  ;;  %v35987_v50 = vpack.c.bf16 %v39214_v29, %v39217_v31  ;;  %v39283_v29 = vld [vmem:[#allocation5_spill] sm:$0xff] }
 0x22e   :  { %33236 = vmatpush3.bf16.msra.mxu0 %v35538_v24  ;;  %32811 = vmatprep.subr.bf16.mxu1 %v34311_v1 }
 0x22f   :  { %33237 = vmatprep.subr.bf16.mxu0 %v34311_v1  ;;  %v35994_v60 = vsub.f32 %v27518_v57, %v27518_v57 }
 0x231   :  { %32813 = vmatpush3.bf16.msra.mxu1 %v35358_v13  ;;  %30345 = vmatmul.mubr.f32.vlgmr.msra.gmra.mrb[8].mxu0 %v4387_v49  ;;  %v35996_v13 = vsub.f32 %v27519_v44, %v27519_v44  ;;  %v39212_v49 = vand.u32 4294901760, %v35968_v53  ;;  %v39216_v44 = vand.u32 4294901760, %v35994_v60 }
 0x232   :  { %33239 = vmatpush3.bf16.msra.mxu0 %v35509_v6  ;;  %32814 = vmatprep.subr.bf16.mxu1 %v34311_v1 }
 0x233   :  { %33240 = vmatprep.subr.bf16.mxu0 %v34311_v1  ;;  %30367 = vmatprep.mubr.msk.f32.mxu0 %vm34313_vm1, %v39248_v23  ;;  %v36005_v6 = vpack.c.bf16 %v39212_v49, %v39213_v17  ;;  %v39215_v57 = vand.u32 4294901760, %v35996_v13 }
 0x235   :  { %32816 = vmatpush3.bf16.msra.mxu1 %v35383_v25  ;;  %v36020_v25 = vpack.c.bf16 %v39215_v57, %v39216_v44  ;;  %v2788_v44 = vsub.f32 %v35767_v58, %v2787_v5 }
 0x236   :  { %33242 = vmatpush3.bf16.msra.mxu0 %v35527_v48  ;;  %32907 = vmatprep.subr.bf16.mxu1 %v34311_v1  ;;  %v27268_v48 = vld [vmem:[%s39169_s2 + $0x12] ss:$0 sm:$0xff] }
 0x237   :  { %33243 = vmatprep.subr.bf16.mxu0 %v34311_v1  ;;  %39282 = vst [vmem:[#allocation2_spill] sm:$0xff] %v36020_v25  ;;  %v2789_v5 = vand.u32 4294901760, %v2788_v44  ;;  %v39285_v25 = vand.u32 4294901760, %v35829_v20 }
 0x238   :  { %29701 = vmatmul.mubr.f32.vlgmr.msra.gmra.mrb[0].mxu1 %v35605_v36 }
 0x239   :  { %32909 = vmatpush3.bf16.msra.mxu1 %v35750_v37  ;;  %29861 = vmatprep.mubr.msk.f32.mxu1 %vm34313_vm1, %v39248_v23 }
 0x23a   :  { %33245 = vmatpush3.bf16.msra.mxu0 %v35552_v34  ;;  %32910 = vmatprep.subr.bf16.mxu1 %v34311_v1 }
 0x23b   :  { %33246 = vmatprep.subr.bf16.mxu0 %v34311_v1 }
 0x23c   :  { %v2682_v36 = vpop.f32.mrb[4].mxu0 }
 0x23d   :  { %v33792_v49 = vadd.f32 %v27268_v48, %v2682_v36  ;;  %32912 = vmatpush3.bf16.msra.mxu1 %v35762_v3  ;;  %v29840_v17 = vpop.f32.mrb[5].mxu0  ;;  %v2794_v48 = vsub.f32 %v35769_v42, %v2793_v21  ;;  %v2800_v21 = vsub.f32 %v35778_v19, %v2799_v59  ;;  %v2806_v36 = vsub.f32 %v35780_v8, %v2805_v56 }
 0x23e   :  { %33248 = vmatpush3.bf16.msra.mxu0 %v39283_v29  ;;  %32913 = vmatprep.subr.bf16.mxu1 %v34311_v1  ;;  %v39284_v29 = vld [vmem:[#allocation6_spill] sm:$0xff]  ;;  %v2812_v59 = vsub.f32 %v35804_v46, %v2811_v54  ;;  %v2818_v56 = vsub.f32 %v35806_v30, %v2817_v41  ;;  %v2824_v41 = vsub.f32 %v35829_v20, %v39285_v25 }
 0x23f   :  { %v2686_v57 = vmax.f32 %v33792_v49, 0.0  ;;  %33249 = vmatprep.subr.bf16.mxu0 %v34311_v1 }
 0x240   :  { %v2819_v27 = vand.u32 4294901760, %v2818_v56  ;;  %v5377_v56 = vpop.permute.xlu1 %5376 }
 0x241   :  { %v2708_v34 = vsel %vm47_vm0, %v2686_v57, 0  ;;  %32915 = vmatpush3.bf16.msra.mxu1 %v35776_v10  ;;  %v2795_v57 = vand.u32 4294901760, %v2794_v48  ;;  %v2807_v48 = vand.u32 4294901760, %v2806_v36  ;;  %v39287_v36 = vand.u32 4294901760, %v35850_v18 }
 0x242   :  { %v36040_v17 = vand.u32 4294901760, %v2708_v34  ;;  %33251 = vmatpush3.bf16.msra.mxu0 %v39284_v29  ;;  %32916 = vmatprep.subr.bf16.mxu1 %v34311_v1 }
 0x243   :  { %33252 = vmatprep.subr.bf16.mxu0 %v34311_v1  ;;  %v2836_v25 = vsub.f32 %v35850_v18, %v39287_v36 }
 0x244   :  { %v36046_v49 = vsub.f32 %v2708_v34, %v36040_v17  ;;  %v2801_v34 = vand.u32 4294901760, %v2800_v21 }
 0x245   :  { %32918 = vmatpush3.bf16.msra.mxu1 %v35793_v63  ;;  %30368 = vmatmul.mubr.f32.vlgmr.msra.gmra.mrb[8].mxu0 %v35671_v43 }
 0x246   :  { %v39218_v29 = vand.u32 4294901760, %v36046_v49  ;;  %33254 = vmatpush3.bf16.msra.mxu0 %v35457_v61  ;;  %32919 = vmatprep.subr.bf16.mxu1 %v34311_v1  ;;  %v32923_v61 = vpack.c.bf16 %v2795_v57, %v2789_v5  ;;  %v32926_v54 = vpack.c.bf16 %v2807_v48, %v2801_v34  ;;  %v39286_v5 = vand.u32 4294901760, %v35832_v26 }
 0x247   :  { %33255 = vmatprep.subr.bf16.mxu0 %v34311_v1  ;;  %30390 = vmatprep.mubr.msk.f32.mxu0 %vm34313_vm1, %v39248_v23  ;;  %v32941_v48 = vpack.c.bf16 %v35780_v8, %v35778_v19  ;;  %v32944_v19 = vpack.c.bf16 %v35806_v30, %v35804_v46  ;;  %v32947_v46 = vpack.c.bf16 %v35832_v26, %v35829_v20  ;;  %v39293_v30 = vand.u32 4294901760, %v35951_v52 }
 0x248   :  { %v2778_v44 = vsub.f32 %v36046_v49, %v39218_v29  ;;  %v2813_v29 = vand.u32 4294901760, %v2812_v59  ;;  %v2830_v57 = vsub.f32 %v35832_v26, %v39286_v5  ;;  %v32950_v20 = vpack.c.bf16 %v35852_v9, %v35850_v18 }
 0x249   :  { %32921 = vmatpush3.bf16.msra.mxu1 %v35818_v7 }
 0x24a   :  { %33257 = vmatpush3.bf16.msra.mxu0 %v35468_v33  ;;  %32922 = vmatprep.subr.bf16.mxu1 %v34311_v1  ;;  %v2779_v31 = vand.u32 4294901760, %v2778_v44  ;;  %v32929_v33 = vpack.c.bf16 %v2819_v27, %v2813_v29  ;;  %v2831_v21 = vand.u32 4294901760, %v2830_v57  ;;  %v39288_v44 = vand.u32 4294901760, %v35852_v9 }
 0x24b   :  { %33258 = vmatprep.subr.bf16.mxu0 %v34311_v1  ;;  %v2837_v27 = vand.u32 4294901760, %v2836_v25 }
 0x24c   :  { %29862 = vmatmul.mubr.f32.vlgmr.msra.gmra.mrb[0].mxu1 %v2779_v31  ;;  %v2825_v31 = vand.u32 4294901760, %v2824_v41  ;;  %v2842_v59 = vsub.f32 %v35852_v9, %v39288_v44  ;;  %v5482_v44 = vsub.f32 %v35951_v52, %v39293_v30 }
 0x24d   :  { %32924 = vmatpush3.bf16.msra.mxu1 %v32923_v61  ;;  %29884 = vmatprep.mubr.msk.f32.mxu1 %vm34313_vm1, %v39248_v23  ;;  %v5378_v61 = vsel %vm47_vm0, %v5377_v56, 0 }
 0x24e   :  { %33260 = vmatpush3.bf16.msra.mxu0 %v35492_v35  ;;  %32925 = vmatprep.subr.bf16.mxu1 %v34311_v1  ;;  %v32932_v35 = vpack.c.bf16 %v2831_v21, %v2825_v31  ;;  %v2843_v29 = vand.u32 4294901760, %v2842_v59  ;;  %v36103_v34 = vand.u32 4294901760, %v5378_v61  ;;  %v39292_v21 = vand.u32 4294901760, %v35922_v16 }
 0x24f   :  { %33261 = vmatprep.subr.bf16.mxu0 %v34311_v1  ;;  %v39294_v59 = vand.u32 4294901760, %v35953_v11  ;;  %v5483_v26 = vand.u32 4294901760, %v5482_v44  ;;  %v36191_v44 = vld [vmem:[%s39167_s1 + $0x1b8] sm:$0xff]  }
 0x250   :  { %v5476_v36 = vsub.f32 %v35922_v16, %v39292_v21 }
 0x251   :  { %32927 = vmatpush3.bf16.msra.mxu1 %v32926_v54  ;;  %v39290_v54 = vand.u32 4294901760, %v35912_v14 }
 0x252   :  { %33263 = vmatpush3.bf16.msra.mxu0 %v35503_v39  ;;  %32928 = vmatprep.subr.bf16.mxu1 %v34311_v1  ;;  %v32935_v39 = vpack.c.bf16 %v2843_v29, %v2837_v27  ;;  %v5477_v56 = vand.u32 4294901760, %v5476_v36 }
 0x253   :  { %33264 = vmatprep.subr.bf16.mxu0 %v34311_v1  ;;  %v5464_v41 = vsub.f32 %v35912_v14, %v39290_v54 }
 0x255   :  { %32930 = vmatpush3.bf16.msra.mxu1 %v32929_v33  ;;  %v5465_v57 = vand.u32 4294901760, %v5464_v41  ;;  %v39291_v33 = vand.u32 4294901760, %v35920_v15 }
 0x256   :  { %33266 = vmatpush3.bf16.msra.mxu0 %v35538_v24  ;;  %32931 = vmatprep.subr.bf16.mxu1 %v34311_v1  ;;  %v32938_v24 = vpack.c.bf16 %v35769_v42, %v35767_v58  ;;  %v39289_v58 = vand.u32 4294901760, %v35910_v38 }
 0x257   :  { %33357 = vmatprep.subr.bf16.mxu0 %v34311_v1  ;;  %v5470_v31 = vsub.f32 %v35920_v15, %v39291_v33 }
 0x258   :  { %v5458_v42 = vsub.f32 %v35910_v38, %v39289_v58 }
 0x259   :  { %32933 = vmatpush3.bf16.msra.mxu1 %v32932_v35  ;;  %30391 = vmatmul.mubr.f32.vlgmr.msra.gmra.mrb[8].mxu0 %v35671_v43  ;;  %v36112_v43 = vsub.f32 %v5378_v61, %v36103_v34  ;;  %v5488_v35 = vsub.f32 %v35953_v11, %v39294_v59  ;;  %v5471_v29 = vand.u32 4294901760, %v5470_v31  ;;  %v36179_v31 = vld [vmem:[%s39167_s1 + $0x1b0] sm:$0xff]   ;;  %v27446_v59 = vunpack.c.l.bf16 %v36191_v44 }
 0x25a   :  { %33359 = vmatpush3.bf16.msra.mxu0 %v35892_v55  ;;  %32934 = vmatprep.subr.bf16.mxu1 %v34311_v1  ;;  %v5459_v8 = vand.u32 4294901760, %v5458_v42  ;;  %v39296_v42 = vand.u32 4294901760, %v35968_v53  ;;  %v27442_v21 = vunpack.c.l.bf16 %v36179_v31  ;;  %v27443_v36 = vunpack.c.h.bf16 %v36179_v31 }
 0x25b   :  { %33360 = vmatprep.subr.bf16.mxu0 %v34311_v1  ;;  %30551 = vmatprep.mubr.msk.f32.mxu0 %vm34313_vm1, %v39248_v23  ;;  %v5447_v5 = vand.u32 4294901760, %v36112_v43 }
 0x25c   :  { %v33373_v27 = vpack.c.bf16 %v5465_v57, %v5459_v8  ;;  %v5500_v54 = vsub.f32 %v35968_v53, %v39296_v42  ;;  %v39298_v57 = vand.u32 4294901760, %v35996_v13  ;;  %v33388_v42 = vpack.c.bf16 %v35912_v14, %v35910_v38 }
 0x25d   :  { %32936 = vmatpush3.bf16.msra.mxu1 %v32935_v39  ;;  %v5448_v25 = vsub.f32 %v36112_v43, %v5447_v5  ;;  %v5489_v39 = vand.u32 4294901760, %v5488_v35  ;;  %v27447_v35 = vunpack.c.h.bf16 %v36191_v44 }
 0x25e   :  { %33362 = vmatpush3.bf16.msra.mxu0 %v35903_v45  ;;  %32937 = vmatprep.subr.bf16.mxu1 %v34311_v1  ;;  %v5501_v41 = vand.u32 4294901760, %v5500_v54  ;;  %v5512_v33 = vsub.f32 %v35996_v13, %v39298_v57  ;;  %v36222_v54 = vld [vmem:[%s39167_s1 + $0x1c8] sm:$0xff]   ;;  %v33391_v57 = vpack.c.bf16 %v35922_v16, %v35920_v15 }
 0x25f   :  { %33363 = vmatprep.subr.bf16.mxu0 %v34311_v1  ;;  %v5449_v61 = vand.u32 4294901760, %v5448_v25  ;;  %v33379_v18 = vpack.c.bf16 %v5489_v39, %v5483_v26  ;;  %v36209_v26 = vsub.f32 %v27447_v35, %v27447_v35 }
 0x260   :  { %29885 = vmatmul.mubr.f32.vlgmr.msra.gmra.mrb[0].mxu1 %v36040_v17  ;;  %v5513_v30 = vand.u32 4294901760, %v5512_v33  ;;  %v36247_v33 = vld [vmem:[%s39167_s1 + $0x1d0] sm:$0xff]  }
 0x261   :  { %32939 = vmatpush3.bf16.msra.mxu1 %v32938_v24  ;;  %29907 = vmatprep.mubr.msk.f32.mxu1 %vm34313_vm1, %v39248_v23  ;;  %v33376_v24 = vpack.c.bf16 %v5477_v56, %v5471_v29  ;;  %v36198_v29 = vsub.f32 %v27443_v36, %v27443_v36  ;;  %v27458_v15 = vunpack.c.l.bf16 %v36247_v33 }
 0x262   :  { %33365 = vmatpush3.bf16.msra.mxu0 %v35927_v32  ;;  %32940 = vmatprep.subr.bf16.mxu1 %v34311_v1 }
 0x263   :  { %33366 = vmatprep.subr.bf16.mxu0 %v34311_v1 }
 0x265   :  { %32942 = vmatpush3.bf16.msra.mxu1 %v32941_v48  ;;  %v39295_v48 = vand.u32 4294901760, %v35966_v62 }
 0x266   :  { %33368 = vmatpush3.bf16.msra.mxu0 %v35938_v40  ;;  %32943 = vmatprep.subr.bf16.mxu1 %v34311_v1 }
 0x267   :  { %33369 = vmatprep.subr.bf16.mxu0 %v34311_v1  ;;  %v5494_v58 = vsub.f32 %v35966_v62, %v39295_v48 }
 0x269   :  { %32945 = vmatpush3.bf16.msra.mxu1 %v32944_v19  ;;  %v5495_v9 = vand.u32 4294901760, %v5494_v58  ;;  %v39297_v19 = vand.u32 4294901760, %v35994_v60  ;;  %v3865_v58 = vand.u32 4294901760, %v36198_v29 }
 0x26a   :  { %33371 = vmatpush3.bf16.msra.mxu0 %v35973_v51  ;;  %32946 = vmatprep.subr.bf16.mxu1 %v34311_v1 }
 0x26b   :  { %33372 = vmatprep.subr.bf16.mxu0 %v34311_v1  ;;  %v5506_v8 = vsub.f32 %v35994_v60, %v39297_v19  ;;  %v33382_v25 = vpack.c.bf16 %v5501_v41, %v5495_v9  ;;  %v27455_v9 = vunpack.c.h.bf16 %v36222_v54 }
 0x26d   :  { %32948 = vmatpush3.bf16.msra.mxu1 %v32947_v46  ;;  %30552 = vmatmul.mubr.f32.vlgmr.msra.gmra.mrb[10].mxu0 %v5449_v61  ;;  %v5507_v46 = vand.u32 4294901760, %v5506_v8  ;;  %v36205_v61 = vld [vmem:[%s39167_s1 + $0x1c0] sm:$0xff]   ;;  %v3877_v8 = vand.u32 4294901760, %v36209_v26  ;;  %v36261_v16 = vsub.f32 %v27455_v9, %v27455_v9 }
 0x26e   :  { %33374 = vmatpush3.bf16.msra.mxu0 %v33373_v27  ;;  %32949 = vmatprep.subr.bf16.mxu1 %v34311_v1  ;;  %v36196_v27 = vsub.f32 %v27442_v21, %v27442_v21  ;;  %v27450_v39 = vunpack.c.l.bf16 %v36205_v61 }
 0x26f   :  { %33375 = vmatprep.subr.bf16.mxu0 %v34311_v1  ;;  %30574 = vmatprep.mubr.msk.f32.mxu0 %vm34313_vm1, %v39248_v23  ;;  %v33385_v56 = vpack.c.bf16 %v5513_v30, %v5507_v46 }
 0x270   :  { %v3859_v48 = vand.u32 4294901760, %v36196_v27  ;;  %v36233_v19 = vsub.f32 %v27450_v39, %v27450_v39  ;;  %v36279_v39 = vsub.f32 %v27458_v15, %v27458_v15 }
 0x271   :  { %32951 = vmatpush3.bf16.msra.mxu1 %v32950_v20  ;;  %v36207_v20 = vsub.f32 %v27446_v59, %v27446_v59  ;;  %v33394_v59 = vpack.c.bf16 %v35953_v11, %v35951_v52  ;;  %v33397_v52 = vpack.c.bf16 %v35968_v53, %v35966_v62  ;;  %v33400_v62 = vpack.c.bf16 %v35996_v13, %v35994_v60  ;;  %v36332_v60 = vld [vmem:[%s39167_s1 + $0xf8] sm:$0xff]  }
 0x272   :  { %33377 = vmatpush3.bf16.msra.mxu0 %v33376_v24  ;;  %32952 = vmatprep.subr.bf16.mxu1 %v34311_v1  ;;  %v27451_v24 = vunpack.c.h.bf16 %v36205_v61  ;;  %v36231_v41 = vpack.c.bf16 %v3865_v58, %v3859_v48  ;;  %v3883_v46 = vand.u32 4294901760, %v36233_v19  ;;  %v27546_v13 = vunpack.c.l.bf16 %v36332_v60 }
 0x273   :  { %33378 = vmatprep.subr.bf16.mxu0 %v34311_v1  ;;  %v3871_v14 = vand.u32 4294901760, %v36207_v20  ;;  %v27547_v9 = vunpack.c.h.bf16 %v36332_v60 }
 0x274   :  { %29908 = vmatmul.mubr.f32.vlgmr.msra.gmra.mrb[0].mxu1 %v36046_v49  ;;  %v36235_v38 = vsub.f32 %v27451_v24, %v27451_v24 }
 0x275   :  { %32954 = vmatpush3.bf16.msra.mxu1 %v35750_v37  ;;  %29930 = vmatprep.mubr.msk.f32.mxu1 %vm34313_vm1, %v39248_v23  ;;  %v36253_v21 = vpack.c.bf16 %v3877_v8, %v3871_v14 }
 0x276   :  { %33380 = vmatpush3.bf16.msra.mxu0 %v33379_v18  ;;  %32955 = vmatprep.subr.bf16.mxu1 %v34311_v1  ;;  %v27454_v18 = vunpack.c.l.bf16 %v36222_v54  ;;  %v3889_v30 = vand.u32 4294901760, %v36235_v38 }
 0x277   :  { %33381 = vmatprep.subr.bf16.mxu0 %v34311_v1 }
 0x278   :  { %v36258_v36 = vsub.f32 %v27454_v18, %v27454_v18  ;;  %v36274_v35 = vpack.c.bf16 %v3889_v30, %v3883_v46  ;;  %v39222_v18 = vand.u32 4294901760, %v36261_v16 }
 0x279   :  { %32957 = vmatpush3.bf16.msra.mxu1 %v35762_v3 }
 0x27a   :  { %33383 = vmatpush3.bf16.msra.mxu0 %v33382_v25  ;;  %32958 = vmatprep.subr.bf16.mxu1 %v34311_v1  ;;  %v27459_v25 = vunpack.c.h.bf16 %v36247_v33 }
 0x27b   :  { %33384 = vmatprep.subr.bf16.mxu0 %v34311_v1 }
 0x27c   :  { %v36281_v24 = vsub.f32 %v27459_v25, %v27459_v25  ;;  %v36351_v25 = vsub.f32 %v27547_v9, %v27547_v9 }
 0x27d   :  { %32960 = vmatpush3.bf16.msra.mxu1 %v35776_v10 }
 0x27e   :  { %33386 = vmatpush3.bf16.msra.mxu0 %v33385_v56  ;;  %32961 = vmatprep.subr.bf16.mxu1 %v34311_v1  ;;  %v39299_v56 = vand.u32 4294901760, %v36046_v49  ;;  %v39221_v49 = vand.u32 4294901760, %v36279_v39 }
 0x27f   :  { %33387 = vmatprep.subr.bf16.mxu0 %v34311_v1 }
 0x281   :  { %32963 = vmatpush3.bf16.msra.mxu1 %v35793_v63  ;;  %30575 = vmatmul.mubr.f32.vlgmr.msra.gmra.mrb[10].mxu0 %v36103_v34 }
 0x282   :  { %33389 = vmatpush3.bf16.msra.mxu0 %v33388_v42  ;;  %32964 = vmatprep.subr.bf16.mxu1 %v34311_v1  ;;  %v39227_v42 = vand.u32 4294901760, %v36258_v36 }
 0x283   :  { %33390 = vmatprep.subr.bf16.mxu0 %v34311_v1  ;;  %30597 = vmatprep.mubr.msk.f32.mxu0 %vm34313_vm1, %v39248_v23 }
 0x284   :  { %v36295_v11 = vpack.c.bf16 %v39222_v18, %v39227_v42  ;;  %v39225_v18 = vand.u32 4294901760, %v36351_v25 }
 0x285   :  { %32966 = vmatpush3.bf16.msra.mxu1 %v35818_v7 }
 0x286   :  { %33392 = vmatpush3.bf16.msra.mxu0 %v33391_v57  ;;  %32967 = vmatprep.subr.bf16.mxu1 %v34311_v1 }
 0x287   :  { %33393 = vmatprep.subr.bf16.mxu0 %v34311_v1 }
 0x288   :  { %29931 = vmatmul.mubr.f32.vlgmr.msra.gmra.mrb[0].mxu1 %v39299_v56 }
 0x289   :  { %32969 = vmatpush3.bf16.msra.mxu1 %v35802_v2  ;;  %29953 = vmatprep.mubr.msk.f32.mxu1 %vm34313_vm1, %v39248_v23  ;;  %v39220_v2 = vand.u32 4294901760, %v36281_v24 }
 0x28a   :  { %33395 = vmatpush3.bf16.msra.mxu0 %v33394_v59  ;;  %32970 = vmatprep.subr.bf16.mxu1 %v34311_v1  ;;  %v36356_v59 = vld [vmem:[%s39167_s1 + $0x100] sm:$0xff]  }
 0x28b   :  { %33396 = vmatprep.subr.bf16.mxu0 %v34311_v1  ;;  %v36308_v53 = vpack.c.bf16 %v39220_v2, %v39221_v49  ;;  %v27551_v56 = vunpack.c.h.bf16 %v36356_v59 }
 0x28d   :  { %32972 = vmatpush3.bf16.msra.mxu1 %v35824_v4  ;;  %v36321_v4 = vld [vmem:[%s39167_s1 + $0xf0] sm:$0xff]   ;;  %v36382_v2 = vsub.f32 %v27551_v56, %v27551_v56 }
 0x28e   :  { %33398 = vmatpush3.bf16.msra.mxu0 %v33397_v52  ;;  %32973 = vmatprep.subr.bf16.mxu1 %v34311_v1 }
 0x28f   :  { %33399 = vmatprep.subr.bf16.mxu0 %v34311_v1  ;;  %v39232_v42 = vand.u32 4294901760, %v36382_v2 }
 0x291   :  { %32975 = vmatpush3.bf16.msra.mxu1 %v35845_v12  ;;  %v27542_v12 = vunpack.c.l.bf16 %v36321_v4 }
 0x292   :  { %33401 = vmatpush3.bf16.msra.mxu0 %v33400_v62  ;;  %32976 = vmatprep.subr.bf16.mxu1 %v34311_v1 }
 0x293   :  { %33402 = vmatprep.subr.bf16.mxu0 %v34311_v1  ;;  %v36339_v57 = vsub.f32 %v27542_v12, %v27542_v12  ;;  %v36367_v12 = vld [vmem:[%s39167_s1 + $0x108] sm:$0xff]  }
 0x294   :  { %v27555_v9 = vunpack.c.h.bf16 %v36367_v12 }
 0x295   :  { %32978 = vmatpush3.bf16.msra.mxu1 %v35866_v22  ;;  %30598 = vmatmul.mubr.f32.vlgmr.msra.gmra.mrb[10].mxu0 %v36112_v43  ;;  %v27543_v22 = vunpack.c.h.bf16 %v36321_v4  ;;  %v39224_v52 = vand.u32 4294901760, %v36339_v57 }
 0x296   :  { %33404 = vmatpush3.bf16.msra.mxu0 %v35892_v55  ;;  %32979 = vmatprep.subr.bf16.mxu1 %v34311_v1  ;;  %v36397_v56 = vsub.f32 %v27555_v9, %v27555_v9 }
 0x297   :  { %33405 = vmatprep.subr.bf16.mxu0 %v34311_v1  ;;  %30620 = vmatprep.mubr.msk.f32.mxu0 %vm34313_vm1, %v39248_v23  ;;  %v36341_v15 = vsub.f32 %v27543_v22, %v27543_v22 }
 0x299   :  { %32981 = vmatpush3.bf16.msra.mxu1 %v35879_v47  ;;  %v36349_v47 = vsub.f32 %v27546_v13, %v27546_v13  ;;  %v39223_v62 = vand.u32 4294901760, %v36341_v15  ;;  %v27554_v13 = vunpack.c.l.bf16 %v36367_v12 }
 0x29a   :  { %33407 = vmatpush3.bf16.msra.mxu0 %v35903_v45  ;;  %32982 = vmatprep.subr.bf16.mxu1 %v34311_v1 }
 0x29b   :  { %33408 = vmatprep.subr.bf16.mxu0 %v34311_v1  ;;  %v36373_v22 = vpack.c.bf16 %v39223_v62, %v39224_v52  ;;  %v39226_v49 = vand.u32 4294901760, %v36349_v47  ;;  %v36402_v52 = vld [vmem:[%s39167_s1 + $0x110] sm:$0xff]  }
 0x29c   :  { %29954 = vmatmul.mubr.f32.vlgmr.msra.gmra.mrb[0].mxu1 %v36040_v17 }
 0x29d   :  { %32984 = vmatpush3.bf16.msra.mxu1 %v35750_v37  ;;  %29976 = vmatprep.mubr.msk.f32.mxu1 %vm34313_vm1, %v39248_v23  ;;  %v27550_v37 = vunpack.c.l.bf16 %v36356_v59  ;;  %v36391_v62 = vpack.c.bf16 %v39225_v18, %v39226_v49  ;;  %v27559_v18 = vunpack.c.h.bf16 %v36402_v52 }
 0x29e   :  { %33410 = vmatpush3.bf16.msra.mxu0 %v35927_v32  ;;  %32985 = vmatprep.subr.bf16.mxu1 %v34311_v1 }
 0x29f   :  { %33411 = vmatprep.subr.bf16.mxu0 %v34311_v1 }
 0x2a1   :  { %32987 = vmatpush3.bf16.msra.mxu1 %v35762_v3  ;;  %v36380_v3 = vsub.f32 %v27550_v37, %v27550_v37  ;;  %v36395_v37 = vsub.f32 %v27554_v13, %v27554_v13 }
 0x2a2   :  { %33413 = vmatpush3.bf16.msra.mxu0 %v35938_v40  ;;  %32988 = vmatprep.subr.bf16.mxu1 %v34311_v1 }
 0x2a3   :  { %33414 = vmatprep.subr.bf16.mxu0 %v34311_v1  ;;  %v39234_v49 = vand.u32 4294901760, %v36380_v3  ;;  %v39229_v43 = vand.u32 4294901760, %v36395_v37 }
 0x2a5   :  { %32990 = vmatpush3.bf16.msra.mxu1 %v35776_v10  ;;  %v27558_v10 = vunpack.c.l.bf16 %v36402_v52  ;;  %v36416_v13 = vpack.c.bf16 %v39232_v42, %v39234_v49 }
 0x2a6   :  { %33416 = vmatpush3.bf16.msra.mxu0 %v35973_v51  ;;  %32991 = vmatprep.subr.bf16.mxu1 %v34311_v1 }
 0x2a7   :  { %33417 = vmatprep.subr.bf16.mxu0 %v34311_v1  ;;  %v36423_v9 = vsub.f32 %v27558_v10, %v27558_v10 }
 0x2a9   :  { %32993 = vmatpush3.bf16.msra.mxu1 %v35793_v63  ;;  %30621 = vmatmul.mubr.f32.vlgmr.msra.gmra.mrb[10].mxu0 %v5447_v5  ;;  %v36425_v63 = vsub.f32 %v27559_v18, %v27559_v18  ;;  %v39228_v5 = vand.u32 4294901760, %v36397_v56  ;;  %v39231_v18 = vand.u32 4294901760, %v36423_v9 }
 0x2aa   :  { %33419 = vmatpush3.bf16.msra.mxu0 %v35944_v28  ;;  %32994 = vmatprep.subr.bf16.mxu1 %v34311_v1 }
 0x2ab   :  { %33420 = vmatprep.subr.bf16.mxu0 %v34311_v1  ;;  %30643 = vmatprep.mubr.msk.f32.mxu0 %vm34313_vm1, %v39248_v23  ;;  %v36434_v28 = vpack.c.bf16 %v39228_v5, %v39229_v43  ;;  %v39230_v10 = vand.u32 4294901760, %v36425_v63 }
 0x2ad   :  { %32996 = vmatpush3.bf16.msra.mxu1 %v35818_v7  ;;  %v36449_v7 = vpack.c.bf16 %v39230_v10, %v39231_v18  ;;  %v3860_v18 = vsub.f32 %v36196_v27, %v3859_v48 }
 0x2ae   :  { %33422 = vmatpush3.bf16.msra.mxu0 %v35962_v0  ;;  %33087 = vmatprep.subr.bf16.mxu1 %v34311_v1  ;;  %v27269_v0 = vld [vmem:[%s39169_s2 + $0x13] ss:$0 sm:$0xff] }
 0x2af   :  { %33423 = vmatprep.subr.bf16.mxu0 %v34311_v1  ;;  %39300 = vst [vmem:[#allocation3_spill] sm:$0xff] %v36449_v7  ;;  %v3861_v48 = vand.u32 4294901760, %v3860_v18  ;;  %v39302_v7 = vand.u32 4294901760, %v36258_v36 }
 0x2b0   :  { %29977 = vmatmul.mubr.f32.vlgmr.msra.gmra.mrb[0].mxu1 %v36040_v17 }
 0x2b1   :  { %33089 = vmatpush3.bf16.msra.mxu1 %v36179_v31  ;;  %30137 = vmatprep.mubr.msk.f32.mxu1 %vm34313_vm1, %v39248_v23 }
 0x2b2   :  { %33425 = vmatpush3.bf16.msra.mxu0 %v35987_v50  ;;  %33090 = vmatprep.subr.bf16.mxu1 %v34311_v1 }
 0x2b3   :  { %33426 = vmatprep.subr.bf16.mxu0 %v34311_v1 }
 0x2b4   :  { %v3754_v17 = vpop.f32.mrb[6].mxu0 }
 0x2b5   :  { %v33793_v5 = vadd.f32 %v27269_v0, %v3754_v17  ;;  %33092 = vmatpush3.bf16.msra.mxu1 %v36191_v44  ;;  %v30116_v43 = vpop.f32.mrb[7].mxu0  ;;  %v3866_v0 = vsub.f32 %v36198_v29, %v3865_v58  ;;  %v3872_v58 = vsub.f32 %v36207_v20, %v3871_v14  ;;  %v3878_v17 = vsub.f32 %v36209_v26, %v3877_v8 }
 0x2b6   :  { %33428 = vmatpush3.bf16.msra.mxu0 %v36005_v6  ;;  %33093 = vmatprep.subr.bf16.mxu1 %v34311_v1  ;;  %v39301_v6 = vld [vmem:[#allocation2_spill] sm:$0xff]  ;;  %v3884_v14 = vsub.f32 %v36233_v19, %v3883_v46  ;;  %v3890_v8 = vsub.f32 %v36235_v38, %v3889_v30  ;;  %v3896_v30 = vsub.f32 %v36258_v36, %v39302_v7 }
 0x2b7   :  { %v3758_v10 = vmax.f32 %v33793_v5, 0.0  ;;  %33429 = vmatprep.subr.bf16.mxu0 %v34311_v1 }
 0x2b8   :  { %v3891_v49 = vand.u32 4294901760, %v3890_v8  ;;  %v6445_v8 = vpop.permute.xlu0 %6444 }
 0x2b9   :  { %v3780_v50 = vsel %vm47_vm0, %v3758_v10, 0  ;;  %33095 = vmatpush3.bf16.msra.mxu1 %v36205_v61  ;;  %v3867_v10 = vand.u32 4294901760, %v3866_v0  ;;  %v3879_v0 = vand.u32 4294901760, %v3878_v17  ;;  %v39304_v17 = vand.u32 4294901760, %v36279_v39 }
 0x2ba   :  { %v36469_v43 = vand.u32 4294901760, %v3780_v50  ;;  %33431 = vmatpush3.bf16.msra.mxu0 %v39301_v6  ;;  %33096 = vmatprep.subr.bf16.mxu1 %v34311_v1 }
 0x2bb   :  { %33432 = vmatprep.subr.bf16.mxu0 %v34311_v1  ;;  %v3908_v7 = vsub.f32 %v36279_v39, %v39304_v17 }
 0x2bc   :  { %v36475_v5 = vsub.f32 %v3780_v50, %v36469_v43  ;;  %v3873_v50 = vand.u32 4294901760, %v3872_v58 }
 0x2bd   :  { %33098 = vmatpush3.bf16.msra.mxu1 %v36222_v54  ;;  %30644 = vmatmul.mubr.f32.vlgmr.msra.gmra.mrb[10].mxu0 %v36103_v34 }
 0x2be   :  { %v39233_v6 = vand.u32 4294901760, %v36475_v5  ;;  %33434 = vmatpush3.bf16.msra.mxu0 %v35892_v55  ;;  %33099 = vmatprep.subr.bf16.mxu1 %v34311_v1  ;;  %v33103_v55 = vpack.c.bf16 %v3867_v10, %v3861_v48  ;;  %v33106_v46 = vpack.c.bf16 %v3879_v0, %v3873_v50  ;;  %v39303_v48 = vand.u32 4294901760, %v36261_v16 }
 0x2bf   :  { %33435 = vmatprep.subr.bf16.mxu0 %v34311_v1  ;;  %30666 = vmatprep.mubr.msk.f32.mxu0 %vm34313_vm1, %v39248_v23 }
 0x2c0   :  { %v3850_v18 = vsub.f32 %v36475_v5, %v39233_v6  ;;  %v3885_v6 = vand.u32 4294901760, %v3884_v14  ;;  %v3902_v10 = vsub.f32 %v36261_v16, %v39303_v48  ;;  %v39307_v48 = vand.u32 4294901760, %v36341_v15 }
 0x2c1   :  { %33101 = vmatpush3.bf16.msra.mxu1 %v36247_v33 }
 0x2c2   :  { %33437 = vmatpush3.bf16.msra.mxu0 %v35903_v45  ;;  %33102 = vmatprep.subr.bf16.mxu1 %v34311_v1  ;;  %v3851_v42 = vand.u32 4294901760, %v3850_v18  ;;  %v33109_v45 = vpack.c.bf16 %v3891_v49, %v3885_v6  ;;  %v3903_v58 = vand.u32 4294901760, %v3902_v10  ;;  %v39305_v18 = vand.u32 4294901760, %v36281_v24 }
 0x2c3   :  { %33438 = vmatprep.subr.bf16.mxu0 %v34311_v1  ;;  %v3909_v6 = vand.u32 4294901760, %v3908_v7  ;;  %v6536_v10 = vsub.f32 %v36341_v15, %v39307_v48  ;;  %v39309_v7 = vand.u32 4294901760, %v36351_v25 }
 0x2c4   :  { %30138 = vmatmul.mubr.f32.vlgmr.msra.gmra.mrb[0].mxu1 %v3851_v42  ;;  %v3897_v42 = vand.u32 4294901760, %v3896_v30  ;;  %v3914_v14 = vsub.f32 %v36281_v24, %v39305_v18  ;;  %v33121_v30 = vpack.c.bf16 %v36209_v26, %v36207_v20  ;;  %v33124_v20 = vpack.c.bf16 %v36235_v38, %v36233_v19 }
 0x2c5   :  { %33104 = vmatpush3.bf16.msra.mxu1 %v33103_v55  ;;  %30160 = vmatprep.mubr.msk.f32.mxu1 %vm34313_vm1, %v39248_v23  ;;  %v6548_v18 = vsub.f32 %v36351_v25, %v39309_v7  ;;  %v33127_v38 = vpack.c.bf16 %v36261_v16, %v36258_v36  ;;  %v33130_v36 = vpack.c.bf16 %v36281_v24, %v36279_v39 }
 0x2c6   :  { %33440 = vmatpush3.bf16.msra.mxu0 %v35927_v32  ;;  %33105 = vmatprep.subr.bf16.mxu1 %v34311_v1  ;;  %v6447_v32 = vpop.permute.xlu1 %6446  ;;  %v33112_v49 = vpack.c.bf16 %v3903_v58, %v3897_v42  ;;  %v3915_v55 = vand.u32 4294901760, %v3914_v14  ;;  %v6537_v42 = vand.u32 4294901760, %v6536_v10  ;;  %v39308_v58 = vand.u32 4294901760, %v36349_v47 }
 0x2c7   :  { %33441 = vmatprep.subr.bf16.mxu0 %v34311_v1  ;;  %v6449_v50 = vsel %vm6448_vm5, %v6445_v8, %v6447_v32  ;;  %v39310_v14 = vand.u32 4294901760, %v36380_v3  ;;  %v39311_v8 = vand.u32 4294901760, %v36382_v2 }
 0x2c8   :  { %v33115_v0 = vpack.c.bf16 %v3915_v55, %v3909_v6  ;;  %v6542_v17 = vsub.f32 %v36349_v47, %v39308_v58 }
 0x2c9   :  { %33107 = vmatpush3.bf16.msra.mxu1 %v33106_v46  ;;  %v6554_v32 = vsub.f32 %v36380_v3, %v39310_v14 }
 0x2ca   :  { %33443 = vmatpush3.bf16.msra.mxu0 %v35938_v40  ;;  %33108 = vmatprep.subr.bf16.mxu1 %v34311_v1  ;;  %v6450_v40 = vsel %vm47_vm0, %v6449_v50, 0  ;;  %v6543_v55 = vand.u32 4294901760, %v6542_v17  ;;  %v6549_v50 = vand.u32 4294901760, %v6548_v18  ;;  %v36608_v17 = vld [vmem:[%s39167_s1 + $0x1d8] sm:$0xff]  }
 0x2cb   :  { %33444 = vmatprep.subr.bf16.mxu0 %v34311_v1  ;;  %v36531_v46 = vand.u32 4294901760, %v6450_v40  ;;  %v6555_v16 = vand.u32 4294901760, %v6554_v32  ;;  %v27482_v7 = vunpack.c.l.bf16 %v36608_v17  ;;  %v27483_v18 = vunpack.c.h.bf16 %v36608_v17  ;;  %v36620_v32 = vld [vmem:[%s39167_s1 + $0x1e0] sm:$0xff]  }
 0x2cd   :  { %33110 = vmatpush3.bf16.msra.mxu1 %v33109_v45 }
 0x2ce   :  { %33446 = vmatpush3.bf16.msra.mxu0 %v35973_v51  ;;  %33111 = vmatprep.subr.bf16.mxu1 %v34311_v1  ;;  %v33118_v51 = vpack.c.bf16 %v36198_v29, %v36196_v27  ;;  %v39306_v27 = vand.u32 4294901760, %v36339_v57 }
 0x2cf   :  { %33537 = vmatprep.subr.bf16.mxu0 %v34311_v1 }
 0x2d0   :  { %v6530_v29 = vsub.f32 %v36339_v57, %v39306_v27 }
 0x2d1   :  { %33113 = vmatpush3.bf16.msra.mxu1 %v33112_v49  ;;  %30667 = vmatmul.mubr.f32.vlgmr.msra.gmra.mrb[10].mxu0 %v36103_v34  ;;  %v36541_v34 = vsub.f32 %v6450_v40, %v36531_v46  ;;  %v6560_v49 = vsub.f32 %v36382_v2, %v39311_v8  ;;  %v27486_v8 = vunpack.c.l.bf16 %v36620_v32 }
 0x2d2   :  { %33539 = vmatpush3.bf16.msra.mxu0 %v36321_v4  ;;  %33114 = vmatprep.subr.bf16.mxu1 %v34311_v1  ;;  %v6531_v26 = vand.u32 4294901760, %v6530_v29  ;;  %v39313_v29 = vand.u32 4294901760, %v36397_v56 }
 0x2d3   :  { %33540 = vmatprep.subr.bf16.mxu0 %v34311_v1  ;;  %30827 = vmatprep.mubr.msk.f32.mxu0 %vm34313_vm1, %v39248_v23  ;;  %v6519_v45 = vand.u32 4294901760, %v36541_v34 }
 0x2d4   :  { %v33553_v6 = vpack.c.bf16 %v6537_v42, %v6531_v26  ;;  %v6572_v48 = vsub.f32 %v36397_v56, %v39313_v29  ;;  %v39315_v42 = vand.u32 4294901760, %v36425_v63  ;;  %v33568_v29 = vpack.c.bf16 %v36341_v15, %v36339_v57 }
 0x2d5   :  { %33116 = vmatpush3.bf16.msra.mxu1 %v33115_v0  ;;  %v6520_v19 = vsub.f32 %v36541_v34, %v6519_v45  ;;  %v6561_v0 = vand.u32 4294901760, %v6560_v49  ;;  %v27487_v49 = vunpack.c.h.bf16 %v36620_v32 }
 0x2d6   :  { %33542 = vmatpush3.bf16.msra.mxu0 %v36332_v60  ;;  %33117 = vmatprep.subr.bf16.mxu1 %v34311_v1  ;;  %v6573_v10 = vand.u32 4294901760, %v6572_v48  ;;  %v6584_v58 = vsub.f32 %v36425_v63, %v39315_v42  ;;  %v36651_v48 = vld [vmem:[%s39167_s1 + $0x1f0] sm:$0xff]   ;;  %v33571_v42 = vpack.c.bf16 %v36351_v25, %v36349_v47 }
 0x2d7   :  { %33543 = vmatprep.subr.bf16.mxu0 %v34311_v1  ;;  %v6521_v40 = vand.u32 4294901760, %v6520_v19  ;;  %v33559_v39 = vpack.c.bf16 %v6561_v0, %v6555_v16  ;;  %v36638_v16 = vsub.f32 %v27487_v49, %v27487_v49 }
 0x2d8   :  { %30161 = vmatmul.mubr.f32.vlgmr.msra.gmra.mrb[0].mxu1 %v36469_v43  ;;  %v6585_v14 = vand.u32 4294901760, %v6584_v58  ;;  %v36676_v58 = vld [vmem:[%s39167_s1 + $0x1f8] sm:$0xff]  }
 0x2d9   :  { %33119 = vmatpush3.bf16.msra.mxu1 %v33118_v51  ;;  %30183 = vmatprep.mubr.msk.f32.mxu1 %vm34313_vm1, %v39248_v23  ;;  %v33556_v51 = vpack.c.bf16 %v6549_v50, %v6543_v55  ;;  %v36627_v55 = vsub.f32 %v27483_v18, %v27483_v18  ;;  %v27498_v47 = vunpack.c.l.bf16 %v36676_v58 }
 0x2da   :  { %33545 = vmatpush3.bf16.msra.mxu0 %v36356_v59  ;;  %33120 = vmatprep.subr.bf16.mxu1 %v34311_v1 }
 0x2db   :  { %33546 = vmatprep.subr.bf16.mxu0 %v34311_v1 }
 0x2dd   :  { %33122 = vmatpush3.bf16.msra.mxu1 %v33121_v30  ;;  %v39312_v30 = vand.u32 4294901760, %v36395_v37 }
 0x2de   :  { %33548 = vmatpush3.bf16.msra.mxu0 %v36367_v12  ;;  %33123 = vmatprep.subr.bf16.mxu1 %v34311_v1 }
 0x2df   :  { %33549 = vmatprep.subr.bf16.mxu0 %v34311_v1  ;;  %v6566_v27 = vsub.f32 %v36395_v37, %v39312_v30 }
 0x2e1   :  { %33125 = vmatpush3.bf16.msra.mxu1 %v33124_v20  ;;  %v6567_v24 = vand.u32 4294901760, %v6566_v27  ;;  %v39314_v20 = vand.u32 4294901760, %v36423_v9  ;;  %v4930_v27 = vand.u32 4294901760, %v36627_v55 }
 0x2e2   :  { %33551 = vmatpush3.bf16.msra.mxu0 %v36402_v52  ;;  %33126 = vmatprep.subr.bf16.mxu1 %v34311_v1 }
 0x2e3   :  { %33552 = vmatprep.subr.bf16.mxu0 %v34311_v1  ;;  %v6578_v26 = vsub.f32 %v36423_v9, %v39314_v20  ;;  %v33562_v19 = vpack.c.bf16 %v6573_v10, %v6567_v24  ;;  %v27495_v24 = vunpack.c.h.bf16 %v36651_v48 }
 0x2e5   :  { %33128 = vmatpush3.bf16.msra.mxu1 %v33127_v38  ;;  %30828 = vmatmul.mubr.f32.vlgmr.msra.gmra.mrb[12].mxu0 %v6521_v40  ;;  %v6579_v38 = vand.u32 4294901760, %v6578_v26  ;;  %v36634_v40 = vld [vmem:[%s39167_s1 + $0x1e8] sm:$0xff]   ;;  %v4942_v26 = vand.u32 4294901760, %v36638_v16  ;;  %v36690_v25 = vsub.f32 %v27495_v24, %v27495_v24 }
 0x2e6   :  { %33554 = vmatpush3.bf16.msra.mxu0 %v33553_v6  ;;  %33129 = vmatprep.subr.bf16.mxu1 %v34311_v1  ;;  %v36625_v6 = vsub.f32 %v27482_v7, %v27482_v7  ;;  %v27490_v0 = vunpack.c.l.bf16 %v36634_v40 }
 0x2e7   :  { %33555 = vmatprep.subr.bf16.mxu0 %v34311_v1  ;;  %30850 = vmatprep.mubr.msk.f32.mxu0 %vm34313_vm1, %v39248_v23  ;;  %v33565_v50 = vpack.c.bf16 %v6585_v14, %v6579_v38 }
 0x2e8   :  { %v4924_v30 = vand.u32 4294901760, %v36625_v6  ;;  %v36662_v20 = vsub.f32 %v27490_v0, %v27490_v0  ;;  %v36708_v0 = vsub.f32 %v27498_v47, %v27498_v47 }
 0x2e9   :  { %33131 = vmatpush3.bf16.msra.mxu1 %v33130_v36  ;;  %v36636_v36 = vsub.f32 %v27486_v8, %v27486_v8  ;;  %v33574_v8 = vpack.c.bf16 %v36382_v2, %v36380_v3  ;;  %v33577_v2 = vpack.c.bf16 %v36397_v56, %v36395_v37  ;;  %v33580_v37 = vpack.c.bf16 %v36425_v63, %v36423_v9 }
 0x2ea   :  { %33557 = vmatpush3.bf16.msra.mxu0 %v33556_v51  ;;  %33132 = vmatprep.subr.bf16.mxu1 %v34311_v1  ;;  %v27491_v51 = vunpack.c.h.bf16 %v36634_v40  ;;  %v36660_v10 = vpack.c.bf16 %v4930_v27, %v4924_v30  ;;  %v4948_v38 = vand.u32 4294901760, %v36662_v20 }
 0x2eb   :  { %33558 = vmatprep.subr.bf16.mxu0 %v34311_v1  ;;  %v4936_v15 = vand.u32 4294901760, %v36636_v36 }
 0x2ec   :  { %30184 = vmatmul.mubr.f32.vlgmr.msra.gmra.mrb[0].mxu1 %v36475_v5  ;;  %v36664_v57 = vsub.f32 %v27491_v51, %v27491_v51 }
 0x2ed   :  { %33134 = vmatpush3.bf16.msra.mxu1 %v36179_v31  ;;  %30206 = vmatprep.mubr.msk.f32.mxu1 %vm34313_vm1, %v39248_v23  ;;  %v36682_v7 = vpack.c.bf16 %v4942_v26, %v4936_v15  ;;  %v4937_v63 = vsub.f32 %v36636_v36, %v4936_v15 }
 0x2ee   :  { %33560 = vmatpush3.bf16.msra.mxu0 %v33559_v39  ;;  %33135 = vmatprep.subr.bf16.mxu1 %v34311_v1  ;;  %v27494_v39 = vunpack.c.l.bf16 %v36651_v48  ;;  %v4954_v14 = vand.u32 4294901760, %v36664_v57 }
 0x2ef   :  { %33561 = vmatprep.subr.bf16.mxu0 %v34311_v1 }
 0x2f0   :  { %v36687_v18 = vsub.f32 %v27494_v39, %v27494_v39  ;;  %v36703_v49 = vpack.c.bf16 %v4954_v14, %v4948_v38  ;;  %v4966_v39 = vand.u32 4294901760, %v36690_v25 }
 0x2f1   :  { %33137 = vmatpush3.bf16.msra.mxu1 %v36191_v44 }
 0x2f2   :  { %33563 = vmatpush3.bf16.msra.mxu0 %v33562_v19  ;;  %33138 = vmatprep.subr.bf16.mxu1 %v34311_v1  ;;  %v27499_v19 = vunpack.c.h.bf16 %v36676_v58 }
 0x2f3   :  { %33564 = vmatprep.subr.bf16.mxu0 %v34311_v1 }
 0x2f4   :  { %v36710_v51 = vsub.f32 %v27499_v19, %v27499_v19 }
 0x2f5   :  { %33140 = vmatpush3.bf16.msra.mxu1 %v36205_v61 }
 0x2f6   :  { %33566 = vmatpush3.bf16.msra.mxu0 %v33565_v50  ;;  %33141 = vmatprep.subr.bf16.mxu1 %v34311_v1  ;;  %v39316_v50 = vand.u32 4294901760, %v36475_v5  ;;  %v4972_v5 = vand.u32 4294901760, %v36708_v0 }
 0x2f7   :  { %33567 = vmatprep.subr.bf16.mxu0 %v34311_v1 }
 0x2f9   :  { %33143 = vmatpush3.bf16.msra.mxu1 %v36222_v54  ;;  %30851 = vmatmul.mubr.f32.vlgmr.msra.gmra.mrb[12].mxu0 %v36531_v46 }
 0x2fa   :  { %33569 = vmatpush3.bf16.msra.mxu0 %v33568_v29  ;;  %33144 = vmatprep.subr.bf16.mxu1 %v34311_v1  ;;  %v4960_v29 = vand.u32 4294901760, %v36687_v18 }
 0x2fb   :  { %33570 = vmatprep.subr.bf16.mxu0 %v34311_v1  ;;  %30873 = vmatprep.mubr.msk.f32.mxu0 %vm34313_vm1, %v39248_v23 }
 0x2fc   :  { %v36724_v3 = vpack.c.bf16 %v4966_v39, %v4960_v29  ;;  %v4961_v19 = vsub.f32 %v36687_v18, %v4960_v29 }
 0x2fd   :  { %33146 = vmatpush3.bf16.msra.mxu1 %v36247_v33 }
 0x2fe   :  { %33572 = vmatpush3.bf16.msra.mxu0 %v33571_v42  ;;  %33147 = vmatprep.subr.bf16.mxu1 %v34311_v1 }
 0x2ff   :  { %33573 = vmatprep.subr.bf16.mxu0 %v34311_v1 }
 0x300   :  { %30207 = vmatmul.mubr.f32.vlgmr.msra.gmra.mrb[0].mxu1 %v39316_v50  ;;  %v4973_v50 = vsub.f32 %v36708_v0, %v4972_v5 }
 0x301   :  { %33149 = vmatpush3.bf16.msra.mxu1 %v36231_v41  ;;  %30229 = vmatprep.mubr.msk.f32.mxu1 %vm34313_vm1, %v39248_v23  ;;  %v4978_v41 = vand.u32 4294901760, %v36710_v51 }
 0x302   :  { %33575 = vmatpush3.bf16.msra.mxu0 %v33574_v8  ;;  %33150 = vmatprep.subr.bf16.mxu1 %v34311_v1 }
 0x303   :  { %33576 = vmatprep.subr.bf16.mxu0 %v34311_v1  ;;  %v36737_v56 = vpack.c.bf16 %v4978_v41, %v4972_v5  ;;  %v4979_v29 = vsub.f32 %v36710_v51, %v4978_v41  ;;  %v36912_v41 = vld [vmem:[%s39167_s1 + $0x210] sm:$0xff]  }
 0x305   :  { %33152 = vmatpush3.bf16.msra.mxu1 %v36253_v21 }
 0x306   :  { %33578 = vmatpush3.bf16.msra.mxu0 %v33577_v2  ;;  %33153 = vmatprep.subr.bf16.mxu1 %v34311_v1  ;;  %v4980_v2 = vand.u32 4294901760, %v4979_v29 }
 0x307   :  { %33579 = vmatprep.subr.bf16.mxu0 %v34311_v1 }
 0x309   :  { %33155 = vmatpush3.bf16.msra.mxu1 %v36274_v35  ;;  %v4925_v35 = vsub.f32 %v36625_v6, %v4924_v30  ;;  %v4955_v30 = vsub.f32 %v36664_v57, %v4954_v14  ;;  %v4962_v14 = vand.u32 4294901760, %v4961_v19 }
 0x30a   :  { %33581 = vmatpush3.bf16.msra.mxu0 %v33580_v37  ;;  %33156 = vmatprep.subr.bf16.mxu1 %v34311_v1 }
 0x30b   :  { %33582 = vmatprep.subr.bf16.mxu0 %v34311_v1  ;;  %v4956_v42 = vand.u32 4294901760, %v4955_v30 }
 0x30d   :  { %33158 = vmatpush3.bf16.msra.mxu1 %v36295_v11  ;;  %30874 = vmatmul.mubr.f32.vlgmr.msra.gmra.mrb[12].mxu0 %v36541_v34  ;;  %v4931_v11 = vsub.f32 %v36627_v55, %v4930_v27  ;;  %v4938_v27 = vand.u32 4294901760, %v4937_v63 }
 0x30e   :  { %33584 = vmatpush3.bf16.msra.mxu0 %v36321_v4  ;;  %33159 = vmatprep.subr.bf16.mxu1 %v34311_v1 }
 0x30f   :  { %33585 = vmatprep.subr.bf16.mxu0 %v34311_v1  ;;  %30896 = vmatprep.mubr.msk.f32.mxu0 %vm34313_vm1, %v39248_v23  ;;  %v4932_v9 = vand.u32 4294901760, %v4931_v11 }
 0x311   :  { %33161 = vmatpush3.bf16.msra.mxu1 %v36308_v53 }
 0x312   :  { %33587 = vmatpush3.bf16.msra.mxu0 %v36332_v60  ;;  %33162 = vmatprep.subr.bf16.mxu1 %v34311_v1 }
 0x313   :  { %33588 = vmatprep.subr.bf16.mxu0 %v34311_v1 }
 0x314   :  { %30230 = vmatmul.mubr.f32.vlgmr.msra.gmra.mrb[0].mxu1 %v36469_v43 }
 0x315   :  { %33164 = vmatpush3.bf16.msra.mxu1 %v36179_v31  ;;  %30252 = vmatprep.mubr.msk.f32.mxu1 %vm34313_vm1, %v39248_v23  ;;  %v27270_v31 = vld [vmem:[%s39169_s2 + $0x14] ss:$0 sm:$0xff] }
 0x316   :  { %33590 = vmatpush3.bf16.msra.mxu0 %v36356_v59  ;;  %33165 = vmatprep.subr.bf16.mxu1 %v34311_v1 }
 0x317   :  { %33591 = vmatprep.subr.bf16.mxu0 %v34311_v1 }
 0x319   :  { %33167 = vmatpush3.bf16.msra.mxu1 %v36191_v44 }
 0x31a   :  { %33593 = vmatpush3.bf16.msra.mxu0 %v36367_v12  ;;  %33168 = vmatprep.subr.bf16.mxu1 %v34311_v1 }
 0x31b   :  { %33594 = vmatprep.subr.bf16.mxu0 %v34311_v1 }
 0x31d   :  { %33170 = vmatpush3.bf16.msra.mxu1 %v36205_v61 }
 0x31e   :  { %33596 = vmatpush3.bf16.msra.mxu0 %v36402_v52  ;;  %33171 = vmatprep.subr.bf16.mxu1 %v34311_v1 }
 0x31f   :  { %33597 = vmatprep.subr.bf16.mxu0 %v34311_v1 }
 0x321   :  { %33173 = vmatpush3.bf16.msra.mxu1 %v36222_v54  ;;  %30897 = vmatmul.mubr.f32.vlgmr.msra.gmra.mrb[12].mxu0 %v6519_v45  ;;  %v4949_v45 = vsub.f32 %v36662_v20, %v4948_v38  ;;  %v4967_v38 = vsub.f32 %v36690_v25, %v4966_v39  ;;  %v4974_v39 = vand.u32 4294901760, %v4973_v50 }
 0x322   :  { %33599 = vmatpush3.bf16.msra.mxu0 %v36373_v22  ;;  %33174 = vmatprep.subr.bf16.mxu1 %v34311_v1 }
 0x323   :  { %33600 = vmatprep.subr.bf16.mxu0 %v34311_v1  ;;  %30919 = vmatprep.mubr.msk.f32.mxu0 %vm34313_vm1, %v39248_v23  ;;  %v4968_v8 = vand.u32 4294901760, %v4967_v38  ;;  %v33295_v5 = vpack.c.bf16 %v4980_v2, %v4974_v39 }
 0x325   :  { %33176 = vmatpush3.bf16.msra.mxu1 %v36247_v33 }
 0x326   :  { %33602 = vmatpush3.bf16.msra.mxu0 %v36391_v62  ;;  %33267 = vmatprep.subr.bf16.mxu1 %v34311_v1  ;;  %v39317_v62 = vld [vmem:[#allocation3_spill] sm:$0xff] }
 0x327   :  { %33603 = vmatprep.subr.bf16.mxu0 %v34311_v1 }
 0x328   :  { %30253 = vmatmul.mubr.f32.vlgmr.msra.gmra.mrb[0].mxu1 %v36469_v43 }
 0x329   :  { %33269 = vmatpush3.bf16.msra.mxu1 %v36608_v17  ;;  %30413 = vmatprep.mubr.msk.f32.mxu1 %vm34313_vm1, %v39248_v23 }
 0x32a   :  { %33605 = vmatpush3.bf16.msra.mxu0 %v36416_v13  ;;  %33270 = vmatprep.subr.bf16.mxu1 %v34311_v1  ;;  %v4926_v13 = vand.u32 4294901760, %v4925_v35 }
 0x32b   :  { %33606 = vmatprep.subr.bf16.mxu0 %v34311_v1 }
 0x32c   :  { %v4819_v44 = vpop.f32.mrb[8].mxu0 }
 0x32d   :  { %v33794_v61 = vadd.f32 %v27270_v31, %v4819_v44  ;;  %33272 = vmatpush3.bf16.msra.mxu1 %v36620_v32  ;;  %v30392_v54 = vpop.f32.mrb[9].mxu0  ;;  %v27530_v44 = vunpack.c.l.bf16 %v36912_v41 }
 0x32e   :  { %33608 = vmatpush3.bf16.msra.mxu0 %v36434_v28  ;;  %33273 = vmatprep.subr.bf16.mxu1 %v34311_v1  ;;  %v4943_v28 = vsub.f32 %v36638_v16, %v4942_v26  ;;  %v4950_v26 = vand.u32 4294901760, %v4949_v45 }
 0x32f   :  { %v4823_v33 = vmax.f32 %v33794_v61, 0.0  ;;  %33609 = vmatprep.subr.bf16.mxu0 %v34311_v1  ;;  %v27531_v61 = vunpack.c.h.bf16 %v36912_v41 }
 0x330   :  { %v4944_v24 = vand.u32 4294901760, %v4943_v28 }
 0x331   :  { %v4845_v21 = vsel %vm47_vm0, %v4823_v33, 0  ;;  %33275 = vmatpush3.bf16.msra.mxu1 %v36634_v40 }
 0x332   :  { %v36803_v53 = vand.u32 4294901760, %v4845_v21  ;;  %33611 = vmatpush3.bf16.msra.mxu0 %v39317_v62  ;;  %33276 = vmatprep.subr.bf16.mxu1 %v34311_v1  ;;  %v33286_v47 = vpack.c.bf16 %v4944_v24, %v4938_v27 }
 0x333   :  { %33612 = vmatprep.subr.bf16.mxu0 %v34311_v1 }
 0x334   :  { %v36809_v22 = vsub.f32 %v4845_v21, %v36803_v53  ;;  %v36927_v21 = vld [vmem:[%s39167_s1 + $0x218] sm:$0xff]  }
 0x335   :  { %33278 = vmatpush3.bf16.msra.mxu1 %v36651_v48  ;;  %30920 = vmatmul.mubr.f32.vlgmr.msra.gmra.mrb[12].mxu0 %v36531_v46  ;;  %v27534_v35 = vunpack.c.l.bf16 %v36927_v21  ;;  %v27535_v11 = vunpack.c.h.bf16 %v36927_v21 }
 0x336   :  { %v4914_v43 = vand.u32 4294901760, %v36809_v22  ;;  %33614 = vmatpush3.bf16.msra.mxu0 %v36321_v4  ;;  %33279 = vmatprep.subr.bf16.mxu1 %v34311_v1  ;;  %v33283_v4 = vpack.c.bf16 %v4932_v9, %v4926_v13  ;;  %v36937_v13 = vsub.f32 %v27530_v44, %v27530_v44  ;;  %v36939_v9 = vsub.f32 %v27531_v61, %v27531_v61 }
 0x337   :  { %33615 = vmatprep.subr.bf16.mxu0 %v34311_v1  ;;  %30942 = vmatprep.mubr.msk.f32.mxu0 %vm34313_vm1, %v39248_v23  ;;  %v36956_v30 = vsub.f32 %v27534_v35, %v27534_v35  ;;  %v36959_v27 = vsub.f32 %v27535_v11, %v27535_v11 }
 0x338   :  { %v4915_v34 = vsub.f32 %v36809_v22, %v4914_v43 }
 0x339   :  { %33281 = vmatpush3.bf16.msra.mxu1 %v36676_v58  ;;  %v6020_v38 = vand.u32 4294901760, %v36956_v30 }
 0x33a   :  { %33617 = vmatpush3.bf16.msra.mxu0 %v36332_v60  ;;  %33282 = vmatprep.subr.bf16.mxu1 %v34311_v1  ;;  %v4916_v15 = vand.u32 4294901760, %v4915_v34  ;;  %v33289_v60 = vpack.c.bf16 %v4956_v42, %v4950_v26  ;;  %v36948_v34 = vld [vmem:[%s39167_s1 + $0x220] sm:$0xff]   ;;  %v6014_v26 = vand.u32 4294901760, %v36939_v9 }
 0x33b   :  { %33618 = vmatprep.subr.bf16.mxu0 %v34311_v1  ;;  %v27539_v24 = vunpack.c.h.bf16 %v36948_v34 }
 0x33c   :  { %30414 = vmatmul.mubr.f32.vlgmr.msra.gmra.mrb[0].mxu1 %v4916_v15  ;;  %v6008_v15 = vand.u32 4294901760, %v36937_v13 }
 0x33d   :  { %33284 = vmatpush3.bf16.msra.mxu1 %v33283_v4  ;;  %30436 = vmatprep.mubr.msk.f32.mxu1 %vm34313_vm1, %v39248_v23  ;;  %v27538_v4 = vunpack.c.l.bf16 %v36948_v34  ;;  %v36976_v19 = vsub.f32 %v27539_v24, %v27539_v24 }
 0x33e   :  { %33620 = vmatpush3.bf16.msra.mxu0 %v36356_v59  ;;  %33285 = vmatprep.subr.bf16.mxu1 %v34311_v1  ;;  %v33292_v59 = vpack.c.bf16 %v4968_v8, %v4962_v14  ;;  %v36970_v42 = vpack.c.bf16 %v6014_v26, %v6008_v15 }
 0x33f   :  { %33621 = vmatprep.subr.bf16.mxu0 %v34311_v1  ;;  %v6038_v14 = vand.u32 4294901760, %v36976_v19 }
 0x341   :  { %33287 = vmatpush3.bf16.msra.mxu1 %v33286_v47  ;;  %v36974_v47 = vsub.f32 %v27538_v4, %v27538_v4  ;;  %v6039_v11 = vsub.f32 %v36976_v19, %v6038_v14 }
 0x342   :  { %33623 = vmatpush3.bf16.msra.mxu0 %v36367_v12  ;;  %33288 = vmatprep.subr.bf16.mxu1 %v34311_v1  ;;  %v33298_v12 = vpack.c.bf16 %v36627_v55, %v36625_v6  ;;  %v33307_v6 = vpack.c.bf16 %v36690_v25, %v36687_v18  ;;  %v33310_v55 = vpack.c.bf16 %v36710_v51, %v36708_v0 }
 0x343   :  { %33624 = vmatprep.subr.bf16.mxu0 %v34311_v1  ;;  %v6040_v4 = vand.u32 4294901760, %v6039_v11 }
 0x345   :  { %33290 = vmatpush3.bf16.msra.mxu1 %v33289_v60  ;;  %v6026_v60 = vand.u32 4294901760, %v36959_v27 }
 0x346   :  { %33626 = vmatpush3.bf16.msra.mxu0 %v36402_v52  ;;  %33291 = vmatprep.subr.bf16.mxu1 %v34311_v1  ;;  %v33301_v52 = vpack.c.bf16 %v36638_v16, %v36636_v36  ;;  %v36888_v36 = vld [vmem:[%s39167_s1 + $0x200] sm:$0xff]  }
 0x347   :  { %33729 = vmatprep.subr.bf16.mxu0 %v34311_v1  ;;  %v27522_v16 = vunpack.c.l.bf16 %v36888_v36  ;;  %v6027_v44 = vsub.f32 %v36959_v27, %v6026_v60 }
 0x349   :  { %33293 = vmatpush3.bf16.msra.mxu1 %v33292_v59  ;;  %30943 = vmatmul.mubr.f32.vlgmr.msra.gmra.mrb[12].mxu0 %v36531_v46  ;;  %v33304_v46 = vpack.c.bf16 %v36664_v57, %v36662_v20  ;;  %v27523_v20 = vunpack.c.h.bf16 %v36888_v36  ;;  %v36899_v57 = vld [vmem:[%s39167_s1 + $0x208] sm:$0xff]   ;;  %v36904_v0 = vsub.f32 %v27522_v16, %v27522_v16 }
 0x34a   :  { %33294 = vmatprep.subr.bf16.mxu1 %v34311_v1  ;;  %31118 = vmatprep.mubr.msk.f32.mxu0 %vm34313_vm1, %v39248_v23  ;;  %v27526_v18 = vunpack.c.l.bf16 %v36899_v57  ;;  %v27527_v25 = vunpack.c.h.bf16 %v36899_v57 }
 0x34b   :  { %v36906_v51 = vsub.f32 %v27523_v20, %v27523_v20  ;;  %v5984_v54 = vand.u32 4294901760, %v36904_v0 }
 0x34c   :  { %v36914_v37 = vsub.f32 %v27526_v18, %v27526_v18  ;;  %v36916_v31 = vsub.f32 %v27527_v25, %v27527_v25  ;;  %v6021_v25 = vsub.f32 %v36956_v30, %v6020_v38 }
 0x34d   :  { %33296 = vmatpush3.bf16.msra.mxu1 %v33295_v5  ;;  %v5990_v33 = vand.u32 4294901760, %v36906_v51  ;;  %v6009_v5 = vsub.f32 %v36937_v13, %v6008_v15  ;;  %v33478_v15 = vpack.c.bf16 %v36906_v51, %v36904_v0 }
 0x34e   :  { %33297 = vmatprep.subr.bf16.mxu1 %v34311_v1  ;;  %v5996_v63 = vand.u32 4294901760, %v36914_v37  ;;  %v6002_v28 = vand.u32 4294901760, %v36916_v31 }
 0x34f   :  { %v36935_v62 = vpack.c.bf16 %v5990_v33, %v5984_v54  ;;  %v6010_v16 = vand.u32 4294901760, %v6009_v5 }
 0x350   :  { %30437 = vmatmul.mubr.f32.vlgmr.msra.gmra.mrb[0].mxu1 %v36803_v53  ;;  %v36954_v45 = vpack.c.bf16 %v6002_v28, %v5996_v63  ;;  %v5997_v29 = vsub.f32 %v36914_v37, %v5996_v63  ;;  %v6003_v59 = vsub.f32 %v36916_v31, %v6002_v28 }
 0x351   :  { %33299 = vmatpush3.bf16.msra.mxu1 %v33298_v12  ;;  %30459 = vmatprep.mubr.msk.f32.mxu1 %vm34313_vm1, %v39248_v23  ;;  %v6015_v12 = vsub.f32 %v36939_v9, %v6014_v26  ;;  %v33481_v26 = vpack.c.bf16 %v36916_v31, %v36914_v37  ;;  %v37104_v37 = vld [vmem:[%s39167_s1 + $0x228] sm:$0xff]  }
 0x352   :  { %33300 = vmatprep.subr.bf16.mxu1 %v34311_v1  ;;  %v27562_v31 = vunpack.c.l.bf16 %v37104_v37 }
 0x353   :  { %v6016_v20 = vand.u32 4294901760, %v6015_v12 }
 0x355   :  { %33302 = vmatpush3.bf16.msra.mxu1 %v33301_v52  ;;  %v33469_v61 = vpack.c.bf16 %v6016_v20, %v6010_v16 }
 0x356   :  { %33303 = vmatprep.subr.bf16.mxu1 %v34311_v1 }
 0x359   :  { %33305 = vmatpush3.bf16.msra.mxu1 %v33304_v46  ;;  %v5998_v46 = vand.u32 4294901760, %v5997_v29 }
 0x35a   :  { %33306 = vmatprep.subr.bf16.mxu1 %v34311_v1 }
 0x35d   :  { %33308 = vmatpush3.bf16.msra.mxu1 %v33307_v6  ;;  %v6004_v6 = vand.u32 4294901760, %v6003_v59 }
 0x35e   :  { %33309 = vmatprep.subr.bf16.mxu1 %v34311_v1 }
 0x35f   :  { %v33466_v18 = vpack.c.bf16 %v6004_v6, %v5998_v46 }
 0x361   :  { %33311 = vmatpush3.bf16.msra.mxu1 %v33310_v55 }
 0x362   :  { %33312 = vmatprep.subr.bf16.mxu1 %v34311_v1 }
 0x364   :  { %30460 = vmatmul.mubr.f32.vlgmr.msra.gmra.mrb[0].mxu1 %v36809_v22  ;;  %v36988_v22 = vpack.c.bf16 %v6026_v60, %v6020_v38  ;;  %v33484_v38 = vpack.c.bf16 %v36939_v9, %v36937_v13  ;;  %v27563_v13 = vunpack.c.h.bf16 %v37104_v37  ;;  %v37115_v9 = vld [vmem:[%s39167_s1 + $0x230] sm:$0xff]   ;;  %v37128_v60 = vld [vmem:[%s39167_s1 + $0x238] sm:$0xff]  }
 0x365   :  { %33314 = vmatpush3.bf16.msra.mxu1 %v36608_v17  ;;  %30482 = vmatprep.mubr.msk.f32.mxu1 %vm34313_vm1, %v39248_v23 }
 0x366   :  { %33315 = vmatprep.subr.bf16.mxu1 %v34311_v1 }
 0x369   :  { %33317 = vmatpush3.bf16.msra.mxu1 %v36620_v32 }
 0x36a   :  { %33318 = vmatprep.subr.bf16.mxu1 %v34311_v1 }
 0x36d   :  { %33320 = vmatpush3.bf16.msra.mxu1 %v36634_v40 }
 0x36e   :  { %33321 = vmatprep.subr.bf16.mxu1 %v34311_v1 }
 0x371   :  { %33323 = vmatpush3.bf16.msra.mxu1 %v36651_v48 }
 0x372   :  { %33324 = vmatprep.subr.bf16.mxu1 %v34311_v1 }
 0x375   :  { %33326 = vmatpush3.bf16.msra.mxu1 %v36676_v58 }
 0x376   :  { %33327 = vmatprep.subr.bf16.mxu1 %v34311_v1 }
 0x378   :  { %30483 = vmatmul.mubr.f32.vlgmr.msra.gmra.mrb[0].mxu1 %v4914_v43  ;;  %v6032_v43 = vand.u32 4294901760, %v36974_v47 }
 0x379   :  { %33329 = vmatpush3.bf16.msra.mxu1 %v36660_v10  ;;  %30505 = vmatprep.mubr.msk.f32.mxu1 %vm34313_vm1, %v39248_v23 }
 0x37a   :  { %33330 = vmatprep.subr.bf16.mxu1 %v34311_v1  ;;  %v36998_v10 = vpack.c.bf16 %v6038_v14, %v6032_v43  ;;  %v6033_v35 = vsub.f32 %v36974_v47, %v6032_v43 }
 0x37c   :  { %v6034_v28 = vand.u32 4294901760, %v6033_v35 }
 0x37d   :  { %33332 = vmatpush3.bf16.msra.mxu1 %v36682_v7 }
 0x37e   :  { %33333 = vmatprep.subr.bf16.mxu1 %v34311_v1  ;;  %v33475_v24 = vpack.c.bf16 %v6040_v4, %v6034_v28 }
 0x381   :  { %33335 = vmatpush3.bf16.msra.mxu1 %v36703_v49  ;;  %v5985_v49 = vsub.f32 %v36904_v0, %v5984_v54  ;;  %v6022_v54 = vand.u32 4294901760, %v6021_v25  ;;  %v33487_v0 = vpack.c.bf16 %v36959_v27, %v36956_v30  ;;  %v27566_v30 = vunpack.c.l.bf16 %v37115_v9 }
 0x382   :  { %33336 = vmatprep.subr.bf16.mxu1 %v34311_v1  ;;  %v27567_v27 = vunpack.c.h.bf16 %v37115_v9 }
 0x383   :  { %v5986_v8 = vand.u32 4294901760, %v5985_v49  ;;  %v37130_v43 = vsub.f32 %v27566_v30, %v27566_v30 }
 0x384   :  { %v37132_v14 = vsub.f32 %v27567_v27, %v27567_v27 }
 0x385   :  { %33338 = vmatpush3.bf16.msra.mxu1 %v36724_v3  ;;  %v5991_v3 = vsub.f32 %v36906_v51, %v5990_v33  ;;  %v6028_v33 = vand.u32 4294901760, %v6027_v44  ;;  %v33490_v51 = vpack.c.bf16 %v36976_v19, %v36974_v47  ;;  %v37120_v47 = vsub.f32 %v27562_v31, %v27562_v31 }
 0x386   :  { %33339 = vmatprep.subr.bf16.mxu1 %v34311_v1  ;;  %v37122_v19 = vsub.f32 %v27563_v13, %v27563_v13  ;;  %v7068_v29 = vand.u32 4294901760, %v37130_v43  ;;  %v7074_v59 = vand.u32 4294901760, %v37132_v14 }
 0x387   :  { %v5992_v50 = vand.u32 4294901760, %v5991_v3  ;;  %v33472_v63 = vpack.c.bf16 %v6028_v33, %v6022_v54 }
 0x388   :  { %v37170_v5 = vpack.c.bf16 %v7074_v59, %v7068_v29 }
 0x389   :  { %33341 = vmatpush3.bf16.msra.mxu1 %v36737_v56  ;;  %v33463_v52 = vpack.c.bf16 %v5992_v50, %v5986_v8 }
 0x38a   :  { %33342 = vmatprep.subr.bf16.mxu1 %v34311_v1 }
 0x38c   :  { %30506 = vmatmul.mubr.f32.vlgmr.msra.gmra.mrb[0].mxu1 %v36803_v53 }
 0x38d   :  { %33344 = vmatpush3.bf16.msra.mxu1 %v36608_v17  ;;  %30528 = vmatprep.mubr.msk.f32.mxu1 %vm34313_vm1, %v39248_v23  ;;  %v27271_v17 = vld [vmem:[%s39169_s2 + $0x15] ss:$0 sm:$0xff] }
 0x38e   :  { %33345 = vmatprep.subr.bf16.mxu1 %v34311_v1 }
 0x391   :  { %33347 = vmatpush3.bf16.msra.mxu1 %v36620_v32 }
 0x392   :  { %33348 = vmatprep.subr.bf16.mxu1 %v34311_v1 }
 0x395   :  { %33350 = vmatpush3.bf16.msra.mxu1 %v36634_v40 }
 0x396   :  { %33351 = vmatprep.subr.bf16.mxu1 %v34311_v1 }
 0x399   :  { %33353 = vmatpush3.bf16.msra.mxu1 %v36651_v48 }
 0x39a   :  { %33354 = vmatprep.subr.bf16.mxu1 %v34311_v1 }
 0x39d   :  { %33356 = vmatpush3.bf16.msra.mxu1 %v36676_v58 }
 0x39e   :  { %33447 = vmatprep.subr.bf16.mxu1 %v34311_v1 }
 0x3a0   :  { %30529 = vmatmul.mubr.f32.vlgmr.msra.gmra.mrb[0].mxu1 %v36803_v53 }
 0x3a1   :  { %33449 = vmatpush3.bf16.msra.mxu1 %v36888_v36  ;;  %30689 = vmatprep.mubr.msk.f32.mxu1 %vm34313_vm1, %v39248_v23 }
 0x3a2   :  { %33450 = vmatprep.subr.bf16.mxu1 %v34311_v1 }
 0x3a4   :  { %v5879_v32 = vpop.f32.mrb[10].mxu0 }
 0x3a5   :  { %v33795_v40 = vadd.f32 %v27271_v17, %v5879_v32  ;;  %33452 = vmatpush3.bf16.msra.mxu1 %v36899_v57  ;;  %v30668_v48 = vpop.f32.mrb[11].mxu0  ;;  %v27570_v17 = vunpack.c.l.bf16 %v37128_v60  ;;  %v27571_v32 = vunpack.c.h.bf16 %v37128_v60 }
 0x3a6   :  { %33453 = vmatprep.subr.bf16.mxu1 %v34311_v1  ;;  %v7062_v48 = vand.u32 4294901760, %v37122_v19 }
 0x3a7   :  { %v5883_v58 = vmax.f32 %v33795_v40, 0.0  ;;  %v7056_v40 = vand.u32 4294901760, %v37120_v47  ;;  %v37153_v8 = vsub.f32 %v27570_v17, %v27570_v17  ;;  %v37155_v50 = vsub.f32 %v27571_v32, %v27571_v32 }
 0x3a9   :  { %v5905_v7 = vsel %vm47_vm0, %v5883_v58, 0  ;;  %33455 = vmatpush3.bf16.msra.mxu1 %v36912_v41  ;;  %v37143_v58 = vld [vmem:[%s39167_s1 + $0x240] sm:$0xff]   ;;  %v37151_v3 = vpack.c.bf16 %v7062_v48, %v7056_v40  ;;  %v7086_v16 = vand.u32 4294901760, %v37155_v50 }
 0x3aa   :  { %v37037_v56 = vand.u32 4294901760, %v5905_v7  ;;  %33456 = vmatprep.subr.bf16.mxu1 %v34311_v1  ;;  %v27575_v49 = vunpack.c.h.bf16 %v37143_v58 }
 0x3ac   :  { %v37041_v53 = vsub.f32 %v5905_v7, %v37037_v56  ;;  %v27574_v7 = vunpack.c.l.bf16 %v37143_v58  ;;  %v37175_v46 = vsub.f32 %v27575_v49, %v27575_v49 }
 0x3ad   :  { %33458 = vmatpush3.bf16.msra.mxu1 %v36927_v21 }
 0x3ae   :  { %v5974_v39 = vand.u32 4294901760, %v37041_v53  ;;  %33459 = vmatprep.subr.bf16.mxu1 %v34311_v1  ;;  %v37172_v12 = vsub.f32 %v27574_v7, %v27574_v7 }
 0x3b0   :  { %v5975_v2 = vsub.f32 %v37041_v53, %v5974_v39  ;;  %v7092_v44 = vand.u32 4294901760, %v37172_v12 }
 0x3b1   :  { %33461 = vmatpush3.bf16.msra.mxu1 %v36948_v34 }
 0x3b2   :  { %33462 = vmatprep.subr.bf16.mxu1 %v34311_v1  ;;  %v5976_v55 = vand.u32 4294901760, %v5975_v2  ;;  %v37164_v2 = vld [vmem:[%s39167_s1 + $0x248] sm:$0xff]  }
 0x3b3   :  { %v27579_v6 = vunpack.c.h.bf16 %v37164_v2 }
 0x3b4   :  { %30690 = vmatmul.mubr.f32.vlgmr.msra.gmra.mrb[0].mxu1 %v5976_v55  ;;  %v7080_v55 = vand.u32 4294901760, %v37153_v8 }
 0x3b5   :  { %33464 = vmatpush3.bf16.msra.mxu1 %v33463_v52  ;;  %30712 = vmatprep.mubr.msk.f32.mxu1 %vm34313_vm1, %v39248_v23  ;;  %v27578_v52 = vunpack.c.l.bf16 %v37164_v2  ;;  %v37192_v25 = vsub.f32 %v27579_v6, %v27579_v6 }
 0x3b6   :  { %33465 = vmatprep.subr.bf16.mxu1 %v34311_v1  ;;  %v37186_v20 = vpack.c.bf16 %v7086_v16, %v7080_v55 }
 0x3b7   :  { %v39235_v54 = vand.u32 4294901760, %v37192_v25 }
 0x3b9   :  { %33467 = vmatpush3.bf16.msra.mxu1 %v33466_v18  ;;  %v37190_v18 = vsub.f32 %v27578_v52, %v27578_v52 }
 0x3ba   :  { %33468 = vmatprep.subr.bf16.mxu1 %v34311_v1 }
 0x3bd   :  { %33470 = vmatpush3.bf16.msra.mxu1 %v33469_v61  ;;  %v39239_v61 = vand.u32 4294901760, %v37175_v46 }
 0x3be   :  { %33471 = vmatprep.subr.bf16.mxu1 %v34311_v1 }
 0x3c1   :  { %33473 = vmatpush3.bf16.msra.mxu1 %v33472_v63 }
 0x3c2   :  { %33474 = vmatprep.subr.bf16.mxu1 %v34311_v1 }
 0x3c5   :  { %33476 = vmatpush3.bf16.msra.mxu1 %v33475_v24 }
 0x3c6   :  { %33477 = vmatprep.subr.bf16.mxu1 %v34311_v1 }
 0x3c8   :  { %30713 = vmatmul.mubr.f32.vlgmr.msra.gmra.mrb[0].mxu1 %v37037_v56 }
 0x3c9   :  { %33479 = vmatpush3.bf16.msra.mxu1 %v33478_v15  ;;  %30735 = vmatprep.mubr.msk.f32.mxu1 %vm34313_vm1, %v39248_v23 }
 0x3ca   :  { %33480 = vmatprep.subr.bf16.mxu1 %v34311_v1 }
 0x3cd   :  { %33482 = vmatpush3.bf16.msra.mxu1 %v33481_v26 }
 0x3ce   :  { %33483 = vmatprep.subr.bf16.mxu1 %v34311_v1 }
 0x3d1   :  { %33485 = vmatpush3.bf16.msra.mxu1 %v33484_v38 }
 0x3d2   :  { %33486 = vmatprep.subr.bf16.mxu1 %v34311_v1 }
 0x3d5   :  { %33488 = vmatpush3.bf16.msra.mxu1 %v33487_v0 }
 0x3d6   :  { %33489 = vmatprep.subr.bf16.mxu1 %v34311_v1 }
 0x3d9   :  { %33491 = vmatpush3.bf16.msra.mxu1 %v33490_v51 }
 0x3da   :  { %33492 = vmatprep.subr.bf16.mxu1 %v34311_v1 }
 0x3dc   :  { %30736 = vmatmul.mubr.f32.vlgmr.msra.gmra.mrb[0].mxu1 %v37041_v53  ;;  %v37204_v53 = vpack.c.bf16 %v39239_v61, %v7092_v44 }
 0x3dd   :  { %33494 = vmatpush3.bf16.msra.mxu1 %v36888_v36  ;;  %30758 = vmatprep.mubr.msk.f32.mxu1 %vm34313_vm1, %v39248_v23 }
 0x3de   :  { %33495 = vmatprep.subr.bf16.mxu1 %v34311_v1 }
 0x3e1   :  { %33497 = vmatpush3.bf16.msra.mxu1 %v36899_v57 }
 0x3e2   :  { %33498 = vmatprep.subr.bf16.mxu1 %v34311_v1 }
 0x3e5   :  { %33500 = vmatpush3.bf16.msra.mxu1 %v36912_v41 }
 0x3e6   :  { %33501 = vmatprep.subr.bf16.mxu1 %v34311_v1 }
 0x3e9   :  { %33503 = vmatpush3.bf16.msra.mxu1 %v36927_v21 }
 0x3ea   :  { %33504 = vmatprep.subr.bf16.mxu1 %v34311_v1 }
 0x3ed   :  { %33506 = vmatpush3.bf16.msra.mxu1 %v36948_v34 }
 0x3ee   :  { %33507 = vmatprep.subr.bf16.mxu1 %v34311_v1 }
 0x3f0   :  { %30759 = vmatmul.mubr.f32.vlgmr.msra.gmra.mrb[0].mxu1 %v5974_v39  ;;  %v39236_v39 = vand.u32 4294901760, %v37190_v18 }
 0x3f1   :  { %33509 = vmatpush3.bf16.msra.mxu1 %v36935_v62  ;;  %30781 = vmatprep.mubr.msk.f32.mxu1 %vm34313_vm1, %v39248_v23 }
 0x3f2   :  { %33510 = vmatprep.subr.bf16.mxu1 %v34311_v1  ;;  %v37214_v62 = vpack.c.bf16 %v39235_v54, %v39236_v39 }
 0x3f5   :  { %33512 = vmatpush3.bf16.msra.mxu1 %v36954_v45  ;;  %v37234_v45 = vld [vmem:[%s39167_s1 + $0x118] sm:$0xff]  }
 0x3f6   :  { %33513 = vmatprep.subr.bf16.mxu1 %v34311_v1 }
 0x3f9   :  { %33515 = vmatpush3.bf16.msra.mxu1 %v36970_v42  ;;  %v27582_v42 = vunpack.c.l.bf16 %v37234_v45 }
 0x3fa   :  { %33516 = vmatprep.subr.bf16.mxu1 %v34311_v1 }
 0x3fb   :  { %v37267_v4 = vsub.f32 %v27582_v42, %v27582_v42 }
 0x3fd   :  { %33518 = vmatpush3.bf16.msra.mxu1 %v36988_v22  ;;  %v27583_v22 = vunpack.c.h.bf16 %v37234_v45  ;;  %v7585_v13 = vand.u32 4294901760, %v37267_v4 }
 0x3fe   :  { %33519 = vmatprep.subr.bf16.mxu1 %v34311_v1 }
 0x3ff   :  { %v37269_v24 = vsub.f32 %v27583_v22, %v27583_v22 }
 0x401   :  { %33521 = vmatpush3.bf16.msra.mxu1 %v36998_v10  ;;  %v7591_v30 = vand.u32 4294901760, %v37269_v24 }
 0x402   :  { %33522 = vmatprep.subr.bf16.mxu1 %v34311_v1 }
 0x403   :  { %v7592_v49 = vsub.f32 %v37269_v24, %v7591_v30 }
 0x404   :  { %30782 = vmatmul.mubr.f32.vlgmr.msra.gmra.mrb[0].mxu1 %v37037_v56 }
 0x405   :  { %33524 = vmatpush3.bf16.msra.mxu1 %v36888_v36  ;;  %30804 = vmatprep.mubr.msk.f32.mxu1 %vm34313_vm1, %v39248_v23  ;;  %v37239_v36 = vld [vmem:[%s39167_s1 + $0x120] sm:$0xff]  }
 0x406   :  { %33525 = vmatprep.subr.bf16.mxu1 %v34311_v1  ;;  %v27586_v10 = vunpack.c.l.bf16 %v37239_v36  ;;  %v27587_v33 = vunpack.c.h.bf16 %v37239_v36 }
 0x408   :  { %v37271_v15 = vsub.f32 %v27586_v10, %v27586_v10  ;;  %v37273_v26 = vsub.f32 %v27587_v33, %v27587_v33 }
 0x409   :  { %33527 = vmatpush3.bf16.msra.mxu1 %v36899_v57  ;;  %v37244_v57 = vld [vmem:[%s39167_s1 + $0x128] sm:$0xff]  }
 0x40a   :  { %33528 = vmatprep.subr.bf16.mxu1 %v34311_v1  ;;  %v27590_v35 = vunpack.c.l.bf16 %v37244_v57  ;;  %v27591_v11 = vunpack.c.h.bf16 %v37244_v57  ;;  %v7597_v27 = vand.u32 4294901760, %v37271_v15  ;;  %v7603_v17 = vand.u32 4294901760, %v37273_v26 }
 0x40c   :  { %v37275_v38 = vsub.f32 %v27590_v35, %v27590_v35  ;;  %v37277_v0 = vsub.f32 %v27591_v11, %v27591_v11  ;;  %v7598_v52 = vsub.f32 %v37271_v15, %v7597_v27  ;;  %v7604_v6 = vsub.f32 %v37273_v26, %v7603_v17 }
 0x40d   :  { %33530 = vmatpush3.bf16.msra.mxu1 %v36912_v41  ;;  %v37250_v41 = vld.sshfl [vmem:[%s39168_s0 + $0x8] sm:$0x33 pattern:$0x76325410]  ;;  %s34322_s0 = smov 13   ;;  %v7593_v11 = vand.u32 4294901760, %v7592_v49 }
 0x40e   :  { %33531 = vmatprep.subr.bf16.mxu1 %v34311_v1  ;;  %7504 = vrot.lane.b32.xlu0 %v37250_v41, %s34321_s29  ;;  %v39238_v32 = vand.u32 4294901760, %v37275_v38  ;;  %v39237_v7 = vand.u32 4294901760, %v37277_v0 }
 0x410   :  { %v7610_v42 = vsub.f32 %v37275_v38, %v39238_v32  ;;  %v7616_v22 = vsub.f32 %v37277_v0, %v39237_v7 }
 0x411   :  { %33533 = vmatpush3.bf16.msra.mxu1 %v36927_v21  ;;  %v37260_v21 = vld [vmem:[%s39167_s1 + $0x130] sm:$0xff]  }
 0x412   :  { %33534 = vmatprep.subr.bf16.mxu1 %v34311_v1  ;;  %v27594_v63 = vunpack.c.l.bf16 %v37260_v21  ;;  %v27595_v28 = vunpack.c.h.bf16 %v37260_v21  ;;  %8916 = vrot.lane.b32.xlu0 %v37250_v41, %s34322_s0  ;;  %v7611_v39 = vand.u32 4294901760, %v7610_v42  ;;  %v7617_v61 = vand.u32 4294901760, %v7616_v22  ;;  %s34337_s0 = smov 24  }
 0x414   :  { %v37279_v51 = vsub.f32 %v27594_v63, %v27594_v63  ;;  %v37281_v31 = vsub.f32 %v27595_v28, %v27595_v28  ;;  %v7605_v63 = vand.u32 4294901760, %v7604_v6  ;;  %v27272_v28 = vld [vmem:[%s39169_s2 + $0x16] ss:$0 sm:$0xff] }
 0x415   :  { %33536 = vmatpush3.bf16.msra.mxu1 %v36948_v34  ;;  %v7586_v34 = vsub.f32 %v37267_v4, %v7585_v13 }
 0x416   :  { %33627 = vmatprep.subr.bf16.mxu1 %v34311_v1  ;;  %v39240_v10 = vand.u32 4294901760, %v37279_v51  ;;  %v7627_v33 = vand.u32 4294901760, %v37281_v31  ;;  %v33751_v6 = vpack.c.bf16 %v37281_v31, %v37279_v51  ;;  %9817 = vrot.lane.b32.xlu0 %v37250_v41, %s34323_s6 }
 0x417   :  { %v7587_v35 = vand.u32 4294901760, %v7586_v34 }
 0x418   :  { %30805 = vmatmul.mubr.f32.vlgmr.msra.gmra.mrb[0].mxu1 %v37037_v56  ;;  %v7599_v56 = vand.u32 4294901760, %v7598_v52  ;;  %v7622_v34 = vsub.f32 %v37279_v51, %v39240_v10  ;;  %v7628_v49 = vsub.f32 %v37281_v31, %v7627_v33  ;;  %v7057_v52 = vsub.f32 %v37120_v47, %v7056_v40 }
 0x419   :  { %33629 = vmatpush3.bf16.msra.mxu1 %v37104_v37  ;;  %30965 = vmatprep.mubr.msk.f32.mxu1 %vm34313_vm1, %v39248_v23  ;;  %v33730_v54 = vpack.c.bf16 %v7593_v11, %v7587_v35 }
 0x41a   :  { %33630 = vmatprep.subr.bf16.mxu1 %v34311_v1  ;;  %v33733_v7 = vpack.c.bf16 %v7605_v63, %v7599_v56  ;;  %v7623_v42 = vand.u32 4294901760, %v7622_v34  ;;  %v7629_v22 = vand.u32 4294901760, %v7628_v49  ;;  %v7058_v63 = vand.u32 4294901760, %v7057_v52  ;;  %10718 = vrot.lane.b32.xlu0 %v37250_v41, %s34324_s7 }
 0x41b   :  { %33731 = vmatpush3.bf16.msra.mxu0 %v33730_v54  ;;  %v33736_v54 = vpack.c.bf16 %v7617_v61, %v7611_v39  ;;  %v7075_v61 = vsub.f32 %v37132_v14, %v7074_v59  ;;  %v37366_v34 = vpack.c.bf16 %v7591_v30, %v7585_v13  ;;  %v7081_v59 = vsub.f32 %v37153_v8, %v7080_v55 }
 0x41c   :  { %v6951_v32 = vpop.f32.mrb[12].mxu0  ;;  %33732 = vmatprep.subr.bf16.mxu0 %v34311_v1  ;;  %v33739_v39 = vpack.c.bf16 %v7629_v22, %v7623_v42  ;;  %v7087_v49 = vsub.f32 %v37155_v50, %v7086_v16  ;;  %v37382_v13 = vpack.c.bf16 %v7603_v17, %v7597_v27  ;;  %v39319_v27 = vand.u32 4294901760, %v37275_v38 }
 0x41d   :  { %v33796_v35 = vadd.f32 %v27272_v28, %v6951_v32  ;;  %33632 = vmatpush3.bf16.msra.mxu1 %v37115_v9  ;;  %v30944_v11 = vpop.f32.mrb[13].mxu0  ;;  %v7063_v32 = vsub.f32 %v37122_v19, %v7062_v48  ;;  %v7082_v55 = vand.u32 4294901760, %v7081_v59  ;;  %v39320_v17 = vand.u32 4294901760, %v37277_v0 }
 0x41e   :  { %33633 = vmatprep.subr.bf16.mxu1 %v34311_v1  ;;  %v7076_v11 = vand.u32 4294901760, %v7075_v61  ;;  %v7088_v16 = vand.u32 4294901760, %v7087_v49  ;;  %v39323_v59 = vand.u32 4294901760, %v37279_v51  ;;  %11619 = vrot.lane.b32.xlu0 %v37250_v41, %s34325_s8 }
 0x41f   :  { %v6955_v10 = vmax.f32 %v33796_v35, 0.0  ;;  %33734 = vmatpush3.bf16.msra.mxu0 %v33733_v7  ;;  %v7064_v48 = vand.u32 4294901760, %v7063_v32  ;;  %v7069_v7 = vsub.f32 %v37130_v43, %v7068_v29  ;;  %v7093_v32 = vsub.f32 %v37172_v12, %v7092_v44 }
 0x420   :  { %33735 = vmatprep.subr.bf16.mxu0 %v34311_v1  ;;  %v37398_v22 = vpack.c.bf16 %v39320_v17, %v39319_v27  ;;  %v37411_v49 = vpack.c.bf16 %v7627_v33, %v39323_v59  ;;  %v33658_v33 = vpack.c.bf16 %v37122_v19, %v37120_v47  ;;  %v33664_v47 = vpack.c.bf16 %v37155_v50, %v37153_v8 }
 0x421   :  { %v6977_v28 = vsel %vm47_vm0, %v6955_v10, 0  ;;  %33635 = vmatpush3.bf16.msra.mxu1 %v37128_v60  ;;  %v33643_v52 = vpack.c.bf16 %v7064_v48, %v7058_v63  ;;  %v7070_v35 = vand.u32 4294901760, %v7069_v7  ;;  %v33649_v63 = vpack.c.bf16 %v7088_v16, %v7082_v55 }
 0x422   :  { %v37345_v56 = vand.u32 4294901760, %v6977_v28  ;;  %33636 = vmatprep.subr.bf16.mxu1 %v34311_v1  ;;  %v7094_v48 = vand.u32 4294901760, %v7093_v32  ;;  %v39321_v7 = vand.u32 4294901760, %v37190_v18  ;;  %v33661_v55 = vpack.c.bf16 %v37132_v14, %v37130_v43  ;;  %12521 = vrot.lane.b32.xlu0 %v37250_v41, %s34326_s10 }
 0x423   :  { %33737 = vmatpush3.bf16.msra.mxu0 %v33736_v54  ;;  %v39318_v54 = vand.u32 4294901760, %v37175_v46  ;;  %v33667_v19 = vpack.c.bf16 %v37175_v46, %v37172_v12  ;;  %v33670_v43 = vpack.c.bf16 %v37192_v25, %v37190_v18  ;;  %v39325_v50 = vpack.c.bf16 %v37273_v26, %v37271_v15 }
 0x424   :  { %v37350_v40 = vsub.f32 %v6977_v28, %v37345_v56  ;;  %33738 = vmatprep.subr.bf16.mxu0 %v34311_v1  ;;  %v33646_v28 = vpack.c.bf16 %v7076_v11, %v7070_v35  ;;  %v7105_v61 = vsub.f32 %v37190_v18, %v39321_v7  ;;  %v12520_v59 = vcombine.high %v37250_v41, %v37250_v41 }
 0x425   :  { %33638 = vmatpush3.bf16.msra.mxu1 %v37143_v58  ;;  %v7099_v42 = vsub.f32 %v37175_v46, %v39318_v54 }
 0x426   :  { %v7046_v10 = vand.u32 4294901760, %v37350_v40  ;;  %33639 = vmatprep.subr.bf16.mxu1 %v34311_v1  ;;  %v7106_v35 = vand.u32 4294901760, %v7105_v61 }
 0x427   :  { %33740 = vmatpush3.bf16.msra.mxu0 %v33739_v39  ;;  %v7100_v44 = vand.u32 4294901760, %v7099_v42  ;;  %v39322_v39 = vand.u32 4294901760, %v37192_v25 }
 0x428   :  { %v7047_v29 = vsub.f32 %v37350_v40, %v7046_v10  ;;  %33741 = vmatprep.subr.bf16.mxu0 %v34311_v1 }
 0x429   :  { %33641 = vmatpush3.bf16.msra.mxu1 %v37164_v2 }
 0x42a   :  { %33642 = vmatprep.subr.bf16.mxu1 %v34311_v1  ;;  %v7048_v30 = vand.u32 4294901760, %v7047_v29  ;;  %v7111_v29 = vsub.f32 %v37192_v25, %v39322_v39 }
 0x42c   :  { %30966 = vmatmul.mubr.f32.vlgmr.msra.gmra.mrb[0].mxu1 %v7048_v30  ;;  %v7112_v11 = vand.u32 4294901760, %v7111_v29 }
 0x42d   :  { %33644 = vmatpush3.bf16.msra.mxu1 %v33643_v52  ;;  %30988 = vmatprep.mubr.msk.f32.mxu1 %vm34313_vm1, %v39248_v23  ;;  %v33652_v52 = vpack.c.bf16 %v7100_v44, %v7094_v48  ;;  %v37638_v44 = vld [vmem:[%s39169_s2 + $0x8] sm:$0xff] }
 0x42e   :  { %33645 = vmatprep.subr.bf16.mxu1 %v34311_v1  ;;  %v33655_v30 = vpack.c.bf16 %v7112_v11, %v7106_v35 }
 0x431   :  { %33647 = vmatpush3.bf16.msra.mxu1 %v33646_v28 }
 0x432   :  { %33648 = vmatprep.subr.bf16.mxu1 %v34311_v1 }
 0x435   :  { %33650 = vmatpush3.bf16.msra.mxu1 %v33649_v63 }
 0x436   :  { %33651 = vmatprep.subr.bf16.mxu1 %v34311_v1 }
 0x439   :  { %33653 = vmatpush3.bf16.msra.mxu1 %v33652_v52 }
 0x43a   :  { %33654 = vmatprep.subr.bf16.mxu1 %v34311_v1 }
 0x43d   :  { %33656 = vmatpush3.bf16.msra.mxu1 %v33655_v30  ;;  %v27274_v30 = vld [vmem:[%s39169_s2 + $0x17] ss:$0 sm:$0xff] }
 0x43e   :  { %33657 = vmatprep.subr.bf16.mxu1 %v34311_v1 }
 0x440   :  { %30989 = vmatmul.mubr.f32.vlgmr.msra.gmra.mrb[0].mxu1 %v37345_v56 }
 0x441   :  { %33659 = vmatpush3.bf16.msra.mxu1 %v33658_v33  ;;  %31011 = vmatprep.mubr.msk.f32.mxu1 %vm34313_vm1, %v39248_v23 }
 0x442   :  { %33660 = vmatprep.subr.bf16.mxu1 %v34311_v1 }
 0x445   :  { %33662 = vmatpush3.bf16.msra.mxu1 %v33661_v55 }
 0x446   :  { %33663 = vmatprep.subr.bf16.mxu1 %v34311_v1 }
 0x449   :  { %33665 = vmatpush3.bf16.msra.mxu1 %v33664_v47 }
 0x44a   :  { %33666 = vmatprep.subr.bf16.mxu1 %v34311_v1 }
 0x44d   :  { %33668 = vmatpush3.bf16.msra.mxu1 %v33667_v19 }
 0x44e   :  { %33669 = vmatprep.subr.bf16.mxu1 %v34311_v1 }
 0x451   :  { %33671 = vmatpush3.bf16.msra.mxu1 %v33670_v43 }
 0x452   :  { %33672 = vmatprep.subr.bf16.mxu1 %v34311_v1 }
 0x454   :  { %31012 = vmatmul.mubr.f32.vlgmr.msra.gmra.mrb[0].mxu1 %v37350_v40 }
 0x455   :  { %33674 = vmatpush3.bf16.msra.mxu1 %v37104_v37  ;;  %31034 = vmatprep.mubr.msk.f32.mxu1 %vm34313_vm1, %v39248_v23 }
 0x456   :  { %33675 = vmatprep.subr.bf16.mxu1 %v34311_v1 }
 0x459   :  { %33677 = vmatpush3.bf16.msra.mxu1 %v37115_v9 }
 0x45a   :  { %33678 = vmatprep.subr.bf16.mxu1 %v34311_v1 }
 0x45d   :  { %33680 = vmatpush3.bf16.msra.mxu1 %v37128_v60 }
 0x45e   :  { %33681 = vmatprep.subr.bf16.mxu1 %v34311_v1 }
 0x461   :  { %33683 = vmatpush3.bf16.msra.mxu1 %v37143_v58 }
 0x462   :  { %33684 = vmatprep.subr.bf16.mxu1 %v34311_v1 }
 0x465   :  { %33686 = vmatpush3.bf16.msra.mxu1 %v37164_v2 }
 0x466   :  { %33687 = vmatprep.subr.bf16.mxu1 %v34311_v1 }
 0x468   :  { %31035 = vmatmul.mubr.f32.vlgmr.msra.gmra.mrb[0].mxu1 %v7046_v10 }
 0x469   :  { %33689 = vmatpush3.bf16.msra.mxu1 %v37151_v3  ;;  %31057 = vmatprep.mubr.msk.f32.mxu1 %vm34313_vm1, %v39248_v23 }
 0x46a   :  { %33690 = vmatprep.subr.bf16.mxu1 %v34311_v1 }
 0x46d   :  { %33692 = vmatpush3.bf16.msra.mxu1 %v37170_v5 }
 0x46e   :  { %33693 = vmatprep.subr.bf16.mxu1 %v34311_v1 }
 0x471   :  { %33695 = vmatpush3.bf16.msra.mxu1 %v37186_v20 }
 0x472   :  { %33696 = vmatprep.subr.bf16.mxu1 %v34311_v1 }
 0x475   :  { %33698 = vmatpush3.bf16.msra.mxu1 %v37204_v53  ;;  %v8003_v53 = vpop.permute.xlu1 %8002 }
 0x476   :  { %33699 = vmatprep.subr.bf16.mxu1 %v34311_v1 }
 0x479   :  { %33701 = vmatpush3.bf16.msra.mxu1 %v37214_v62 }
 0x47a   :  { %33702 = vmatprep.subr.bf16.mxu1 %v34311_v1 }
 0x47c   :  { %31058 = vmatmul.mubr.f32.vlgmr.msra.gmra.mrb[0].mxu1 %v37345_v56 }
 0x47d   :  { %33704 = vmatpush3.bf16.msra.mxu1 %v37104_v37  ;;  %31080 = vmatprep.mubr.msk.f32.mxu1 %vm34313_vm1, %v39248_v23  ;;  %v7999_v37 = vld [vmem:[%s39169_s2 + $0x5] sm:$0x7] }
 0x47e   :  { %33705 = vmatprep.subr.bf16.mxu1 %v34311_v1 }
 0x480   :  { %v7505_v14 = vpop.permute.xlu0 %7504 }
 0x481   :  { %33707 = vmatpush3.bf16.msra.mxu1 %v37115_v9  ;;  %v7506_v3 = vsel %vm4316_vm4, %v7505_v14, 0  ;;  %v39324_v9 = vpack.c.bf16 %v37269_v24, %v37267_v4  ;;  %v8005_v4 = vsel %vm8004_vm7, %v8003_v53, 0 }
 0x482   :  { %33708 = vmatprep.subr.bf16.mxu1 %v34311_v1  ;;  %v37476_v8 = vand.u32 4294901760, %v7506_v3  ;;  %v8077_v15 = vand.u32 4294901760, %v8005_v4 }
 0x484   :  { %31119 = vmatmul.mubr.f32.vlgmr.msra.gmra.mrb[14].mxu0 %v37476_v8  ;;  %v8078_v26 = vsub.f32 %v8005_v4, %v8077_v15 }
 0x485   :  { %33710 = vmatpush3.bf16.msra.mxu1 %v37128_v60  ;;  %33743 = vmatpush3.bf16.msra.mxu0 %v39324_v9  ;;  %v8009_v60 = vsel %vm8007_vm6, %v7999_v37, 0 }
 0x486   :  { %33711 = vmatprep.subr.bf16.mxu1 %v34311_v1  ;;  %31137 = vmatprep.mubr.msk.f32.mxu0 %vm34313_vm1, %v39248_v23  ;;  %v37496_v5 = vand.u32 4294901760, %v8009_v60 }
 0x487   :  { %33744 = vmatprep.subr.bf16.mxu0 %v34311_v1 }
 0x488   :  { %v37506_v12 = vsub.f32 %v8009_v60, %v37496_v5 }
 0x489   :  { %33713 = vmatpush3.bf16.msra.mxu1 %v37143_v58  ;;  %33746 = vmatpush3.bf16.msra.mxu0 %v39325_v50  ;;  %v39326_v58 = vpack.c.bf16 %v37277_v0, %v37275_v38  ;;  %v8079_v38 = vand.u32 4294901760, %v8078_v26 }
 0x48a   :  { %33714 = vmatprep.subr.bf16.mxu1 %v34311_v1  ;;  %33747 = vmatprep.subr.bf16.mxu0 %v34311_v1  ;;  %v37518_v46 = vand.u32 4294901760, %v37506_v12 }
 0x48b   :  { %v8080_v0 = vsub.f32 %v8078_v26, %v8079_v38 }
 0x48c   :  { %v8091_v25 = vsub.f32 %v37506_v12, %v37518_v46 }
 0x48d   :  { %33716 = vmatpush3.bf16.msra.mxu1 %v37164_v2  ;;  %33749 = vmatpush3.bf16.msra.mxu0 %v39326_v58  ;;  %v7574_v2 = vsub.f32 %v7506_v3, %v37476_v8  ;;  %v8081_v51 = vand.u32 4294901760, %v8080_v0 }
 0x48e   :  { %33717 = vmatprep.subr.bf16.mxu1 %v34311_v1  ;;  %33750 = vmatprep.subr.bf16.mxu0 %v34311_v1  ;;  %v37533_v24 = vand.u32 4294901760, %v8091_v25 }
 0x48f   :  { %v7575_v20 = vand.u32 4294901760, %v7574_v2 }
 0x490   :  { %31081 = vmatmul.mubr.f32.vlgmr.msra.gmra.mrb[0].mxu1 %v37345_v56 }
 0x491   :  { %33719 = vmatpush3.bf16.msra.mxu1 %v37234_v45  ;;  %31099 = vmatprep.mubr.msk.f32.mxu1 %vm34313_vm1, %v39248_v23  ;;  %v7576_v18 = vsub.f32 %v7574_v2, %v7575_v20 }
 0x492   :  { %33720 = vmatprep.subr.bf16.mxu1 %v34311_v1  ;;  %33752 = vmatpush3.bf16.msra.mxu0 %v33751_v6 }
 0x493   :  { %33753 = vmatprep.subr.bf16.mxu0 %v34311_v1  ;;  %v7577_v62 = vand.u32 4294901760, %v7576_v18 }
 0x495   :  { %33722 = vmatpush3.bf16.msra.mxu1 %v37239_v36  ;;  %31138 = vmatmul.mubr.f32.vlgmr.msra.gmra.mrb[14].mxu0 %v7574_v2 }
 0x496   :  { %33723 = vmatprep.subr.bf16.mxu1 %v34311_v1  ;;  %33755 = vmatpush3.bf16.msra.mxu0 %v37234_v45 }
 0x497   :  { %31156 = vmatprep.mubr.msk.f32.mxu0 %vm34313_vm1, %v39248_v23  ;;  %33756 = vmatprep.subr.bf16.mxu0 %v34311_v1 }
 0x499   :  { %33725 = vmatpush3.bf16.msra.mxu1 %v37244_v57 }
 0x49a   :  { %33726 = vmatprep.subr.bf16.mxu1 %v34311_v1  ;;  %33758 = vmatpush3.bf16.msra.mxu0 %v37239_v36 }
 0x49b   :  { %33759 = vmatprep.subr.bf16.mxu0 %v34311_v1 }
 0x49d   :  { %33728 = vmatpush3.bf16.msra.mxu1 %v37260_v21 }
 0x49e   :  { %31202 = vmatprep.subr.mxu1 %v39248_v23  ;;  %33761 = vmatpush3.bf16.msra.mxu0 %v37244_v57 }
 0x49f   :  { %33762 = vmatprep.subr.bf16.mxu0 %v34311_v1 }
 0x4a0   :  { %31100 = vmatmul.mubr.f32.vlgmr.msra.gmra.mrb[2].mxu1 %v7577_v62 }
 0x4a1   :  { %31203 = vmatpush3.msra.mxu1 %v37533_v24  ;;  %31204 = vmatprep.mubr.msk.f32.mxu1 %vm34313_vm1, %v39248_v23 }
 0x4a2   :  { %31207 = vmatprep.subr.mxu1 %v39248_v23  ;;  %33764 = vmatpush3.bf16.msra.mxu0 %v37260_v21 }
 0x4a3   :  { %33765 = vmatprep.subr.bf16.mxu0 %v34311_v1 }
 0x4a4   :  { %31205 = vmatmul.mubr.f32.vlgmr.msra.gmra.mrb[4].mxu1 %v8077_v15 }
 0x4a5   :  { %31208 = vmatpush3.msra.mxu1 %v37506_v12  ;;  %31209 = vmatprep.mubr.msk.f32.mxu1 %vm34313_vm1, %v39248_v23 }
 0x4a6   :  { %31212 = vmatprep.subr.mxu1 %v39248_v23  ;;  %31157 = vmatmul.mubr.f32.vlgmr.msra.gmra.mrb[14].mxu0 %v7575_v20 }
 0x4a7   :  { %33767 = vmatpush3.bf16.msra.mxu0 %v37366_v34  ;;  %31175 = vmatprep.mubr.msk.f32.mxu0 %vm34313_vm1, %v39248_v23 }
 0x4a8   :  { %33768 = vmatprep.subr.bf16.mxu0 %v34311_v1  ;;  %31210 = vmatmul.mubr.f32.vlgmr.msra.gmra.mrb[6].mxu1 %v8078_v26 }
 0x4a9   :  { %31213 = vmatpush3.msra.mxu1 %v37496_v5  ;;  %31214 = vmatprep.mubr.msk.f32.mxu1 %vm34313_vm1, %v39248_v23 }
 0x4aa   :  { %31217 = vmatprep.subr.mxu1 %v39248_v23 }
 0x4ab   :  { %33770 = vmatpush3.bf16.msra.mxu0 %v37382_v13  ;;  %v27265_v13 = vld [vmem:[%s39169_s2 + $0x18] ss:$0 sm:$0xff] }
 0x4ac   :  { %33771 = vmatprep.subr.bf16.mxu0 %v34311_v1  ;;  %31215 = vmatmul.mubr.f32.vlgmr.msra.gmra.mrb[8].mxu1 %v8079_v38 }
 0x4ad   :  { %31218 = vmatpush3.msra.mxu1 %v37518_v46  ;;  %31219 = vmatprep.mubr.msk.f32.mxu1 %vm34313_vm1, %v39248_v23 }
 0x4ae   :  { %31222 = vmatprep.subr.mxu1 %v39248_v23 }
 0x4af   :  { %33773 = vmatpush3.bf16.msra.mxu0 %v37398_v22 }
 0x4b0   :  { %33774 = vmatprep.subr.bf16.mxu0 %v34311_v1  ;;  %31220 = vmatmul.mubr.f32.vlgmr.msra.gmra.mrb[10].mxu1 %v8077_v15 }
 0x4b1   :  { %31223 = vmatpush3.msra.mxu1 %v37496_v5  ;;  %31224 = vmatprep.mubr.msk.f32.mxu1 %vm34313_vm1, %v39248_v23 }
 0x4b2   :  { %31227 = vmatprep.subr.mxu1 %v39248_v23 }
 0x4b3   :  { %33776 = vmatpush3.bf16.msra.mxu0 %v37411_v49 }
 0x4b4   :  { %33777 = vmatprep.subr.bf16.mxu0 %v34311_v1  ;;  %31225 = vmatmul.mubr.f32.vlgmr.msra.gmra.mrb[12].mxu1 %v8077_v15 }
 0x4b5   :  { %31229 = vmatprep.mubr.msk.f32.mxu1 %vm34313_vm1, %v39248_v23 }
 0x4b6   :  { %31176 = vmatmul.mubr.f32.vlgmr.msra.gmra.mrb[14].mxu0 %v37476_v8 }
 0x4b7   :  { %33779 = vmatpush3.bf16.msra.mxu0 %v37234_v45  ;;  %31194 = vmatprep.mubr.msk.f32.mxu0 %vm34313_vm1, %v39248_v23 }
 0x4b8   :  { %33780 = vmatprep.subr.bf16.mxu0 %v34311_v1 }
 0x4bb   :  { %33782 = vmatpush3.bf16.msra.mxu0 %v37239_v36 }
 0x4bc   :  { %33783 = vmatprep.subr.bf16.mxu0 %v34311_v1 }
 0x4bf   :  { %33785 = vmatpush3.bf16.msra.mxu0 %v37244_v57  ;;  %v8917_v57 = vpop.permute.xlu0 %8916 }
 0x4c0   :  { %33786 = vmatprep.subr.bf16.mxu0 %v34311_v1  ;;  %v7998_v1 = vld [vmem:[%s39169_s2] sm:$0x1f]  ;;  %v8918_v29 = vsel %vm8004_vm7, %v8917_v57, 0 }
 0x4c1   :  { %v8463_v45 = vsel %vm8461_vm8, %v7998_v1, 0  ;;  %v8986_v49 = vand.u32 4294901760, %v8918_v29 }
 0x4c2   :  { %v37595_v36 = vand.u32 4294901760, %v8463_v45 }
 0x4c3   :  { %33788 = vmatpush3.bf16.msra.mxu0 %v37260_v21  ;;  %v9818_v21 = vpop.permute.xlu0 %9817  ;;  %v8987_v52 = vsub.f32 %v8918_v29, %v8986_v49 }
 0x4c4   :  { %31197 = vmatprep.subr.mxu0 %v39248_v23  ;;  %31228 = vmatpush3.msra.mxu1 %v37595_v36  ;;  %v9819_v31 = vsel %vm8004_vm7, %v9818_v21, 0  ;;  %v37627_v16 = vsub.f32 %v8463_v45, %v37595_v36 }
 0x4c5   :  { %31232 = vmatprep.subr.mxu1 %v39248_v23  ;;  %v37600_v6 = vand.u32 4294901760, %v9819_v31  ;;  %v8988_v41 = vand.u32 4294901760, %v8987_v52 }
 0x4c6   :  { %31195 = vmatmul.mubr.f32.vlgmr.msra.gmra.mrb[14].mxu0 %v37476_v8  ;;  %v37631_v27 = vand.u32 4294901760, %v37627_v16 }
 0x4c7   :  { %31198 = vmatpush3.msra.mxu0 %v37496_v5  ;;  %31199 = vmatprep.mubr.msk.f32.mxu0 %vm34313_vm1, %v39248_v23  ;;  %v37603_v56 = vsub.f32 %v9819_v31, %v37600_v6  ;;  %v8989_v35 = vsub.f32 %v8987_v52, %v8988_v41  ;;  %v10719_v45 = vpop.permute.xlu0 %10718 }
 0x4c8   :  { %31317 = vmatprep.subr.mxu0 %v39248_v23  ;;  %v8545_v63 = vsub.f32 %v37627_v16, %v37631_v27  ;;  %v10720_v31 = vsel %vm8004_vm7, %v10719_v45, 0 }
 0x4c9   :  { %v9889_v40 = vand.u32 4294901760, %v37603_v56  ;;  %v8990_v11 = vand.u32 4294901760, %v8989_v35 }
 0x4ca   :  { %31200 = vmatmul.mubr.f32.vlgmr.msra.gmra.mrb[16].mxu0 %v8081_v51  ;;  %v37640_v61 = vand.u32 4294901760, %v8545_v63 }
 0x4cb   :  { %31318 = vmatpush3.msra.mxu0 %v37496_v5  ;;  %31319 = vmatprep.mubr.msk.f32.mxu0 %vm34313_vm1, %v39248_v23  ;;  %v9890_v10 = vsub.f32 %v37603_v56, %v9889_v40  ;;  %v11620_v35 = vpop.permute.xlu0 %11619 }
 0x4cc   :  { %31327 = vmatprep.subr.mxu0 %v39248_v23 }
 0x4cd   :  { %v9891_v34 = vand.u32 4294901760, %v9890_v10 }
 0x4cf   :  { %31320 = vmatmul.mubr.f32.vlgmr.msra.gmra.mrb[18].mxu0 %v9891_v34 }
 0x4d0   :  { %31328 = vmatpush3.msra.mxu0 %v37506_v12  ;;  %31329 = vmatprep.mubr.msk.f32.mxu0 %vm34313_vm1, %v39248_v23 }
 0x4d1   :  { %31337 = vmatprep.subr.mxu0 %v39248_v23 }
 0x4d3   :  { %31330 = vmatmul.mubr.f32.vlgmr.msra.gmra.mrb[20].mxu0 %v37603_v56 }
 0x4d4   :  { %31338 = vmatpush3.msra.mxu0 %v37518_v46  ;;  %31339 = vmatprep.mubr.msk.f32.mxu0 %vm34313_vm1, %v39248_v23 }
 0x4d5   :  { %31347 = vmatprep.subr.mxu0 %v39248_v23 }
 0x4d7   :  { %31340 = vmatmul.mubr.f32.vlgmr.msra.gmra.mrb[22].mxu0 %v37600_v6 }
 0x4d8   :  { %31348 = vmatpush3.msra.mxu0 %v37595_v36  ;;  %31349 = vmatprep.mubr.msk.f32.mxu0 %vm34313_vm1, %v39248_v23 }
 0x4d9   :  { %31357 = vmatprep.subr.mxu0 %v39248_v23 }
 0x563   :  { %v7478_v32 = vpop.f32.mrb[0].mxu1 }
 0x564   :  { %v33790_v28 = vadd.f32 %v27265_v13, %v7478_v32  ;;  %v31082_v54 = vpop.f32.mrb[1].mxu1  ;;  %v37711_v32 = vand.u32 4294901760, %v10720_v31 }
 0x566   :  { %12975 = vrot.lane.b32.xlu0 %v33790_v28, %s34327_s18  ;;  %9366 = vrot.lane.b32.xlu1 %v33790_v28, %s34328_s19  ;;  %v8459_v42 = vsel %vm8457_vm9, %v33790_v28, 0 }
 0x567   :  { %v8531_v17 = vand.u32 4294901760, %v8459_v42 }
 0x569   :  { %v8532_v22 = vsub.f32 %v8459_v42, %v8531_v17 }
 0x56a   :  { %13876 = vrot.lane.b32.xlu0 %v33790_v28, %s34329_s20  ;;  %10267 = vrot.lane.b32.xlu1 %v33790_v28, %s34330_s21 }
 0x56b   :  { %v8533_v48 = vand.u32 4294901760, %v8532_v22 }
 0x56d   :  { %v8534_v7 = vsub.f32 %v8532_v22, %v8533_v48 }
 0x56e   :  { %11168 = vrot.lane.b32.xlu1 %v33790_v28, %s34331_s24  ;;  %14785 = vrot.lane.b32.xlu0 %v37638_v44, %s34332_s25 }
 0x56f   :  { %v8535_v39 = vand.u32 4294901760, %v8534_v7 }
 0x571   :  { %31230 = vmatmul.mubr.f32.vlgmr.msra.gmra.mrb[14].mxu1 %v8535_v39 }
 0x572   :  { %12069 = vrot.lane.b32.xlu1 %v33790_v28, %s34333_s26  ;;  %31233 = vmatpush3.msra.mxu1 %v37640_v61 }
 0x573   :  { %31234 = vmatprep.mubr.msk.f32.mxu1 %vm34313_vm1, %v39248_v23  ;;  %31237 = vmatprep.subr.mxu1 %v39248_v23  ;;  %v7579_v33 = vpop.f32.mrb[2].mxu1 }
 0x574   :  { %v7580_v47 = vadd.f32 %v27274_v30, %v7579_v33  ;;  %v31101_v19 = vpop.f32.mrb[3].mxu1 }
 0x575   :  { %31235 = vmatmul.mubr.f32.vlgmr.msra.gmra.mrb[16].mxu1 %v8531_v17 }
 0x576   :  { %31238 = vmatpush3.msra.mxu1 %v37627_v16  ;;  %31239 = vmatprep.mubr.msk.f32.mxu1 %vm34313_vm1, %v39248_v23 }
 0x577   :  { %31242 = vmatprep.subr.mxu1 %v39248_v23  ;;  %12523 = vrot.lane.b32.xlu1 %v12520_v59, %s34326_s10  ;;  %v8159_v3 = vpop.f32.mrb[4].mxu1 }
 0x578   :  { %v31206_v9 = vpop.f32.mrb[5].mxu1 }
 0x579   :  { %31240 = vmatmul.mubr.f32.vlgmr.msra.gmra.mrb[18].mxu1 %v8532_v22  ;;  %v37718_v22 = vsub.f32 %v10720_v31, %v37711_v32  ;;  %v12522_v9 = vpop.permute.xlu0 %12521 }
 0x57a   :  { %31243 = vmatpush3.msra.mxu1 %v37595_v36  ;;  %31244 = vmatprep.mubr.msk.f32.mxu1 %vm34313_vm1, %v39248_v23 }
 0x57b   :  { %31247 = vmatprep.subr.mxu1 %v39248_v23  ;;  %13426 = vrot.lane.b32.xlu1 %v12520_v59, %s34334_s27  ;;  %v8233_v50 = vpop.f32.mrb[6].mxu1  ;;  %v10790_v7 = vand.u32 4294901760, %v37718_v22 }
 0x57c   :  { %v31211_v2 = vpop.f32.mrb[7].mxu1 }
 0x57d   :  { %31245 = vmatmul.mubr.f32.vlgmr.msra.gmra.mrb[20].mxu1 %v8533_v48  ;;  %v10791_v59 = vsub.f32 %v37718_v22, %v10790_v7 }
 0x57e   :  { %31248 = vmatpush3.msra.mxu1 %v37631_v27  ;;  %31249 = vmatprep.mubr.msk.f32.mxu1 %vm34313_vm1, %v39248_v23 }
 0x57f   :  { %31252 = vmatprep.subr.mxu1 %v39248_v23  ;;  %15245 = vrot.lane.b32.xlu1 %v37638_v44, %s34319_s17  ;;  %v8307_v20 = vpop.f32.mrb[8].mxu1 }
 0x580   :  { %v31216_v25 = vpop.f32.mrb[9].mxu1 }
 0x581   :  { %31250 = vmatmul.mubr.f32.vlgmr.msra.gmra.mrb[22].mxu1 %v8531_v17 }
 0x582   :  { %31253 = vmatpush3.msra.mxu1 %v37595_v36  ;;  %31254 = vmatprep.mubr.msk.f32.mxu1 %vm34313_vm1, %v39248_v23 }
 0x583   :  { %31257 = vmatprep.subr.mxu1 %v39248_v23  ;;  %15700 = vrot.lane.b32.xlu1 %v37638_v44, %s34335_s28  ;;  %v8381_v53 = vpop.f32.mrb[10].mxu1 }
 0x584   :  { %v31221_v4 = vpop.f32.mrb[11].mxu1 }
 0x585   :  { %31255 = vmatmul.mubr.f32.vlgmr.msra.gmra.mrb[24].mxu1 %v8531_v17 }
 0x586   :  { %31258 = vmatpush3.msra.mxu1 %v37496_v5  ;;  %31259 = vmatprep.mubr.msk.f32.mxu1 %vm34313_vm1, %v39248_v23 }
 0x587   :  { %31262 = vmatprep.subr.mxu1 %v39248_v23  ;;  %v8453_v15 = vpop.f32.mrb[12].mxu1 }
 0x588   :  { %v31226_v38 = vpop.f32.mrb[13].mxu1 }
 0x589   :  { %31260 = vmatmul.mubr.f32.vlgmr.msra.gmra.mrb[26].mxu1 %v8990_v11  ;;  %v11621_v11 = vsel %vm8004_vm7, %v11620_v35, 0 }
 0x58a   :  { %31263 = vmatpush3.msra.mxu1 %v37533_v24  ;;  %31264 = vmatprep.mubr.msk.f32.mxu1 %vm34313_vm1, %v39248_v23  ;;  %v37773_v33 = vand.u32 4294901760, %v11621_v11 }
 0x58b   :  { %31267 = vmatprep.subr.mxu1 %v39248_v23 }
 0x58d   :  { %31265 = vmatmul.mubr.f32.vlgmr.msra.gmra.mrb[28].mxu1 %v8986_v49 }
 0x58e   :  { %31268 = vmatpush3.msra.mxu1 %v37506_v12  ;;  %31269 = vmatprep.mubr.msk.f32.mxu1 %vm34313_vm1, %v39248_v23 }
 0x58f   :  { %31272 = vmatprep.subr.mxu1 %v39248_v23 }
 0x591   :  { %31270 = vmatmul.mubr.f32.vlgmr.msra.gmra.mrb[30].mxu1 %v8987_v52  ;;  %v10792_v52 = vand.u32 4294901760, %v10791_v59 }
 0x592   :  { %31273 = vmatpush3.msra.mxu1 %v37496_v5  ;;  %31274 = vmatprep.mubr.msk.f32.mxu1 %vm34313_vm1, %v39248_v23 }
 0x593   :  { %31277 = vmatprep.subr.mxu1 %v39248_v23 }
 0x595   :  { %31275 = vmatmul.mubr.f32.vlgmr.msra.gmra.mrb[32].mxu1 %v8988_v41 }
 0x596   :  { %31278 = vmatpush3.msra.mxu1 %v37518_v46  ;;  %31279 = vmatprep.mubr.msk.f32.mxu1 %vm34313_vm1, %v39248_v23 }
 0x597   :  { %31282 = vmatprep.subr.mxu1 %v39248_v23 }
 0x599   :  { %31280 = vmatmul.mubr.f32.vlgmr.msra.gmra.mrb[34].mxu1 %v8986_v49  ;;  %v7993_v55 = vpop.f32.mrb[14].mxu0 }
 0x59a   :  { %31283 = vmatpush3.msra.mxu1 %v37496_v5  ;;  %31284 = vmatprep.mubr.msk.f32.mxu1 %vm34313_vm1, %v39248_v23  ;;  %v31196_v43 = vpop.f32.mrb[15].mxu0  ;;  %v37702_v8 = vadd.f32 %v7993_v55, %v7580_v47  ;;  %v37788_v47 = vsub.f32 %v11621_v11, %v37773_v33 }
 0x59b   :  { %31287 = vmatprep.subr.mxu1 %v39248_v23 }
 0x59c   :  { %v11691_v43 = vand.u32 4294901760, %v37788_v47 }
 0x59d   :  { %31285 = vmatmul.mubr.f32.vlgmr.msra.gmra.mrb[36].mxu1 %v8986_v49  ;;  %v8083_v14 = vpop.f32.mrb[16].mxu0 }
 0x59e   :  { %31288 = vmatpush3.msra.mxu1 %v37595_v36  ;;  %31289 = vmatprep.mubr.msk.f32.mxu1 %vm34313_vm1, %v39248_v23  ;;  %v8160_v37 = vadd.f32 %v8159_v3, %v8083_v14  ;;  %v31201_v60 = vpop.f32.mrb[17].mxu0  ;;  %v11692_v56 = vsub.f32 %v37788_v47, %v11691_v43 }
 0x59f   :  { %31292 = vmatprep.subr.mxu1 %v39248_v23 }
 0x5a0   :  { %v8234_v58 = vadd.f32 %v8233_v50, %v8160_v37  ;;  %v11693_v37 = vand.u32 4294901760, %v11692_v56 }
 0x5a2   :  { %v8308_v18 = vadd.f32 %v8307_v20, %v8234_v58 }
 0x5a4   :  { %v8382_v62 = vadd.f32 %v8381_v53, %v8308_v18 }
 0x5a6   :  { %v37704_v26 = vadd.f32 %v8453_v15, %v8382_v62 }
 0x5d8   :  { %v9367_v0 = vpop.permute.xlu1 %9366  ;;  %v12976_v62 = vpop.permute.xlu0 %12975 }
 0x5d9   :  { %v9368_v51 = vsel %vm8457_vm9, %v9367_v0, 0  ;;  %v12977_v15 = vsel %vm8457_vm9, %v12976_v62, 0 }
 0x5da   :  { %v9436_v1 = vand.u32 4294901760, %v9368_v51  ;;  %v37900_v0 = vand.u32 4294901760, %v12977_v15 }
 0x5dc   :  { %v9437_v57 = vsub.f32 %v9368_v51, %v9436_v1  ;;  %v10268_v21 = vpop.permute.xlu1 %10267 }
 0x5dd   :  { %v10269_v10 = vsel %vm8457_vm9, %v10268_v21, 0 }
 0x5de   :  { %v9438_v34 = vand.u32 4294901760, %v9437_v57  ;;  %v37709_v13 = vand.u32 4294901760, %v10269_v10 }
 0x5e0   :  { %v9439_v28 = vsub.f32 %v9437_v57, %v9438_v34  ;;  %v37714_v54 = vsub.f32 %v10269_v10, %v37709_v13  ;;  %v11169_v39 = vpop.permute.xlu1 %11168 }
 0x5e1   :  { %v11170_v29 = vsel %vm8457_vm9, %v11169_v39, 0 }
 0x5e2   :  { %v9440_v42 = vand.u32 4294901760, %v9439_v28  ;;  %v10339_v17 = vand.u32 4294901760, %v37714_v54  ;;  %v37744_v49 = vand.u32 4294901760, %v11170_v29 }
 0x5e4   :  { %v10340_v63 = vsub.f32 %v37714_v54, %v10339_v17  ;;  %31290 = vmatmul.mubr.f32.vlgmr.msra.gmra.mrb[38].mxu1 %v9440_v42  ;;  %v37756_v41 = vsub.f32 %v11170_v29, %v37744_v49  ;;  %v12070_v14 = vpop.permute.xlu1 %12069 }
 0x5e5   :  { %31293 = vmatpush3.msra.mxu1 %v37640_v61  ;;  %31294 = vmatprep.mubr.msk.f32.mxu1 %vm34313_vm1, %v39248_v23  ;;  %v12071_v3 = vsel %vm8457_vm9, %v12070_v14, 0 }
 0x5e6   :  { %v10341_v48 = vand.u32 4294901760, %v10340_v63  ;;  %31297 = vmatprep.subr.mxu1 %v39248_v23  ;;  %v11240_v30 = vand.u32 4294901760, %v37756_v41 }
 0x5e8   :  { %31295 = vmatmul.mubr.f32.vlgmr.msra.gmra.mrb[40].mxu1 %v9436_v1  ;;  %31350 = vmatmul.mubr.f32.vlgmr.msra.gmra.mrb[24].mxu0 %v10341_v48  ;;  %v11241_v55 = vsub.f32 %v37756_v41, %v11240_v30 }
 0x5e9   :  { %31298 = vmatpush3.msra.mxu1 %v37627_v16  ;;  %31299 = vmatprep.mubr.msk.f32.mxu1 %vm34313_vm1, %v39248_v23 }
 0x5ea   :  { %31302 = vmatprep.subr.mxu1 %v39248_v23  ;;  %31358 = vmatpush3.msra.mxu0 %v37627_v16  ;;  %v11242_v19 = vand.u32 4294901760, %v11241_v55 }
 0x5eb   :  { %31359 = vmatprep.mubr.msk.f32.mxu0 %vm34313_vm1, %v39248_v23  ;;  %31367 = vmatprep.subr.mxu0 %v39248_v23 }
 0x5ec   :  { %31300 = vmatmul.mubr.f32.vlgmr.msra.gmra.mrb[42].mxu1 %v9437_v57  ;;  %31360 = vmatmul.mubr.f32.vlgmr.msra.gmra.mrb[26].mxu0 %v37714_v54 }
 0x5ed   :  { %31303 = vmatpush3.msra.mxu1 %v37595_v36  ;;  %31304 = vmatprep.mubr.msk.f32.mxu1 %vm34313_vm1, %v39248_v23 }
 0x5ee   :  { %31307 = vmatprep.subr.mxu1 %v39248_v23  ;;  %31368 = vmatpush3.msra.mxu0 %v37631_v27 }
 0x5ef   :  { %31369 = vmatprep.mubr.msk.f32.mxu0 %vm34313_vm1, %v39248_v23  ;;  %31377 = vmatprep.subr.mxu0 %v39248_v23 }
 0x5f0   :  { %31305 = vmatmul.mubr.f32.vlgmr.msra.gmra.mrb[44].mxu1 %v9438_v34  ;;  %31370 = vmatmul.mubr.f32.vlgmr.msra.gmra.mrb[28].mxu0 %v37709_v13 }
 0x5f1   :  { %31308 = vmatpush3.msra.mxu1 %v37631_v27  ;;  %31309 = vmatprep.mubr.msk.f32.mxu1 %vm34313_vm1, %v39248_v23 }
 0x5f2   :  { %31312 = vmatprep.subr.mxu1 %v39248_v23  ;;  %31378 = vmatpush3.msra.mxu0 %v37496_v5 }
 0x5f3   :  { %31379 = vmatprep.mubr.msk.f32.mxu0 %vm34313_vm1, %v39248_v23  ;;  %31387 = vmatprep.subr.mxu0 %v39248_v23 }
 0x5f4   :  { %31310 = vmatmul.mubr.f32.vlgmr.msra.gmra.mrb[46].mxu1 %v9436_v1  ;;  %31380 = vmatmul.mubr.f32.vlgmr.msra.gmra.mrb[30].mxu0 %v10792_v52 }
 0x5f5   :  { %31313 = vmatpush3.msra.mxu1 %v37595_v36  ;;  %31314 = vmatprep.mubr.msk.f32.mxu1 %vm34313_vm1, %v39248_v23 }
 0x5f6   :  { %31322 = vmatprep.subr.mxu1 %v39248_v23  ;;  %31388 = vmatpush3.msra.mxu0 %v37506_v12 }
 0x5f7   :  { %31389 = vmatprep.mubr.msk.f32.mxu0 %vm34313_vm1, %v39248_v23  ;;  %31397 = vmatprep.subr.mxu0 %v39248_v23 }
 0x5f8   :  { %31315 = vmatmul.mubr.f32.vlgmr.msra.gmra.mrb[48].mxu1 %v9436_v1  ;;  %31390 = vmatmul.mubr.f32.vlgmr.msra.gmra.mrb[32].mxu0 %v37718_v22  ;;  %v37913_v1 = vsub.f32 %v12977_v15, %v37900_v0 }
 0x5f9   :  { %31323 = vmatpush3.msra.mxu1 %v37533_v24  ;;  %31324 = vmatprep.mubr.msk.f32.mxu1 %vm34313_vm1, %v39248_v23 }
 0x5fa   :  { %31332 = vmatprep.subr.mxu1 %v39248_v23  ;;  %31398 = vmatpush3.msra.mxu0 %v37518_v46  ;;  %v13047_v21 = vand.u32 4294901760, %v37913_v1 }
 0x5fb   :  { %31399 = vmatprep.mubr.msk.f32.mxu0 %vm34313_vm1, %v39248_v23  ;;  %31407 = vmatprep.subr.mxu0 %v39248_v23 }
 0x5fc   :  { %31325 = vmatmul.mubr.f32.vlgmr.msra.gmra.mrb[50].mxu1 %v37600_v6  ;;  %31400 = vmatmul.mubr.f32.vlgmr.msra.gmra.mrb[34].mxu0 %v37711_v32  ;;  %v13048_v10 = vsub.f32 %v37913_v1, %v13047_v21 }
 0x5fd   :  { %31333 = vmatpush3.msra.mxu1 %v37496_v5  ;;  %31334 = vmatprep.mubr.msk.f32.mxu1 %vm34313_vm1, %v39248_v23 }
 0x5fe   :  { %31342 = vmatprep.subr.mxu1 %v39248_v23  ;;  %31408 = vmatpush3.msra.mxu0 %v37595_v36 }
 0x5ff   :  { %31409 = vmatprep.mubr.msk.f32.mxu0 %vm34313_vm1, %v39248_v23  ;;  %31417 = vmatprep.subr.mxu0 %v39248_v23 }
 0x600   :  { %31335 = vmatmul.mubr.f32.vlgmr.msra.gmra.mrb[52].mxu1 %v9889_v40  ;;  %31410 = vmatmul.mubr.f32.vlgmr.msra.gmra.mrb[36].mxu0 %v11242_v19  ;;  %v37820_v40 = vand.u32 4294901760, %v12071_v3 }
 0x601   :  { %31343 = vmatpush3.msra.mxu1 %v37496_v5  ;;  %31344 = vmatprep.mubr.msk.f32.mxu1 %vm34313_vm1, %v39248_v23 }
 0x602   :  { %31352 = vmatprep.subr.mxu1 %v39248_v23  ;;  %31418 = vmatpush3.msra.mxu0 %v37627_v16  ;;  %v37833_v60 = vsub.f32 %v12071_v3, %v37820_v40 }
 0x603   :  { %31419 = vmatprep.mubr.msk.f32.mxu0 %vm34313_vm1, %v39248_v23  ;;  %31427 = vmatprep.subr.mxu0 %v39248_v23 }
 0x604   :  { %31345 = vmatmul.mubr.f32.vlgmr.msra.gmra.mrb[54].mxu1 %v37600_v6  ;;  %31420 = vmatmul.mubr.f32.vlgmr.msra.gmra.mrb[38].mxu0 %v37756_v41  ;;  %v12524_v6 = vpop.permute.xlu1 %12523  ;;  %v12141_v2 = vand.u32 4294901760, %v37833_v60 }
 0x605   :  { %31353 = vmatpush3.msra.mxu1 %v37640_v61  ;;  %31354 = vmatprep.mubr.msk.f32.mxu1 %vm34313_vm1, %v39248_v23  ;;  %v12526_v50 = vsel %vm12525_vm10, %v12522_v9, %v12524_v6 }
 0x606   :  { %31362 = vmatprep.subr.mxu1 %v39248_v23  ;;  %31428 = vmatpush3.msra.mxu0 %v37631_v27  ;;  %v12527_v58 = vsel %vm8004_vm7, %v12526_v50, 0  ;;  %v12142_v18 = vsub.f32 %v37833_v60, %v12141_v2 }
 0x607   :  { %31429 = vmatprep.mubr.msk.f32.mxu0 %vm34313_vm1, %v39248_v23  ;;  %31437 = vmatprep.subr.mxu0 %v39248_v23  ;;  %v37854_v20 = vand.u32 4294901760, %v12527_v58 }
 0x608   :  { %31355 = vmatmul.mubr.f32.vlgmr.msra.gmra.mrb[56].mxu1 %v37709_v13  ;;  %31430 = vmatmul.mubr.f32.vlgmr.msra.gmra.mrb[40].mxu0 %v37744_v49  ;;  %v12143_v53 = vand.u32 4294901760, %v12142_v18  ;;  %v13427_v45 = vpop.permute.xlu1 %13426 }
 0x609   :  { %31363 = vmatpush3.msra.mxu1 %v37595_v36  ;;  %31364 = vmatprep.mubr.msk.f32.mxu1 %vm34313_vm1, %v39248_v23  ;;  %v37870_v25 = vsub.f32 %v12527_v58, %v37854_v20  ;;  %v13428_v57 = vsel %vm8004_vm7, %v13427_v45, 0 }
 0x60a   :  { %31372 = vmatprep.subr.mxu1 %v39248_v23  ;;  %31438 = vmatpush3.msra.mxu0 %v37496_v5  ;;  %v37934_v31 = vand.u32 4294901760, %v13428_v57 }
 0x60b   :  { %31439 = vmatprep.mubr.msk.f32.mxu0 %vm34313_vm1, %v39248_v23  ;;  %31447 = vmatprep.subr.mxu0 %v39248_v23  ;;  %v12597_v4 = vand.u32 4294901760, %v37870_v25 }
 0x60c   :  { %31365 = vmatmul.mubr.f32.vlgmr.msra.gmra.mrb[58].mxu1 %v10339_v17  ;;  %31440 = vmatmul.mubr.f32.vlgmr.msra.gmra.mrb[42].mxu0 %v11693_v37  ;;  %v37950_v34 = vsub.f32 %v13428_v57, %v37934_v31  ;;  %v37977_v17 = vpop.f32.mrb[18].mxu0  ;;  %v15246_v57 = vpop.permute.xlu1 %15245 }
 0x60d   :  { %31373 = vmatpush3.msra.mxu1 %v37595_v36  ;;  %31374 = vmatprep.mubr.msk.f32.mxu1 %vm34313_vm1, %v39248_v23  ;;  %v12598_v38 = vsub.f32 %v37870_v25, %v12597_v4  ;;  %v31321_v22 = vpop.f32.mrb[19].mxu0 }
 0x60e   :  { %31382 = vmatprep.subr.mxu1 %v39248_v23  ;;  %31448 = vmatpush3.msra.mxu0 %v37506_v12  ;;  %v13498_v28 = vand.u32 4294901760, %v37950_v34 }
 0x60f   :  { %31449 = vmatprep.mubr.msk.f32.mxu0 %vm34313_vm1, %v39248_v23  ;;  %31457 = vmatprep.subr.mxu0 %v39248_v23  ;;  %v12599_v51 = vand.u32 4294901760, %v12598_v38 }
 0x610   :  { %31375 = vmatmul.mubr.f32.vlgmr.msra.gmra.mrb[60].mxu1 %v37709_v13  ;;  %31450 = vmatmul.mubr.f32.vlgmr.msra.gmra.mrb[44].mxu0 %v37788_v47  ;;  %v13049_v13 = vand.u32 4294901760, %v13048_v10  ;;  %v13499_v42 = vsub.f32 %v37950_v34, %v13498_v28  ;;  %v38161_v10 = vand.u32 4294901760, %v15246_v57  ;;  %v15701_v22 = vpop.permute.xlu1 %15700 }
 0x611   :  { %31383 = vmatpush3.msra.mxu1 %v37533_v24  ;;  %31384 = vmatprep.mubr.msk.f32.mxu1 %vm34313_vm1, %v39248_v23 }
 0x612   :  { %31392 = vmatprep.subr.mxu1 %v39248_v23  ;;  %31458 = vmatpush3.msra.mxu0 %v37518_v46  ;;  %v13500_v48 = vand.u32 4294901760, %v13499_v42 }
 0x613   :  { %31459 = vmatprep.mubr.msk.f32.mxu0 %vm34313_vm1, %v39248_v23  ;;  %31467 = vmatprep.subr.mxu0 %v39248_v23 }
 0x614   :  { %31385 = vmatmul.mubr.f32.vlgmr.msra.gmra.mrb[62].mxu1 %v37711_v32  ;;  %31460 = vmatmul.mubr.f32.vlgmr.msra.gmra.mrb[46].mxu0 %v37773_v33 }
 0x615   :  { %31393 = vmatpush3.msra.mxu1 %v37496_v5  ;;  %31468 = vmatpush3.msra.mxu0 %v37595_v36 }
 0x616   :  { %31469 = vmatprep.mubr.msk.f32.mxu0 %vm34313_vm1, %v39248_v23  ;;  %31394 = vmatprep.mubr.msk.f32.mxu1 %vm34313_vm1, %v39248_v23 }
 0x617   :  { %31402 = vmatprep.subr.mxu1 %v39248_v23  ;;  %31477 = vmatprep.subr.mxu0 %v39248_v23 }
 0x618   :  { %31395 = vmatmul.mubr.f32.vlgmr.msra.gmra.mrb[64].mxu1 %v10790_v7  ;;  %31470 = vmatmul.mubr.f32.vlgmr.msra.gmra.mrb[48].mxu0 %v12143_v53  ;;  %v37991_v7 = vpop.f32.mrb[20].mxu0 }
 0x619   :  { %31403 = vmatpush3.msra.mxu1 %v37496_v5  ;;  %31404 = vmatprep.mubr.msk.f32.mxu1 %vm34313_vm1, %v39248_v23  ;;  %v31331_v39 = vpop.f32.mrb[21].mxu0 }
 0x61a   :  { %31412 = vmatprep.subr.mxu1 %v39248_v23  ;;  %31478 = vmatpush3.msra.mxu0 %v37627_v16  ;;  %v38001_v59 = vpop.f32.mrb[22].mxu0 }
 0x61b   :  { %31479 = vmatprep.mubr.msk.f32.mxu0 %vm34313_vm1, %v39248_v23  ;;  %31487 = vmatprep.subr.mxu0 %v39248_v23 }
 0x61c   :  { %31405 = vmatmul.mubr.f32.vlgmr.msra.gmra.mrb[66].mxu1 %v37711_v32  ;;  %31480 = vmatmul.mubr.f32.vlgmr.msra.gmra.mrb[50].mxu0 %v37833_v60  ;;  %v13877_v32 = vpop.permute.xlu0 %13876 }
 0x61d   :  { %31413 = vmatpush3.msra.mxu1 %v37640_v61  ;;  %31414 = vmatprep.mubr.msk.f32.mxu1 %vm34313_vm1, %v39248_v23  ;;  %v13878_v54 = vsel %vm8457_vm9, %v13877_v32, 0 }
 0x61e   :  { %31422 = vmatprep.subr.mxu1 %v39248_v23  ;;  %31488 = vmatpush3.msra.mxu0 %v37631_v27  ;;  %v37982_v63 = vand.u32 4294901760, %v13878_v54 }
 0x61f   :  { %31489 = vmatprep.mubr.msk.f32.mxu0 %vm34313_vm1, %v39248_v23  ;;  %31497 = vmatprep.subr.mxu0 %v39248_v23 }
 0x620   :  { %31415 = vmatmul.mubr.f32.vlgmr.msra.gmra.mrb[68].mxu1 %v37744_v49  ;;  %31490 = vmatmul.mubr.f32.vlgmr.msra.gmra.mrb[52].mxu0 %v37820_v40  ;;  %v37997_v29 = vsub.f32 %v13878_v54, %v37982_v63  ;;  %v14786_v55 = vpop.permute.xlu0 %14785 }
 0x621   :  { %31423 = vmatpush3.msra.mxu1 %v37595_v36  ;;  %31424 = vmatprep.mubr.msk.f32.mxu1 %vm34313_vm1, %v39248_v23  ;;  %v38061_v14 = vand.u32 4294901760, %v14786_v55 }
 0x622   :  { %31432 = vmatprep.subr.mxu1 %v39248_v23  ;;  %31498 = vmatpush3.msra.mxu0 %v37496_v5  ;;  %v13948_v52 = vand.u32 4294901760, %v37997_v29 }
 0x623   :  { %31499 = vmatprep.mubr.msk.f32.mxu0 %vm34313_vm1, %v39248_v23  ;;  %31507 = vmatprep.subr.mxu0 %v39248_v23  ;;  %v38078_v6 = vsub.f32 %v14786_v55, %v38061_v14 }
 0x624   :  { %31425 = vmatmul.mubr.f32.vlgmr.msra.gmra.mrb[70].mxu1 %v11240_v30  ;;  %31500 = vmatmul.mubr.f32.vlgmr.msra.gmra.mrb[54].mxu0 %v12599_v51  ;;  %v13949_v41 = vsub.f32 %v37997_v29, %v13948_v52 }
 0x625   :  { %31433 = vmatpush3.msra.mxu1 %v37595_v36  ;;  %31434 = vmatprep.mubr.msk.f32.mxu1 %vm34313_vm1, %v39248_v23  ;;  %v38095_v50 = vand.u32 4294901760, %v38078_v6 }
 0x626   :  { %31442 = vmatprep.subr.mxu1 %v39248_v23  ;;  %31508 = vmatpush3.msra.mxu0 %v37506_v12  ;;  %v13950_v30 = vand.u32 4294901760, %v13949_v41 }
 0x627   :  { %31509 = vmatprep.mubr.msk.f32.mxu0 %vm34313_vm1, %v39248_v23  ;;  %31517 = vmatprep.subr.mxu0 %v39248_v23  ;;  %v14868_v18 = vsub.f32 %v38078_v6, %v38095_v50 }
 0x628   :  { %31435 = vmatmul.mubr.f32.vlgmr.msra.gmra.mrb[72].mxu1 %v37744_v49  ;;  %31510 = vmatmul.mubr.f32.vlgmr.msra.gmra.mrb[56].mxu0 %v37870_v25  ;;  %v31341_v49 = vpop.f32.mrb[23].mxu0 }
 0x629   :  { %31443 = vmatpush3.msra.mxu1 %v37533_v24  ;;  %31444 = vmatprep.mubr.msk.f32.mxu1 %vm34313_vm1, %v39248_v23  ;;  %v38121_v53 = vand.u32 4294901760, %v14868_v18 }
 0x62a   :  { %31452 = vmatprep.subr.mxu1 %v39248_v23  ;;  %31518 = vmatpush3.msra.mxu0 %v37518_v46 }
 0x62b   :  { %31519 = vmatprep.mubr.msk.f32.mxu0 %vm34313_vm1, %v39248_v23  ;;  %31527 = vmatprep.subr.mxu0 %v39248_v23 }
 0x62c   :  { %31445 = vmatmul.mubr.f32.vlgmr.msra.gmra.mrb[74].mxu1 %v37773_v33  ;;  %31520 = vmatmul.mubr.f32.vlgmr.msra.gmra.mrb[58].mxu0 %v37854_v20 }
 0x62d   :  { %31453 = vmatpush3.msra.mxu1 %v37496_v5  ;;  %31454 = vmatprep.mubr.msk.f32.mxu1 %vm34313_vm1, %v39248_v23 }
 0x62e   :  { %31462 = vmatprep.subr.mxu1 %v39248_v23  ;;  %31528 = vmatpush3.msra.mxu0 %v37595_v36 }
 0x62f   :  { %31529 = vmatprep.mubr.msk.f32.mxu0 %vm34313_vm1, %v39248_v23  ;;  %31537 = vmatprep.subr.mxu0 %v39248_v23 }
 0x630   :  { %31530 = vmatmul.mubr.f32.vlgmr.msra.gmra.mrb[60].mxu0 %v13049_v13  ;;  %31455 = vmatmul.mubr.f32.vlgmr.msra.gmra.mrb[76].mxu1 %v11691_v43 }
 0x631   :  { %31463 = vmatpush3.msra.mxu1 %v37496_v5  ;;  %31464 = vmatprep.mubr.msk.f32.mxu1 %vm34313_vm1, %v39248_v23 }
 0x632   :  { %31472 = vmatprep.subr.mxu1 %v39248_v23  ;;  %31538 = vmatpush3.msra.mxu0 %v37627_v16 }
 0x633   :  { %31539 = vmatprep.mubr.msk.f32.mxu0 %vm34313_vm1, %v39248_v23  ;;  %31547 = vmatprep.subr.mxu0 %v39248_v23 }
 0x634   :  { %31465 = vmatmul.mubr.f32.vlgmr.msra.gmra.mrb[78].mxu1 %v37773_v33  ;;  %31540 = vmatmul.mubr.f32.vlgmr.msra.gmra.mrb[62].mxu0 %v37913_v1 }
 0x635   :  { %31473 = vmatpush3.msra.mxu1 %v37640_v61  ;;  %31474 = vmatprep.mubr.msk.f32.mxu1 %vm34313_vm1, %v39248_v23 }
 0x636   :  { %31482 = vmatprep.subr.mxu1 %v39248_v23  ;;  %31548 = vmatpush3.msra.mxu0 %v37631_v27 }
 0x637   :  { %31549 = vmatprep.mubr.msk.f32.mxu0 %vm34313_vm1, %v39248_v23  ;;  %31557 = vmatprep.subr.mxu0 %v39248_v23 }
 0x638   :  { %31475 = vmatmul.mubr.f32.vlgmr.msra.gmra.mrb[80].mxu1 %v37820_v40  ;;  %31550 = vmatmul.mubr.f32.vlgmr.msra.gmra.mrb[64].mxu0 %v37900_v0 }
 0x639   :  { %31483 = vmatpush3.msra.mxu1 %v37595_v36  ;;  %31484 = vmatprep.mubr.msk.f32.mxu1 %vm34313_vm1, %v39248_v23 }
 0x63a   :  { %31492 = vmatprep.subr.mxu1 %v39248_v23  ;;  %31558 = vmatpush3.msra.mxu0 %v37496_v5 }
 0x63b   :  { %31559 = vmatprep.mubr.msk.f32.mxu0 %vm34313_vm1, %v39248_v23  ;;  %31567 = vmatprep.subr.mxu0 %v39248_v23 }
 0x63c   :  { %31485 = vmatmul.mubr.f32.vlgmr.msra.gmra.mrb[82].mxu1 %v12141_v2  ;;  %31560 = vmatmul.mubr.f32.vlgmr.msra.gmra.mrb[66].mxu0 %v13500_v48  ;;  %v38194_v48 = vand.u32 4294901760, %v15701_v22 }
 0x63d   :  { %31493 = vmatpush3.msra.mxu1 %v37595_v36  ;;  %31494 = vmatprep.mubr.msk.f32.mxu1 %vm34313_vm1, %v39248_v23 }
 0x63e   :  { %31502 = vmatprep.subr.mxu1 %v39248_v23  ;;  %31568 = vmatpush3.msra.mxu0 %v37506_v12 }
 0x63f   :  { %31569 = vmatprep.mubr.msk.f32.mxu0 %vm34313_vm1, %v39248_v23  ;;  %31577 = vmatprep.subr.mxu0 %v39248_v23 }
 0x640   :  { %31495 = vmatmul.mubr.f32.vlgmr.msra.gmra.mrb[84].mxu1 %v37820_v40  ;;  %31570 = vmatmul.mubr.f32.vlgmr.msra.gmra.mrb[68].mxu0 %v37950_v34 }
 0x641   :  { %31503 = vmatpush3.msra.mxu1 %v37533_v24  ;;  %31504 = vmatprep.mubr.msk.f32.mxu1 %vm34313_vm1, %v39248_v23 }
 0x642   :  { %31512 = vmatprep.subr.mxu1 %v39248_v23  ;;  %31578 = vmatpush3.msra.mxu0 %v37518_v46 }
 0x643   :  { %31579 = vmatprep.mubr.msk.f32.mxu0 %vm34313_vm1, %v39248_v23  ;;  %31587 = vmatprep.subr.mxu0 %v39248_v23 }
 0x644   :  { %v8537_v12 = vpop.f32.mrb[14].mxu1  ;;  %31505 = vmatmul.mubr.f32.vlgmr.msra.gmra.mrb[86].mxu1 %v37854_v20  ;;  %31580 = vmatmul.mubr.f32.vlgmr.msra.gmra.mrb[70].mxu0 %v37934_v31 }
 0x645   :  { %v8538_v35 = vadd.f32 %v8537_v12, %v37704_v26  ;;  %31513 = vmatpush3.msra.mxu1 %v37496_v5  ;;  %v31231_v11 = vpop.f32.mrb[15].mxu1  ;;  %31514 = vmatprep.mubr.msk.f32.mxu1 %vm34313_vm1, %v39248_v23 }
 0x646   :  { %31522 = vmatprep.subr.mxu1 %v39248_v23  ;;  %31588 = vmatpush3.msra.mxu0 %v37595_v36 }
 0x647   :  { %31589 = vmatprep.mubr.msk.f32.mxu0 %vm34313_vm1, %v39248_v23  ;;  %31597 = vmatprep.subr.mxu0 %v39248_v23 }
 0x648   :  { %v8613_v46 = vpop.f32.mrb[16].mxu1  ;;  %31515 = vmatmul.mubr.f32.vlgmr.msra.gmra.mrb[88].mxu1 %v12597_v4  ;;  %31590 = vmatmul.mubr.f32.vlgmr.msra.gmra.mrb[72].mxu0 %v13950_v30 }
 0x649   :  { %v8614_v26 = vadd.f32 %v8613_v46, %v8538_v35  ;;  %31523 = vmatpush3.msra.mxu1 %v37496_v5  ;;  %v31236_v33 = vpop.f32.mrb[17].mxu1  ;;  %31524 = vmatprep.mubr.msk.f32.mxu1 %vm34313_vm1, %v39248_v23 }
 0x64a   :  { %31532 = vmatprep.subr.mxu1 %v39248_v23  ;;  %31598 = vmatpush3.msra.mxu0 %v37627_v16  ;;  %v38057_v16 = vand.u32 4294901760, %v37638_v44 }
 0x64b   :  { %31599 = vmatprep.mubr.msk.f32.mxu0 %vm34313_vm1, %v39248_v23  ;;  %31607 = vmatprep.subr.mxu0 %v39248_v23 }
 0x64c   :  { %v8687_v47 = vpop.f32.mrb[18].mxu1  ;;  %31525 = vmatmul.mubr.f32.vlgmr.msra.gmra.mrb[90].mxu1 %v37854_v20  ;;  %31600 = vmatmul.mubr.f32.vlgmr.msra.gmra.mrb[74].mxu0 %v37997_v29  ;;  %v38208_v29 = vsub.f32 %v15701_v22, %v38194_v48 }
 0x64d   :  { %v8688_v19 = vadd.f32 %v8687_v47, %v8614_v26  ;;  %31533 = vmatpush3.msra.mxu1 %v37640_v61  ;;  %v31241_v43 = vpop.f32.mrb[19].mxu1  ;;  %31534 = vmatprep.mubr.msk.f32.mxu1 %vm34313_vm1, %v39248_v23 }
 0x64e   :  { %31542 = vmatprep.subr.mxu1 %v39248_v23  ;;  %31608 = vmatpush3.msra.mxu0 %v37631_v27  ;;  %v38073_v27 = vsub.f32 %v37638_v44, %v38057_v16  ;;  %v38216_v49 = vand.u32 4294901760, %v38208_v29 }
 0x64f   :  { %31609 = vmatprep.mubr.msk.f32.mxu0 %vm34313_vm1, %v39248_v23  ;;  %31617 = vmatprep.subr.mxu0 %v39248_v23 }
 0x650   :  { %v8761_v3 = vpop.f32.mrb[20].mxu1  ;;  %31535 = vmatmul.mubr.f32.vlgmr.msra.gmra.mrb[92].mxu1 %v37900_v0  ;;  %31610 = vmatmul.mubr.f32.vlgmr.msra.gmra.mrb[76].mxu0 %v37982_v63  ;;  %v38092_v60 = vand.u32 4294901760, %v38073_v27 }
 0x651   :  { %v8762_v56 = vadd.f32 %v8761_v3, %v8688_v19  ;;  %31543 = vmatpush3.msra.mxu1 %v37595_v36  ;;  %v31246_v40 = vpop.f32.mrb[21].mxu1  ;;  %31544 = vmatprep.mubr.msk.f32.mxu1 %vm34313_vm1, %v39248_v23 }
 0x652   :  { %31552 = vmatprep.subr.mxu1 %v39248_v23  ;;  %31618 = vmatpush3.msra.mxu0 %v38057_v16 }
 0x653   :  { %31619 = vmatprep.mubr.msk.f32.mxu0 %vm34313_vm1, %v39248_v23  ;;  %31627 = vmatprep.subr.mxu0 %v39248_v23 }
 0x654   :  { %v8835_v37 = vpop.f32.mrb[22].mxu1  ;;  %31545 = vmatmul.mubr.f32.vlgmr.msra.gmra.mrb[94].mxu1 %v13047_v21  ;;  %31620 = vmatmul.mubr.f32.vlgmr.msra.gmra.mrb[78].mxu0 %v39248_v23 }
 0x655   :  { %v8836_v44 = vadd.f32 %v8835_v37, %v8762_v56  ;;  %31553 = vmatpush3.msra.mxu1 %v37595_v36  ;;  %v31251_v9 = vpop.f32.mrb[23].mxu1  ;;  %31554 = vmatprep.mubr.msk.f32.mxu1 %vm34313_vm1, %v39248_v23 }
 0x656   :  { %31562 = vmatprep.subr.mxu1 %v39248_v23  ;;  %31628 = vmatpush3.msra.mxu0 %v38073_v27 }
 0x657   :  { %31629 = vmatprep.mubr.msk.f32.mxu0 %vm34313_vm1, %v39248_v23  ;;  %31637 = vmatprep.subr.mxu0 %v39248_v23 }
 0x658   :  { %v8907_v58 = vpop.f32.mrb[24].mxu1  ;;  %31555 = vmatmul.mubr.f32.vlgmr.msra.gmra.mrb[96].mxu1 %v37900_v0  ;;  %31630 = vmatmul.mubr.f32.vlgmr.msra.gmra.mrb[80].mxu0 %v39248_v23 }
 0x659   :  { %v38102_v2 = vadd.f32 %v8907_v58, %v8836_v44  ;;  %31563 = vmatpush3.msra.mxu1 %v37533_v24  ;;  %v31256_v20 = vpop.f32.mrb[25].mxu1  ;;  %31564 = vmatprep.mubr.msk.f32.mxu1 %vm34313_vm1, %v39248_v23 }
 0x65a   :  { %31572 = vmatprep.subr.mxu1 %v39248_v23  ;;  %31638 = vmatpush3.msra.mxu0 %v38092_v60 }
 0x65b   :  { %31639 = vmatprep.mubr.msk.f32.mxu0 %vm34313_vm1, %v39248_v23  ;;  %31647 = vmatprep.subr.mxu0 %v39248_v23 }
 0x65c   :  { %31565 = vmatmul.mubr.f32.vlgmr.msra.gmra.mrb[98].mxu1 %v37934_v31  ;;  %31640 = vmatmul.mubr.f32.vlgmr.msra.gmra.mrb[82].mxu0 %v39248_v23  ;;  %v8992_v24 = vpop.f32.mrb[26].mxu1 }
 0x65d   :  { %31573 = vmatpush3.msra.mxu1 %v37496_v5  ;;  %31574 = vmatprep.mubr.msk.f32.mxu1 %vm34313_vm1, %v39248_v23  ;;  %v31261_v25 = vpop.f32.mrb[27].mxu1 }
 0x65e   :  { %31582 = vmatprep.subr.mxu1 %v39248_v23  ;;  %31648 = vmatpush3.msra.mxu0 %v38061_v14 }
 0x65f   :  { %31649 = vmatprep.mubr.msk.f32.mxu0 %vm34313_vm1, %v39248_v23  ;;  %31652 = vmatprep.subr.mxu0 %v39248_v23 }
 0x660   :  { %31575 = vmatmul.mubr.f32.vlgmr.msra.gmra.mrb[100].mxu1 %v13498_v28  ;;  %31650 = vmatmul.mubr.f32.vlgmr.msra.gmra.mrb[84].mxu0 %v39248_v23  ;;  %v9068_v62 = vpop.f32.mrb[28].mxu1 }
 0x661   :  { %31583 = vmatpush3.msra.mxu1 %v37496_v5  ;;  %31584 = vmatprep.mubr.msk.f32.mxu1 %vm34313_vm1, %v39248_v23  ;;  %v9069_v4 = vadd.f32 %v9068_v62, %v8992_v24  ;;  %v31266_v15 = vpop.f32.mrb[29].mxu1 }
 0x662   :  { %31592 = vmatprep.subr.mxu1 %v39248_v23  ;;  %31653 = vmatpush3.msra.mxu0 %v38121_v53 }
 0x663   :  { %31654 = vmatprep.mubr.msk.f32.mxu0 %vm34313_vm1, %v39248_v23  ;;  %31657 = vmatprep.subr.mxu0 %v39248_v23 }
 0x664   :  { %31585 = vmatmul.mubr.f32.vlgmr.msra.gmra.mrb[102].mxu1 %v37934_v31  ;;  %v9142_v38 = vpop.f32.mrb[30].mxu1 }
 0x665   :  { %31593 = vmatpush3.msra.mxu1 %v37640_v61  ;;  %31594 = vmatprep.mubr.msk.f32.mxu1 %vm34313_vm1, %v39248_v23  ;;  %v9143_v5 = vadd.f32 %v9142_v38, %v9069_v4  ;;  %v31271_v0 = vpop.f32.mrb[31].mxu1  ;;  %v14411_v61 = vsub.f32 %v38073_v27, %v38092_v60 }
 0x666   :  { %31602 = vmatprep.subr.mxu1 %v39248_v23 }
 0x667   :  { %v38159_v31 = vand.u32 4294901760, %v14411_v61 }
 0x668   :  { %31595 = vmatmul.mubr.f32.vlgmr.msra.gmra.mrb[104].mxu1 %v37982_v63  ;;  %31655 = vmatmul.mubr.f32.vlgmr.msra.gmra.mrb[84].mxu0 %v39248_v23  ;;  %v9216_v51 = vpop.f32.mrb[32].mxu1 }
 0x669   :  { %31603 = vmatpush3.msra.mxu1 %v37595_v36  ;;  %31604 = vmatprep.mubr.msk.f32.mxu1 %vm34313_vm1, %v39248_v23  ;;  %v9217_v1 = vadd.f32 %v9216_v51, %v9143_v5  ;;  %v31276_v45 = vpop.f32.mrb[33].mxu1 }
 0x66a   :  { %31612 = vmatprep.subr.mxu1 %v39248_v23  ;;  %31658 = vmatpush3.msra.mxu0 %v38078_v6 }
 0x66b   :  { %31659 = vmatprep.mubr.msk.f32.mxu0 %vm34313_vm1, %v39248_v23  ;;  %31662 = vmatprep.subr.mxu0 %v39248_v23 }
 0x66c   :  { %31605 = vmatmul.mubr.f32.vlgmr.msra.gmra.mrb[106].mxu1 %v13948_v52  ;;  %v9290_v21 = vpop.f32.mrb[34].mxu1  ;;  %v15783_v52 = vsub.f32 %v38208_v29, %v38216_v49 }
 0x66d   :  { %31613 = vmatpush3.msra.mxu1 %v37595_v36  ;;  %31614 = vmatprep.mubr.msk.f32.mxu1 %vm34313_vm1, %v39248_v23  ;;  %v9291_v34 = vadd.f32 %v9290_v21, %v9217_v1  ;;  %v31281_v13 = vpop.f32.mrb[35].mxu1  ;;  %v38168_v36 = vsub.f32 %v15246_v57, %v38161_v10 }
 0x66e   :  { %31622 = vmatprep.subr.mxu1 %v39248_v23  ;;  %v38230_v41 = vand.u32 4294901760, %v15783_v52 }
 0x66f   :  { %v38181_v42 = vand.u32 4294901760, %v38168_v36 }
 0x670   :  { %31615 = vmatmul.mubr.f32.vlgmr.msra.gmra.mrb[108].mxu1 %v37982_v63  ;;  %31660 = vmatmul.mubr.f32.vlgmr.msra.gmra.mrb[84].mxu0 %v39248_v23  ;;  %v9362_v32 = vpop.f32.mrb[36].mxu1 }
 0x671   :  { %31623 = vmatpush3.msra.mxu1 %v38159_v31  ;;  %31624 = vmatprep.mubr.msk.f32.mxu1 %vm34313_vm1, %v39248_v23  ;;  %v38172_v28 = vadd.f32 %v9362_v32, %v9291_v34  ;;  %v31286_v54 = vpop.f32.mrb[37].mxu1  ;;  %v15328_v63 = vsub.f32 %v38168_v36, %v38181_v42 }
 0x672   :  { %31632 = vmatprep.subr.mxu1 %v39248_v23  ;;  %31663 = vmatpush3.msra.mxu0 %v38061_v14 }
 0x673   :  { %31664 = vmatprep.mubr.msk.f32.mxu0 %vm34313_vm1, %v39248_v23  ;;  %31667 = vmatprep.subr.mxu0 %v39248_v23  ;;  %v38205_v39 = vand.u32 4294901760, %v15328_v63 }
 0x674   :  { %31625 = vmatmul.mubr.f32.vlgmr.msra.gmra.mrb[110].mxu1 %v39248_v23 }
 0x675   :  { %31633 = vmatpush3.msra.mxu1 %v38057_v16  ;;  %31634 = vmatprep.mubr.msk.f32.mxu1 %vm34313_vm1, %v39248_v23 }
 0x676   :  { %31642 = vmatprep.subr.mxu1 %v39248_v23 }
 0x678   :  { %31635 = vmatmul.mubr.f32.vlgmr.msra.gmra.mrb[112].mxu1 %v39248_v23  ;;  %31665 = vmatmul.mubr.f32.vlgmr.msra.gmra.mrb[84].mxu0 %v39248_v23 }
 0x679   :  { %31643 = vmatpush3.msra.mxu1 %v38057_v16  ;;  %31644 = vmatprep.mubr.msk.f32.mxu1 %vm34313_vm1, %v39248_v23 }
 0x67a   :  { %31677 = vmatprep.subr.mxu1 %v39248_v23  ;;  %31668 = vmatpush3.msra.mxu0 %v38095_v50 }
 0x67b   :  { %31669 = vmatprep.mubr.msk.f32.mxu0 %vm34313_vm1, %v39248_v23  ;;  %31672 = vmatprep.subr.mxu0 %v39248_v23 }
 0x67c   :  { %31645 = vmatmul.mubr.f32.vlgmr.msra.gmra.mrb[114].mxu1 %v39248_v23 }
 0x67d   :  { %31678 = vmatpush3.msra.mxu1 %v38161_v10  ;;  %31679 = vmatprep.mubr.msk.f32.mxu1 %vm34313_vm1, %v39248_v23 }
 0x67e   :  { %31682 = vmatprep.subr.mxu1 %v39248_v23 }
 0x680   :  { %31670 = vmatmul.mubr.f32.vlgmr.msra.gmra.mrb[84].mxu0 %v39248_v23  ;;  %31680 = vmatmul.mubr.f32.vlgmr.msra.gmra.mrb[116].mxu1 %v39248_v23 }
 0x681   :  { %31683 = vmatpush3.msra.mxu1 %v38205_v39  ;;  %31673 = vmatpush3.msra.mxu0 %v38061_v14 }
 0x682   :  { %31674 = vmatprep.mubr.msk.f32.mxu0 %vm34313_vm1, %v39248_v23  ;;  %31684 = vmatprep.mubr.msk.f32.mxu1 %vm34313_vm1, %v39248_v23 }
 0x683   :  { %31687 = vmatprep.subr.mxu1 %v39248_v23  ;;  %31707 = vmatprep.subr.mxu0 %v39248_v23 }
 0x688   :  { %31675 = vmatmul.mubr.f32.vlgmr.msra.gmra.mrb[84].mxu0 %v39248_v23  ;;  %31685 = vmatmul.mubr.f32.vlgmr.msra.gmra.mrb[116].mxu1 %v39248_v23 }
 0x689   :  { %31688 = vmatpush3.msra.mxu1 %v38168_v36  ;;  %31708 = vmatpush3.msra.mxu0 %v38194_v48 }
 0x68a   :  { %31709 = vmatprep.mubr.msk.f32.mxu0 %vm34313_vm1, %v39248_v23  ;;  %31689 = vmatprep.mubr.msk.f32.mxu1 %vm34313_vm1, %v39248_v23 }
 0x68b   :  { %31692 = vmatprep.subr.mxu1 %v39248_v23  ;;  %31712 = vmatprep.subr.mxu0 %v39248_v23 }
 0x68c   :  { %31710 = vmatmul.mubr.f32.vlgmr.msra.gmra.mrb[86].mxu0 %v39248_v23 }
 0x68d   :  { %31713 = vmatpush3.msra.mxu0 %v38230_v41  ;;  %31714 = vmatprep.mubr.msk.f32.mxu0 %vm34313_vm1, %v39248_v23 }
 0x68e   :  { %31717 = vmatprep.subr.mxu0 %v39248_v23 }
 0x690   :  { %31690 = vmatmul.mubr.f32.vlgmr.msra.gmra.mrb[116].mxu1 %v39248_v23 }
 0x691   :  { %31693 = vmatpush3.msra.mxu1 %v38161_v10  ;;  %31694 = vmatprep.mubr.msk.f32.mxu1 %vm34313_vm1, %v39248_v23 }
 0x692   :  { %31697 = vmatprep.subr.mxu1 %v39248_v23 }
 0x694   :  { %31715 = vmatmul.mubr.f32.vlgmr.msra.gmra.mrb[86].mxu0 %v39248_v23 }
 0x695   :  { %31718 = vmatpush3.msra.mxu0 %v38208_v29  ;;  %31719 = vmatprep.mubr.msk.f32.mxu0 %vm34313_vm1, %v39248_v23 }
 0x696   :  { %31722 = vmatprep.subr.mxu0 %v39248_v23 }
 0x698   :  { %31695 = vmatmul.mubr.f32.vlgmr.msra.gmra.mrb[116].mxu1 %v39248_v23 }
 0x699   :  { %31698 = vmatpush3.msra.mxu1 %v38181_v42  ;;  %31699 = vmatprep.mubr.msk.f32.mxu1 %vm34313_vm1, %v39248_v23 }
 0x69a   :  { %31702 = vmatprep.subr.mxu1 %v39248_v23 }
 0x69c   :  { %31720 = vmatmul.mubr.f32.vlgmr.msra.gmra.mrb[86].mxu0 %v39248_v23 }
 0x69d   :  { %31723 = vmatpush3.msra.mxu0 %v38194_v48  ;;  %31724 = vmatprep.mubr.msk.f32.mxu0 %vm34313_vm1, %v39248_v23 }
 0x69e   :  { %31727 = vmatprep.subr.mxu0 %v39248_v23 }
 0x6a0   :  { %31700 = vmatmul.mubr.f32.vlgmr.msra.gmra.mrb[116].mxu1 %v39248_v23 }
 0x6a1   :  { %31703 = vmatpush3.msra.mxu1 %v38161_v10  ;;  %31704 = vmatprep.mubr.msk.f32.mxu1 %vm34313_vm1, %v39248_v23 }
 0x6a2   :  { %31737 = vmatprep.subr.mxu1 %v39248_v23 }
 0x6a4   :  { %31725 = vmatmul.mubr.f32.vlgmr.msra.gmra.mrb[86].mxu0 %v39248_v23 }
 0x6a5   :  { %31728 = vmatpush3.msra.mxu0 %v38216_v49  ;;  %31729 = vmatprep.mubr.msk.f32.mxu0 %vm34313_vm1, %v39248_v23 }
 0x6a6   :  { %31732 = vmatprep.subr.mxu0 %v39248_v23 }
 0x6a8   :  { %31705 = vmatmul.mubr.f32.vlgmr.msra.gmra.mrb[116].mxu1 %v39248_v23 }
 0x6a9   :  { %31738 = vmatpush3.msra.mxu1 %v38057_v16  ;;  %31739 = vmatprep.mubr.msk.f32.mxu1 %vm34313_vm1, %v39248_v23 }
 0x6aa   :  { %31742 = vmatprep.subr.mxu1 %v39248_v23 }
 0x6ac   :  { %31730 = vmatmul.mubr.f32.vlgmr.msra.gmra.mrb[86].mxu0 %v39248_v23 }
 0x6ad   :  { %31733 = vmatpush3.msra.mxu0 %v38194_v48  ;;  %31734 = vmatprep.mubr.msk.f32.mxu0 %vm34313_vm1, %v39248_v23 }
 0x6ae   :  { %31767 = vmatprep.subr.mxu0 %v39248_v23 }
 0x6b4   :  { %31735 = vmatmul.mubr.f32.vlgmr.msra.gmra.mrb[86].mxu0 %v39248_v23 }
 0x6b5   :  { %31768 = vmatpush3.msra.mxu0 %v38061_v14  ;;  %31769 = vmatprep.mubr.msk.f32.mxu0 %vm34313_vm1, %v39248_v23 }
 0x6b6   :  { %31772 = vmatprep.subr.mxu0 %v39248_v23 }
 0x6b7   :  { %v9442_v12 = vpop.f32.mrb[38].mxu1 }
 0x6b8   :  { %v9443_v35 = vadd.f32 %v9442_v12, %v38172_v28  ;;  %v31291_v11 = vpop.f32.mrb[39].mxu1 }
 0x6bb   :  { %v9518_v30 = vpop.f32.mrb[40].mxu1  ;;  %v10343_v46 = vpop.f32.mrb[24].mxu0 }
 0x6bc   :  { %v9519_v26 = vadd.f32 %v9518_v30, %v9443_v35  ;;  %v31296_v33 = vpop.f32.mrb[41].mxu1  ;;  %v31351_v55 = vpop.f32.mrb[25].mxu0 }
 0x6bf   :  { %v9592_v47 = vpop.f32.mrb[42].mxu1  ;;  %v10493_v19 = vpop.f32.mrb[26].mxu0 }
 0x6c0   :  { %v9593_v43 = vadd.f32 %v9592_v47, %v9519_v26  ;;  %v31301_v3 = vpop.f32.mrb[43].mxu1  ;;  %v31361_v56 = vpop.f32.mrb[27].mxu0 }
 0x6c3   :  { %v9666_v40 = vpop.f32.mrb[44].mxu1  ;;  %v10641_v37 = vpop.f32.mrb[28].mxu0 }
 0x6c4   :  { %v9667_v44 = vadd.f32 %v9666_v40, %v9593_v43  ;;  %v31306_v9 = vpop.f32.mrb[45].mxu1  ;;  %v31371_v58 = vpop.f32.mrb[29].mxu0 }
 0x6c7   :  { %v9740_v20 = vpop.f32.mrb[46].mxu1  ;;  %v10794_v18 = vpop.f32.mrb[30].mxu0 }
 0x6c8   :  { %v9741_v24 = vadd.f32 %v9740_v20, %v9667_v44  ;;  %v31311_v25 = vpop.f32.mrb[47].mxu1  ;;  %v31381_v62 = vpop.f32.mrb[31].mxu0 }
 0x6cb   :  { %v9812_v4 = vpop.f32.mrb[48].mxu1  ;;  %v10944_v15 = vpop.f32.mrb[32].mxu0 }
 0x6cc   :  { %v38289_v38 = vadd.f32 %v9812_v4, %v9741_v24  ;;  %v31316_v5 = vpop.f32.mrb[49].mxu1  ;;  %v31391_v0 = vpop.f32.mrb[33].mxu0 }
 0x6cf   :  { %v9969_v51 = vpop.f32.mrb[50].mxu1  ;;  %v11092_v61 = vpop.f32.mrb[34].mxu0 }
 0x6d0   :  { %v9970_v1 = vadd.f32 %v9969_v51, %v37977_v17  ;;  %v31326_v45 = vpop.f32.mrb[51].mxu1  ;;  %v31401_v57 = vpop.f32.mrb[35].mxu0 }
 0x6d2   :  { %v10044_v21 = vadd.f32 %v37991_v7, %v9970_v1 }
 0x6d3   :  { %v10117_v34 = vpop.f32.mrb[52].mxu1  ;;  %v11244_v13 = vpop.f32.mrb[36].mxu0 }
 0x6d4   :  { %v10118_v32 = vadd.f32 %v10117_v34, %v10044_v21  ;;  %v31336_v28 = vpop.f32.mrb[53].mxu1  ;;  %v31411_v54 = vpop.f32.mrb[37].mxu0 }
 0x6d6   :  { %v10192_v22 = vadd.f32 %v38001_v59, %v10118_v32 }
 0x6d7   :  { %v10263_v63 = vpop.f32.mrb[54].mxu1  ;;  %v11394_v52 = vpop.f32.mrb[38].mxu0 }
 0x6d8   :  { %v10264_v12 = vadd.f32 %v10263_v63, %v10192_v22  ;;  %v31346_v35 = vpop.f32.mrb[55].mxu1  ;;  %v31421_v11 = vpop.f32.mrb[39].mxu0 }
 0x6da   :  { %v10344_v30 = vadd.f32 %v10343_v46, %v10264_v12 }
 0x6db   :  { %v10419_v26 = vpop.f32.mrb[56].mxu1  ;;  %v11542_v33 = vpop.f32.mrb[40].mxu0 }
 0x6dc   :  { %v10420_v17 = vadd.f32 %v10419_v26, %v10344_v30  ;;  %v31356_v55 = vpop.f32.mrb[57].mxu1  ;;  %v31431_v47 = vpop.f32.mrb[41].mxu0 }
 0x6de   :  { %v10494_v43 = vadd.f32 %v10493_v19, %v10420_v17 }
 0x6df   :  { %v10567_v7 = vpop.f32.mrb[58].mxu1  ;;  %v11695_v3 = vpop.f32.mrb[42].mxu0 }
 0x6e0   :  { %v10568_v56 = vadd.f32 %v10567_v7, %v10494_v43  ;;  %v31366_v40 = vpop.f32.mrb[59].mxu1  ;;  %v31441_v44 = vpop.f32.mrb[43].mxu0 }
 0x6e2   :  { %v10642_v9 = vadd.f32 %v10641_v37, %v10568_v56 }
 0x6e3   :  { %v10713_v58 = vpop.f32.mrb[60].mxu1  ;;  %v11845_v59 = vpop.f32.mrb[44].mxu0 }
 0x6e4   :  { %v38294_v20 = vadd.f32 %v10713_v58, %v10642_v9  ;;  %v31376_v24 = vpop.f32.mrb[61].mxu1  ;;  %v31451_v25 = vpop.f32.mrb[45].mxu0 }
 0x6e7   :  { %v10870_v62 = vpop.f32.mrb[62].mxu1  ;;  %v11993_v46 = vpop.f32.mrb[46].mxu0 }
 0x6e8   :  { %v10871_v4 = vadd.f32 %v10870_v62, %v10794_v18  ;;  %v31386_v5 = vpop.f32.mrb[63].mxu1  ;;  %v31461_v0 = vpop.f32.mrb[47].mxu0 }
 0x6ea   :  { %v10945_v51 = vadd.f32 %v10944_v15, %v10871_v4 }
 0x6eb   :  { %v11018_v1 = vpop.f32.mrb[64].mxu1  ;;  %v12145_v19 = vpop.f32.mrb[48].mxu0 }
 0x6ec   :  { %v11019_v45 = vadd.f32 %v11018_v1, %v10945_v51  ;;  %v31396_v57 = vpop.f32.mrb[65].mxu1  ;;  %v31471_v21 = vpop.f32.mrb[49].mxu0 }
 0x6ee   :  { %v11093_v34 = vadd.f32 %v11092_v61, %v11019_v45 }
 0x6ef   :  { %v11164_v32 = vpop.f32.mrb[66].mxu1  ;;  %v12295_v37 = vpop.f32.mrb[50].mxu0 }
 0x6f0   :  { %v11165_v28 = vadd.f32 %v11164_v32, %v11093_v34  ;;  %v31406_v54 = vpop.f32.mrb[67].mxu1  ;;  %v31481_v22 = vpop.f32.mrb[51].mxu0 }
 0x6f2   :  { %v11245_v63 = vadd.f32 %v11244_v13, %v11165_v28 }
 0x6f3   :  { %v11320_v12 = vpop.f32.mrb[68].mxu1  ;;  %v12443_v35 = vpop.f32.mrb[52].mxu0 }
 0x6f4   :  { %v11321_v11 = vadd.f32 %v11320_v12, %v11245_v63  ;;  %v31416_v30 = vpop.f32.mrb[69].mxu1  ;;  %v31491_v18 = vpop.f32.mrb[53].mxu0 }
 0x6f6   :  { %v11395_v26 = vadd.f32 %v11394_v52, %v11321_v11 }
 0x6f7   :  { %v11468_v17 = vpop.f32.mrb[70].mxu1  ;;  %v12601_v15 = vpop.f32.mrb[54].mxu0 }
 0x6f8   :  { %v11469_v55 = vadd.f32 %v11468_v17, %v11395_v26  ;;  %v31426_v47 = vpop.f32.mrb[71].mxu1  ;;  %v31501_v43 = vpop.f32.mrb[55].mxu0 }
 0x6fa   :  { %v11543_v7 = vadd.f32 %v11542_v33, %v11469_v55 }
 0x6fb   :  { %v11614_v56 = vpop.f32.mrb[72].mxu1  ;;  %v12751_v61 = vpop.f32.mrb[56].mxu0 }
 0x6fc   :  { %v38296_v40 = vadd.f32 %v11614_v56, %v11543_v7  ;;  %v31436_v44 = vpop.f32.mrb[73].mxu1  ;;  %v31511_v9 = vpop.f32.mrb[57].mxu0 }
 0x6ff   :  { %v11771_v58 = vpop.f32.mrb[74].mxu1  ;;  %v12899_v13 = vpop.f32.mrb[58].mxu0 }
 0x700   :  { %v11772_v24 = vadd.f32 %v11771_v58, %v11695_v3  ;;  %v31446_v25 = vpop.f32.mrb[75].mxu1  ;;  %v31521_v62 = vpop.f32.mrb[59].mxu0 }
 0x702   :  { %v11846_v4 = vadd.f32 %v11845_v59, %v11772_v24 }
 0x703   :  { %v11919_v5 = vpop.f32.mrb[76].mxu1  ;;  %v13051_v52 = vpop.f32.mrb[60].mxu0 }
 0x704   :  { %v11920_v0 = vadd.f32 %v11919_v5, %v11846_v4  ;;  %v31456_v51 = vpop.f32.mrb[77].mxu1  ;;  %v31531_v1 = vpop.f32.mrb[61].mxu0 }
 0x706   :  { %v11994_v45 = vadd.f32 %v11993_v46, %v11920_v0 }
 0x707   :  { %v12065_v57 = vpop.f32.mrb[78].mxu1  ;;  %v13201_v33 = vpop.f32.mrb[62].mxu0 }
 0x708   :  { %v12066_v21 = vadd.f32 %v12065_v57, %v11994_v45  ;;  %v31466_v34 = vpop.f32.mrb[79].mxu1  ;;  %v31541_v32 = vpop.f32.mrb[63].mxu0 }
 0x70a   :  { %v12146_v28 = vadd.f32 %v12145_v19, %v12066_v21 }
 0x70b   :  { %v12221_v54 = vpop.f32.mrb[80].mxu1  ;;  %v13349_v22 = vpop.f32.mrb[64].mxu0 }
 0x70c   :  { %v12222_v63 = vadd.f32 %v12221_v54, %v12146_v28  ;;  %v31476_v12 = vpop.f32.mrb[81].mxu1  ;;  %v31551_v3 = vpop.f32.mrb[65].mxu0 }
 0x70e   :  { %v12296_v11 = vadd.f32 %v12295_v37, %v12222_v63 }
 0x70f   :  { %v12369_v30 = vpop.f32.mrb[82].mxu1  ;;  %v13502_v59 = vpop.f32.mrb[66].mxu0 }
 0x710   :  { %v12370_v18 = vadd.f32 %v12369_v30, %v12296_v11  ;;  %v31486_v26 = vpop.f32.mrb[83].mxu1  ;;  %v31561_v17 = vpop.f32.mrb[67].mxu0 }
 0x712   :  { %v12444_v55 = vadd.f32 %v12443_v35, %v12370_v18 }
 0x713   :  { %v12515_v47 = vpop.f32.mrb[84].mxu1  ;;  %v13652_v46 = vpop.f32.mrb[68].mxu0 }
 0x714   :  { %v38298_v43 = vadd.f32 %v12515_v47, %v12444_v55  ;;  %v31496_v7 = vpop.f32.mrb[85].mxu1  ;;  %v31571_v56 = vpop.f32.mrb[69].mxu0 }
 0x717   :  { %v12677_v44 = vpop.f32.mrb[86].mxu1  ;;  %v13800_v19 = vpop.f32.mrb[70].mxu0 }
 0x718   :  { %v12678_v9 = vadd.f32 %v12677_v44, %v12601_v15  ;;  %v31506_v58 = vpop.f32.mrb[87].mxu1  ;;  %v31581_v24 = vpop.f32.mrb[71].mxu0 }
 0x71a   :  { %v12752_v25 = vadd.f32 %v12751_v61, %v12678_v9 }
 0x71b   :  { %v12825_v62 = vpop.f32.mrb[88].mxu1  ;;  %v13952_v37 = vpop.f32.mrb[72].mxu0 }
 0x71c   :  { %v12826_v4 = vadd.f32 %v12825_v62, %v12752_v25  ;;  %v31516_v5 = vpop.f32.mrb[89].mxu1  ;;  %v31591_v0 = vpop.f32.mrb[73].mxu0 }
 0x71e   :  { %v12900_v51 = vadd.f32 %v12899_v13, %v12826_v4 }
 0x71f   :  { %v12971_v1 = vpop.f32.mrb[90].mxu1  ;;  %v14102_v35 = vpop.f32.mrb[74].mxu0 }
 0x720   :  { %v12972_v45 = vadd.f32 %v12971_v1, %v12900_v51  ;;  %v31526_v57 = vpop.f32.mrb[91].mxu1  ;;  %v31601_v21 = vpop.f32.mrb[75].mxu0 }
 0x722   :  { %v13052_v34 = vadd.f32 %v13051_v52, %v12972_v45 }
 0x723   :  { %v13127_v32 = vpop.f32.mrb[92].mxu1  ;;  %v14250_v28 = vpop.f32.mrb[76].mxu0 }
 0x724   :  { %v13128_v54 = vadd.f32 %v13127_v32, %v13052_v34  ;;  %v31536_v63 = vpop.f32.mrb[93].mxu1  ;;  %v31611_v15 = vpop.f32.mrb[77].mxu0 }
 0x726   :  { %v13202_v12 = vadd.f32 %v13201_v33, %v13128_v54 }
 0x727   :  { %v13275_v3 = vpop.f32.mrb[94].mxu1  ;;  %v14403_v61 = vpop.f32.mrb[78].mxu0 }
 0x728   :  { %v13276_v11 = vadd.f32 %v13275_v3, %v13202_v12  ;;  %v31546_v30 = vpop.f32.mrb[95].mxu1  ;;  %v31621_v18 = vpop.f32.mrb[79].mxu0 }
 0x72a   :  { %v13350_v26 = vadd.f32 %v13349_v22, %v13276_v11 }
 0x72b   :  { %v13421_v17 = vpop.f32.mrb[96].mxu1  ;;  %v14553_v13 = vpop.f32.mrb[80].mxu0 }
 0x72c   :  { %v38300_v55 = vadd.f32 %v13421_v17, %v13350_v26  ;;  %v31556_v47 = vpop.f32.mrb[97].mxu1  ;;  %v31631_v7 = vpop.f32.mrb[81].mxu0 }
 0x72f   :  { %v13578_v56 = vpop.f32.mrb[98].mxu1  ;;  %v14701_v52 = vpop.f32.mrb[82].mxu0 }
 0x730   :  { %v13579_v44 = vadd.f32 %v13578_v56, %v13502_v59  ;;  %v31566_v9 = vpop.f32.mrb[99].mxu1  ;;  %v31641_v58 = vpop.f32.mrb[83].mxu0 }
 0x732   :  { %v13653_v24 = vadd.f32 %v13652_v46, %v13579_v44 }
 0x733   :  { %v13726_v25 = vpop.f32.mrb[100].mxu1 }
 0x734   :  { %v13727_v33 = vadd.f32 %v13726_v25, %v13653_v24  ;;  %v31576_v62 = vpop.f32.mrb[101].mxu1 }
 0x736   :  { %v13801_v4 = vadd.f32 %v13800_v19, %v13727_v33 }
 0x737   :  { %v13872_v5 = vpop.f32.mrb[102].mxu1 }
 0x738   :  { %v13873_v0 = vadd.f32 %v13872_v5, %v13801_v4  ;;  %v31586_v51 = vpop.f32.mrb[103].mxu1 }
 0x73a   :  { %v13953_v22 = vadd.f32 %v13952_v37, %v13873_v0 }
 0x73b   :  { %v14028_v1 = vpop.f32.mrb[104].mxu1 }
 0x73c   :  { %v14029_v45 = vadd.f32 %v14028_v1, %v13953_v22  ;;  %v31596_v57 = vpop.f32.mrb[105].mxu1 }
 0x73e   :  { %v14103_v21 = vadd.f32 %v14102_v35, %v14029_v45 }
 0x73f   :  { %v14176_v34 = vpop.f32.mrb[106].mxu1 }
 0x740   :  { %v14177_v32 = vadd.f32 %v14176_v34, %v14103_v21  ;;  %v31606_v54 = vpop.f32.mrb[107].mxu1 }
 0x742   :  { %v14251_v63 = vadd.f32 %v14250_v28, %v14177_v32 }
 0x743   :  { %v14322_v59 = vpop.f32.mrb[108].mxu1 }
 0x744   :  { %v38302_v15 = vadd.f32 %v14322_v59, %v14251_v63  ;;  %v31616_v46 = vpop.f32.mrb[109].mxu1 }
 0x747   :  { %v14479_v12 = vpop.f32.mrb[110].mxu1 }
 0x748   :  { %v14480_v3 = vadd.f32 %v14479_v12, %v14403_v61  ;;  %v31626_v11 = vpop.f32.mrb[111].mxu1 }
 0x74a   :  { %v14554_v19 = vadd.f32 %v14553_v13, %v14480_v3  ;;  %v38310_v13 = vld [vmem:[%s39169_s2 + $0x19] ss:$0 sm:$0xff] }
 0x74b   :  { %v14627_v30 = vpop.f32.mrb[112].mxu1 }
 0x74c   :  { %v14628_v18 = vadd.f32 %v14627_v30, %v14554_v19  ;;  %v31636_v26 = vpop.f32.mrb[113].mxu1 }
 0x74e   :  { %v14702_v37 = vadd.f32 %v14701_v52, %v14628_v18  ;;  %v8915_v52 = vadd.f32 %v38310_v13, %v38102_v2 }
 0x74f   :  { %v14773_v17 = vpop.f32.mrb[114].mxu1 }
 0x750   :  { %v14774_v47 = vadd.f32 %v14773_v17, %v14702_v37  ;;  %v31646_v7 = vpop.f32.mrb[115].mxu1 }
 0x752   :  { %v14777_v33 = vadd.f32 %v14774_v47, %v8915_v52 }
 0x754   :  { %v27276_v62 = vmul.f32 -1.442695, %v14777_v33 }
 0x75b   :  { %v15230_v35 = vpop.f32.mrb[84].mxu0 }
 0x75c   :  { %v31676_v56 = vpop.f32.mrb[85].mxu0 }
 0x77b   :  { %v15690_v44 = vpop.f32.mrb[116].mxu1 }
 0x77c   :  { %15695 = vrot.lane.b32.xlu0 %v15690_v44, %s34317_s9  ;;  %v31706_v28 = vpop.f32.mrb[117].mxu1 }
 0x780   :  { %15235 = vrot.lane.b32.xlu0 %v15230_v35, %s34336_s4 }
 0x787   :  { %v16145_v9 = vpop.f32.mrb[86].mxu0 }
 0x788   :  { %16150 = vrot.lane.b32.xlu0 %v16145_v9, %s34337_s0  ;;  %v31736_v61 = vpop.f32.mrb[87].mxu0 }
 0x7ee   :  { %v15696_v58 = vpop.permute.xlu0 %15695 }
 0x7ef   :  { %v15698_v24 = vadd.f32 %v15696_v58, %v8915_v52 }
 0x7f1   :  { %34197 = vtanh.f32 %v15698_v24 }
 0x7f2   :  { %34199 = vpow2.f32 %v27276_v62  ;;  %v15236_v1 = vpop.permute.xlu0 %15235 }
 0x7f3   :  { %v15238_v45 = vadd.f32 %v15236_v1, %v8915_v52 }
 0x7f5   :  { %v27277_v2 = vmul.f32 -1.442695, %v15238_v45 }
 0x7fa   :  { %v16151_v46 = vpop.permute.xlu0 %16150 }
 0x7fb   :  { %v34198_v25 = vpop.eup %34197  ;;  %v16153_v12 = vadd.f32 %v16151_v46, %v8915_v52  ;;  %v9816_v46 = vadd.f32 %v38310_v13, %v38289_v38 }
 0x7fc   :  { %16162 = vrot.lane.b32.xlu1 %v34198_v25, %s34319_s17  ;;  %v34200_v4 = vpop.eup %34199 }
 0x7fd   :  { %v14781_v5 = vadd.f32 1.0, %v34200_v4  ;;  %v27278_v3 = vmul.f32 -1.442695, %v16153_v12 }
 0x7ff   :  { %34201 = vrcp.f32 %v14781_v5 }
 0x800   :  { %34203 = vpow2.f32 %v27277_v2 }
 0x809   :  { %v34202_v0 = vpop.eup %34201 }
 0x80a   :  { %v34204_v57 = vpop.eup %34203 }
 0x80b   :  { %v15242_v21 = vadd.f32 1.0, %v34204_v57 }
 0x80d   :  { %34205 = vrcp.f32 %v15242_v21 }
 0x817   :  { %v34206_v34 = vpop.eup %34205 }
 0x818   :  { %v16160_v32 = vmul.f32 0.0, %v34206_v34 }
 0x86e   :  { %v16163_v51 = vpop.permute.xlu1 %16162 }
 0x86f   :  { %v16165_v22 = vmul.f32 %v34202_v0, %v16163_v51 }
 0x871   :  { %16167 = vrot.lane.b32.xlu1 %v16165_v22, %s34336_s4 }
 0x8e3   :  { %v16168_v54 = vpop.permute.xlu1 %16167 }
 0x8e4   :  { %v38316_v63 = vadd.f32 %v16168_v54, %v16160_v32 }
 0x8e6   :  { %34207 = vtanh.f32 %v38316_v63 }
 0x8e7   :  { %34209 = vpow2.f32 %v27278_v3 }
 0x8f0   :  { %v34208_v59 = vpop.eup %34207 }
 0x8f1   :  { %16173 = vrot.lane.b32.xlu1 %v34208_v59, %s34317_s9  ;;  %v34210_v11 = vpop.eup %34209 }
 0x8f2   :  { %v16157_v19 = vadd.f32 1.0, %v34210_v11 }
 0x8f4   :  { %34211 = vrcp.f32 %v16157_v19 }
 0x8fe   :  { %v34212_v30 = vpop.eup %34211 }
 0x963   :  { %v16174_v18 = vpop.permute.xlu1 %16173 }
 0x964   :  { %v16176_v26 = vmul.f32 %v34212_v30, %v16174_v18 }
 0x966   :  { %16178 = vrot.lane.b32.xlu0 %v16176_v26, %s34335_s28 }
 0x9d8   :  { %v16179_v37 = vpop.permute.xlu0 %16178 }
 0x9d9   :  { %v16180_v17 = vsel %vm14327_vm11, %v16179_v37, 0 }
 0x9da   :  { %v38322_v47 = vand.u32 4294901760, %v16180_v17 }
 0x9dc   :  { %v38325_v7 = vsub.f32 %v16180_v17, %v38322_v47 }
 0x9de   :  { %v38328_v35 = vand.u32 4294901760, %v38325_v7 }
 0x9e0   :  { %v16251_v56 = vsub.f32 %v38325_v7, %v38328_v35 }
 0x9e2   :  { %v16252_v44 = vand.u32 4294901760, %v16251_v56 }
 0x9e4   :  { %31740 = vmatmul.mubr.f32.vlgmr.msra.gmra.mrb[118].mxu1 %v16252_v44  ;;  %31770 = vmatmul.mubr.f32.vlgmr.msra.gmra.mrb[88].mxu0 %v16252_v44 }
 0x9e5   :  { %31743 = vmatpush3.msra.mxu1 %v38159_v31  ;;  %31773 = vmatpush3.msra.mxu0 %v38121_v53 }
 0x9e6   :  { %31744 = vmatprep.mubr.msk.f32.mxu1 %vm34313_vm1, %v39248_v23  ;;  %31747 = vmatprep.subr.mxu1 %v39248_v23 }
 0x9e7   :  { %31774 = vmatprep.mubr.msk.f32.mxu0 %vm34313_vm1, %v39248_v23  ;;  %31777 = vmatprep.subr.mxu0 %v39248_v23 }
 0x9e8   :  { %31745 = vmatmul.mubr.f32.vlgmr.msra.gmra.mrb[120].mxu1 %v38322_v47 }
 0x9e9   :  { %31748 = vmatpush3.msra.mxu1 %v38073_v27  ;;  %31749 = vmatprep.mubr.msk.f32.mxu1 %vm34313_vm1, %v39248_v23 }
 0x9ea   :  { %31752 = vmatprep.subr.mxu1 %v39248_v23 }
 0x9ec   :  { %31750 = vmatmul.mubr.f32.vlgmr.msra.gmra.mrb[122].mxu1 %v38325_v7  ;;  %31775 = vmatmul.mubr.f32.vlgmr.msra.gmra.mrb[88].mxu0 %v38322_v47 }
 0x9ed   :  { %31753 = vmatpush3.msra.mxu1 %v38057_v16  ;;  %31778 = vmatpush3.msra.mxu0 %v38078_v6 }
 0x9ee   :  { %31754 = vmatprep.mubr.msk.f32.mxu1 %vm34313_vm1, %v39248_v23  ;;  %31757 = vmatprep.subr.mxu1 %v39248_v23 }
 0x9ef   :  { %31779 = vmatprep.mubr.msk.f32.mxu0 %vm34313_vm1, %v39248_v23  ;;  %31782 = vmatprep.subr.mxu0 %v39248_v23 }
 0x9f0   :  { %31755 = vmatmul.mubr.f32.vlgmr.msra.gmra.mrb[124].mxu1 %v38328_v35 }
 0x9f1   :  { %31758 = vmatpush3.msra.mxu1 %v38092_v60  ;;  %31759 = vmatprep.mubr.msk.f32.mxu1 %vm34313_vm1, %v39248_v23 }
 0x9f2   :  { %31762 = vmatprep.subr.mxu1 %v39248_v23 }
 0x9f4   :  { %31760 = vmatmul.mubr.f32.vlgmr.msra.gmra.mrb[126].mxu1 %v38322_v47  ;;  %31780 = vmatmul.mubr.f32.vlgmr.msra.gmra.mrb[88].mxu0 %v38325_v7 }
 0x9f5   :  { %31763 = vmatpush3.msra.mxu1 %v38057_v16  ;;  %31783 = vmatpush3.msra.mxu0 %v38061_v14 }
 0x9f6   :  { %31764 = vmatprep.mubr.msk.f32.mxu1 %vm34313_vm1, %v39248_v23  ;;  %31797 = vmatprep.subr.mxu1 %v39248_v23 }
 0x9f7   :  { %31784 = vmatprep.mubr.msk.f32.mxu0 %vm34313_vm1, %v39248_v23  ;;  %31787 = vmatprep.subr.mxu0 %v39248_v23 }
 0x9f8   :  { %31765 = vmatmul.mubr.f32.vlgmr.msra.gmra.mrb[128].mxu1 %v38322_v47 }
 0x9f9   :  { %31798 = vmatpush3.msra.mxu1 %v38161_v10  ;;  %31799 = vmatprep.mubr.msk.f32.mxu1 %vm34313_vm1, %v39248_v23 }
 0x9fa   :  { %31802 = vmatprep.subr.mxu1 %v39248_v23 }
 0x9fc   :  { %31785 = vmatmul.mubr.f32.vlgmr.msra.gmra.mrb[88].mxu0 %v38328_v35  ;;  %31800 = vmatmul.mubr.f32.vlgmr.msra.gmra.mrb[130].mxu1 %v16252_v44 }
 0x9fd   :  { %31788 = vmatpush3.msra.mxu0 %v38095_v50  ;;  %31803 = vmatpush3.msra.mxu1 %v38205_v39 }
 0x9fe   :  { %31789 = vmatprep.mubr.msk.f32.mxu0 %vm34313_vm1, %v39248_v23  ;;  %31792 = vmatprep.subr.mxu0 %v39248_v23 }
 0x9ff   :  { %31804 = vmatprep.mubr.msk.f32.mxu1 %vm34313_vm1, %v39248_v23  ;;  %31807 = vmatprep.subr.mxu1 %v39248_v23 }
 0xa04   :  { %31790 = vmatmul.mubr.f32.vlgmr.msra.gmra.mrb[88].mxu0 %v38322_v47  ;;  %31805 = vmatmul.mubr.f32.vlgmr.msra.gmra.mrb[130].mxu1 %v38322_v47 }
 0xa05   :  { %31793 = vmatpush3.msra.mxu0 %v38061_v14  ;;  %31808 = vmatpush3.msra.mxu1 %v38168_v36 }
 0xa06   :  { %31794 = vmatprep.mubr.msk.f32.mxu0 %vm34313_vm1, %v39248_v23  ;;  %31809 = vmatprep.mubr.msk.f32.mxu1 %vm34313_vm1, %v39248_v23 }
 0xa07   :  { %31812 = vmatprep.subr.mxu1 %v39248_v23  ;;  %31827 = vmatprep.subr.mxu0 %v39248_v23 }
 0xa0c   :  { %31795 = vmatmul.mubr.f32.vlgmr.msra.gmra.mrb[88].mxu0 %v38322_v47  ;;  %31810 = vmatmul.mubr.f32.vlgmr.msra.gmra.mrb[130].mxu1 %v38325_v7 }
 0xa0d   :  { %31813 = vmatpush3.msra.mxu1 %v38161_v10  ;;  %31828 = vmatpush3.msra.mxu0 %v38194_v48 }
 0xa0e   :  { %31829 = vmatprep.mubr.msk.f32.mxu0 %vm34313_vm1, %v39248_v23  ;;  %31832 = vmatprep.subr.mxu0 %v39248_v23 }
 0xa0f   :  { %31814 = vmatprep.mubr.msk.f32.mxu1 %vm34313_vm1, %v39248_v23  ;;  %31817 = vmatprep.subr.mxu1 %v39248_v23 }
 0xa10   :  { %31830 = vmatmul.mubr.f32.vlgmr.msra.gmra.mrb[90].mxu0 %v16252_v44 }
 0xa11   :  { %31833 = vmatpush3.msra.mxu0 %v38230_v41  ;;  %31834 = vmatprep.mubr.msk.f32.mxu0 %vm34313_vm1, %v39248_v23 }
 0xa12   :  { %31837 = vmatprep.subr.mxu0 %v39248_v23 }
 0xa14   :  { %31815 = vmatmul.mubr.f32.vlgmr.msra.gmra.mrb[130].mxu1 %v38328_v35 }
 0xa15   :  { %31818 = vmatpush3.msra.mxu1 %v38181_v42  ;;  %31819 = vmatprep.mubr.msk.f32.mxu1 %vm34313_vm1, %v39248_v23 }
 0xa16   :  { %31822 = vmatprep.subr.mxu1 %v39248_v23 }
 0xa18   :  { %31835 = vmatmul.mubr.f32.vlgmr.msra.gmra.mrb[90].mxu0 %v38322_v47 }
 0xa19   :  { %31838 = vmatpush3.msra.mxu0 %v38208_v29  ;;  %31839 = vmatprep.mubr.msk.f32.mxu0 %vm34313_vm1, %v39248_v23 }
 0xa1a   :  { %31842 = vmatprep.subr.mxu0 %v39248_v23 }
 0xa1c   :  { %31820 = vmatmul.mubr.f32.vlgmr.msra.gmra.mrb[130].mxu1 %v38322_v47 }
 0xa1d   :  { %31823 = vmatpush3.msra.mxu1 %v38161_v10  ;;  %31824 = vmatprep.mubr.msk.f32.mxu1 %vm34313_vm1, %v39248_v23 }
 0xa1e   :  { %31857 = vmatprep.subr.mxu1 %v39248_v23 }
 0xa20   :  { %31840 = vmatmul.mubr.f32.vlgmr.msra.gmra.mrb[90].mxu0 %v38325_v7 }
 0xa21   :  { %31843 = vmatpush3.msra.mxu0 %v38194_v48  ;;  %31844 = vmatprep.mubr.msk.f32.mxu0 %vm34313_vm1, %v39248_v23 }
 0xa22   :  { %31847 = vmatprep.subr.mxu0 %v39248_v23 }
 0xa24   :  { %31825 = vmatmul.mubr.f32.vlgmr.msra.gmra.mrb[130].mxu1 %v38322_v47 }
 0xa25   :  { %31858 = vmatpush3.msra.mxu1 %v38057_v16  ;;  %31859 = vmatprep.mubr.msk.f32.mxu1 %vm34313_vm1, %v39248_v23 }
 0xa26   :  { %31862 = vmatprep.subr.mxu1 %v39248_v23 }
 0xa28   :  { %31845 = vmatmul.mubr.f32.vlgmr.msra.gmra.mrb[90].mxu0 %v38328_v35 }
 0xa29   :  { %31848 = vmatpush3.msra.mxu0 %v38216_v49  ;;  %31849 = vmatprep.mubr.msk.f32.mxu0 %vm34313_vm1, %v39248_v23 }
 0xa2a   :  { %31852 = vmatprep.subr.mxu0 %v39248_v23 }
 0xa30   :  { %31850 = vmatmul.mubr.f32.vlgmr.msra.gmra.mrb[90].mxu0 %v38322_v47 }
 0xa31   :  { %31853 = vmatpush3.msra.mxu0 %v38194_v48  ;;  %31854 = vmatprep.mubr.msk.f32.mxu0 %vm34313_vm1, %v39248_v23 }
 0xa32   :  { %31887 = vmatprep.subr.mxu0 %v39248_v23 }
 0xa38   :  { %31855 = vmatmul.mubr.f32.vlgmr.msra.gmra.mrb[90].mxu0 %v38322_v47 }
 0xa39   :  { %31888 = vmatpush3.msra.mxu0 %v38061_v14  ;;  %31889 = vmatprep.mubr.msk.f32.mxu0 %vm34313_vm1, %v39248_v23 }
 0xa3a   :  { %31892 = vmatprep.subr.mxu0 %v39248_v23 }
 0xab7   :  { %v16254_v28 = vpop.f32.mrb[118].mxu1 }
 0xab8   :  { %v31741_v9 = vpop.f32.mrb[119].mxu1 }
 0xabb   :  { %v16330_v61 = vpop.f32.mrb[120].mxu1 }
 0xabc   :  { %v16331_v52 = vadd.f32 %v16330_v61, %v16254_v28  ;;  %v31746_v58 = vpop.f32.mrb[121].mxu1 }
 0xabf   :  { %v16404_v24 = vpop.f32.mrb[122].mxu1 }
 0xac0   :  { %v16405_v25 = vadd.f32 %v16404_v24, %v16331_v52  ;;  %v31751_v33 = vpop.f32.mrb[123].mxu1 }
 0xac3   :  { %v16478_v62 = vpop.f32.mrb[124].mxu1 }
 0xac4   :  { %v16479_v4 = vadd.f32 %v16478_v62, %v16405_v25  ;;  %v31756_v5 = vpop.f32.mrb[125].mxu1 }
 0xac7   :  { %v16552_v0 = vpop.f32.mrb[126].mxu1 }
 0xac8   :  { %v16553_v51 = vadd.f32 %v16552_v0, %v16479_v4  ;;  %v31761_v22 = vpop.f32.mrb[127].mxu1 }
 0xacb   :  { %v16624_v1 = vpop.f32.mrb[128].mxu1 }
 0xacc   :  { %v16625_v45 = vadd.f32 %v16624_v1, %v16553_v51  ;;  %v31766_v2 = vpop.f32.mrb[129].mxu1 }
 0xace   :  { %v16628_v19 = vadd.f32 %v16625_v45, %v9816_v46 }
 0xad0   :  { %v27279_v30 = vmul.f32 -1.442695, %v16628_v19 }
 0xadf   :  { %v17077_v57 = vpop.f32.mrb[88].mxu0 }
 0xae0   :  { %v31796_v21 = vpop.f32.mrb[89].mxu0 }
 0xaf7   :  { %v17534_v34 = vpop.f32.mrb[130].mxu1 }
 0xaf8   :  { %17539 = vrot.lane.b32.xlu1 %v17534_v34, %s34317_s9  ;;  %v31826_v32 = vpop.f32.mrb[131].mxu1 }
 0xafc   :  { %17082 = vrot.lane.b32.xlu1 %v17077_v57, %s34336_s4 }
 0xb0b   :  { %v17986_v54 = vpop.f32.mrb[90].mxu0 }
 0xb0c   :  { %17991 = vrot.lane.b32.xlu1 %v17986_v54, %s34337_s0  ;;  %v31856_v59 = vpop.f32.mrb[91].mxu0 }
 0xb6a   :  { %v17540_v12 = vpop.permute.xlu1 %17539 }
 0xb6b   :  { %v17542_v3 = vadd.f32 %v17540_v12, %v9816_v46 }
 0xb6d   :  { %34213 = vtanh.f32 %v17542_v3 }
 0xb6e   :  { %34215 = vpow2.f32 %v27279_v30  ;;  %v17083_v7 = vpop.permute.xlu1 %17082 }
 0xb6f   :  { %v17085_v35 = vadd.f32 %v17083_v7, %v9816_v46 }
 0xb71   :  { %v27280_v38 = vmul.f32 -1.442695, %v17085_v35 }
 0xb77   :  { %v34214_v11 = vpop.eup %34213 }
 0xb78   :  { %18003 = vrot.lane.b32.xlu0 %v34214_v11, %s34319_s17  ;;  %v34216_v18 = vpop.eup %34215 }
 0xb79   :  { %v16632_v26 = vadd.f32 1.0, %v34216_v18 }
 0xb7b   :  { %34217 = vrcp.f32 %v16632_v26 }
 0xb7c   :  { %34219 = vpow2.f32 %v27280_v38 }
 0xb7e   :  { %v17992_v24 = vpop.permute.xlu1 %17991 }
 0xb7f   :  { %v17994_v25 = vadd.f32 %v17992_v24, %v9816_v46 }
 0xb81   :  { %v27281_v33 = vmul.f32 -1.442695, %v17994_v25 }
 0xb85   :  { %v34218_v37 = vpop.eup %34217 }
 0xb86   :  { %v34220_v56 = vpop.eup %34219 }
 0xb87   :  { %v17089_v44 = vadd.f32 1.0, %v34220_v56 }
 0xb89   :  { %34221 = vrcp.f32 %v17089_v44 }
 0xb93   :  { %v34222_v28 = vpop.eup %34221 }
 0xb94   :  { %v18001_v9 = vmul.f32 %v34222_v28, %v38316_v63 }
 0xbea   :  { %v18004_v17 = vpop.permute.xlu0 %18003 }
 0xbeb   :  { %v18006_v47 = vmul.f32 %v34218_v37, %v18004_v17 }
 0xbed   :  { %18008 = vrot.lane.b32.xlu0 %v18006_v47, %s34336_s4 }
 0xc5f   :  { %v18009_v61 = vpop.permute.xlu0 %18008 }
 0xc60   :  { %v38456_v52 = vadd.f32 %v18009_v61, %v18001_v9 }
 0xc62   :  { %34223 = vtanh.f32 %v38456_v52 }
 0xc63   :  { %34225 = vpow2.f32 %v27281_v33 }
 0xc6c   :  { %v34224_v58 = vpop.eup %34223 }
 0xc6d   :  { %18014 = vrot.lane.b32.xlu0 %v34224_v58, %s34317_s9  ;;  %v34226_v62 = vpop.eup %34225  ;;  %v10717_v58 = vadd.f32 %v38310_v13, %v38294_v20 }
 0xc6e   :  { %v17998_v4 = vadd.f32 1.0, %v34226_v62 }
 0xc70   :  { %34227 = vrcp.f32 %v17998_v4 }
 0xc7a   :  { %v34228_v5 = vpop.eup %34227 }
 0xcdf   :  { %v18015_v0 = vpop.permute.xlu0 %18014 }
 0xce0   :  { %v18017_v51 = vmul.f32 %v34228_v5, %v18015_v0 }
 0xce2   :  { %18019 = vrot.lane.b32.xlu1 %v18017_v51, %s34335_s28 }
 0xd54   :  { %v18020_v63 = vpop.permute.xlu1 %18019 }
 0xd55   :  { %v18021_v22 = vsel %vm14327_vm11, %v18020_v63, 0 }
 0xd56   :  { %v38462_v1 = vand.u32 4294901760, %v18021_v22 }
 0xd58   :  { %v38465_v45 = vsub.f32 %v18021_v22, %v38462_v1 }
 0xd5a   :  { %v38468_v2 = vand.u32 4294901760, %v38465_v45 }
 0xd5c   :  { %v18092_v57 = vsub.f32 %v38465_v45, %v38468_v2 }
 0xd5e   :  { %v18093_v21 = vand.u32 4294901760, %v18092_v57 }
 0xd60   :  { %31860 = vmatmul.mubr.f32.vlgmr.msra.gmra.mrb[132].mxu1 %v18093_v21  ;;  %31890 = vmatmul.mubr.f32.vlgmr.msra.gmra.mrb[92].mxu0 %v18093_v21 }
 0xd61   :  { %31863 = vmatpush3.msra.mxu1 %v38159_v31  ;;  %31893 = vmatpush3.msra.mxu0 %v38121_v53 }
 0xd62   :  { %31864 = vmatprep.mubr.msk.f32.mxu1 %vm34313_vm1, %v39248_v23  ;;  %31867 = vmatprep.subr.mxu1 %v39248_v23 }
 0xd63   :  { %31894 = vmatprep.mubr.msk.f32.mxu0 %vm34313_vm1, %v39248_v23  ;;  %31897 = vmatprep.subr.mxu0 %v39248_v23 }
 0xd64   :  { %31865 = vmatmul.mubr.f32.vlgmr.msra.gmra.mrb[134].mxu1 %v38462_v1 }
 0xd65   :  { %31868 = vmatpush3.msra.mxu1 %v38073_v27  ;;  %31869 = vmatprep.mubr.msk.f32.mxu1 %vm34313_vm1, %v39248_v23 }
 0xd66   :  { %31872 = vmatprep.subr.mxu1 %v39248_v23 }
 0xd68   :  { %31870 = vmatmul.mubr.f32.vlgmr.msra.gmra.mrb[136].mxu1 %v38465_v45  ;;  %31895 = vmatmul.mubr.f32.vlgmr.msra.gmra.mrb[92].mxu0 %v38462_v1 }
 0xd69   :  { %31873 = vmatpush3.msra.mxu1 %v38057_v16  ;;  %31898 = vmatpush3.msra.mxu0 %v38078_v6 }
 0xd6a   :  { %31874 = vmatprep.mubr.msk.f32.mxu1 %vm34313_vm1, %v39248_v23  ;;  %31877 = vmatprep.subr.mxu1 %v39248_v23 }
 0xd6b   :  { %31899 = vmatprep.mubr.msk.f32.mxu0 %vm34313_vm1, %v39248_v23  ;;  %31902 = vmatprep.subr.mxu0 %v39248_v23 }
 0xd6c   :  { %31875 = vmatmul.mubr.f32.vlgmr.msra.gmra.mrb[138].mxu1 %v38468_v2 }
 0xd6d   :  { %31878 = vmatpush3.msra.mxu1 %v38092_v60  ;;  %31879 = vmatprep.mubr.msk.f32.mxu1 %vm34313_vm1, %v39248_v23 }
 0xd6e   :  { %31882 = vmatprep.subr.mxu1 %v39248_v23 }
 0xd70   :  { %31880 = vmatmul.mubr.f32.vlgmr.msra.gmra.mrb[140].mxu1 %v38462_v1  ;;  %31900 = vmatmul.mubr.f32.vlgmr.msra.gmra.mrb[92].mxu0 %v38465_v45 }
 0xd71   :  { %31883 = vmatpush3.msra.mxu1 %v38057_v16  ;;  %31903 = vmatpush3.msra.mxu0 %v38061_v14 }
 0xd72   :  { %31884 = vmatprep.mubr.msk.f32.mxu1 %vm34313_vm1, %v39248_v23  ;;  %31917 = vmatprep.subr.mxu1 %v39248_v23 }
 0xd73   :  { %31904 = vmatprep.mubr.msk.f32.mxu0 %vm34313_vm1, %v39248_v23  ;;  %31907 = vmatprep.subr.mxu0 %v39248_v23 }
 0xd74   :  { %31885 = vmatmul.mubr.f32.vlgmr.msra.gmra.mrb[142].mxu1 %v38462_v1 }
 0xd75   :  { %31918 = vmatpush3.msra.mxu1 %v38161_v10  ;;  %31919 = vmatprep.mubr.msk.f32.mxu1 %vm34313_vm1, %v39248_v23 }
 0xd76   :  { %31922 = vmatprep.subr.mxu1 %v39248_v23 }
 0xd78   :  { %31905 = vmatmul.mubr.f32.vlgmr.msra.gmra.mrb[92].mxu0 %v38468_v2  ;;  %31920 = vmatmul.mubr.f32.vlgmr.msra.gmra.mrb[144].mxu1 %v18093_v21 }
 0xd79   :  { %31908 = vmatpush3.msra.mxu0 %v38095_v50  ;;  %31923 = vmatpush3.msra.mxu1 %v38205_v39 }
 0xd7a   :  { %31909 = vmatprep.mubr.msk.f32.mxu0 %vm34313_vm1, %v39248_v23  ;;  %31912 = vmatprep.subr.mxu0 %v39248_v23 }
 0xd7b   :  { %31924 = vmatprep.mubr.msk.f32.mxu1 %vm34313_vm1, %v39248_v23  ;;  %31927 = vmatprep.subr.mxu1 %v39248_v23 }
 0xd80   :  { %31910 = vmatmul.mubr.f32.vlgmr.msra.gmra.mrb[92].mxu0 %v38462_v1  ;;  %31925 = vmatmul.mubr.f32.vlgmr.msra.gmra.mrb[144].mxu1 %v38462_v1 }
 0xd81   :  { %31913 = vmatpush3.msra.mxu0 %v38061_v14  ;;  %31928 = vmatpush3.msra.mxu1 %v38168_v36 }
 0xd82   :  { %31914 = vmatprep.mubr.msk.f32.mxu0 %vm34313_vm1, %v39248_v23  ;;  %31929 = vmatprep.mubr.msk.f32.mxu1 %vm34313_vm1, %v39248_v23 }
 0xd83   :  { %31932 = vmatprep.subr.mxu1 %v39248_v23  ;;  %31947 = vmatprep.subr.mxu0 %v39248_v23 }
 0xd88   :  { %31915 = vmatmul.mubr.f32.vlgmr.msra.gmra.mrb[92].mxu0 %v38462_v1  ;;  %31930 = vmatmul.mubr.f32.vlgmr.msra.gmra.mrb[144].mxu1 %v38465_v45 }
 0xd89   :  { %31933 = vmatpush3.msra.mxu1 %v38161_v10  ;;  %31948 = vmatpush3.msra.mxu0 %v38194_v48 }
 0xd8a   :  { %31949 = vmatprep.mubr.msk.f32.mxu0 %vm34313_vm1, %v39248_v23  ;;  %31952 = vmatprep.subr.mxu0 %v39248_v23 }
 0xd8b   :  { %31934 = vmatprep.mubr.msk.f32.mxu1 %vm34313_vm1, %v39248_v23  ;;  %31937 = vmatprep.subr.mxu1 %v39248_v23 }
 0xd8c   :  { %31950 = vmatmul.mubr.f32.vlgmr.msra.gmra.mrb[94].mxu0 %v18093_v21 }
 0xd8d   :  { %31953 = vmatpush3.msra.mxu0 %v38230_v41  ;;  %31954 = vmatprep.mubr.msk.f32.mxu0 %vm34313_vm1, %v39248_v23 }
 0xd8e   :  { %31957 = vmatprep.subr.mxu0 %v39248_v23 }
 0xd90   :  { %31935 = vmatmul.mubr.f32.vlgmr.msra.gmra.mrb[144].mxu1 %v38468_v2 }
 0xd91   :  { %31938 = vmatpush3.msra.mxu1 %v38181_v42  ;;  %31939 = vmatprep.mubr.msk.f32.mxu1 %vm34313_vm1, %v39248_v23 }
 0xd92   :  { %31942 = vmatprep.subr.mxu1 %v39248_v23 }
 0xd94   :  { %31955 = vmatmul.mubr.f32.vlgmr.msra.gmra.mrb[94].mxu0 %v38462_v1 }
 0xd95   :  { %31958 = vmatpush3.msra.mxu0 %v38208_v29  ;;  %31959 = vmatprep.mubr.msk.f32.mxu0 %vm34313_vm1, %v39248_v23 }
 0xd96   :  { %31962 = vmatprep.subr.mxu0 %v39248_v23 }
 0xd98   :  { %31940 = vmatmul.mubr.f32.vlgmr.msra.gmra.mrb[144].mxu1 %v38462_v1 }
 0xd99   :  { %31943 = vmatpush3.msra.mxu1 %v38161_v10  ;;  %31944 = vmatprep.mubr.msk.f32.mxu1 %vm34313_vm1, %v39248_v23 }
 0xd9a   :  { %31977 = vmatprep.subr.mxu1 %v39248_v23 }
 0xd9c   :  { %31960 = vmatmul.mubr.f32.vlgmr.msra.gmra.mrb[94].mxu0 %v38465_v45 }
 0xd9d   :  { %31963 = vmatpush3.msra.mxu0 %v38194_v48  ;;  %31964 = vmatprep.mubr.msk.f32.mxu0 %vm34313_vm1, %v39248_v23 }
 0xd9e   :  { %31967 = vmatprep.subr.mxu0 %v39248_v23 }
 0xda0   :  { %31945 = vmatmul.mubr.f32.vlgmr.msra.gmra.mrb[144].mxu1 %v38462_v1 }
 0xda1   :  { %31978 = vmatpush3.msra.mxu1 %v38057_v16  ;;  %31979 = vmatprep.mubr.msk.f32.mxu1 %vm34313_vm1, %v39248_v23 }
 0xda2   :  { %31982 = vmatprep.subr.mxu1 %v39248_v23 }
 0xda4   :  { %31965 = vmatmul.mubr.f32.vlgmr.msra.gmra.mrb[94].mxu0 %v38468_v2 }
 0xda5   :  { %31968 = vmatpush3.msra.mxu0 %v38216_v49  ;;  %31969 = vmatprep.mubr.msk.f32.mxu0 %vm34313_vm1, %v39248_v23 }
 0xda6   :  { %31972 = vmatprep.subr.mxu0 %v39248_v23 }
 0xdac   :  { %31970 = vmatmul.mubr.f32.vlgmr.msra.gmra.mrb[94].mxu0 %v38462_v1 }
 0xdad   :  { %31973 = vmatpush3.msra.mxu0 %v38194_v48  ;;  %31974 = vmatprep.mubr.msk.f32.mxu0 %vm34313_vm1, %v39248_v23 }
 0xdae   :  { %32007 = vmatprep.subr.mxu0 %v39248_v23 }
 0xdb4   :  { %31975 = vmatmul.mubr.f32.vlgmr.msra.gmra.mrb[94].mxu0 %v38462_v1 }
 0xdb5   :  { %32008 = vmatpush3.msra.mxu0 %v38061_v14  ;;  %32009 = vmatprep.mubr.msk.f32.mxu0 %vm34313_vm1, %v39248_v23 }
 0xdb6   :  { %32012 = vmatprep.subr.mxu0 %v39248_v23 }
 0xe33   :  { %v18095_v34 = vpop.f32.mrb[132].mxu1 }
 0xe34   :  { %v31861_v32 = vpop.f32.mrb[133].mxu1 }
 0xe37   :  { %v18171_v54 = vpop.f32.mrb[134].mxu1 }
 0xe38   :  { %v18172_v59 = vadd.f32 %v18171_v54, %v18095_v34  ;;  %v31866_v46 = vpop.f32.mrb[135].mxu1 }
 0xe3b   :  { %v18245_v12 = vpop.f32.mrb[136].mxu1 }
 0xe3c   :  { %v18246_v3 = vadd.f32 %v18245_v12, %v18172_v59  ;;  %v31871_v11 = vpop.f32.mrb[137].mxu1 }
 0xe3f   :  { %v18319_v19 = vpop.f32.mrb[138].mxu1 }
 0xe40   :  { %v18320_v30 = vadd.f32 %v18319_v19, %v18246_v3  ;;  %v31876_v18 = vpop.f32.mrb[139].mxu1 }
 0xe43   :  { %v18393_v26 = vpop.f32.mrb[140].mxu1 }
 0xe44   :  { %v18394_v37 = vadd.f32 %v18393_v26, %v18320_v30  ;;  %v31881_v17 = vpop.f32.mrb[141].mxu1 }
 0xe47   :  { %v18465_v47 = vpop.f32.mrb[142].mxu1 }
 0xe48   :  { %v18466_v7 = vadd.f32 %v18465_v47, %v18394_v37  ;;  %v31886_v35 = vpop.f32.mrb[143].mxu1 }
 0xe4a   :  { %v18469_v62 = vadd.f32 %v18466_v7, %v10717_v58 }
 0xe4c   :  { %v27282_v4 = vmul.f32 -1.442695, %v18469_v62 }
 0xe5b   :  { %v18918_v38 = vpop.f32.mrb[92].mxu0 }
 0xe5c   :  { %v31916_v56 = vpop.f32.mrb[93].mxu0 }
 0xe73   :  { %v19375_v44 = vpop.f32.mrb[144].mxu1 }
 0xe74   :  { %19380 = vrot.lane.b32.xlu0 %v19375_v44, %s34317_s9  ;;  %v31946_v28 = vpop.f32.mrb[145].mxu1 }
 0xe78   :  { %18923 = vrot.lane.b32.xlu0 %v18918_v38, %s34336_s4 }
 0xe87   :  { %v19827_v9 = vpop.f32.mrb[94].mxu0 }
 0xe88   :  { %19832 = vrot.lane.b32.xlu0 %v19827_v9, %s34337_s0  ;;  %v31976_v61 = vpop.f32.mrb[95].mxu0 }
 0xee6   :  { %v19381_v24 = vpop.permute.xlu0 %19380 }
 0xee7   :  { %v19383_v25 = vadd.f32 %v19381_v24, %v10717_v58 }
 0xee9   :  { %34229 = vtanh.f32 %v19383_v25 }
 0xeea   :  { %34231 = vpow2.f32 %v27282_v4  ;;  %v18924_v1 = vpop.permute.xlu0 %18923 }
 0xeeb   :  { %v18926_v45 = vadd.f32 %v18924_v1, %v10717_v58 }
 0xeed   :  { %v27283_v20 = vmul.f32 -1.442695, %v18926_v45 }
 0xef3   :  { %v34230_v33 = vpop.eup %34229 }
 0xef4   :  { %19844 = vrot.lane.b32.xlu1 %v34230_v33, %s34319_s17  ;;  %v34232_v5 = vpop.eup %34231 }
 0xef5   :  { %v18473_v0 = vadd.f32 1.0, %v34232_v5 }
 0xef7   :  { %34233 = vrcp.f32 %v18473_v0 }
 0xef8   :  { %34235 = vpow2.f32 %v27283_v20 }
 0xefa   :  { %v19833_v59 = vpop.permute.xlu0 %19832 }
 0xefb   :  { %v19835_v46 = vadd.f32 %v19833_v59, %v10717_v58 }
 0xefd   :  { %v27284_v12 = vmul.f32 -1.442695, %v19835_v46 }
 0xf01   :  { %v34234_v51 = vpop.eup %34233 }
 0xf02   :  { %v34236_v13 = vpop.eup %34235 }
 0xf03   :  { %v18930_v2 = vadd.f32 1.0, %v34236_v13 }
 0xf05   :  { %34237 = vrcp.f32 %v18930_v2 }
 0xf0f   :  { %v34238_v57 = vpop.eup %34237 }
 0xf10   :  { %v19842_v21 = vmul.f32 %v34238_v57, %v38456_v52 }
 0xf66   :  { %v19845_v63 = vpop.permute.xlu1 %19844 }
 0xf67   :  { %v19847_v22 = vmul.f32 %v34234_v51, %v19845_v63 }
 0xf69   :  { %19849 = vrot.lane.b32.xlu1 %v19847_v22, %s34336_s4 }
 0xfdb   :  { %v19850_v34 = vpop.permute.xlu1 %19849 }
 0xfdc   :  { %v38596_v32 = vadd.f32 %v19850_v34, %v19842_v21  ;;  %v38734_v21 = vld [vmem:[%s39169_s2 + $0x19] ss:$0 sm:$0xff] }
 0xfdd   :  { %v11618_v34 = vadd.f32 %v38734_v21, %v38296_v40 }
 0xfde   :  { %34239 = vtanh.f32 %v38596_v32 }
 0xfdf   :  { %34241 = vpow2.f32 %v27284_v12 }
 0xfe8   :  { %v34240_v54 = vpop.eup %34239 }
 0xfe9   :  { %19855 = vrot.lane.b32.xlu1 %v34240_v54, %s34317_s9  ;;  %v34242_v3 = vpop.eup %34241 }
 0xfea   :  { %v19839_v11 = vadd.f32 1.0, %v34242_v3 }
 0xfec   :  { %34243 = vrcp.f32 %v19839_v11 }
 0xff6   :  { %v34244_v19 = vpop.eup %34243 }
0x105b   :  { %v19856_v30 = vpop.permute.xlu1 %19855 }
0x105c   :  { %v19858_v18 = vmul.f32 %v34244_v19, %v19856_v30 }
0x105e   :  { %19860 = vrot.lane.b32.xlu0 %v19858_v18, %s34335_s28 }
0x10d0   :  { %v19861_v52 = vpop.permute.xlu0 %19860 }
0x10d1   :  { %v19862_v26 = vsel %vm14327_vm11, %v19861_v52, 0 }
0x10d2   :  { %v38602_v37 = vand.u32 4294901760, %v19862_v26 }
0x10d4   :  { %v38605_v17 = vsub.f32 %v19862_v26, %v38602_v37 }
0x10d6   :  { %v38608_v47 = vand.u32 4294901760, %v38605_v17 }
0x10d8   :  { %v19933_v7 = vsub.f32 %v38605_v17, %v38608_v47 }
0x10da   :  { %v19934_v35 = vand.u32 4294901760, %v19933_v7 }
0x10dc   :  { %31980 = vmatmul.mubr.f32.vlgmr.msra.gmra.mrb[146].mxu1 %v19934_v35  ;;  %32010 = vmatmul.mubr.f32.vlgmr.msra.gmra.mrb[96].mxu0 %v19934_v35 }
0x10dd   :  { %31983 = vmatpush3.msra.mxu1 %v38159_v31  ;;  %32013 = vmatpush3.msra.mxu0 %v38121_v53 }
0x10de   :  { %31984 = vmatprep.mubr.msk.f32.mxu1 %vm34313_vm1, %v39248_v23  ;;  %31987 = vmatprep.subr.mxu1 %v39248_v23 }
0x10df   :  { %32014 = vmatprep.mubr.msk.f32.mxu0 %vm34313_vm1, %v39248_v23  ;;  %32017 = vmatprep.subr.mxu0 %v39248_v23 }
0x10e0   :  { %31985 = vmatmul.mubr.f32.vlgmr.msra.gmra.mrb[148].mxu1 %v38602_v37 }
0x10e1   :  { %31988 = vmatpush3.msra.mxu1 %v38073_v27  ;;  %31989 = vmatprep.mubr.msk.f32.mxu1 %vm34313_vm1, %v39248_v23 }
0x10e2   :  { %31992 = vmatprep.subr.mxu1 %v39248_v23 }
0x10e4   :  { %31990 = vmatmul.mubr.f32.vlgmr.msra.gmra.mrb[150].mxu1 %v38605_v17  ;;  %32015 = vmatmul.mubr.f32.vlgmr.msra.gmra.mrb[96].mxu0 %v38602_v37 }
0x10e5   :  { %31993 = vmatpush3.msra.mxu1 %v38057_v16  ;;  %32018 = vmatpush3.msra.mxu0 %v38078_v6 }
0x10e6   :  { %31994 = vmatprep.mubr.msk.f32.mxu1 %vm34313_vm1, %v39248_v23  ;;  %31997 = vmatprep.subr.mxu1 %v39248_v23 }
0x10e7   :  { %32019 = vmatprep.mubr.msk.f32.mxu0 %vm34313_vm1, %v39248_v23  ;;  %32022 = vmatprep.subr.mxu0 %v39248_v23 }
0x10e8   :  { %31995 = vmatmul.mubr.f32.vlgmr.msra.gmra.mrb[152].mxu1 %v38608_v47 }
0x10e9   :  { %31998 = vmatpush3.msra.mxu1 %v38092_v60  ;;  %31999 = vmatprep.mubr.msk.f32.mxu1 %vm34313_vm1, %v39248_v23 }
0x10ea   :  { %32002 = vmatprep.subr.mxu1 %v39248_v23 }
0x10ec   :  { %32000 = vmatmul.mubr.f32.vlgmr.msra.gmra.mrb[154].mxu1 %v38602_v37  ;;  %32020 = vmatmul.mubr.f32.vlgmr.msra.gmra.mrb[96].mxu0 %v38605_v17 }
0x10ed   :  { %32003 = vmatpush3.msra.mxu1 %v38057_v16  ;;  %32023 = vmatpush3.msra.mxu0 %v38061_v14 }
0x10ee   :  { %32004 = vmatprep.mubr.msk.f32.mxu1 %vm34313_vm1, %v39248_v23  ;;  %32037 = vmatprep.subr.mxu1 %v39248_v23 }
0x10ef   :  { %32024 = vmatprep.mubr.msk.f32.mxu0 %vm34313_vm1, %v39248_v23  ;;  %32027 = vmatprep.subr.mxu0 %v39248_v23 }
0x10f0   :  { %32005 = vmatmul.mubr.f32.vlgmr.msra.gmra.mrb[156].mxu1 %v38602_v37 }
0x10f1   :  { %32038 = vmatpush3.msra.mxu1 %v38161_v10  ;;  %32039 = vmatprep.mubr.msk.f32.mxu1 %vm34313_vm1, %v39248_v23 }
0x10f2   :  { %32042 = vmatprep.subr.mxu1 %v39248_v23 }
0x10f4   :  { %32025 = vmatmul.mubr.f32.vlgmr.msra.gmra.mrb[96].mxu0 %v38608_v47  ;;  %32040 = vmatmul.mubr.f32.vlgmr.msra.gmra.mrb[158].mxu1 %v19934_v35 }
0x10f5   :  { %32028 = vmatpush3.msra.mxu0 %v38095_v50  ;;  %32043 = vmatpush3.msra.mxu1 %v38205_v39 }
0x10f6   :  { %32029 = vmatprep.mubr.msk.f32.mxu0 %vm34313_vm1, %v39248_v23  ;;  %32032 = vmatprep.subr.mxu0 %v39248_v23 }
0x10f7   :  { %32044 = vmatprep.mubr.msk.f32.mxu1 %vm34313_vm1, %v39248_v23  ;;  %32047 = vmatprep.subr.mxu1 %v39248_v23 }
0x10fc   :  { %32030 = vmatmul.mubr.f32.vlgmr.msra.gmra.mrb[96].mxu0 %v38602_v37  ;;  %32045 = vmatmul.mubr.f32.vlgmr.msra.gmra.mrb[158].mxu1 %v38602_v37 }
0x10fd   :  { %32033 = vmatpush3.msra.mxu0 %v38061_v14  ;;  %32048 = vmatpush3.msra.mxu1 %v38168_v36 }
0x10fe   :  { %32034 = vmatprep.mubr.msk.f32.mxu0 %vm34313_vm1, %v39248_v23  ;;  %32049 = vmatprep.mubr.msk.f32.mxu1 %vm34313_vm1, %v39248_v23 }
0x10ff   :  { %32052 = vmatprep.subr.mxu1 %v39248_v23  ;;  %32067 = vmatprep.subr.mxu0 %v39248_v23 }
0x1104   :  { %32035 = vmatmul.mubr.f32.vlgmr.msra.gmra.mrb[96].mxu0 %v38602_v37  ;;  %32050 = vmatmul.mubr.f32.vlgmr.msra.gmra.mrb[158].mxu1 %v38605_v17 }
0x1105   :  { %32053 = vmatpush3.msra.mxu1 %v38161_v10  ;;  %32068 = vmatpush3.msra.mxu0 %v38194_v48 }
0x1106   :  { %32069 = vmatprep.mubr.msk.f32.mxu0 %vm34313_vm1, %v39248_v23  ;;  %32072 = vmatprep.subr.mxu0 %v39248_v23 }
0x1107   :  { %32054 = vmatprep.mubr.msk.f32.mxu1 %vm34313_vm1, %v39248_v23  ;;  %32057 = vmatprep.subr.mxu1 %v39248_v23 }
0x1108   :  { %32070 = vmatmul.mubr.f32.vlgmr.msra.gmra.mrb[98].mxu0 %v19934_v35 }
0x1109   :  { %32073 = vmatpush3.msra.mxu0 %v38230_v41  ;;  %32074 = vmatprep.mubr.msk.f32.mxu0 %vm34313_vm1, %v39248_v23 }
0x110a   :  { %32077 = vmatprep.subr.mxu0 %v39248_v23 }
0x110c   :  { %32055 = vmatmul.mubr.f32.vlgmr.msra.gmra.mrb[158].mxu1 %v38608_v47 }
0x110d   :  { %32058 = vmatpush3.msra.mxu1 %v38181_v42  ;;  %32059 = vmatprep.mubr.msk.f32.mxu1 %vm34313_vm1, %v39248_v23 }
0x110e   :  { %32062 = vmatprep.subr.mxu1 %v39248_v23 }
0x1110   :  { %32075 = vmatmul.mubr.f32.vlgmr.msra.gmra.mrb[98].mxu0 %v38602_v37 }
0x1111   :  { %32078 = vmatpush3.msra.mxu0 %v38208_v29  ;;  %32079 = vmatprep.mubr.msk.f32.mxu0 %vm34313_vm1, %v39248_v23 }
0x1112   :  { %32082 = vmatprep.subr.mxu0 %v39248_v23 }
0x1114   :  { %32060 = vmatmul.mubr.f32.vlgmr.msra.gmra.mrb[158].mxu1 %v38602_v37 }
0x1115   :  { %32063 = vmatpush3.msra.mxu1 %v38161_v10  ;;  %32064 = vmatprep.mubr.msk.f32.mxu1 %vm34313_vm1, %v39248_v23 }
0x1116   :  { %32097 = vmatprep.subr.mxu1 %v39248_v23 }
0x1118   :  { %32080 = vmatmul.mubr.f32.vlgmr.msra.gmra.mrb[98].mxu0 %v38605_v17 }
0x1119   :  { %32083 = vmatpush3.msra.mxu0 %v38194_v48  ;;  %32084 = vmatprep.mubr.msk.f32.mxu0 %vm34313_vm1, %v39248_v23 }
0x111a   :  { %32087 = vmatprep.subr.mxu0 %v39248_v23 }
0x111c   :  { %32065 = vmatmul.mubr.f32.vlgmr.msra.gmra.mrb[158].mxu1 %v38602_v37 }
0x111d   :  { %32098 = vmatpush3.msra.mxu1 %v38057_v16  ;;  %32099 = vmatprep.mubr.msk.f32.mxu1 %vm34313_vm1, %v39248_v23 }
0x111e   :  { %32102 = vmatprep.subr.mxu1 %v39248_v23 }
0x1120   :  { %32085 = vmatmul.mubr.f32.vlgmr.msra.gmra.mrb[98].mxu0 %v38608_v47 }
0x1121   :  { %32088 = vmatpush3.msra.mxu0 %v38216_v49  ;;  %32089 = vmatprep.mubr.msk.f32.mxu0 %vm34313_vm1, %v39248_v23 }
0x1122   :  { %32092 = vmatprep.subr.mxu0 %v39248_v23 }
0x1128   :  { %32090 = vmatmul.mubr.f32.vlgmr.msra.gmra.mrb[98].mxu0 %v38602_v37 }
0x1129   :  { %32093 = vmatpush3.msra.mxu0 %v38194_v48  ;;  %32094 = vmatprep.mubr.msk.f32.mxu0 %vm34313_vm1, %v39248_v23 }
0x112a   :  { %32127 = vmatprep.subr.mxu0 %v39248_v23 }
0x1130   :  { %32095 = vmatmul.mubr.f32.vlgmr.msra.gmra.mrb[98].mxu0 %v38602_v37 }
0x1131   :  { %32128 = vmatpush3.msra.mxu0 %v38061_v14  ;;  %32129 = vmatprep.mubr.msk.f32.mxu0 %vm34313_vm1, %v39248_v23 }
0x1132   :  { %32132 = vmatprep.subr.mxu0 %v39248_v23 }
0x11af   :  { %v19936_v38 = vpop.f32.mrb[146].mxu1 }
0x11b0   :  { %v31981_v56 = vpop.f32.mrb[147].mxu1 }
0x11b3   :  { %v20012_v44 = vpop.f32.mrb[148].mxu1 }
0x11b4   :  { %v20013_v28 = vadd.f32 %v20012_v44, %v19936_v38  ;;  %v31986_v9 = vpop.f32.mrb[149].mxu1 }
0x11b7   :  { %v20086_v61 = vpop.f32.mrb[150].mxu1 }
0x11b8   :  { %v20087_v58 = vadd.f32 %v20086_v61, %v20013_v28  ;;  %v31991_v24 = vpop.f32.mrb[151].mxu1 }
0x11bb   :  { %v20160_v25 = vpop.f32.mrb[152].mxu1 }
0x11bc   :  { %v20161_v33 = vadd.f32 %v20160_v25, %v20087_v58  ;;  %v31996_v62 = vpop.f32.mrb[153].mxu1 }
0x11bf   :  { %v20234_v4 = vpop.f32.mrb[154].mxu1 }
0x11c0   :  { %v20235_v5 = vadd.f32 %v20234_v4, %v20161_v33  ;;  %v32001_v0 = vpop.f32.mrb[155].mxu1 }
0x11c3   :  { %v20306_v51 = vpop.f32.mrb[156].mxu1 }
0x11c4   :  { %v20307_v63 = vadd.f32 %v20306_v51, %v20235_v5  ;;  %v32006_v22 = vpop.f32.mrb[157].mxu1 }
0x11c6   :  { %v20310_v12 = vadd.f32 %v20307_v63, %v11618_v34 }
0x11c8   :  { %v27285_v3 = vmul.f32 -1.442695, %v20310_v12 }
0x11d7   :  { %v20759_v1 = vpop.f32.mrb[96].mxu0 }
0x11d8   :  { %v32036_v45 = vpop.f32.mrb[97].mxu0 }
0x11ef   :  { %v21216_v20 = vpop.f32.mrb[158].mxu1 }
0x11f0   :  { %21221 = vrot.lane.b32.xlu1 %v21216_v20, %s34317_s9  ;;  %v32066_v13 = vpop.f32.mrb[159].mxu1 }
0x11f4   :  { %20764 = vrot.lane.b32.xlu1 %v20759_v1, %s34336_s4 }
0x1203   :  { %v21668_v2 = vpop.f32.mrb[98].mxu0 }
0x1204   :  { %21673 = vrot.lane.b32.xlu1 %v21668_v2, %s34337_s0  ;;  %v32096_v57 = vpop.f32.mrb[99].mxu0 }
0x1262   :  { %v21222_v54 = vpop.permute.xlu1 %21221 }
0x1263   :  { %v21224_v59 = vadd.f32 %v21222_v54, %v11618_v34 }
0x1265   :  { %34245 = vtanh.f32 %v21224_v59 }
0x1266   :  { %34247 = vpow2.f32 %v27285_v3  ;;  %v20765_v26 = vpop.permute.xlu1 %20764 }
0x1267   :  { %v20767_v37 = vadd.f32 %v20765_v26, %v11618_v34 }
0x1269   :  { %v27286_v40 = vmul.f32 -1.442695, %v20767_v37 }
0x126f   :  { %v34246_v46 = vpop.eup %34245 }
0x1270   :  { %21685 = vrot.lane.b32.xlu0 %v34246_v46, %s34319_s17  ;;  %v34248_v11 = vpop.eup %34247 }
0x1271   :  { %v20314_v19 = vadd.f32 1.0, %v34248_v11 }
0x1273   :  { %34249 = vrcp.f32 %v20314_v19 }
0x1274   :  { %34251 = vpow2.f32 %v27286_v40 }
0x1276   :  { %v21674_v28 = vpop.permute.xlu1 %21673 }
0x1277   :  { %v21676_v9 = vadd.f32 %v21674_v28, %v11618_v34 }
0x1279   :  { %v27287_v61 = vmul.f32 -1.442695, %v21676_v9 }
0x127d   :  { %v34250_v30 = vpop.eup %34249 }
0x127e   :  { %v34252_v17 = vpop.eup %34251 }
0x127f   :  { %v20771_v47 = vadd.f32 1.0, %v34252_v17 }
0x1281   :  { %34253 = vrcp.f32 %v20771_v47 }
0x128b   :  { %v34254_v7 = vpop.eup %34253 }
0x128c   :  { %v21683_v35 = vmul.f32 %v34254_v7, %v38596_v32 }
0x12e2   :  { %v21686_v18 = vpop.permute.xlu0 %21685 }
0x12e3   :  { %v21688_v52 = vmul.f32 %v34250_v30, %v21686_v18 }
0x12e5   :  { %21690 = vrot.lane.b32.xlu0 %v21688_v52, %s34336_s4 }
0x1357   :  { %v21691_v38 = vpop.permute.xlu0 %21690 }
0x1358   :  { %v38741_v56 = vadd.f32 %v21691_v38, %v21683_v35  ;;  %v12519_v35 = vadd.f32 %v38734_v21, %v38298_v43 }
0x135a   :  { %34255 = vtanh.f32 %v38741_v56 }
0x135b   :  { %34257 = vpow2.f32 %v27287_v61 }
0x1364   :  { %v34256_v44 = vpop.eup %34255 }
0x1365   :  { %21696 = vrot.lane.b32.xlu0 %v34256_v44, %s34317_s9  ;;  %v34258_v58 = vpop.eup %34257 }
0x1366   :  { %v21680_v24 = vadd.f32 1.0, %v34258_v58 }
0x1368   :  { %34259 = vrcp.f32 %v21680_v24 }
0x1372   :  { %v34260_v25 = vpop.eup %34259 }
0x13d7   :  { %v21697_v33 = vpop.permute.xlu0 %21696 }
0x13d8   :  { %v21699_v62 = vmul.f32 %v34260_v25, %v21697_v33 }
0x13da   :  { %21701 = vrot.lane.b32.xlu1 %v21699_v62, %s34335_s28 }
0x144c   :  { %v21702_v32 = vpop.permute.xlu1 %21701 }
0x144d   :  { %v21703_v4 = vsel %vm14327_vm11, %v21702_v32, 0 }
0x144e   :  { %v38747_v5 = vand.u32 4294901760, %v21703_v4 }
0x1450   :  { %v38750_v0 = vsub.f32 %v21703_v4, %v38747_v5 }
0x1452   :  { %v38753_v51 = vand.u32 4294901760, %v38750_v0 }
0x1454   :  { %v21774_v63 = vsub.f32 %v38750_v0, %v38753_v51 }
0x1456   :  { %v21775_v22 = vand.u32 4294901760, %v21774_v63 }
0x1458   :  { %32100 = vmatmul.mubr.f32.vlgmr.msra.gmra.mrb[160].mxu1 %v21775_v22  ;;  %32130 = vmatmul.mubr.f32.vlgmr.msra.gmra.mrb[100].mxu0 %v21775_v22 }
0x1459   :  { %32103 = vmatpush3.msra.mxu1 %v38159_v31  ;;  %32133 = vmatpush3.msra.mxu0 %v38121_v53 }
0x145a   :  { %32104 = vmatprep.mubr.msk.f32.mxu1 %vm34313_vm1, %v39248_v23  ;;  %32107 = vmatprep.subr.mxu1 %v39248_v23 }
0x145b   :  { %32134 = vmatprep.mubr.msk.f32.mxu0 %vm34313_vm1, %v39248_v23  ;;  %32137 = vmatprep.subr.mxu0 %v39248_v23 }
0x145c   :  { %32105 = vmatmul.mubr.f32.vlgmr.msra.gmra.mrb[162].mxu1 %v38747_v5 }
0x145d   :  { %32108 = vmatpush3.msra.mxu1 %v38073_v27  ;;  %32109 = vmatprep.mubr.msk.f32.mxu1 %vm34313_vm1, %v39248_v23 }
0x145e   :  { %32112 = vmatprep.subr.mxu1 %v39248_v23 }
0x1460   :  { %32110 = vmatmul.mubr.f32.vlgmr.msra.gmra.mrb[164].mxu1 %v38750_v0  ;;  %32135 = vmatmul.mubr.f32.vlgmr.msra.gmra.mrb[100].mxu0 %v38747_v5 }
0x1461   :  { %32113 = vmatpush3.msra.mxu1 %v38057_v16  ;;  %32138 = vmatpush3.msra.mxu0 %v38078_v6 }
0x1462   :  { %32114 = vmatprep.mubr.msk.f32.mxu1 %vm34313_vm1, %v39248_v23  ;;  %32117 = vmatprep.subr.mxu1 %v39248_v23 }
0x1463   :  { %32139 = vmatprep.mubr.msk.f32.mxu0 %vm34313_vm1, %v39248_v23  ;;  %32142 = vmatprep.subr.mxu0 %v39248_v23 }
0x1464   :  { %32115 = vmatmul.mubr.f32.vlgmr.msra.gmra.mrb[166].mxu1 %v38753_v51 }
0x1465   :  { %32118 = vmatpush3.msra.mxu1 %v38092_v60  ;;  %32119 = vmatprep.mubr.msk.f32.mxu1 %vm34313_vm1, %v39248_v23 }
0x1466   :  { %32122 = vmatprep.subr.mxu1 %v39248_v23 }
0x1468   :  { %32120 = vmatmul.mubr.f32.vlgmr.msra.gmra.mrb[168].mxu1 %v38747_v5  ;;  %32140 = vmatmul.mubr.f32.vlgmr.msra.gmra.mrb[100].mxu0 %v38750_v0 }
0x1469   :  { %32123 = vmatpush3.msra.mxu1 %v38057_v16  ;;  %32143 = vmatpush3.msra.mxu0 %v38061_v14 }
0x146a   :  { %32124 = vmatprep.mubr.msk.f32.mxu1 %vm34313_vm1, %v39248_v23  ;;  %32157 = vmatprep.subr.mxu1 %v39248_v23 }
0x146b   :  { %32144 = vmatprep.mubr.msk.f32.mxu0 %vm34313_vm1, %v39248_v23  ;;  %32147 = vmatprep.subr.mxu0 %v39248_v23 }
0x146c   :  { %32125 = vmatmul.mubr.f32.vlgmr.msra.gmra.mrb[170].mxu1 %v38747_v5 }
0x146d   :  { %32158 = vmatpush3.msra.mxu1 %v38161_v10  ;;  %32159 = vmatprep.mubr.msk.f32.mxu1 %vm34313_vm1, %v39248_v23 }
0x146e   :  { %32162 = vmatprep.subr.mxu1 %v39248_v23 }
0x1470   :  { %32145 = vmatmul.mubr.f32.vlgmr.msra.gmra.mrb[100].mxu0 %v38753_v51  ;;  %32160 = vmatmul.mubr.f32.vlgmr.msra.gmra.mrb[172].mxu1 %v21775_v22 }
0x1471   :  { %32148 = vmatpush3.msra.mxu0 %v38095_v50  ;;  %32163 = vmatpush3.msra.mxu1 %v38205_v39 }
0x1472   :  { %32149 = vmatprep.mubr.msk.f32.mxu0 %vm34313_vm1, %v39248_v23  ;;  %32152 = vmatprep.subr.mxu0 %v39248_v23 }
0x1473   :  { %32164 = vmatprep.mubr.msk.f32.mxu1 %vm34313_vm1, %v39248_v23  ;;  %32167 = vmatprep.subr.mxu1 %v39248_v23 }
0x1478   :  { %32150 = vmatmul.mubr.f32.vlgmr.msra.gmra.mrb[100].mxu0 %v38747_v5  ;;  %32165 = vmatmul.mubr.f32.vlgmr.msra.gmra.mrb[172].mxu1 %v38747_v5 }
0x1479   :  { %32153 = vmatpush3.msra.mxu0 %v38061_v14  ;;  %32168 = vmatpush3.msra.mxu1 %v38168_v36 }
0x147a   :  { %32154 = vmatprep.mubr.msk.f32.mxu0 %vm34313_vm1, %v39248_v23  ;;  %32169 = vmatprep.mubr.msk.f32.mxu1 %vm34313_vm1, %v39248_v23 }
0x147b   :  { %32172 = vmatprep.subr.mxu1 %v39248_v23  ;;  %32187 = vmatprep.subr.mxu0 %v39248_v23 }
0x1480   :  { %32155 = vmatmul.mubr.f32.vlgmr.msra.gmra.mrb[100].mxu0 %v38747_v5  ;;  %32170 = vmatmul.mubr.f32.vlgmr.msra.gmra.mrb[172].mxu1 %v38750_v0 }
0x1481   :  { %32173 = vmatpush3.msra.mxu1 %v38161_v10  ;;  %32188 = vmatpush3.msra.mxu0 %v38194_v48 }
0x1482   :  { %32189 = vmatprep.mubr.msk.f32.mxu0 %vm34313_vm1, %v39248_v23  ;;  %32192 = vmatprep.subr.mxu0 %v39248_v23 }
0x1483   :  { %32174 = vmatprep.mubr.msk.f32.mxu1 %vm34313_vm1, %v39248_v23  ;;  %32177 = vmatprep.subr.mxu1 %v39248_v23 }
0x1484   :  { %32190 = vmatmul.mubr.f32.vlgmr.msra.gmra.mrb[102].mxu0 %v21775_v22 }
0x1485   :  { %32193 = vmatpush3.msra.mxu0 %v38230_v41  ;;  %32194 = vmatprep.mubr.msk.f32.mxu0 %vm34313_vm1, %v39248_v23 }
0x1486   :  { %32197 = vmatprep.subr.mxu0 %v39248_v23 }
0x1488   :  { %32175 = vmatmul.mubr.f32.vlgmr.msra.gmra.mrb[172].mxu1 %v38753_v51 }
0x1489   :  { %32178 = vmatpush3.msra.mxu1 %v38181_v42  ;;  %32179 = vmatprep.mubr.msk.f32.mxu1 %vm34313_vm1, %v39248_v23 }
0x148a   :  { %32182 = vmatprep.subr.mxu1 %v39248_v23 }
0x148c   :  { %32195 = vmatmul.mubr.f32.vlgmr.msra.gmra.mrb[102].mxu0 %v38747_v5 }
0x148d   :  { %32198 = vmatpush3.msra.mxu0 %v38208_v29  ;;  %32199 = vmatprep.mubr.msk.f32.mxu0 %vm34313_vm1, %v39248_v23 }
0x148e   :  { %32202 = vmatprep.subr.mxu0 %v39248_v23 }
0x1490   :  { %32180 = vmatmul.mubr.f32.vlgmr.msra.gmra.mrb[172].mxu1 %v38747_v5 }
0x1491   :  { %32183 = vmatpush3.msra.mxu1 %v38161_v10  ;;  %32184 = vmatprep.mubr.msk.f32.mxu1 %vm34313_vm1, %v39248_v23 }
0x1492   :  { %32217 = vmatprep.subr.mxu1 %v39248_v23 }
0x1494   :  { %32200 = vmatmul.mubr.f32.vlgmr.msra.gmra.mrb[102].mxu0 %v38750_v0 }
0x1495   :  { %32203 = vmatpush3.msra.mxu0 %v38194_v48  ;;  %32204 = vmatprep.mubr.msk.f32.mxu0 %vm34313_vm1, %v39248_v23 }
0x1496   :  { %32207 = vmatprep.subr.mxu0 %v39248_v23 }
0x1498   :  { %32185 = vmatmul.mubr.f32.vlgmr.msra.gmra.mrb[172].mxu1 %v38747_v5 }
0x1499   :  { %32218 = vmatpush3.msra.mxu1 %v38057_v16  ;;  %32219 = vmatprep.mubr.msk.f32.mxu1 %vm34313_vm1, %v39248_v23 }
0x149a   :  { %32222 = vmatprep.subr.mxu1 %v39248_v23 }
0x149c   :  { %32205 = vmatmul.mubr.f32.vlgmr.msra.gmra.mrb[102].mxu0 %v38753_v51 }
0x149d   :  { %32208 = vmatpush3.msra.mxu0 %v38216_v49  ;;  %32209 = vmatprep.mubr.msk.f32.mxu0 %vm34313_vm1, %v39248_v23 }
0x149e   :  { %32212 = vmatprep.subr.mxu0 %v39248_v23 }
0x14a4   :  { %32210 = vmatmul.mubr.f32.vlgmr.msra.gmra.mrb[102].mxu0 %v38747_v5 }
0x14a5   :  { %32213 = vmatpush3.msra.mxu0 %v38194_v48  ;;  %32214 = vmatprep.mubr.msk.f32.mxu0 %vm34313_vm1, %v39248_v23 }
0x14a6   :  { %32247 = vmatprep.subr.mxu0 %v39248_v23 }
0x14ac   :  { %32215 = vmatmul.mubr.f32.vlgmr.msra.gmra.mrb[102].mxu0 %v38747_v5 }
0x14ad   :  { %32248 = vmatpush3.msra.mxu0 %v38061_v14  ;;  %32249 = vmatprep.mubr.msk.f32.mxu0 %vm34313_vm1, %v39248_v23 }
0x14ae   :  { %32252 = vmatprep.subr.mxu0 %v39248_v23 }
0x152b   :  { %v21777_v1 = vpop.f32.mrb[160].mxu1 }
0x152c   :  { %v32101_v45 = vpop.f32.mrb[161].mxu1 }
0x152f   :  { %v21853_v20 = vpop.f32.mrb[162].mxu1 }
0x1530   :  { %v21854_v13 = vadd.f32 %v21853_v20, %v21777_v1  ;;  %v32106_v2 = vpop.f32.mrb[163].mxu1 }
0x1533   :  { %v21927_v57 = vpop.f32.mrb[164].mxu1 }
0x1534   :  { %v21928_v34 = vadd.f32 %v21927_v57, %v21854_v13  ;;  %v32111_v54 = vpop.f32.mrb[165].mxu1 }
0x1537   :  { %v22001_v59 = vpop.f32.mrb[166].mxu1 }
0x1538   :  { %v22002_v46 = vadd.f32 %v22001_v59, %v21928_v34  ;;  %v32116_v12 = vpop.f32.mrb[167].mxu1 }
0x153b   :  { %v22075_v3 = vpop.f32.mrb[168].mxu1 }
0x153c   :  { %v22076_v11 = vadd.f32 %v22075_v3, %v22002_v46  ;;  %v32121_v19 = vpop.f32.mrb[169].mxu1 }
0x153f   :  { %v22147_v30 = vpop.f32.mrb[170].mxu1 }
0x1540   :  { %v22148_v18 = vadd.f32 %v22147_v30, %v22076_v11  ;;  %v32126_v52 = vpop.f32.mrb[171].mxu1 }
0x1542   :  { %v22151_v9 = vadd.f32 %v22148_v18, %v12519_v35 }
0x1544   :  { %v27288_v61 = vmul.f32 -1.442695, %v22151_v9 }
0x1553   :  { %v22600_v26 = vpop.f32.mrb[100].mxu0 }
0x1554   :  { %v32156_v37 = vpop.f32.mrb[101].mxu0 }
0x156b   :  { %v23057_v40 = vpop.f32.mrb[172].mxu1 }
0x156c   :  { %23062 = vrot.lane.b32.xlu0 %v23057_v40, %s34317_s9  ;;  %v32186_v17 = vpop.f32.mrb[173].mxu1 }
0x1570   :  { %22605 = vrot.lane.b32.xlu0 %v22600_v26, %s34336_s4 }
0x157f   :  { %v23509_v47 = vpop.f32.mrb[102].mxu0 }
0x1580   :  { %23514 = vrot.lane.b32.xlu0 %v23509_v47, %s34337_s0  ;;  %v32216_v7 = vpop.f32.mrb[103].mxu0 }
0x15de   :  { %v23063_v38 = vpop.permute.xlu0 %23062 }
0x15df   :  { %v23065_v44 = vadd.f32 %v23063_v38, %v12519_v35 }
0x15e1   :  { %34261 = vtanh.f32 %v23065_v44 }
0x15e2   :  { %34263 = vpow2.f32 %v27288_v61  ;;  %v22606_v32 = vpop.permute.xlu0 %22605 }
0x15e3   :  { %v22608_v4 = vadd.f32 %v22606_v32, %v12519_v35 }
0x15e5   :  { %v27289_v43 = vmul.f32 -1.442695, %v22608_v4 }
0x15eb   :  { %v34262_v28 = vpop.eup %34261 }
0x15ec   :  { %23526 = vrot.lane.b32.xlu1 %v34262_v28, %s34319_s17  ;;  %v34264_v58 = vpop.eup %34263 }
0x15ed   :  { %v22155_v24 = vadd.f32 1.0, %v34264_v58 }
0x15ef   :  { %34265 = vrcp.f32 %v22155_v24 }
0x15f0   :  { %34267 = vpow2.f32 %v27289_v43 }
0x15f2   :  { %v23515_v20 = vpop.permute.xlu0 %23514 }
0x15f3   :  { %v23517_v13 = vadd.f32 %v23515_v20, %v12519_v35 }
0x15f5   :  { %v27290_v2 = vmul.f32 -1.442695, %v23517_v13 }
0x15f9   :  { %v34266_v25 = vpop.eup %34265 }
0x15fa   :  { %v34268_v5 = vpop.eup %34267 }
0x15fb   :  { %v22612_v0 = vadd.f32 1.0, %v34268_v5 }
0x15fd   :  { %34269 = vrcp.f32 %v22612_v0 }
0x1607   :  { %v34270_v51 = vpop.eup %34269 }
0x1608   :  { %v23524_v63 = vmul.f32 %v34270_v51, %v38741_v56  ;;  %v13425_v51 = vadd.f32 %v38734_v21, %v38300_v55 }
0x165e   :  { %v23527_v33 = vpop.permute.xlu1 %23526 }
0x165f   :  { %v23529_v62 = vmul.f32 %v34266_v25, %v23527_v33 }
0x1661   :  { %23531 = vrot.lane.b32.xlu1 %v23529_v62, %s34336_s4 }
0x16d3   :  { %v23532_v22 = vpop.permute.xlu1 %23531 }
0x16d4   :  { %v38881_v1 = vadd.f32 %v23532_v22, %v23524_v63 }
0x16d6   :  { %34271 = vtanh.f32 %v38881_v1 }
0x16d7   :  { %34273 = vpow2.f32 %v27290_v2 }
0x16e0   :  { %v34272_v45 = vpop.eup %34271 }
0x16e1   :  { %23537 = vrot.lane.b32.xlu1 %v34272_v45, %s34317_s9  ;;  %v34274_v57 = vpop.eup %34273 }
0x16e2   :  { %v23521_v34 = vadd.f32 1.0, %v34274_v57 }
0x16e4   :  { %34275 = vrcp.f32 %v23521_v34 }
0x16ee   :  { %v34276_v54 = vpop.eup %34275 }
0x1753   :  { %v23538_v59 = vpop.permute.xlu1 %23537 }
0x1754   :  { %v23540_v46 = vmul.f32 %v34276_v54, %v23538_v59 }
0x1756   :  { %23542 = vrot.lane.b32.xlu0 %v23540_v46, %s34335_s28 }
0x17c8   :  { %v23543_v56 = vpop.permute.xlu0 %23542 }
0x17c9   :  { %v23544_v12 = vsel %vm14327_vm11, %v23543_v56, 0 }
0x17ca   :  { %v38887_v3 = vand.u32 4294901760, %v23544_v12 }
0x17cc   :  { %v38890_v11 = vsub.f32 %v23544_v12, %v38887_v3 }
0x17ce   :  { %v38893_v19 = vand.u32 4294901760, %v38890_v11 }
0x17d0   :  { %v23615_v30 = vsub.f32 %v38890_v11, %v38893_v19 }
0x17d2   :  { %v23616_v18 = vand.u32 4294901760, %v23615_v30 }
0x17d4   :  { %32220 = vmatmul.mubr.f32.vlgmr.msra.gmra.mrb[174].mxu1 %v23616_v18  ;;  %32250 = vmatmul.mubr.f32.vlgmr.msra.gmra.mrb[104].mxu0 %v23616_v18 }
0x17d5   :  { %32223 = vmatpush3.msra.mxu1 %v38159_v31  ;;  %32253 = vmatpush3.msra.mxu0 %v38121_v53 }
0x17d6   :  { %32224 = vmatprep.mubr.msk.f32.mxu1 %vm34313_vm1, %v39248_v23  ;;  %32227 = vmatprep.subr.mxu1 %v39248_v23 }
0x17d7   :  { %32254 = vmatprep.mubr.msk.f32.mxu0 %vm34313_vm1, %v39248_v23  ;;  %32257 = vmatprep.subr.mxu0 %v39248_v23 }
0x17d8   :  { %32225 = vmatmul.mubr.f32.vlgmr.msra.gmra.mrb[176].mxu1 %v38887_v3 }
0x17d9   :  { %32228 = vmatpush3.msra.mxu1 %v38073_v27  ;;  %32229 = vmatprep.mubr.msk.f32.mxu1 %vm34313_vm1, %v39248_v23 }
0x17da   :  { %32232 = vmatprep.subr.mxu1 %v39248_v23 }
0x17dc   :  { %32230 = vmatmul.mubr.f32.vlgmr.msra.gmra.mrb[178].mxu1 %v38890_v11  ;;  %32255 = vmatmul.mubr.f32.vlgmr.msra.gmra.mrb[104].mxu0 %v38887_v3 }
0x17dd   :  { %32233 = vmatpush3.msra.mxu1 %v38057_v16  ;;  %32258 = vmatpush3.msra.mxu0 %v38078_v6 }
0x17de   :  { %32234 = vmatprep.mubr.msk.f32.mxu1 %vm34313_vm1, %v39248_v23  ;;  %32237 = vmatprep.subr.mxu1 %v39248_v23 }
0x17df   :  { %32259 = vmatprep.mubr.msk.f32.mxu0 %vm34313_vm1, %v39248_v23  ;;  %32262 = vmatprep.subr.mxu0 %v39248_v23 }
0x17e0   :  { %32235 = vmatmul.mubr.f32.vlgmr.msra.gmra.mrb[180].mxu1 %v38893_v19 }
0x17e1   :  { %32238 = vmatpush3.msra.mxu1 %v38092_v60  ;;  %32239 = vmatprep.mubr.msk.f32.mxu1 %vm34313_vm1, %v39248_v23 }
0x17e2   :  { %32242 = vmatprep.subr.mxu1 %v39248_v23 }
0x17e4   :  { %32240 = vmatmul.mubr.f32.vlgmr.msra.gmra.mrb[182].mxu1 %v38887_v3  ;;  %32260 = vmatmul.mubr.f32.vlgmr.msra.gmra.mrb[104].mxu0 %v38890_v11 }
0x17e5   :  { %32243 = vmatpush3.msra.mxu1 %v38057_v16  ;;  %32263 = vmatpush3.msra.mxu0 %v38061_v14 }
0x17e6   :  { %32244 = vmatprep.mubr.msk.f32.mxu1 %vm34313_vm1, %v39248_v23  ;;  %32277 = vmatprep.subr.mxu1 %v39248_v23 }
0x17e7   :  { %32264 = vmatprep.mubr.msk.f32.mxu0 %vm34313_vm1, %v39248_v23  ;;  %32267 = vmatprep.subr.mxu0 %v39248_v23 }
0x17e8   :  { %32245 = vmatmul.mubr.f32.vlgmr.msra.gmra.mrb[184].mxu1 %v38887_v3 }
0x17e9   :  { %32278 = vmatpush3.msra.mxu1 %v38161_v10  ;;  %32279 = vmatprep.mubr.msk.f32.mxu1 %vm34313_vm1, %v39248_v23 }
0x17ea   :  { %32282 = vmatprep.subr.mxu1 %v39248_v23 }
0x17ec   :  { %32265 = vmatmul.mubr.f32.vlgmr.msra.gmra.mrb[104].mxu0 %v38893_v19  ;;  %32280 = vmatmul.mubr.f32.vlgmr.msra.gmra.mrb[186].mxu1 %v23616_v18 }
0x17ed   :  { %32268 = vmatpush3.msra.mxu0 %v38095_v50  ;;  %32283 = vmatpush3.msra.mxu1 %v38205_v39 }
0x17ee   :  { %32269 = vmatprep.mubr.msk.f32.mxu0 %vm34313_vm1, %v39248_v23  ;;  %32272 = vmatprep.subr.mxu0 %v39248_v23 }
0x17ef   :  { %32284 = vmatprep.mubr.msk.f32.mxu1 %vm34313_vm1, %v39248_v23  ;;  %32287 = vmatprep.subr.mxu1 %v39248_v23 }
0x17f4   :  { %32270 = vmatmul.mubr.f32.vlgmr.msra.gmra.mrb[104].mxu0 %v38887_v3  ;;  %32285 = vmatmul.mubr.f32.vlgmr.msra.gmra.mrb[186].mxu1 %v38887_v3 }
0x17f5   :  { %32273 = vmatpush3.msra.mxu0 %v38061_v14  ;;  %32288 = vmatpush3.msra.mxu1 %v38168_v36 }
0x17f6   :  { %32274 = vmatprep.mubr.msk.f32.mxu0 %vm34313_vm1, %v39248_v23  ;;  %32289 = vmatprep.mubr.msk.f32.mxu1 %vm34313_vm1, %v39248_v23 }
0x17f7   :  { %32292 = vmatprep.subr.mxu1 %v39248_v23  ;;  %32307 = vmatprep.subr.mxu0 %v39248_v23 }
0x17fc   :  { %32275 = vmatmul.mubr.f32.vlgmr.msra.gmra.mrb[104].mxu0 %v38887_v3  ;;  %32290 = vmatmul.mubr.f32.vlgmr.msra.gmra.mrb[186].mxu1 %v38890_v11 }
0x17fd   :  { %32293 = vmatpush3.msra.mxu1 %v38161_v10  ;;  %32308 = vmatpush3.msra.mxu0 %v38194_v48 }
0x17fe   :  { %32309 = vmatprep.mubr.msk.f32.mxu0 %vm34313_vm1, %v39248_v23  ;;  %32312 = vmatprep.subr.mxu0 %v39248_v23 }
0x17ff   :  { %32294 = vmatprep.mubr.msk.f32.mxu1 %vm34313_vm1, %v39248_v23  ;;  %32297 = vmatprep.subr.mxu1 %v39248_v23 }
0x1800   :  { %32310 = vmatmul.mubr.f32.vlgmr.msra.gmra.mrb[106].mxu0 %v23616_v18 }
0x1801   :  { %32313 = vmatpush3.msra.mxu0 %v38230_v41  ;;  %32314 = vmatprep.mubr.msk.f32.mxu0 %vm34313_vm1, %v39248_v23 }
0x1802   :  { %32317 = vmatprep.subr.mxu0 %v39248_v23 }
0x1804   :  { %32295 = vmatmul.mubr.f32.vlgmr.msra.gmra.mrb[186].mxu1 %v38893_v19 }
0x1805   :  { %32298 = vmatpush3.msra.mxu1 %v38181_v42  ;;  %32299 = vmatprep.mubr.msk.f32.mxu1 %vm34313_vm1, %v39248_v23 }
0x1806   :  { %32302 = vmatprep.subr.mxu1 %v39248_v23 }
0x1808   :  { %32315 = vmatmul.mubr.f32.vlgmr.msra.gmra.mrb[106].mxu0 %v38887_v3 }
0x1809   :  { %32318 = vmatpush3.msra.mxu0 %v38208_v29  ;;  %32319 = vmatprep.mubr.msk.f32.mxu0 %vm34313_vm1, %v39248_v23 }
0x180a   :  { %32322 = vmatprep.subr.mxu0 %v39248_v23 }
0x180c   :  { %32300 = vmatmul.mubr.f32.vlgmr.msra.gmra.mrb[186].mxu1 %v38887_v3 }
0x180d   :  { %32303 = vmatpush3.msra.mxu1 %v38161_v10  ;;  %32304 = vmatprep.mubr.msk.f32.mxu1 %vm34313_vm1, %v39248_v23 }
0x180e   :  { %32337 = vmatprep.subr.mxu1 %v39248_v23 }
0x1810   :  { %32320 = vmatmul.mubr.f32.vlgmr.msra.gmra.mrb[106].mxu0 %v38890_v11 }
0x1811   :  { %32323 = vmatpush3.msra.mxu0 %v38194_v48  ;;  %32324 = vmatprep.mubr.msk.f32.mxu0 %vm34313_vm1, %v39248_v23 }
0x1812   :  { %32327 = vmatprep.subr.mxu0 %v39248_v23 }
0x1814   :  { %32305 = vmatmul.mubr.f32.vlgmr.msra.gmra.mrb[186].mxu1 %v38887_v3 }
0x1815   :  { %32338 = vmatpush3.msra.mxu1 %v38057_v16  ;;  %32339 = vmatprep.mubr.msk.f32.mxu1 %vm34313_vm1, %v39248_v23 }
0x1816   :  { %32342 = vmatprep.subr.mxu1 %v39248_v23 }
0x1818   :  { %32325 = vmatmul.mubr.f32.vlgmr.msra.gmra.mrb[106].mxu0 %v38893_v19 }
0x1819   :  { %32328 = vmatpush3.msra.mxu0 %v38216_v49  ;;  %32329 = vmatprep.mubr.msk.f32.mxu0 %vm34313_vm1, %v39248_v23 }
0x181a   :  { %32332 = vmatprep.subr.mxu0 %v39248_v23 }
0x1820   :  { %32330 = vmatmul.mubr.f32.vlgmr.msra.gmra.mrb[106].mxu0 %v38887_v3 }
0x1821   :  { %32333 = vmatpush3.msra.mxu0 %v38194_v48  ;;  %32334 = vmatprep.mubr.msk.f32.mxu0 %vm34313_vm1, %v39248_v23 }
0x1822   :  { %32367 = vmatprep.subr.mxu0 %v39248_v23 }
0x1828   :  { %32335 = vmatmul.mubr.f32.vlgmr.msra.gmra.mrb[106].mxu0 %v38887_v3 }
0x1829   :  { %32368 = vmatpush3.msra.mxu0 %v38061_v14  ;;  %32369 = vmatprep.mubr.msk.f32.mxu0 %vm34313_vm1, %v39248_v23 }
0x182a   :  { %32372 = vmatprep.subr.mxu0 %v39248_v23 }
0x18a7   :  { %v23618_v52 = vpop.f32.mrb[174].mxu1 }
0x18a8   :  { %v32221_v26 = vpop.f32.mrb[175].mxu1 }
0x18ab   :  { %v23694_v37 = vpop.f32.mrb[176].mxu1 }
0x18ac   :  { %v23695_v40 = vadd.f32 %v23694_v37, %v23618_v52  ;;  %v32226_v17 = vpop.f32.mrb[177].mxu1 }
0x18af   :  { %v23768_v47 = vpop.f32.mrb[178].mxu1 }
0x18b0   :  { %v23769_v7 = vadd.f32 %v23768_v47, %v23695_v40  ;;  %v32231_v35 = vpop.f32.mrb[179].mxu1 }
0x18b3   :  { %v23842_v38 = vpop.f32.mrb[180].mxu1 }
0x18b4   :  { %v23843_v44 = vadd.f32 %v23842_v38, %v23769_v7  ;;  %v32236_v28 = vpop.f32.mrb[181].mxu1 }
0x18b7   :  { %v23916_v9 = vpop.f32.mrb[182].mxu1 }
0x18b8   :  { %v23917_v61 = vadd.f32 %v23916_v9, %v23843_v44  ;;  %v32241_v58 = vpop.f32.mrb[183].mxu1 }
0x18bb   :  { %v23988_v24 = vpop.f32.mrb[184].mxu1 }
0x18bc   :  { %v23989_v25 = vadd.f32 %v23988_v24, %v23917_v61  ;;  %v32246_v33 = vpop.f32.mrb[185].mxu1 }
0x18be   :  { %v23992_v20 = vadd.f32 %v23989_v25, %v13425_v51 }
0x18c0   :  { %v27291_v13 = vmul.f32 -1.442695, %v23992_v20 }
0x18cf   :  { %v24441_v62 = vpop.f32.mrb[104].mxu0 }
0x18d0   :  { %v32276_v32 = vpop.f32.mrb[105].mxu0 }
0x18e7   :  { %v24898_v4 = vpop.f32.mrb[186].mxu1 }
0x18e8   :  { %24903 = vrot.lane.b32.xlu1 %v24898_v4, %s34317_s9  ;;  %v32306_v43 = vpop.f32.mrb[187].mxu1 }
0x18ec   :  { %24446 = vrot.lane.b32.xlu1 %v24441_v62, %s34336_s4 }
0x18fb   :  { %v25350_v5 = vpop.f32.mrb[106].mxu0 }
0x18fc   :  { %25355 = vrot.lane.b32.xlu1 %v25350_v5, %s34337_s0  ;;  %v32336_v0 = vpop.f32.mrb[107].mxu0  ;;  %v14326_v5 = vadd.f32 %v38734_v21, %v38302_v15  ;;  %v27297_v15 = vld [vmem:[%s39169_s2 + $0x1a] ss:$0 sm:$0xff] }
0x195a   :  { %v24904_v63 = vpop.permute.xlu1 %24903 }
0x195b   :  { %v24906_v22 = vadd.f32 %v24904_v63, %v13425_v51 }
0x195d   :  { %34277 = vtanh.f32 %v24906_v22 }
0x195e   :  { %34279 = vpow2.f32 %v27291_v13  ;;  %v24447_v46 = vpop.permute.xlu1 %24446 }
0x195f   :  { %v24449_v56 = vadd.f32 %v24447_v46, %v13425_v51 }
0x1961   :  { %v27292_v55 = vmul.f32 -1.442695, %v24449_v56 }
0x1967   :  { %v34278_v45 = vpop.eup %34277 }
0x1968   :  { %25367 = vrot.lane.b32.xlu0 %v34278_v45, %s34319_s17  ;;  %v34280_v2 = vpop.eup %34279 }
0x1969   :  { %v23996_v57 = vadd.f32 1.0, %v34280_v2 }
0x196b   :  { %34281 = vrcp.f32 %v23996_v57 }
0x196c   :  { %34283 = vpow2.f32 %v27292_v55 }
0x196e   :  { %v25356_v26 = vpop.permute.xlu1 %25355 }
0x196f   :  { %v25358_v37 = vadd.f32 %v25356_v26, %v13425_v51 }
0x1971   :  { %v27293_v40 = vmul.f32 -1.442695, %v25358_v37 }
0x1975   :  { %v34282_v34 = vpop.eup %34281 }
0x1976   :  { %v34284_v12 = vpop.eup %34283 }
0x1977   :  { %v24453_v3 = vadd.f32 1.0, %v34284_v12 }
0x1979   :  { %34285 = vrcp.f32 %v24453_v3 }
0x1983   :  { %v34286_v11 = vpop.eup %34285 }
0x1984   :  { %v25365_v19 = vmul.f32 %v34286_v11, %v38881_v1 }
0x19da   :  { %v25368_v54 = vpop.permute.xlu0 %25367 }
0x19db   :  { %v25370_v59 = vmul.f32 %v34282_v34, %v25368_v54 }
0x19dd   :  { %25372 = vrot.lane.b32.xlu0 %v25370_v59, %s34336_s4 }
0x1a4f   :  { %v25373_v30 = vpop.permute.xlu0 %25372 }
0x1a50   :  { %v39021_v18 = vadd.f32 %v25373_v30, %v25365_v19 }
0x1a52   :  { %34287 = vtanh.f32 %v39021_v18 }
0x1a53   :  { %34289 = vpow2.f32 %v27293_v40 }
0x1a5c   :  { %v34288_v52 = vpop.eup %34287 }
0x1a5d   :  { %25378 = vrot.lane.b32.xlu0 %v34288_v52, %s34317_s9  ;;  %v34290_v17 = vpop.eup %34289 }
0x1a5e   :  { %v25362_v47 = vadd.f32 1.0, %v34290_v17 }
0x1a60   :  { %34291 = vrcp.f32 %v25362_v47 }
0x1a6a   :  { %v34292_v7 = vpop.eup %34291 }
0x1acf   :  { %v25379_v35 = vpop.permute.xlu0 %25378 }
0x1ad0   :  { %v25381_v38 = vmul.f32 %v34292_v7, %v25379_v35 }
0x1ad2   :  { %25383 = vrot.lane.b32.xlu1 %v25381_v38, %s34335_s28 }
0x1b44   :  { %v25384_v1 = vpop.permute.xlu1 %25383 }
0x1b45   :  { %v25385_v44 = vsel %vm14327_vm11, %v25384_v1, 0  ;;  %v27298_v1 = vld [vmem:[%s39169_s2 + $0x1b] ss:$0 sm:$0xff] }
0x1b46   :  { %v39027_v28 = vand.u32 4294901760, %v25385_v44 }
0x1b48   :  { %v39030_v9 = vsub.f32 %v25385_v44, %v39027_v28 }
0x1b4a   :  { %v39033_v61 = vand.u32 4294901760, %v39030_v9 }
0x1b4c   :  { %v25456_v58 = vsub.f32 %v39030_v9, %v39033_v61 }
0x1b4e   :  { %v25457_v24 = vand.u32 4294901760, %v25456_v58 }
0x1b50   :  { %32340 = vmatmul.mubr.f32.vlgmr.msra.gmra.mrb[188].mxu1 %v25457_v24  ;;  %32370 = vmatmul.mubr.f32.vlgmr.msra.gmra.mrb[108].mxu0 %v25457_v24 }
0x1b51   :  { %32343 = vmatpush3.msra.mxu1 %v38159_v31  ;;  %32373 = vmatpush3.msra.mxu0 %v38121_v53 }
0x1b52   :  { %32344 = vmatprep.mubr.msk.f32.mxu1 %vm34313_vm1, %v39248_v23  ;;  %32347 = vmatprep.subr.mxu1 %v39248_v23 }
0x1b53   :  { %32374 = vmatprep.mubr.msk.f32.mxu0 %vm34313_vm1, %v39248_v23  ;;  %32377 = vmatprep.subr.mxu0 %v39248_v23 }
0x1b54   :  { %32345 = vmatmul.mubr.f32.vlgmr.msra.gmra.mrb[190].mxu1 %v39027_v28 }
0x1b55   :  { %32348 = vmatpush3.msra.mxu1 %v38073_v27  ;;  %32349 = vmatprep.mubr.msk.f32.mxu1 %vm34313_vm1, %v39248_v23 }
0x1b56   :  { %32352 = vmatprep.subr.mxu1 %v39248_v23 }
0x1b58   :  { %32350 = vmatmul.mubr.f32.vlgmr.msra.gmra.mrb[192].mxu1 %v39030_v9  ;;  %32375 = vmatmul.mubr.f32.vlgmr.msra.gmra.mrb[108].mxu0 %v39027_v28 }
0x1b59   :  { %32353 = vmatpush3.msra.mxu1 %v38057_v16  ;;  %32378 = vmatpush3.msra.mxu0 %v38078_v6 }
0x1b5a   :  { %32354 = vmatprep.mubr.msk.f32.mxu1 %vm34313_vm1, %v39248_v23  ;;  %32357 = vmatprep.subr.mxu1 %v39248_v23 }
0x1b5b   :  { %32379 = vmatprep.mubr.msk.f32.mxu0 %vm34313_vm1, %v39248_v23  ;;  %32382 = vmatprep.subr.mxu0 %v39248_v23 }
0x1b5c   :  { %32355 = vmatmul.mubr.f32.vlgmr.msra.gmra.mrb[194].mxu1 %v39033_v61 }
0x1b5d   :  { %32358 = vmatpush3.msra.mxu1 %v38092_v60  ;;  %32359 = vmatprep.mubr.msk.f32.mxu1 %vm34313_vm1, %v39248_v23 }
0x1b5e   :  { %32362 = vmatprep.subr.mxu1 %v39248_v23 }
0x1b60   :  { %32360 = vmatmul.mubr.f32.vlgmr.msra.gmra.mrb[196].mxu1 %v39027_v28  ;;  %32380 = vmatmul.mubr.f32.vlgmr.msra.gmra.mrb[108].mxu0 %v39030_v9 }
0x1b61   :  { %32363 = vmatpush3.msra.mxu1 %v38057_v16  ;;  %32383 = vmatpush3.msra.mxu0 %v38061_v14 }
0x1b62   :  { %32364 = vmatprep.mubr.msk.f32.mxu1 %vm34313_vm1, %v39248_v23  ;;  %32397 = vmatprep.subr.mxu1 %v39248_v23 }
0x1b63   :  { %32384 = vmatprep.mubr.msk.f32.mxu0 %vm34313_vm1, %v39248_v23  ;;  %32387 = vmatprep.subr.mxu0 %v39248_v23 }
0x1b64   :  { %32365 = vmatmul.mubr.f32.vlgmr.msra.gmra.mrb[198].mxu1 %v39027_v28 }
0x1b65   :  { %32398 = vmatpush3.msra.mxu1 %v38161_v10  ;;  %32399 = vmatprep.mubr.msk.f32.mxu1 %vm34313_vm1, %v39248_v23 }
0x1b66   :  { %32402 = vmatprep.subr.mxu1 %v39248_v23 }
0x1b68   :  { %32385 = vmatmul.mubr.f32.vlgmr.msra.gmra.mrb[108].mxu0 %v39033_v61  ;;  %32400 = vmatmul.mubr.f32.vlgmr.msra.gmra.mrb[200].mxu1 %v25457_v24 }
0x1b69   :  { %32388 = vmatpush3.msra.mxu0 %v38095_v50  ;;  %32403 = vmatpush3.msra.mxu1 %v38205_v39 }
0x1b6a   :  { %32389 = vmatprep.mubr.msk.f32.mxu0 %vm34313_vm1, %v39248_v23  ;;  %32392 = vmatprep.subr.mxu0 %v39248_v23 }
0x1b6b   :  { %32404 = vmatprep.mubr.msk.f32.mxu1 %vm34313_vm1, %v39248_v23  ;;  %32407 = vmatprep.subr.mxu1 %v39248_v23 }
0x1b70   :  { %32390 = vmatmul.mubr.f32.vlgmr.msra.gmra.mrb[108].mxu0 %v39027_v28  ;;  %32405 = vmatmul.mubr.f32.vlgmr.msra.gmra.mrb[200].mxu1 %v39027_v28 }
0x1b71   :  { %32393 = vmatpush3.msra.mxu0 %v38061_v14  ;;  %32408 = vmatpush3.msra.mxu1 %v38168_v36 }
0x1b72   :  { %32394 = vmatprep.mubr.msk.f32.mxu0 %vm34313_vm1, %v39248_v23  ;;  %32409 = vmatprep.mubr.msk.f32.mxu1 %vm34313_vm1, %v39248_v23 }
0x1b73   :  { %32412 = vmatprep.subr.mxu1 %v39248_v23  ;;  %32427 = vmatprep.subr.mxu0 %v39248_v23 }
0x1b78   :  { %32395 = vmatmul.mubr.f32.vlgmr.msra.gmra.mrb[108].mxu0 %v39027_v28  ;;  %32410 = vmatmul.mubr.f32.vlgmr.msra.gmra.mrb[200].mxu1 %v39030_v9 }
0x1b79   :  { %32413 = vmatpush3.msra.mxu1 %v38161_v10  ;;  %32428 = vmatpush3.msra.mxu0 %v38194_v48 }
0x1b7a   :  { %32429 = vmatprep.mubr.msk.f32.mxu0 %vm34313_vm1, %v39248_v23  ;;  %32432 = vmatprep.subr.mxu0 %v39248_v23 }
0x1b7b   :  { %32414 = vmatprep.mubr.msk.f32.mxu1 %vm34313_vm1, %v39248_v23  ;;  %32417 = vmatprep.subr.mxu1 %v39248_v23 }
0x1b7c   :  { %32430 = vmatmul.mubr.f32.vlgmr.msra.gmra.mrb[110].mxu0 %v25457_v24  ;;  %v27299_v24 = vld [vmem:[%s39169_s2 + $0x1c] ss:$0 sm:$0xff] }
0x1b7d   :  { %32433 = vmatpush3.msra.mxu0 %v38230_v41  ;;  %32434 = vmatprep.mubr.msk.f32.mxu0 %vm34313_vm1, %v39248_v23 }
0x1b7e   :  { %32437 = vmatprep.subr.mxu0 %v39248_v23 }
0x1b80   :  { %32415 = vmatmul.mubr.f32.vlgmr.msra.gmra.mrb[200].mxu1 %v39033_v61 }
0x1b81   :  { %32418 = vmatpush3.msra.mxu1 %v38181_v42  ;;  %32419 = vmatprep.mubr.msk.f32.mxu1 %vm34313_vm1, %v39248_v23 }
0x1b82   :  { %32422 = vmatprep.subr.mxu1 %v39248_v23 }
0x1b84   :  { %32435 = vmatmul.mubr.f32.vlgmr.msra.gmra.mrb[110].mxu0 %v39027_v28 }
0x1b85   :  { %32438 = vmatpush3.msra.mxu0 %v38208_v29  ;;  %32439 = vmatprep.mubr.msk.f32.mxu0 %vm34313_vm1, %v39248_v23 }
0x1b86   :  { %32442 = vmatprep.subr.mxu0 %v39248_v23 }
0x1b88   :  { %32420 = vmatmul.mubr.f32.vlgmr.msra.gmra.mrb[200].mxu1 %v39027_v28 }
0x1b89   :  { %32423 = vmatpush3.msra.mxu1 %v38161_v10  ;;  %32424 = vmatprep.mubr.msk.f32.mxu1 %vm34313_vm1, %v39248_v23 }
0x1b8c   :  { %32440 = vmatmul.mubr.f32.vlgmr.msra.gmra.mrb[110].mxu0 %v39030_v9 }
0x1b8d   :  { %32443 = vmatpush3.msra.mxu0 %v38194_v48  ;;  %32444 = vmatprep.mubr.msk.f32.mxu0 %vm34313_vm1, %v39248_v23 }
0x1b8e   :  { %32447 = vmatprep.subr.mxu0 %v39248_v23 }
0x1b90   :  { %32425 = vmatmul.mubr.f32.vlgmr.msra.gmra.mrb[200].mxu1 %v39027_v28 }
0x1b94   :  { %32445 = vmatmul.mubr.f32.vlgmr.msra.gmra.mrb[110].mxu0 %v39033_v61 }
0x1b95   :  { %32448 = vmatpush3.msra.mxu0 %v38216_v49  ;;  %32449 = vmatprep.mubr.msk.f32.mxu0 %vm34313_vm1, %v39248_v23 }
0x1b96   :  { %32452 = vmatprep.subr.mxu0 %v39248_v23 }
0x1b9c   :  { %32450 = vmatmul.mubr.f32.vlgmr.msra.gmra.mrb[110].mxu0 %v39027_v28 }
0x1b9d   :  { %32453 = vmatpush3.msra.mxu0 %v38194_v48  ;;  %32454 = vmatprep.mubr.msk.f32.mxu0 %vm34313_vm1, %v39248_v23 }
0x1ba4   :  { %32455 = vmatmul.mubr.f32.vlgmr.msra.gmra.mrb[110].mxu0 %v39027_v28 }
0x1c23   :  { %v25459_v16 = vpop.f32.mrb[188].mxu1 }
0x1c24   :  { %v32341_v14 = vpop.f32.mrb[189].mxu1 }
0x1c27   :  { %v25535_v27 = vpop.f32.mrb[190].mxu1 }
0x1c28   :  { %v25536_v6 = vadd.f32 %v25535_v27, %v25459_v16  ;;  %v32346_v60 = vpop.f32.mrb[191].mxu1 }
0x1c2b   :  { %v25609_v50 = vpop.f32.mrb[192].mxu1 }
0x1c2c   :  { %v25610_v53 = vadd.f32 %v25609_v50, %v25536_v6  ;;  %v32351_v31 = vpop.f32.mrb[193].mxu1 }
0x1c2f   :  { %v25683_v10 = vpop.f32.mrb[194].mxu1 }
0x1c30   :  { %v25684_v36 = vadd.f32 %v25683_v10, %v25610_v53  ;;  %v32356_v42 = vpop.f32.mrb[195].mxu1 }
0x1c33   :  { %v25757_v39 = vpop.f32.mrb[196].mxu1 }
0x1c34   :  { %v25758_v29 = vadd.f32 %v25757_v39, %v25684_v36  ;;  %v32361_v49 = vpop.f32.mrb[197].mxu1 }
0x1c37   :  { %v25829_v48 = vpop.f32.mrb[198].mxu1 }
0x1c38   :  { %v25830_v41 = vadd.f32 %v25829_v48, %v25758_v29  ;;  %v32366_v25 = vpop.f32.mrb[199].mxu1 }
0x1c3a   :  { %v25833_v22 = vadd.f32 %v25830_v41, %v14326_v5 }
0x1c3c   :  { %v27294_v45 = vmul.f32 -1.442695, %v25833_v22 }
0x1c4b   :  { %v26282_v23 = vpop.f32.mrb[108].mxu0 }
0x1c4c   :  { %v32396_v33 = vpop.f32.mrb[109].mxu0 }
0x1c63   :  { %v26739_v62 = vpop.f32.mrb[200].mxu1 }
0x1c64   :  { %26744 = vrot.lane.b32.xlu0 %v26739_v62, %s34317_s9  ;;  %v32426_v32 = vpop.f32.mrb[201].mxu1 }
0x1c68   :  { %26287 = vrot.lane.b32.xlu0 %v26282_v23, %s34336_s4 }
0x1c77   :  { %v27191_v4 = vpop.f32.mrb[110].mxu0 }
0x1c78   :  { %27196 = vrot.lane.b32.xlu0 %v27191_v4, %s34337_s0  ;;  %v32456_v43 = vpop.f32.mrb[111].mxu0 }
0x1c7c   :  { %27231 = vrot.lane.b32.xlu0 %v27297_v15, %s34337_s0 }
0x1cd6   :  { %v26745_v0 = vpop.permute.xlu0 %26744 }
0x1cd7   :  { %v26747_v51 = vadd.f32 %v26745_v0, %v14326_v5 }
0x1cd9   :  { %34293 = vtanh.f32 %v26747_v51 }
0x1cda   :  { %34295 = vpow2.f32 %v27294_v45  ;;  %v26288_v21 = vpop.permute.xlu0 %26287 }
0x1cdb   :  { %v26290_v54 = vadd.f32 %v26288_v21, %v14326_v5 }
0x1cdd   :  { %v27295_v59 = vmul.f32 -1.442695, %v26290_v54 }
0x1ce3   :  { %v34294_v63 = vpop.eup %34293 }
0x1ce4   :  { %27208 = vrot.lane.b32.xlu1 %v34294_v63, %s34319_s17  ;;  %v34296_v20 = vpop.eup %34295 }
0x1ce5   :  { %v25837_v13 = vadd.f32 1.0, %v34296_v20 }
0x1ce7   :  { %34297 = vrcp.f32 %v25837_v13 }
0x1ce8   :  { %34299 = vpow2.f32 %v27295_v59 }
0x1cea   :  { %v27197_v30 = vpop.permute.xlu0 %27196 }
0x1ceb   :  { %v27199_v52 = vadd.f32 %v27197_v30, %v14326_v5 }
0x1ced   :  { %v27296_v26 = vmul.f32 -1.442695, %v27199_v52 }
0x1cee   :  { %v27232_v7 = vpop.permute.xlu0 %27231 }
0x1cf1   :  { %v34298_v2 = vpop.eup %34297 }
0x1cf2   :  { %v34300_v46 = vpop.eup %34299 }
0x1cf3   :  { %v26294_v56 = vadd.f32 1.0, %v34300_v46 }
0x1cf5   :  { %34301 = vrcp.f32 %v26294_v56 }
0x1cff   :  { %v34302_v55 = vpop.eup %34301 }
0x1d00   :  { %v27206_v12 = vmul.f32 %v34302_v55, %v39021_v18  ;;  %v7997_v18 = vmax.f32 %v37702_v8, 0.0 }
0x1d02   :  { %v27247_v44 = vmul.f32 %v27298_v1, %v7997_v18 }
0x1d04   :  { %v27249_v28 = vsel %vm27248_vm12, %v27247_v44, 0.0 }
0x1d56   :  { %v27209_v57 = vpop.permute.xlu1 %27208 }
0x1d57   :  { %v27211_v34 = vmul.f32 %v34298_v2, %v27209_v57 }
0x1d59   :  { %27213 = vrot.lane.b32.xlu1 %v27211_v34, %s34336_s4 }
0x1dcb   :  { %v27214_v3 = vpop.permute.xlu1 %27213 }
0x1dcc   :  { %v27216_v11 = vadd.f32 %v27214_v3, %v27206_v12 }
0x1dce   :  { %34303 = vtanh.f32 %v27216_v11 }
0x1dcf   :  { %34305 = vpow2.f32 %v27296_v26 }
0x1dd8   :  { %v34304_v19 = vpop.eup %34303 }
0x1dd9   :  { %27219 = vrot.lane.b32.xlu1 %v34304_v19, %s34317_s9  ;;  %v34306_v37 = vpop.eup %34305 }
0x1dda   :  { %v27203_v40 = vadd.f32 1.0, %v34306_v37 }
0x1ddc   :  { %34307 = vrcp.f32 %v27203_v40 }
0x1de6   :  { %v34308_v17 = vpop.eup %34307 }
0x1e4b   :  { %v27220_v47 = vpop.permute.xlu1 %27219 }
0x1e4c   :  { %v27222_v35 = vmul.f32 %v34308_v17, %v27220_v47 }
0x1e4e   :  { %v27234_v38 = vmul.f32 %v27232_v7, %v27222_v35 }
0x1e50   :  { %27236 = vrot.lane.b32.xlu1 %v27234_v38, %s34335_s28 }
0x1e74   :  { %27250 = vadd.xlane.f32.xlu1 %v27249_v28 }
0x1ec2   :  { %v27237_v9 = vpop.permute.xlu1 %27236 }
0x1ec3   :  { %v27240_v61 = vsel %vm27239_vm13, %v27237_v9, 0.0 }
0x1ec4   :  { %27241 = vadd.xlane.f32.xlu0 %v27240_v61 }
0x1f01   :  { %v27251_v58 = vpop.xlane.xlu1 %27250 }
0x1f51   :  { %v27242_v16 = vpop.xlane.xlu0 %27241 }
0x1f52   :  { %v27252_v14 = vadd.f32 %v27251_v58, %v27242_v16 }
0x1f54   :  { %v27257_v8 = vadd.f32 %v27299_v24, %v27252_v14 }
0x1f56   :  { %v27258_v27 = vmax.f32 %v27257_v8, 0.0 }
0x1f58   :  { %27260 = vst.msk [vmem:[%s39170_s3] sm:$0x3] %vm27259_vm14, %v27258_v27 }

</bundles_post_ra>
